<compile_context>
chip_gen: v7x
topology: tpu7x:2x2x1
jax: 0.10.0
libtpu: 0.0.40
codegen_flags: <defaults>
</compile_context>

<pallas_src>
import math

import jax
import jax.numpy as jnp
from jax import lax
from jax.experimental import pallas as pl
from jax.experimental.pallas import tpu as pltpu


_INV_SQRT2 = 1.0 / math.sqrt(2.0)


def _erf(x):
    # Abramowitz & Stegun 7.1.26 rational approximation (max abs err 1.5e-7).
    # Uses only mul/add/div/exp, all of which lower cleanly in Mosaic.
    p = 0.3275911
    a1, a2, a3, a4, a5 = (0.254829592, -0.284496736, 1.421413741,
                          -1.453152027, 1.061405429)
    sgn = jnp.where(x >= 0.0, 1.0, -1.0)
    ax = jnp.abs(x)
    t = 1.0 / (1.0 + p * ax)
    poly = ((((a5 * t + a4) * t + a3) * t + a2) * t + a1) * t
    return sgn * (1.0 - poly * jnp.exp(-ax * ax))


def _gelu(x):
    # x * 0.5 * (1 + erf(x / sqrt(2)))  -- the module's exact (erf) GeLU.
    return x * 0.5 * (1.0 + _erf(x * _INV_SQRT2))


# ----------------------------------------------------------------------------
# Fused ConvNeXt-block kernel: one grid step per image.
# ----------------------------------------------------------------------------
def _block_kernel(xpad_ref, wc_ref, bc_ref, lnw_ref, lnb_ref,
                  w1_ref, b1_ref, w2_ref, b2_ref, gamma_ref, o_ref):
    _, H, W, C = o_ref.shape
    xpad = xpad_ref[0]            # (H+6, W+6, C), resident in VMEM
    wc = wc_ref[...]              # (49, C, C)

    # ---- 7x7 conv (padding=3) as 49 shifted matmuls, f32 accumulation ----
    acc = jnp.zeros((H * W, C), jnp.float32)
    for dy in range(7):
        for dx in range(7):
            patch = xpad[dy:dy + H, dx:dx + W, :].reshape(H * W, C)
            acc = acc + jnp.dot(patch, wc[dy * 7 + dx],
                                preferred_element_type=jnp.float32)
    y = acc + bc_ref[...]                                     # (HW, C)

    # ---- LayerNorm over channels (channels_last, eps=1e-6) ----
    mu = jnp.mean(y, axis=-1, keepdims=True)
    var = jnp.mean(jnp.square(y - mu), axis=-1, keepdims=True)
    yn = (y - mu) * lax.rsqrt(var + 1e-6)                     # rsqrt -> EUP
    yn = yn * lnw_ref[...] + lnb_ref[...]

    # ---- pwconv1 (C -> 4C) -> GeLU(erf) -> pwconv2 (4C -> C) ----
    h = jnp.dot(yn, w1_ref[...], preferred_element_type=jnp.float32) + b1_ref[...]
    h = _gelu(h)
    z = jnp.dot(h, w2_ref[...], preferred_element_type=jnp.float32) + b2_ref[...]

    # ---- layer scale (gamma) + residual add (drop_path = identity) ----
    z = z * gamma_ref[...]
    res = xpad[3:3 + H, 3:3 + W, :].reshape(H * W, C)         # original input
    o_ref[0] = (res + z).reshape(H, W, C).astype(o_ref.dtype)


def convnext_block_forward(x_nchw, params):
    """Forward pass of the ConvNeXt `Block`. Input/output are NCHW like PyTorch."""
    x = jnp.transpose(x_nchw, (0, 2, 3, 1))                   # NHWC
    B, H, W, C = x.shape
    C4 = 4 * C
    xpad = jnp.pad(x, ((0, 0), (3, 3), (3, 3), (0, 0)))       # pad=3 each side

    out_nhwc = pl.pallas_call(
        _block_kernel,
        out_shape=jax.ShapeDtypeStruct((B, H, W, C), x.dtype),
        grid=(B,),
        in_specs=[
            pl.BlockSpec((1, H + 6, W + 6, C), lambda b: (b, 0, 0, 0)),
            pl.BlockSpec((49, C, C), lambda b: (0, 0, 0)),     # conv weight
            pl.BlockSpec((1, C), lambda b: (0, 0)),            # conv bias
            pl.BlockSpec((1, C), lambda b: (0, 0)),            # ln weight
            pl.BlockSpec((1, C), lambda b: (0, 0)),            # ln bias
            pl.BlockSpec((C, C4), lambda b: (0, 0)),           # pwconv1 weight
            pl.BlockSpec((1, C4), lambda b: (0, 0)),           # pwconv1 bias
            pl.BlockSpec((C4, C), lambda b: (0, 0)),           # pwconv2 weight
            pl.BlockSpec((1, C), lambda b: (0, 0)),            # pwconv2 bias
            pl.BlockSpec((1, C), lambda b: (0, 0)),            # gamma
        ],
        out_specs=pl.BlockSpec((1, H, W, C), lambda b: (b, 0, 0, 0)),
        compiler_params=pltpu.CompilerParams(
            dimension_semantics=("parallel",)),
    )(xpad,
      params["w_conv"].reshape(49, C, C),
      params["b_conv"].reshape(1, C),
      params["ln_w"].reshape(1, C),
      params["ln_b"].reshape(1, C),
      params["w1"],
      params["b1"].reshape(1, C4),
      params["w2"],
      params["b2"].reshape(1, C),
      params["gamma"].reshape(1, C))

    return jnp.transpose(out_nhwc, (0, 3, 1, 2))               # back to NCHW


# ----------------------------------------------------------------------------
# Synthetic deterministic parameters
# ----------------------------------------------------------------------------
def init_params(key, C):
    ks = jax.random.split(key, 9)
    C4 = 4 * C
    p = {}
    p["w_conv"] = jax.random.normal(ks[0], (7, 7, C, C), jnp.float32) / math.sqrt(49 * C)
    p["b_conv"] = jax.random.normal(ks[1], (C,), jnp.float32) * 0.02
    p["ln_w"] = 1.0 + jax.random.normal(ks[2], (C,), jnp.float32) * 0.05
    p["ln_b"] = jax.random.normal(ks[3], (C,), jnp.float32) * 0.02
    p["w1"] = jax.random.normal(ks[4], (C, C4), jnp.float32) / math.sqrt(C)
    p["b1"] = jax.random.normal(ks[5], (C4,), jnp.float32) * 0.02
    p["w2"] = jax.random.normal(ks[6], (C4, C), jnp.float32) / math.sqrt(C4)
    p["b2"] = jax.random.normal(ks[7], (C,), jnp.float32) * 0.02
    # Module default is layer_scale_init_value * ones (1e-6); use non-trivial
    # values so the non-residual branch is actually exercised by the check.
    p["gamma"] = jax.random.normal(ks[8], (C,), jnp.float32) * 0.5
    return p


# ----------------------------------------------------------------------------
# Pure-JAX reference (exact erf GeLU) for correctness check
# ----------------------------------------------------------------------------
def reference_forward(x_nchw, params):
    x = jnp.transpose(x_nchw, (0, 2, 3, 1))                    # NHWC
    y = lax.conv_general_dilated(
        x, params["w_conv"], (1, 1), "SAME",
        dimension_numbers=("NHWC", "HWIO", "NHWC")) + params["b_conv"]
    mu = y.mean(-1, keepdims=True)
    var = ((y - mu) ** 2).mean(-1, keepdims=True)
    yn = (y - mu) / jnp.sqrt(var + 1e-6) * params["ln_w"] + params["ln_b"]
    h = yn @ params["w1"] + params["b1"]
    h = h * 0.5 * (1.0 + jax.scipy.special.erf(h / math.sqrt(2.0)))
    z = h @ params["w2"] + params["b2"]
    z = z * params["gamma"]
    out = x + z                                                # drop_path = identity
    return jnp.transpose(out, (0, 3, 1, 2))


# ----------------------------------------------------------------------------
if __name__ == "__main__":
    key = jax.random.PRNGKey(0)
    B, C, H, W = 2, 32, 16, 16

    kx, kp = jax.random.split(key, 2)
    x = jax.random.normal(kx, (B, C, H, W), jnp.float32)       # NCHW, like PyTorch
    params = init_params(kp, C)

    fwd = jax.jit(convnext_block_forward)
    out = jax.block_until_ready(fwd(x, params))

    expected = reference_forward(x, params)
    err = float(jnp.max(jnp.abs(out - expected)))
    assert out.shape == (B, C, H, W), out.shape
    assert err < 2e-3, f"max abs error {err}"
    print("KERNEL_OK")
</pallas_src>

<mosaic_0001>
module attributes {stable_mosaic.version = 11 : i64} {
  func.func @_block_kernel(%arg0: i32, %arg1: memref<1x22x22x32xf32, #tpu.memory_space<vmem>>, %arg2: memref<49x32x32xf32, #tpu.memory_space<vmem>>, %arg3: memref<1x32xf32, #tpu.memory_space<vmem>>, %arg4: memref<1x32xf32, #tpu.memory_space<vmem>>, %arg5: memref<1x32xf32, #tpu.memory_space<vmem>>, %arg6: memref<32x128xf32, #tpu.memory_space<vmem>>, %arg7: memref<1x128xf32, #tpu.memory_space<vmem>>, %arg8: memref<128x32xf32, #tpu.memory_space<vmem>>, %arg9: memref<1x32xf32, #tpu.memory_space<vmem>>, %arg10: memref<1x32xf32, #tpu.memory_space<vmem>>, %arg11: memref<1x16x16x32xf32, #tpu.memory_space<vmem>>) attributes {dimension_semantics = [#tpu.dimension_semantics<parallel>], iteration_bounds = array<i64: 2>, scalar_prefetch = 0 : i64, scratch_operands = 0 : i64, tpu.core_type = #tpu.core_type<tc>, window_params = [{transform_indices = @transform_0, window_bounds = array<i64: 1, 22, 22, 32>}, {pipeline_mode = #tpu.pipeline_mode<synchronous>, transform_indices = @transform_1, window_bounds = array<i64: 49, 32, 32>}, {pipeline_mode = #tpu.pipeline_mode<synchronous>, transform_indices = @transform_2, window_bounds = array<i64: 1, 32>}, {pipeline_mode = #tpu.pipeline_mode<synchronous>, transform_indices = @transform_3, window_bounds = array<i64: 1, 32>}, {pipeline_mode = #tpu.pipeline_mode<synchronous>, transform_indices = @transform_4, window_bounds = array<i64: 1, 32>}, {pipeline_mode = #tpu.pipeline_mode<synchronous>, transform_indices = @transform_5, window_bounds = array<i64: 32, 128>}, {pipeline_mode = #tpu.pipeline_mode<synchronous>, transform_indices = @transform_6, window_bounds = array<i64: 1, 128>}, {pipeline_mode = #tpu.pipeline_mode<synchronous>, transform_indices = @transform_7, window_bounds = array<i64: 128, 32>}, {pipeline_mode = #tpu.pipeline_mode<synchronous>, transform_indices = @transform_8, window_bounds = array<i64: 1, 32>}, {pipeline_mode = #tpu.pipeline_mode<synchronous>, transform_indices = @transform_9, window_bounds = array<i64: 1, 32>}, {transform_indices = @transform_10, window_bounds = array<i64: 1, 16, 16, 32>}]} {
    %c0 = arith.constant 0 : index
    %c0_0 = arith.constant 0 : index
    %c0_1 = arith.constant 0 : index
    %c0_2 = arith.constant 0 : index
    %0 = vector.load %arg1[%c0, %c0_0, %c0_1, %c0_2] : memref<1x22x22x32xf32, #tpu.memory_space<vmem>>, vector<1x22x22x32xf32>
    %1 = vector.shape_cast %0 : vector<1x22x22x32xf32> to vector<22x22x32xf32>
    %c0_3 = arith.constant 0 : index
    %c0_4 = arith.constant 0 : index
    %c0_5 = arith.constant 0 : index
    %2 = vector.load %arg2[%c0_3, %c0_4, %c0_5] : memref<49x32x32xf32, #tpu.memory_space<vmem>>, vector<49x32x32xf32>
    %cst = arith.constant 0.000000e+00 : f32
    %3 = vector.broadcast %cst : f32 to vector<256x32xf32>
    %4 = vector.extract_strided_slice %1 {offsets = [0, 0, 0], sizes = [16, 16, 32], strides = [1, 1, 1]} : vector<22x22x32xf32> to vector<16x16x32xf32>
    %5 = vector.shape_cast %4 : vector<16x16x32xf32> to vector<256x32xf32>
    %6 = vector.extract_strided_slice %2 {offsets = [0, 0, 0], sizes = [1, 32, 32], strides = [1, 1, 1]} : vector<49x32x32xf32> to vector<1x32x32xf32>
    %7 = vector.shape_cast %6 : vector<1x32x32xf32> to vector<32x32xf32>
    %cst_6 = arith.constant dense<0.000000e+00> : vector<256x32xf32>
    %8 = tpu.matmul %5, %7, %cst_6 {dimension_numbers = #tpu.dot_dimension_numbers<[1], [0], [0], [1], [0, 0, 1, 1], [], []>} : vector<256x32xf32>, vector<32x32xf32>, vector<256x32xf32> -> vector<256x32xf32>
    %9 = arith.addf %3, %8 : vector<256x32xf32>
    %10 = vector.extract_strided_slice %1 {offsets = [0, 1, 0], sizes = [16, 16, 32], strides = [1, 1, 1]} : vector<22x22x32xf32> to vector<16x16x32xf32>
    %11 = vector.shape_cast %10 : vector<16x16x32xf32> to vector<256x32xf32>
    %12 = vector.extract_strided_slice %2 {offsets = [1, 0, 0], sizes = [1, 32, 32], strides = [1, 1, 1]} : vector<49x32x32xf32> to vector<1x32x32xf32>
    %13 = vector.shape_cast %12 : vector<1x32x32xf32> to vector<32x32xf32>
    %cst_7 = arith.constant dense<0.000000e+00> : vector<256x32xf32>
    %14 = tpu.matmul %11, %13, %cst_7 {dimension_numbers = #tpu.dot_dimension_numbers<[1], [0], [0], [1], [0, 0, 1, 1], [], []>} : vector<256x32xf32>, vector<32x32xf32>, vector<256x32xf32> -> vector<256x32xf32>
    %15 = arith.addf %9, %14 : vector<256x32xf32>
    %16 = vector.extract_strided_slice %1 {offsets = [0, 2, 0], sizes = [16, 16, 32], strides = [1, 1, 1]} : vector<22x22x32xf32> to vector<16x16x32xf32>
    %17 = vector.shape_cast %16 : vector<16x16x32xf32> to vector<256x32xf32>
    %18 = vector.extract_strided_slice %2 {offsets = [2, 0, 0], sizes = [1, 32, 32], strides = [1, 1, 1]} : vector<49x32x32xf32> to vector<1x32x32xf32>
    %19 = vector.shape_cast %18 : vector<1x32x32xf32> to vector<32x32xf32>
    %cst_8 = arith.constant dense<0.000000e+00> : vector<256x32xf32>
    %20 = tpu.matmul %17, %19, %cst_8 {dimension_numbers = #tpu.dot_dimension_numbers<[1], [0], [0], [1], [0, 0, 1, 1], [], []>} : vector<256x32xf32>, vector<32x32xf32>, vector<256x32xf32> -> vector<256x32xf32>
    %21 = arith.addf %15, %20 : vector<256x32xf32>
    %22 = vector.extract_strided_slice %1 {offsets = [0, 3, 0], sizes = [16, 16, 32], strides = [1, 1, 1]} : vector<22x22x32xf32> to vector<16x16x32xf32>
    %23 = vector.shape_cast %22 : vector<16x16x32xf32> to vector<256x32xf32>
    %24 = vector.extract_strided_slice %2 {offsets = [3, 0, 0], sizes = [1, 32, 32], strides = [1, 1, 1]} : vector<49x32x32xf32> to vector<1x32x32xf32>
    %25 = vector.shape_cast %24 : vector<1x32x32xf32> to vector<32x32xf32>
    %cst_9 = arith.constant dense<0.000000e+00> : vector<256x32xf32>
    %26 = tpu.matmul %23, %25, %cst_9 {dimension_numbers = #tpu.dot_dimension_numbers<[1], [0], [0], [1], [0, 0, 1, 1], [], []>} : vector<256x32xf32>, vector<32x32xf32>, vector<256x32xf32> -> vector<256x32xf32>
    %27 = arith.addf %21, %26 : vector<256x32xf32>
    %28 = vector.extract_strided_slice %1 {offsets = [0, 4, 0], sizes = [16, 16, 32], strides = [1, 1, 1]} : vector<22x22x32xf32> to vector<16x16x32xf32>
    %29 = vector.shape_cast %28 : vector<16x16x32xf32> to vector<256x32xf32>
    %30 = vector.extract_strided_slice %2 {offsets = [4, 0, 0], sizes = [1, 32, 32], strides = [1, 1, 1]} : vector<49x32x32xf32> to vector<1x32x32xf32>
    %31 = vector.shape_cast %30 : vector<1x32x32xf32> to vector<32x32xf32>
    %cst_10 = arith.constant dense<0.000000e+00> : vector<256x32xf32>
    %32 = tpu.matmul %29, %31, %cst_10 {dimension_numbers = #tpu.dot_dimension_numbers<[1], [0], [0], [1], [0, 0, 1, 1], [], []>} : vector<256x32xf32>, vector<32x32xf32>, vector<256x32xf32> -> vector<256x32xf32>
    %33 = arith.addf %27, %32 : vector<256x32xf32>
    %34 = vector.extract_strided_slice %1 {offsets = [0, 5, 0], sizes = [16, 16, 32], strides = [1, 1, 1]} : vector<22x22x32xf32> to vector<16x16x32xf32>
    %35 = vector.shape_cast %34 : vector<16x16x32xf32> to vector<256x32xf32>
    %36 = vector.extract_strided_slice %2 {offsets = [5, 0, 0], sizes = [1, 32, 32], strides = [1, 1, 1]} : vector<49x32x32xf32> to vector<1x32x32xf32>
    %37 = vector.shape_cast %36 : vector<1x32x32xf32> to vector<32x32xf32>
    %cst_11 = arith.constant dense<0.000000e+00> : vector<256x32xf32>
    %38 = tpu.matmul %35, %37, %cst_11 {dimension_numbers = #tpu.dot_dimension_numbers<[1], [0], [0], [1], [0, 0, 1, 1], [], []>} : vector<256x32xf32>, vector<32x32xf32>, vector<256x32xf32> -> vector<256x32xf32>
    %39 = arith.addf %33, %38 : vector<256x32xf32>
    %40 = vector.extract_strided_slice %1 {offsets = [0, 6, 0], sizes = [16, 16, 32], strides = [1, 1, 1]} : vector<22x22x32xf32> to vector<16x16x32xf32>
    %41 = vector.shape_cast %40 : vector<16x16x32xf32> to vector<256x32xf32>
    %42 = vector.extract_strided_slice %2 {offsets = [6, 0, 0], sizes = [1, 32, 32], strides = [1, 1, 1]} : vector<49x32x32xf32> to vector<1x32x32xf32>
    %43 = vector.shape_cast %42 : vector<1x32x32xf32> to vector<32x32xf32>
    %cst_12 = arith.constant dense<0.000000e+00> : vector<256x32xf32>
    %44 = tpu.matmul %41, %43, %cst_12 {dimension_numbers = #tpu.dot_dimension_numbers<[1], [0], [0], [1], [0, 0, 1, 1], [], []>} : vector<256x32xf32>, vector<32x32xf32>, vector<256x32xf32> -> vector<256x32xf32>
    %45 = arith.addf %39, %44 : vector<256x32xf32>
    %46 = vector.extract_strided_slice %1 {offsets = [1, 0, 0], sizes = [16, 16, 32], strides = [1, 1, 1]} : vector<22x22x32xf32> to vector<16x16x32xf32>
    %47 = vector.shape_cast %46 : vector<16x16x32xf32> to vector<256x32xf32>
    %48 = vector.extract_strided_slice %2 {offsets = [7, 0, 0], sizes = [1, 32, 32], strides = [1, 1, 1]} : vector<49x32x32xf32> to vector<1x32x32xf32>
    %49 = vector.shape_cast %48 : vector<1x32x32xf32> to vector<32x32xf32>
    %cst_13 = arith.constant dense<0.000000e+00> : vector<256x32xf32>
    %50 = tpu.matmul %47, %49, %cst_13 {dimension_numbers = #tpu.dot_dimension_numbers<[1], [0], [0], [1], [0, 0, 1, 1], [], []>} : vector<256x32xf32>, vector<32x32xf32>, vector<256x32xf32> -> vector<256x32xf32>
    %51 = arith.addf %45, %50 : vector<256x32xf32>
    %52 = vector.extract_strided_slice %1 {offsets = [1, 1, 0], sizes = [16, 16, 32], strides = [1, 1, 1]} : vector<22x22x32xf32> to vector<16x16x32xf32>
    %53 = vector.shape_cast %52 : vector<16x16x32xf32> to vector<256x32xf32>
    %54 = vector.extract_strided_slice %2 {offsets = [8, 0, 0], sizes = [1, 32, 32], strides = [1, 1, 1]} : vector<49x32x32xf32> to vector<1x32x32xf32>
    %55 = vector.shape_cast %54 : vector<1x32x32xf32> to vector<32x32xf32>
    %cst_14 = arith.constant dense<0.000000e+00> : vector<256x32xf32>
    %56 = tpu.matmul %53, %55, %cst_14 {dimension_numbers = #tpu.dot_dimension_numbers<[1], [0], [0], [1], [0, 0, 1, 1], [], []>} : vector<256x32xf32>, vector<32x32xf32>, vector<256x32xf32> -> vector<256x32xf32>
    %57 = arith.addf %51, %56 : vector<256x32xf32>
    %58 = vector.extract_strided_slice %1 {offsets = [1, 2, 0], sizes = [16, 16, 32], strides = [1, 1, 1]} : vector<22x22x32xf32> to vector<16x16x32xf32>
    %59 = vector.shape_cast %58 : vector<16x16x32xf32> to vector<256x32xf32>
    %60 = vector.extract_strided_slice %2 {offsets = [9, 0, 0], sizes = [1, 32, 32], strides = [1, 1, 1]} : vector<49x32x32xf32> to vector<1x32x32xf32>
    %61 = vector.shape_cast %60 : vector<1x32x32xf32> to vector<32x32xf32>
    %cst_15 = arith.constant dense<0.000000e+00> : vector<256x32xf32>
    %62 = tpu.matmul %59, %61, %cst_15 {dimension_numbers = #tpu.dot_dimension_numbers<[1], [0], [0], [1], [0, 0, 1, 1], [], []>} : vector<256x32xf32>, vector<32x32xf32>, vector<256x32xf32> -> vector<256x32xf32>
    %63 = arith.addf %57, %62 : vector<256x32xf32>
    %64 = vector.extract_strided_slice %1 {offsets = [1, 3, 0], sizes = [16, 16, 32], strides = [1, 1, 1]} : vector<22x22x32xf32> to vector<16x16x32xf32>
    %65 = vector.shape_cast %64 : vector<16x16x32xf32> to vector<256x32xf32>
    %66 = vector.extract_strided_slice %2 {offsets = [10, 0, 0], sizes = [1, 32, 32], strides = [1, 1, 1]} : vector<49x32x32xf32> to vector<1x32x32xf32>
    %67 = vector.shape_cast %66 : vector<1x32x32xf32> to vector<32x32xf32>
    %cst_16 = arith.constant dense<0.000000e+00> : vector<256x32xf32>
    %68 = tpu.matmul %65, %67, %cst_16 {dimension_numbers = #tpu.dot_dimension_numbers<[1], [0], [0], [1], [0, 0, 1, 1], [], []>} : vector<256x32xf32>, vector<32x32xf32>, vector<256x32xf32> -> vector<256x32xf32>
    %69 = arith.addf %63, %68 : vector<256x32xf32>
    %70 = vector.extract_strided_slice %1 {offsets = [1, 4, 0], sizes = [16, 16, 32], strides = [1, 1, 1]} : vector<22x22x32xf32> to vector<16x16x32xf32>
    %71 = vector.shape_cast %70 : vector<16x16x32xf32> to vector<256x32xf32>
    %72 = vector.extract_strided_slice %2 {offsets = [11, 0, 0], sizes = [1, 32, 32], strides = [1, 1, 1]} : vector<49x32x32xf32> to vector<1x32x32xf32>
    %73 = vector.shape_cast %72 : vector<1x32x32xf32> to vector<32x32xf32>
    %cst_17 = arith.constant dense<0.000000e+00> : vector<256x32xf32>
    %74 = tpu.matmul %71, %73, %cst_17 {dimension_numbers = #tpu.dot_dimension_numbers<[1], [0], [0], [1], [0, 0, 1, 1], [], []>} : vector<256x32xf32>, vector<32x32xf32>, vector<256x32xf32> -> vector<256x32xf32>
    %75 = arith.addf %69, %74 : vector<256x32xf32>
    %76 = vector.extract_strided_slice %1 {offsets = [1, 5, 0], sizes = [16, 16, 32], strides = [1, 1, 1]} : vector<22x22x32xf32> to vector<16x16x32xf32>
    %77 = vector.shape_cast %76 : vector<16x16x32xf32> to vector<256x32xf32>
    %78 = vector.extract_strided_slice %2 {offsets = [12, 0, 0], sizes = [1, 32, 32], strides = [1, 1, 1]} : vector<49x32x32xf32> to vector<1x32x32xf32>
    %79 = vector.shape_cast %78 : vector<1x32x32xf32> to vector<32x32xf32>
    %cst_18 = arith.constant dense<0.000000e+00> : vector<256x32xf32>
    %80 = tpu.matmul %77, %79, %cst_18 {dimension_numbers = #tpu.dot_dimension_numbers<[1], [0], [0], [1], [0, 0, 1, 1], [], []>} : vector<256x32xf32>, vector<32x32xf32>, vector<256x32xf32> -> vector<256x32xf32>
    %81 = arith.addf %75, %80 : vector<256x32xf32>
    %82 = vector.extract_strided_slice %1 {offsets = [1, 6, 0], sizes = [16, 16, 32], strides = [1, 1, 1]} : vector<22x22x32xf32> to vector<16x16x32xf32>
    %83 = vector.shape_cast %82 : vector<16x16x32xf32> to vector<256x32xf32>
    %84 = vector.extract_strided_slice %2 {offsets = [13, 0, 0], sizes = [1, 32, 32], strides = [1, 1, 1]} : vector<49x32x32xf32> to vector<1x32x32xf32>
    %85 = vector.shape_cast %84 : vector<1x32x32xf32> to vector<32x32xf32>
    %cst_19 = arith.constant dense<0.000000e+00> : vector<256x32xf32>
    %86 = tpu.matmul %83, %85, %cst_19 {dimension_numbers = #tpu.dot_dimension_numbers<[1], [0], [0], [1], [0, 0, 1, 1], [], []>} : vector<256x32xf32>, vector<32x32xf32>, vector<256x32xf32> -> vector<256x32xf32>
    %87 = arith.addf %81, %86 : vector<256x32xf32>
    %88 = vector.extract_strided_slice %1 {offsets = [2, 0, 0], sizes = [16, 16, 32], strides = [1, 1, 1]} : vector<22x22x32xf32> to vector<16x16x32xf32>
    %89 = vector.shape_cast %88 : vector<16x16x32xf32> to vector<256x32xf32>
    %90 = vector.extract_strided_slice %2 {offsets = [14, 0, 0], sizes = [1, 32, 32], strides = [1, 1, 1]} : vector<49x32x32xf32> to vector<1x32x32xf32>
    %91 = vector.shape_cast %90 : vector<1x32x32xf32> to vector<32x32xf32>
    %cst_20 = arith.constant dense<0.000000e+00> : vector<256x32xf32>
    %92 = tpu.matmul %89, %91, %cst_20 {dimension_numbers = #tpu.dot_dimension_numbers<[1], [0], [0], [1], [0, 0, 1, 1], [], []>} : vector<256x32xf32>, vector<32x32xf32>, vector<256x32xf32> -> vector<256x32xf32>
    %93 = arith.addf %87, %92 : vector<256x32xf32>
    %94 = vector.extract_strided_slice %1 {offsets = [2, 1, 0], sizes = [16, 16, 32], strides = [1, 1, 1]} : vector<22x22x32xf32> to vector<16x16x32xf32>
    %95 = vector.shape_cast %94 : vector<16x16x32xf32> to vector<256x32xf32>
    %96 = vector.extract_strided_slice %2 {offsets = [15, 0, 0], sizes = [1, 32, 32], strides = [1, 1, 1]} : vector<49x32x32xf32> to vector<1x32x32xf32>
    %97 = vector.shape_cast %96 : vector<1x32x32xf32> to vector<32x32xf32>
    %cst_21 = arith.constant dense<0.000000e+00> : vector<256x32xf32>
    %98 = tpu.matmul %95, %97, %cst_21 {dimension_numbers = #tpu.dot_dimension_numbers<[1], [0], [0], [1], [0, 0, 1, 1], [], []>} : vector<256x32xf32>, vector<32x32xf32>, vector<256x32xf32> -> vector<256x32xf32>
    %99 = arith.addf %93, %98 : vector<256x32xf32>
    %100 = vector.extract_strided_slice %1 {offsets = [2, 2, 0], sizes = [16, 16, 32], strides = [1, 1, 1]} : vector<22x22x32xf32> to vector<16x16x32xf32>
    %101 = vector.shape_cast %100 : vector<16x16x32xf32> to vector<256x32xf32>
    %102 = vector.extract_strided_slice %2 {offsets = [16, 0, 0], sizes = [1, 32, 32], strides = [1, 1, 1]} : vector<49x32x32xf32> to vector<1x32x32xf32>
    %103 = vector.shape_cast %102 : vector<1x32x32xf32> to vector<32x32xf32>
    %cst_22 = arith.constant dense<0.000000e+00> : vector<256x32xf32>
    %104 = tpu.matmul %101, %103, %cst_22 {dimension_numbers = #tpu.dot_dimension_numbers<[1], [0], [0], [1], [0, 0, 1, 1], [], []>} : vector<256x32xf32>, vector<32x32xf32>, vector<256x32xf32> -> vector<256x32xf32>
    %105 = arith.addf %99, %104 : vector<256x32xf32>
    %106 = vector.extract_strided_slice %1 {offsets = [2, 3, 0], sizes = [16, 16, 32], strides = [1, 1, 1]} : vector<22x22x32xf32> to vector<16x16x32xf32>
    %107 = vector.shape_cast %106 : vector<16x16x32xf32> to vector<256x32xf32>
    %108 = vector.extract_strided_slice %2 {offsets = [17, 0, 0], sizes = [1, 32, 32], strides = [1, 1, 1]} : vector<49x32x32xf32> to vector<1x32x32xf32>
    %109 = vector.shape_cast %108 : vector<1x32x32xf32> to vector<32x32xf32>
    %cst_23 = arith.constant dense<0.000000e+00> : vector<256x32xf32>
    %110 = tpu.matmul %107, %109, %cst_23 {dimension_numbers = #tpu.dot_dimension_numbers<[1], [0], [0], [1], [0, 0, 1, 1], [], []>} : vector<256x32xf32>, vector<32x32xf32>, vector<256x32xf32> -> vector<256x32xf32>
    %111 = arith.addf %105, %110 : vector<256x32xf32>
    %112 = vector.extract_strided_slice %1 {offsets = [2, 4, 0], sizes = [16, 16, 32], strides = [1, 1, 1]} : vector<22x22x32xf32> to vector<16x16x32xf32>
    %113 = vector.shape_cast %112 : vector<16x16x32xf32> to vector<256x32xf32>
    %114 = vector.extract_strided_slice %2 {offsets = [18, 0, 0], sizes = [1, 32, 32], strides = [1, 1, 1]} : vector<49x32x32xf32> to vector<1x32x32xf32>
    %115 = vector.shape_cast %114 : vector<1x32x32xf32> to vector<32x32xf32>
    %cst_24 = arith.constant dense<0.000000e+00> : vector<256x32xf32>
    %116 = tpu.matmul %113, %115, %cst_24 {dimension_numbers = #tpu.dot_dimension_numbers<[1], [0], [0], [1], [0, 0, 1, 1], [], []>} : vector<256x32xf32>, vector<32x32xf32>, vector<256x32xf32> -> vector<256x32xf32>
    %117 = arith.addf %111, %116 : vector<256x32xf32>
    %118 = vector.extract_strided_slice %1 {offsets = [2, 5, 0], sizes = [16, 16, 32], strides = [1, 1, 1]} : vector<22x22x32xf32> to vector<16x16x32xf32>
    %119 = vector.shape_cast %118 : vector<16x16x32xf32> to vector<256x32xf32>
    %120 = vector.extract_strided_slice %2 {offsets = [19, 0, 0], sizes = [1, 32, 32], strides = [1, 1, 1]} : vector<49x32x32xf32> to vector<1x32x32xf32>
    %121 = vector.shape_cast %120 : vector<1x32x32xf32> to vector<32x32xf32>
    %cst_25 = arith.constant dense<0.000000e+00> : vector<256x32xf32>
    %122 = tpu.matmul %119, %121, %cst_25 {dimension_numbers = #tpu.dot_dimension_numbers<[1], [0], [0], [1], [0, 0, 1, 1], [], []>} : vector<256x32xf32>, vector<32x32xf32>, vector<256x32xf32> -> vector<256x32xf32>
    %123 = arith.addf %117, %122 : vector<256x32xf32>
    %124 = vector.extract_strided_slice %1 {offsets = [2, 6, 0], sizes = [16, 16, 32], strides = [1, 1, 1]} : vector<22x22x32xf32> to vector<16x16x32xf32>
    %125 = vector.shape_cast %124 : vector<16x16x32xf32> to vector<256x32xf32>
    %126 = vector.extract_strided_slice %2 {offsets = [20, 0, 0], sizes = [1, 32, 32], strides = [1, 1, 1]} : vector<49x32x32xf32> to vector<1x32x32xf32>
    %127 = vector.shape_cast %126 : vector<1x32x32xf32> to vector<32x32xf32>
    %cst_26 = arith.constant dense<0.000000e+00> : vector<256x32xf32>
    %128 = tpu.matmul %125, %127, %cst_26 {dimension_numbers = #tpu.dot_dimension_numbers<[1], [0], [0], [1], [0, 0, 1, 1], [], []>} : vector<256x32xf32>, vector<32x32xf32>, vector<256x32xf32> -> vector<256x32xf32>
    %129 = arith.addf %123, %128 : vector<256x32xf32>
    %130 = vector.extract_strided_slice %1 {offsets = [3, 0, 0], sizes = [16, 16, 32], strides = [1, 1, 1]} : vector<22x22x32xf32> to vector<16x16x32xf32>
    %131 = vector.shape_cast %130 : vector<16x16x32xf32> to vector<256x32xf32>
    %132 = vector.extract_strided_slice %2 {offsets = [21, 0, 0], sizes = [1, 32, 32], strides = [1, 1, 1]} : vector<49x32x32xf32> to vector<1x32x32xf32>
    %133 = vector.shape_cast %132 : vector<1x32x32xf32> to vector<32x32xf32>
    %cst_27 = arith.constant dense<0.000000e+00> : vector<256x32xf32>
    %134 = tpu.matmul %131, %133, %cst_27 {dimension_numbers = #tpu.dot_dimension_numbers<[1], [0], [0], [1], [0, 0, 1, 1], [], []>} : vector<256x32xf32>, vector<32x32xf32>, vector<256x32xf32> -> vector<256x32xf32>
    %135 = arith.addf %129, %134 : vector<256x32xf32>
    %136 = vector.extract_strided_slice %1 {offsets = [3, 1, 0], sizes = [16, 16, 32], strides = [1, 1, 1]} : vector<22x22x32xf32> to vector<16x16x32xf32>
    %137 = vector.shape_cast %136 : vector<16x16x32xf32> to vector<256x32xf32>
    %138 = vector.extract_strided_slice %2 {offsets = [22, 0, 0], sizes = [1, 32, 32], strides = [1, 1, 1]} : vector<49x32x32xf32> to vector<1x32x32xf32>
    %139 = vector.shape_cast %138 : vector<1x32x32xf32> to vector<32x32xf32>
    %cst_28 = arith.constant dense<0.000000e+00> : vector<256x32xf32>
    %140 = tpu.matmul %137, %139, %cst_28 {dimension_numbers = #tpu.dot_dimension_numbers<[1], [0], [0], [1], [0, 0, 1, 1], [], []>} : vector<256x32xf32>, vector<32x32xf32>, vector<256x32xf32> -> vector<256x32xf32>
    %141 = arith.addf %135, %140 : vector<256x32xf32>
    %142 = vector.extract_strided_slice %1 {offsets = [3, 2, 0], sizes = [16, 16, 32], strides = [1, 1, 1]} : vector<22x22x32xf32> to vector<16x16x32xf32>
    %143 = vector.shape_cast %142 : vector<16x16x32xf32> to vector<256x32xf32>
    %144 = vector.extract_strided_slice %2 {offsets = [23, 0, 0], sizes = [1, 32, 32], strides = [1, 1, 1]} : vector<49x32x32xf32> to vector<1x32x32xf32>
    %145 = vector.shape_cast %144 : vector<1x32x32xf32> to vector<32x32xf32>
    %cst_29 = arith.constant dense<0.000000e+00> : vector<256x32xf32>
    %146 = tpu.matmul %143, %145, %cst_29 {dimension_numbers = #tpu.dot_dimension_numbers<[1], [0], [0], [1], [0, 0, 1, 1], [], []>} : vector<256x32xf32>, vector<32x32xf32>, vector<256x32xf32> -> vector<256x32xf32>
    %147 = arith.addf %141, %146 : vector<256x32xf32>
    %148 = vector.extract_strided_slice %1 {offsets = [3, 3, 0], sizes = [16, 16, 32], strides = [1, 1, 1]} : vector<22x22x32xf32> to vector<16x16x32xf32>
    %149 = vector.shape_cast %148 : vector<16x16x32xf32> to vector<256x32xf32>
    %150 = vector.extract_strided_slice %2 {offsets = [24, 0, 0], sizes = [1, 32, 32], strides = [1, 1, 1]} : vector<49x32x32xf32> to vector<1x32x32xf32>
    %151 = vector.shape_cast %150 : vector<1x32x32xf32> to vector<32x32xf32>
    %cst_30 = arith.constant dense<0.000000e+00> : vector<256x32xf32>
    %152 = tpu.matmul %149, %151, %cst_30 {dimension_numbers = #tpu.dot_dimension_numbers<[1], [0], [0], [1], [0, 0, 1, 1], [], []>} : vector<256x32xf32>, vector<32x32xf32>, vector<256x32xf32> -> vector<256x32xf32>
    %153 = arith.addf %147, %152 : vector<256x32xf32>
    %154 = vector.extract_strided_slice %1 {offsets = [3, 4, 0], sizes = [16, 16, 32], strides = [1, 1, 1]} : vector<22x22x32xf32> to vector<16x16x32xf32>
    %155 = vector.shape_cast %154 : vector<16x16x32xf32> to vector<256x32xf32>
    %156 = vector.extract_strided_slice %2 {offsets = [25, 0, 0], sizes = [1, 32, 32], strides = [1, 1, 1]} : vector<49x32x32xf32> to vector<1x32x32xf32>
    %157 = vector.shape_cast %156 : vector<1x32x32xf32> to vector<32x32xf32>
    %cst_31 = arith.constant dense<0.000000e+00> : vector<256x32xf32>
    %158 = tpu.matmul %155, %157, %cst_31 {dimension_numbers = #tpu.dot_dimension_numbers<[1], [0], [0], [1], [0, 0, 1, 1], [], []>} : vector<256x32xf32>, vector<32x32xf32>, vector<256x32xf32> -> vector<256x32xf32>
    %159 = arith.addf %153, %158 : vector<256x32xf32>
    %160 = vector.extract_strided_slice %1 {offsets = [3, 5, 0], sizes = [16, 16, 32], strides = [1, 1, 1]} : vector<22x22x32xf32> to vector<16x16x32xf32>
    %161 = vector.shape_cast %160 : vector<16x16x32xf32> to vector<256x32xf32>
    %162 = vector.extract_strided_slice %2 {offsets = [26, 0, 0], sizes = [1, 32, 32], strides = [1, 1, 1]} : vector<49x32x32xf32> to vector<1x32x32xf32>
    %163 = vector.shape_cast %162 : vector<1x32x32xf32> to vector<32x32xf32>
    %cst_32 = arith.constant dense<0.000000e+00> : vector<256x32xf32>
    %164 = tpu.matmul %161, %163, %cst_32 {dimension_numbers = #tpu.dot_dimension_numbers<[1], [0], [0], [1], [0, 0, 1, 1], [], []>} : vector<256x32xf32>, vector<32x32xf32>, vector<256x32xf32> -> vector<256x32xf32>
    %165 = arith.addf %159, %164 : vector<256x32xf32>
    %166 = vector.extract_strided_slice %1 {offsets = [3, 6, 0], sizes = [16, 16, 32], strides = [1, 1, 1]} : vector<22x22x32xf32> to vector<16x16x32xf32>
    %167 = vector.shape_cast %166 : vector<16x16x32xf32> to vector<256x32xf32>
    %168 = vector.extract_strided_slice %2 {offsets = [27, 0, 0], sizes = [1, 32, 32], strides = [1, 1, 1]} : vector<49x32x32xf32> to vector<1x32x32xf32>
    %169 = vector.shape_cast %168 : vector<1x32x32xf32> to vector<32x32xf32>
    %cst_33 = arith.constant dense<0.000000e+00> : vector<256x32xf32>
    %170 = tpu.matmul %167, %169, %cst_33 {dimension_numbers = #tpu.dot_dimension_numbers<[1], [0], [0], [1], [0, 0, 1, 1], [], []>} : vector<256x32xf32>, vector<32x32xf32>, vector<256x32xf32> -> vector<256x32xf32>
    %171 = arith.addf %165, %170 : vector<256x32xf32>
    %172 = vector.extract_strided_slice %1 {offsets = [4, 0, 0], sizes = [16, 16, 32], strides = [1, 1, 1]} : vector<22x22x32xf32> to vector<16x16x32xf32>
    %173 = vector.shape_cast %172 : vector<16x16x32xf32> to vector<256x32xf32>
    %174 = vector.extract_strided_slice %2 {offsets = [28, 0, 0], sizes = [1, 32, 32], strides = [1, 1, 1]} : vector<49x32x32xf32> to vector<1x32x32xf32>
    %175 = vector.shape_cast %174 : vector<1x32x32xf32> to vector<32x32xf32>
    %cst_34 = arith.constant dense<0.000000e+00> : vector<256x32xf32>
    %176 = tpu.matmul %173, %175, %cst_34 {dimension_numbers = #tpu.dot_dimension_numbers<[1], [0], [0], [1], [0, 0, 1, 1], [], []>} : vector<256x32xf32>, vector<32x32xf32>, vector<256x32xf32> -> vector<256x32xf32>
    %177 = arith.addf %171, %176 : vector<256x32xf32>
    %178 = vector.extract_strided_slice %1 {offsets = [4, 1, 0], sizes = [16, 16, 32], strides = [1, 1, 1]} : vector<22x22x32xf32> to vector<16x16x32xf32>
    %179 = vector.shape_cast %178 : vector<16x16x32xf32> to vector<256x32xf32>
    %180 = vector.extract_strided_slice %2 {offsets = [29, 0, 0], sizes = [1, 32, 32], strides = [1, 1, 1]} : vector<49x32x32xf32> to vector<1x32x32xf32>
    %181 = vector.shape_cast %180 : vector<1x32x32xf32> to vector<32x32xf32>
    %cst_35 = arith.constant dense<0.000000e+00> : vector<256x32xf32>
    %182 = tpu.matmul %179, %181, %cst_35 {dimension_numbers = #tpu.dot_dimension_numbers<[1], [0], [0], [1], [0, 0, 1, 1], [], []>} : vector<256x32xf32>, vector<32x32xf32>, vector<256x32xf32> -> vector<256x32xf32>
    %183 = arith.addf %177, %182 : vector<256x32xf32>
    %184 = vector.extract_strided_slice %1 {offsets = [4, 2, 0], sizes = [16, 16, 32], strides = [1, 1, 1]} : vector<22x22x32xf32> to vector<16x16x32xf32>
    %185 = vector.shape_cast %184 : vector<16x16x32xf32> to vector<256x32xf32>
    %186 = vector.extract_strided_slice %2 {offsets = [30, 0, 0], sizes = [1, 32, 32], strides = [1, 1, 1]} : vector<49x32x32xf32> to vector<1x32x32xf32>
    %187 = vector.shape_cast %186 : vector<1x32x32xf32> to vector<32x32xf32>
    %cst_36 = arith.constant dense<0.000000e+00> : vector<256x32xf32>
    %188 = tpu.matmul %185, %187, %cst_36 {dimension_numbers = #tpu.dot_dimension_numbers<[1], [0], [0], [1], [0, 0, 1, 1], [], []>} : vector<256x32xf32>, vector<32x32xf32>, vector<256x32xf32> -> vector<256x32xf32>
    %189 = arith.addf %183, %188 : vector<256x32xf32>
    %190 = vector.extract_strided_slice %1 {offsets = [4, 3, 0], sizes = [16, 16, 32], strides = [1, 1, 1]} : vector<22x22x32xf32> to vector<16x16x32xf32>
    %191 = vector.shape_cast %190 : vector<16x16x32xf32> to vector<256x32xf32>
    %192 = vector.extract_strided_slice %2 {offsets = [31, 0, 0], sizes = [1, 32, 32], strides = [1, 1, 1]} : vector<49x32x32xf32> to vector<1x32x32xf32>
    %193 = vector.shape_cast %192 : vector<1x32x32xf32> to vector<32x32xf32>
    %cst_37 = arith.constant dense<0.000000e+00> : vector<256x32xf32>
    %194 = tpu.matmul %191, %193, %cst_37 {dimension_numbers = #tpu.dot_dimension_numbers<[1], [0], [0], [1], [0, 0, 1, 1], [], []>} : vector<256x32xf32>, vector<32x32xf32>, vector<256x32xf32> -> vector<256x32xf32>
    %195 = arith.addf %189, %194 : vector<256x32xf32>
    %196 = vector.extract_strided_slice %1 {offsets = [4, 4, 0], sizes = [16, 16, 32], strides = [1, 1, 1]} : vector<22x22x32xf32> to vector<16x16x32xf32>
    %197 = vector.shape_cast %196 : vector<16x16x32xf32> to vector<256x32xf32>
    %198 = vector.extract_strided_slice %2 {offsets = [32, 0, 0], sizes = [1, 32, 32], strides = [1, 1, 1]} : vector<49x32x32xf32> to vector<1x32x32xf32>
    %199 = vector.shape_cast %198 : vector<1x32x32xf32> to vector<32x32xf32>
    %cst_38 = arith.constant dense<0.000000e+00> : vector<256x32xf32>
    %200 = tpu.matmul %197, %199, %cst_38 {dimension_numbers = #tpu.dot_dimension_numbers<[1], [0], [0], [1], [0, 0, 1, 1], [], []>} : vector<256x32xf32>, vector<32x32xf32>, vector<256x32xf32> -> vector<256x32xf32>
    %201 = arith.addf %195, %200 : vector<256x32xf32>
    %202 = vector.extract_strided_slice %1 {offsets = [4, 5, 0], sizes = [16, 16, 32], strides = [1, 1, 1]} : vector<22x22x32xf32> to vector<16x16x32xf32>
    %203 = vector.shape_cast %202 : vector<16x16x32xf32> to vector<256x32xf32>
    %204 = vector.extract_strided_slice %2 {offsets = [33, 0, 0], sizes = [1, 32, 32], strides = [1, 1, 1]} : vector<49x32x32xf32> to vector<1x32x32xf32>
    %205 = vector.shape_cast %204 : vector<1x32x32xf32> to vector<32x32xf32>
    %cst_39 = arith.constant dense<0.000000e+00> : vector<256x32xf32>
    %206 = tpu.matmul %203, %205, %cst_39 {dimension_numbers = #tpu.dot_dimension_numbers<[1], [0], [0], [1], [0, 0, 1, 1], [], []>} : vector<256x32xf32>, vector<32x32xf32>, vector<256x32xf32> -> vector<256x32xf32>
    %207 = arith.addf %201, %206 : vector<256x32xf32>
    %208 = vector.extract_strided_slice %1 {offsets = [4, 6, 0], sizes = [16, 16, 32], strides = [1, 1, 1]} : vector<22x22x32xf32> to vector<16x16x32xf32>
    %209 = vector.shape_cast %208 : vector<16x16x32xf32> to vector<256x32xf32>
    %210 = vector.extract_strided_slice %2 {offsets = [34, 0, 0], sizes = [1, 32, 32], strides = [1, 1, 1]} : vector<49x32x32xf32> to vector<1x32x32xf32>
    %211 = vector.shape_cast %210 : vector<1x32x32xf32> to vector<32x32xf32>
    %cst_40 = arith.constant dense<0.000000e+00> : vector<256x32xf32>
    %212 = tpu.matmul %209, %211, %cst_40 {dimension_numbers = #tpu.dot_dimension_numbers<[1], [0], [0], [1], [0, 0, 1, 1], [], []>} : vector<256x32xf32>, vector<32x32xf32>, vector<256x32xf32> -> vector<256x32xf32>
    %213 = arith.addf %207, %212 : vector<256x32xf32>
    %214 = vector.extract_strided_slice %1 {offsets = [5, 0, 0], sizes = [16, 16, 32], strides = [1, 1, 1]} : vector<22x22x32xf32> to vector<16x16x32xf32>
    %215 = vector.shape_cast %214 : vector<16x16x32xf32> to vector<256x32xf32>
    %216 = vector.extract_strided_slice %2 {offsets = [35, 0, 0], sizes = [1, 32, 32], strides = [1, 1, 1]} : vector<49x32x32xf32> to vector<1x32x32xf32>
    %217 = vector.shape_cast %216 : vector<1x32x32xf32> to vector<32x32xf32>
    %cst_41 = arith.constant dense<0.000000e+00> : vector<256x32xf32>
    %218 = tpu.matmul %215, %217, %cst_41 {dimension_numbers = #tpu.dot_dimension_numbers<[1], [0], [0], [1], [0, 0, 1, 1], [], []>} : vector<256x32xf32>, vector<32x32xf32>, vector<256x32xf32> -> vector<256x32xf32>
    %219 = arith.addf %213, %218 : vector<256x32xf32>
    %220 = vector.extract_strided_slice %1 {offsets = [5, 1, 0], sizes = [16, 16, 32], strides = [1, 1, 1]} : vector<22x22x32xf32> to vector<16x16x32xf32>
    %221 = vector.shape_cast %220 : vector<16x16x32xf32> to vector<256x32xf32>
    %222 = vector.extract_strided_slice %2 {offsets = [36, 0, 0], sizes = [1, 32, 32], strides = [1, 1, 1]} : vector<49x32x32xf32> to vector<1x32x32xf32>
    %223 = vector.shape_cast %222 : vector<1x32x32xf32> to vector<32x32xf32>
    %cst_42 = arith.constant dense<0.000000e+00> : vector<256x32xf32>
    %224 = tpu.matmul %221, %223, %cst_42 {dimension_numbers = #tpu.dot_dimension_numbers<[1], [0], [0], [1], [0, 0, 1, 1], [], []>} : vector<256x32xf32>, vector<32x32xf32>, vector<256x32xf32> -> vector<256x32xf32>
    %225 = arith.addf %219, %224 : vector<256x32xf32>
    %226 = vector.extract_strided_slice %1 {offsets = [5, 2, 0], sizes = [16, 16, 32], strides = [1, 1, 1]} : vector<22x22x32xf32> to vector<16x16x32xf32>
    %227 = vector.shape_cast %226 : vector<16x16x32xf32> to vector<256x32xf32>
    %228 = vector.extract_strided_slice %2 {offsets = [37, 0, 0], sizes = [1, 32, 32], strides = [1, 1, 1]} : vector<49x32x32xf32> to vector<1x32x32xf32>
    %229 = vector.shape_cast %228 : vector<1x32x32xf32> to vector<32x32xf32>
    %cst_43 = arith.constant dense<0.000000e+00> : vector<256x32xf32>
    %230 = tpu.matmul %227, %229, %cst_43 {dimension_numbers = #tpu.dot_dimension_numbers<[1], [0], [0], [1], [0, 0, 1, 1], [], []>} : vector<256x32xf32>, vector<32x32xf32>, vector<256x32xf32> -> vector<256x32xf32>
    %231 = arith.addf %225, %230 : vector<256x32xf32>
    %232 = vector.extract_strided_slice %1 {offsets = [5, 3, 0], sizes = [16, 16, 32], strides = [1, 1, 1]} : vector<22x22x32xf32> to vector<16x16x32xf32>
    %233 = vector.shape_cast %232 : vector<16x16x32xf32> to vector<256x32xf32>
    %234 = vector.extract_strided_slice %2 {offsets = [38, 0, 0], sizes = [1, 32, 32], strides = [1, 1, 1]} : vector<49x32x32xf32> to vector<1x32x32xf32>
    %235 = vector.shape_cast %234 : vector<1x32x32xf32> to vector<32x32xf32>
    %cst_44 = arith.constant dense<0.000000e+00> : vector<256x32xf32>
    %236 = tpu.matmul %233, %235, %cst_44 {dimension_numbers = #tpu.dot_dimension_numbers<[1], [0], [0], [1], [0, 0, 1, 1], [], []>} : vector<256x32xf32>, vector<32x32xf32>, vector<256x32xf32> -> vector<256x32xf32>
    %237 = arith.addf %231, %236 : vector<256x32xf32>
    %238 = vector.extract_strided_slice %1 {offsets = [5, 4, 0], sizes = [16, 16, 32], strides = [1, 1, 1]} : vector<22x22x32xf32> to vector<16x16x32xf32>
    %239 = vector.shape_cast %238 : vector<16x16x32xf32> to vector<256x32xf32>
    %240 = vector.extract_strided_slice %2 {offsets = [39, 0, 0], sizes = [1, 32, 32], strides = [1, 1, 1]} : vector<49x32x32xf32> to vector<1x32x32xf32>
    %241 = vector.shape_cast %240 : vector<1x32x32xf32> to vector<32x32xf32>
    %cst_45 = arith.constant dense<0.000000e+00> : vector<256x32xf32>
    %242 = tpu.matmul %239, %241, %cst_45 {dimension_numbers = #tpu.dot_dimension_numbers<[1], [0], [0], [1], [0, 0, 1, 1], [], []>} : vector<256x32xf32>, vector<32x32xf32>, vector<256x32xf32> -> vector<256x32xf32>
    %243 = arith.addf %237, %242 : vector<256x32xf32>
    %244 = vector.extract_strided_slice %1 {offsets = [5, 5, 0], sizes = [16, 16, 32], strides = [1, 1, 1]} : vector<22x22x32xf32> to vector<16x16x32xf32>
    %245 = vector.shape_cast %244 : vector<16x16x32xf32> to vector<256x32xf32>
    %246 = vector.extract_strided_slice %2 {offsets = [40, 0, 0], sizes = [1, 32, 32], strides = [1, 1, 1]} : vector<49x32x32xf32> to vector<1x32x32xf32>
    %247 = vector.shape_cast %246 : vector<1x32x32xf32> to vector<32x32xf32>
    %cst_46 = arith.constant dense<0.000000e+00> : vector<256x32xf32>
    %248 = tpu.matmul %245, %247, %cst_46 {dimension_numbers = #tpu.dot_dimension_numbers<[1], [0], [0], [1], [0, 0, 1, 1], [], []>} : vector<256x32xf32>, vector<32x32xf32>, vector<256x32xf32> -> vector<256x32xf32>
    %249 = arith.addf %243, %248 : vector<256x32xf32>
    %250 = vector.extract_strided_slice %1 {offsets = [5, 6, 0], sizes = [16, 16, 32], strides = [1, 1, 1]} : vector<22x22x32xf32> to vector<16x16x32xf32>
    %251 = vector.shape_cast %250 : vector<16x16x32xf32> to vector<256x32xf32>
    %252 = vector.extract_strided_slice %2 {offsets = [41, 0, 0], sizes = [1, 32, 32], strides = [1, 1, 1]} : vector<49x32x32xf32> to vector<1x32x32xf32>
    %253 = vector.shape_cast %252 : vector<1x32x32xf32> to vector<32x32xf32>
    %cst_47 = arith.constant dense<0.000000e+00> : vector<256x32xf32>
    %254 = tpu.matmul %251, %253, %cst_47 {dimension_numbers = #tpu.dot_dimension_numbers<[1], [0], [0], [1], [0, 0, 1, 1], [], []>} : vector<256x32xf32>, vector<32x32xf32>, vector<256x32xf32> -> vector<256x32xf32>
    %255 = arith.addf %249, %254 : vector<256x32xf32>
    %256 = vector.extract_strided_slice %1 {offsets = [6, 0, 0], sizes = [16, 16, 32], strides = [1, 1, 1]} : vector<22x22x32xf32> to vector<16x16x32xf32>
    %257 = vector.shape_cast %256 : vector<16x16x32xf32> to vector<256x32xf32>
    %258 = vector.extract_strided_slice %2 {offsets = [42, 0, 0], sizes = [1, 32, 32], strides = [1, 1, 1]} : vector<49x32x32xf32> to vector<1x32x32xf32>
    %259 = vector.shape_cast %258 : vector<1x32x32xf32> to vector<32x32xf32>
    %cst_48 = arith.constant dense<0.000000e+00> : vector<256x32xf32>
    %260 = tpu.matmul %257, %259, %cst_48 {dimension_numbers = #tpu.dot_dimension_numbers<[1], [0], [0], [1], [0, 0, 1, 1], [], []>} : vector<256x32xf32>, vector<32x32xf32>, vector<256x32xf32> -> vector<256x32xf32>
    %261 = arith.addf %255, %260 : vector<256x32xf32>
    %262 = vector.extract_strided_slice %1 {offsets = [6, 1, 0], sizes = [16, 16, 32], strides = [1, 1, 1]} : vector<22x22x32xf32> to vector<16x16x32xf32>
    %263 = vector.shape_cast %262 : vector<16x16x32xf32> to vector<256x32xf32>
    %264 = vector.extract_strided_slice %2 {offsets = [43, 0, 0], sizes = [1, 32, 32], strides = [1, 1, 1]} : vector<49x32x32xf32> to vector<1x32x32xf32>
    %265 = vector.shape_cast %264 : vector<1x32x32xf32> to vector<32x32xf32>
    %cst_49 = arith.constant dense<0.000000e+00> : vector<256x32xf32>
    %266 = tpu.matmul %263, %265, %cst_49 {dimension_numbers = #tpu.dot_dimension_numbers<[1], [0], [0], [1], [0, 0, 1, 1], [], []>} : vector<256x32xf32>, vector<32x32xf32>, vector<256x32xf32> -> vector<256x32xf32>
    %267 = arith.addf %261, %266 : vector<256x32xf32>
    %268 = vector.extract_strided_slice %1 {offsets = [6, 2, 0], sizes = [16, 16, 32], strides = [1, 1, 1]} : vector<22x22x32xf32> to vector<16x16x32xf32>
    %269 = vector.shape_cast %268 : vector<16x16x32xf32> to vector<256x32xf32>
    %270 = vector.extract_strided_slice %2 {offsets = [44, 0, 0], sizes = [1, 32, 32], strides = [1, 1, 1]} : vector<49x32x32xf32> to vector<1x32x32xf32>
    %271 = vector.shape_cast %270 : vector<1x32x32xf32> to vector<32x32xf32>
    %cst_50 = arith.constant dense<0.000000e+00> : vector<256x32xf32>
    %272 = tpu.matmul %269, %271, %cst_50 {dimension_numbers = #tpu.dot_dimension_numbers<[1], [0], [0], [1], [0, 0, 1, 1], [], []>} : vector<256x32xf32>, vector<32x32xf32>, vector<256x32xf32> -> vector<256x32xf32>
    %273 = arith.addf %267, %272 : vector<256x32xf32>
    %274 = vector.extract_strided_slice %1 {offsets = [6, 3, 0], sizes = [16, 16, 32], strides = [1, 1, 1]} : vector<22x22x32xf32> to vector<16x16x32xf32>
    %275 = vector.shape_cast %274 : vector<16x16x32xf32> to vector<256x32xf32>
    %276 = vector.extract_strided_slice %2 {offsets = [45, 0, 0], sizes = [1, 32, 32], strides = [1, 1, 1]} : vector<49x32x32xf32> to vector<1x32x32xf32>
    %277 = vector.shape_cast %276 : vector<1x32x32xf32> to vector<32x32xf32>
    %cst_51 = arith.constant dense<0.000000e+00> : vector<256x32xf32>
    %278 = tpu.matmul %275, %277, %cst_51 {dimension_numbers = #tpu.dot_dimension_numbers<[1], [0], [0], [1], [0, 0, 1, 1], [], []>} : vector<256x32xf32>, vector<32x32xf32>, vector<256x32xf32> -> vector<256x32xf32>
    %279 = arith.addf %273, %278 : vector<256x32xf32>
    %280 = vector.extract_strided_slice %1 {offsets = [6, 4, 0], sizes = [16, 16, 32], strides = [1, 1, 1]} : vector<22x22x32xf32> to vector<16x16x32xf32>
    %281 = vector.shape_cast %280 : vector<16x16x32xf32> to vector<256x32xf32>
    %282 = vector.extract_strided_slice %2 {offsets = [46, 0, 0], sizes = [1, 32, 32], strides = [1, 1, 1]} : vector<49x32x32xf32> to vector<1x32x32xf32>
    %283 = vector.shape_cast %282 : vector<1x32x32xf32> to vector<32x32xf32>
    %cst_52 = arith.constant dense<0.000000e+00> : vector<256x32xf32>
    %284 = tpu.matmul %281, %283, %cst_52 {dimension_numbers = #tpu.dot_dimension_numbers<[1], [0], [0], [1], [0, 0, 1, 1], [], []>} : vector<256x32xf32>, vector<32x32xf32>, vector<256x32xf32> -> vector<256x32xf32>
    %285 = arith.addf %279, %284 : vector<256x32xf32>
    %286 = vector.extract_strided_slice %1 {offsets = [6, 5, 0], sizes = [16, 16, 32], strides = [1, 1, 1]} : vector<22x22x32xf32> to vector<16x16x32xf32>
    %287 = vector.shape_cast %286 : vector<16x16x32xf32> to vector<256x32xf32>
    %288 = vector.extract_strided_slice %2 {offsets = [47, 0, 0], sizes = [1, 32, 32], strides = [1, 1, 1]} : vector<49x32x32xf32> to vector<1x32x32xf32>
    %289 = vector.shape_cast %288 : vector<1x32x32xf32> to vector<32x32xf32>
    %cst_53 = arith.constant dense<0.000000e+00> : vector<256x32xf32>
    %290 = tpu.matmul %287, %289, %cst_53 {dimension_numbers = #tpu.dot_dimension_numbers<[1], [0], [0], [1], [0, 0, 1, 1], [], []>} : vector<256x32xf32>, vector<32x32xf32>, vector<256x32xf32> -> vector<256x32xf32>
    %291 = arith.addf %285, %290 : vector<256x32xf32>
    %292 = vector.extract_strided_slice %1 {offsets = [6, 6, 0], sizes = [16, 16, 32], strides = [1, 1, 1]} : vector<22x22x32xf32> to vector<16x16x32xf32>
    %293 = vector.shape_cast %292 : vector<16x16x32xf32> to vector<256x32xf32>
    %294 = vector.extract_strided_slice %2 {offsets = [48, 0, 0], sizes = [1, 32, 32], strides = [1, 1, 1]} : vector<49x32x32xf32> to vector<1x32x32xf32>
    %295 = vector.shape_cast %294 : vector<1x32x32xf32> to vector<32x32xf32>
    %cst_54 = arith.constant dense<0.000000e+00> : vector<256x32xf32>
    %296 = tpu.matmul %293, %295, %cst_54 {dimension_numbers = #tpu.dot_dimension_numbers<[1], [0], [0], [1], [0, 0, 1, 1], [], []>} : vector<256x32xf32>, vector<32x32xf32>, vector<256x32xf32> -> vector<256x32xf32>
    %297 = arith.addf %291, %296 : vector<256x32xf32>
    %c0_55 = arith.constant 0 : index
    %c0_56 = arith.constant 0 : index
    %298 = vector.load %arg3[%c0_55, %c0_56] : memref<1x32xf32, #tpu.memory_space<vmem>>, vector<1x32xf32>
    %299 = vector.broadcast %298 : vector<1x32xf32> to vector<256x32xf32>
    %300 = arith.addf %297, %299 : vector<256x32xf32>
    %cst_57 = arith.constant dense<0.000000e+00> : vector<256xf32>
    %301 = vector.multi_reduction <add>, %300, %cst_57 [1] : vector<256x32xf32> to vector<256xf32>
    %302 = vector.shape_cast %301 : vector<256xf32> to vector<256x1xf32>
    %cst_58 = arith.constant 3.200000e+01 : f32
    %303 = vector.broadcast %cst_58 : f32 to vector<256x1xf32>
    %304 = arith.divf %302, %303 : vector<256x1xf32>
    %305 = vector.broadcast %304 : vector<256x1xf32> to vector<256x32xf32>
    %306 = arith.subf %300, %305 : vector<256x32xf32>
    %307 = arith.mulf %306, %306 : vector<256x32xf32>
    %cst_59 = arith.constant dense<0.000000e+00> : vector<256xf32>
    %308 = vector.multi_reduction <add>, %307, %cst_59 [1] : vector<256x32xf32> to vector<256xf32>
    %309 = vector.shape_cast %308 : vector<256xf32> to vector<256x1xf32>
    %cst_60 = arith.constant 3.200000e+01 : f32
    %310 = vector.broadcast %cst_60 : f32 to vector<256x1xf32>
    %311 = arith.divf %309, %310 : vector<256x1xf32>
    %312 = vector.broadcast %304 : vector<256x1xf32> to vector<256x32xf32>
    %313 = arith.subf %300, %312 : vector<256x32xf32>
    %cst_61 = arith.constant 9.99999997E-7 : f32
    %314 = vector.broadcast %cst_61 : f32 to vector<256x1xf32>
    %315 = arith.addf %311, %314 : vector<256x1xf32>
    %316 = math.rsqrt %315 : vector<256x1xf32>
    %317 = vector.broadcast %316 : vector<256x1xf32> to vector<256x32xf32>
    %318 = arith.mulf %313, %317 : vector<256x32xf32>
    %c0_62 = arith.constant 0 : index
    %c0_63 = arith.constant 0 : index
    %319 = vector.load %arg4[%c0_62, %c0_63] : memref<1x32xf32, #tpu.memory_space<vmem>>, vector<1x32xf32>
    %320 = vector.broadcast %319 : vector<1x32xf32> to vector<256x32xf32>
    %321 = arith.mulf %318, %320 : vector<256x32xf32>
    %c0_64 = arith.constant 0 : index
    %c0_65 = arith.constant 0 : index
    %322 = vector.load %arg5[%c0_64, %c0_65] : memref<1x32xf32, #tpu.memory_space<vmem>>, vector<1x32xf32>
    %323 = vector.broadcast %322 : vector<1x32xf32> to vector<256x32xf32>
    %324 = arith.addf %321, %323 : vector<256x32xf32>
    %c0_66 = arith.constant 0 : index
    %c0_67 = arith.constant 0 : index
    %325 = vector.load %arg6[%c0_66, %c0_67] : memref<32x128xf32, #tpu.memory_space<vmem>>, vector<32x128xf32>
    %cst_68 = arith.constant dense<0.000000e+00> : vector<256x128xf32>
    %326 = tpu.matmul %324, %325, %cst_68 {dimension_numbers = #tpu.dot_dimension_numbers<[1], [0], [0], [1], [0, 0, 1, 1], [], []>} : vector<256x32xf32>, vector<32x128xf32>, vector<256x128xf32> -> vector<256x128xf32>
    %c0_69 = arith.constant 0 : index
    %c0_70 = arith.constant 0 : index
    %327 = vector.load %arg7[%c0_69, %c0_70] : memref<1x128xf32, #tpu.memory_space<vmem>>, vector<1x128xf32>
    %328 = vector.broadcast %327 : vector<1x128xf32> to vector<256x128xf32>
    %329 = arith.addf %326, %328 : vector<256x128xf32>
    %cst_71 = arith.constant 5.000000e-01 : f32
    %330 = vector.broadcast %cst_71 : f32 to vector<256x128xf32>
    %331 = arith.mulf %329, %330 : vector<256x128xf32>
    %cst_72 = arith.constant 0.707106769 : f32
    %332 = vector.broadcast %cst_72 : f32 to vector<256x128xf32>
    %333 = arith.mulf %329, %332 : vector<256x128xf32>
    %cst_73 = arith.constant 0.000000e+00 : f32
    %334 = vector.broadcast %cst_73 : f32 to vector<256x128xf32>
    %335 = arith.cmpf oge, %333, %334 : vector<256x128xf32>
    %cst_74 = arith.constant 1.000000e+00 : f32
    %cst_75 = arith.constant -1.000000e+00 : f32
    %336 = vector.broadcast %cst_74 : f32 to vector<256x128xf32>
    %337 = vector.broadcast %cst_75 : f32 to vector<256x128xf32>
    %338 = arith.select %335, %336, %337 : vector<256x128xi1>, vector<256x128xf32>
    %339 = math.absf %333 : vector<256x128xf32>
    %cst_76 = arith.constant 0.327591091 : f32
    %340 = vector.broadcast %cst_76 : f32 to vector<256x128xf32>
    %341 = arith.mulf %340, %339 : vector<256x128xf32>
    %cst_77 = arith.constant 1.000000e+00 : f32
    %342 = vector.broadcast %cst_77 : f32 to vector<256x128xf32>
    %343 = arith.addf %342, %341 : vector<256x128xf32>
    %cst_78 = arith.constant 1.000000e+00 : f32
    %344 = vector.broadcast %cst_78 : f32 to vector<256x128xf32>
    %345 = arith.divf %344, %343 : vector<256x128xf32>
    %cst_79 = arith.constant 1.06140542 : f32
    %346 = vector.broadcast %cst_79 : f32 to vector<256x128xf32>
    %347 = arith.mulf %346, %345 : vector<256x128xf32>
    %cst_80 = arith.constant -1.45315206 : f32
    %348 = vector.broadcast %cst_80 : f32 to vector<256x128xf32>
    %349 = arith.addf %347, %348 : vector<256x128xf32>
    %350 = arith.mulf %349, %345 : vector<256x128xf32>
    %cst_81 = arith.constant 1.42141378 : f32
    %351 = vector.broadcast %cst_81 : f32 to vector<256x128xf32>
    %352 = arith.addf %350, %351 : vector<256x128xf32>
    %353 = arith.mulf %352, %345 : vector<256x128xf32>
    %cst_82 = arith.constant -0.284496725 : f32
    %354 = vector.broadcast %cst_82 : f32 to vector<256x128xf32>
    %355 = arith.addf %353, %354 : vector<256x128xf32>
    %356 = arith.mulf %355, %345 : vector<256x128xf32>
    %cst_83 = arith.constant 0.254829586 : f32
    %357 = vector.broadcast %cst_83 : f32 to vector<256x128xf32>
    %358 = arith.addf %356, %357 : vector<256x128xf32>
    %359 = arith.mulf %358, %345 : vector<256x128xf32>
    %cst_84 = arith.constant 0.000000e+00 : f32
    %360 = vector.broadcast %cst_84 : f32 to vector<256x128xf32>
    %361 = arith.subf %360, %339 : vector<256x128xf32>
    %362 = arith.mulf %361, %339 : vector<256x128xf32>
    %363 = math.exp %362 : vector<256x128xf32>
    %364 = arith.mulf %359, %363 : vector<256x128xf32>
    %cst_85 = arith.constant 1.000000e+00 : f32
    %365 = vector.broadcast %cst_85 : f32 to vector<256x128xf32>
    %366 = arith.subf %365, %364 : vector<256x128xf32>
    %367 = arith.mulf %338, %366 : vector<256x128xf32>
    %cst_86 = arith.constant 1.000000e+00 : f32
    %368 = vector.broadcast %cst_86 : f32 to vector<256x128xf32>
    %369 = arith.addf %368, %367 : vector<256x128xf32>
    %370 = arith.mulf %331, %369 : vector<256x128xf32>
    %c0_87 = arith.constant 0 : index
    %c0_88 = arith.constant 0 : index
    %371 = vector.load %arg8[%c0_87, %c0_88] : memref<128x32xf32, #tpu.memory_space<vmem>>, vector<128x32xf32>
    %cst_89 = arith.constant dense<0.000000e+00> : vector<256x32xf32>
    %372 = tpu.matmul %370, %371, %cst_89 {dimension_numbers = #tpu.dot_dimension_numbers<[1], [0], [0], [1], [0, 0, 1, 1], [], []>} : vector<256x128xf32>, vector<128x32xf32>, vector<256x32xf32> -> vector<256x32xf32>
    %c0_90 = arith.constant 0 : index
    %c0_91 = arith.constant 0 : index
    %373 = vector.load %arg9[%c0_90, %c0_91] : memref<1x32xf32, #tpu.memory_space<vmem>>, vector<1x32xf32>
    %374 = vector.broadcast %373 : vector<1x32xf32> to vector<256x32xf32>
    %375 = arith.addf %372, %374 : vector<256x32xf32>
    %c0_92 = arith.constant 0 : index
    %c0_93 = arith.constant 0 : index
    %376 = vector.load %arg10[%c0_92, %c0_93] : memref<1x32xf32, #tpu.memory_space<vmem>>, vector<1x32xf32>
    %377 = vector.broadcast %376 : vector<1x32xf32> to vector<256x32xf32>
    %378 = arith.mulf %375, %377 : vector<256x32xf32>
    %379 = vector.extract_strided_slice %1 {offsets = [3, 3, 0], sizes = [16, 16, 32], strides = [1, 1, 1]} : vector<22x22x32xf32> to vector<16x16x32xf32>
    %380 = vector.shape_cast %379 : vector<16x16x32xf32> to vector<256x32xf32>
    %381 = arith.addf %380, %378 : vector<256x32xf32>
    %382 = vector.shape_cast %381 : vector<256x32xf32> to vector<16x16x32xf32>
    %c0_94 = arith.constant 0 : index
    %c0_95 = arith.constant 0 : index
    %c0_96 = arith.constant 0 : index
    %c0_97 = arith.constant 0 : index
    %383 = vector.load %arg11[%c0_94, %c0_95, %c0_96, %c0_97] : memref<1x16x16x32xf32, #tpu.memory_space<vmem>>, vector<1x16x16x32xf32>
    %384 = vector.shape_cast %383 : vector<1x16x16x32xf32> to vector<16x16x32xf32>
    %385 = vector.shape_cast %382 : vector<16x16x32xf32> to vector<1x16x16x32xf32>
    tpu.vector_store %arg11[%c0_94, %c0_95, %c0_96, %c0_97], %385 {strides = array<i32>} : memref<1x16x16x32xf32, #tpu.memory_space<vmem>>, vector<1x16x16x32xf32>,
    return
  }
  func.func @transform_0(%arg0: i32) -> (i32, i32, i32, i32) {
    %c0_i32 = arith.constant 0 : i32
    %c0_i32_0 = arith.constant 0 : i32
    %c0_i32_1 = arith.constant 0 : i32
    %c0_i32_2 = arith.constant 0 : i32
    return %arg0, %c0_i32, %c0_i32_0, %c0_i32_1 : i32, i32, i32, i32
  }
  func.func @transform_1(%arg0: i32) -> (i32, i32, i32) {
    %c0_i32 = arith.constant 0 : i32
    %c0_i32_0 = arith.constant 0 : i32
    %c0_i32_1 = arith.constant 0 : i32
    %c0_i32_2 = arith.constant 0 : i32
    return %c0_i32, %c0_i32_0, %c0_i32_1 : i32, i32, i32
  }
  func.func @transform_2(%arg0: i32) -> (i32, i32) {
    %c0_i32 = arith.constant 0 : i32
    %c0_i32_0 = arith.constant 0 : i32
    %c0_i32_1 = arith.constant 0 : i32
    return %c0_i32, %c0_i32_0 : i32, i32
  }
  func.func @transform_3(%arg0: i32) -> (i32, i32) {
    %c0_i32 = arith.constant 0 : i32
    %c0_i32_0 = arith.constant 0 : i32
    %c0_i32_1 = arith.constant 0 : i32
    return %c0_i32, %c0_i32_0 : i32, i32
  }
  func.func @transform_4(%arg0: i32) -> (i32, i32) {
    %c0_i32 = arith.constant 0 : i32
    %c0_i32_0 = arith.constant 0 : i32
    %c0_i32_1 = arith.constant 0 : i32
    return %c0_i32, %c0_i32_0 : i32, i32
  }
  func.func @transform_5(%arg0: i32) -> (i32, i32) {
    %c0_i32 = arith.constant 0 : i32
    %c0_i32_0 = arith.constant 0 : i32
    %c0_i32_1 = arith.constant 0 : i32
    return %c0_i32, %c0_i32_0 : i32, i32
  }
  func.func @transform_6(%arg0: i32) -> (i32, i32) {
    %c0_i32 = arith.constant 0 : i32
    %c0_i32_0 = arith.constant 0 : i32
    %c0_i32_1 = arith.constant 0 : i32
    return %c0_i32, %c0_i32_0 : i32, i32
  }
  func.func @transform_7(%arg0: i32) -> (i32, i32) {
    %c0_i32 = arith.constant 0 : i32
    %c0_i32_0 = arith.constant 0 : i32
    %c0_i32_1 = arith.constant 0 : i32
    return %c0_i32, %c0_i32_0 : i32, i32
  }
  func.func @transform_8(%arg0: i32) -> (i32, i32) {
    %c0_i32 = arith.constant 0 : i32
    %c0_i32_0 = arith.constant 0 : i32
    %c0_i32_1 = arith.constant 0 : i32
    return %c0_i32, %c0_i32_0 : i32, i32
  }
  func.func @transform_9(%arg0: i32) -> (i32, i32) {
    %c0_i32 = arith.constant 0 : i32
    %c0_i32_0 = arith.constant 0 : i32
    %c0_i32_1 = arith.constant 0 : i32
    return %c0_i32, %c0_i32_0 : i32, i32
  }
  func.func @transform_10(%arg0: i32) -> (i32, i32, i32, i32) {
    %c0_i32 = arith.constant 0 : i32
    %c0_i32_0 = arith.constant 0 : i32
    %c0_i32_1 = arith.constant 0 : i32
    %c0_i32_2 = arith.constant 0 : i32
    return %arg0, %c0_i32, %c0_i32_0, %c0_i32_1 : i32, i32, i32, i32
  }
}

</mosaic_0001>

<bundles_post_ra>
// kernel: convnext_block_forward.1
= control target key start
LH: loop header
LB: loop body
LE: loop exit
PB: predicated region body
PF: predicated region fallthrough
CT: control target
= control target key end

     0   :  { %15 = vsyncpa [#allocation3], 0  ;;  %s32668_s0 = inlined_call_operand.vmem [shape: f32[2,22,22,32], index: 0, kind: input, shape index: {}]   ;;  %s32669_s1 = inlined_call_operand.vmem [shape: f32[49,32,32], index: 1, kind: input, shape index: {}]   ;;  %s32670_s2 = inlined_call_operand.vmem [shape: f32[1,32], index: 2, kind: input, shape index: {}]   ;;  %s32671_s3 = inlined_call_operand.vmem [shape: f32[1,32], index: 3, kind: input, shape index: {}]   ;;  %s32672_s4 = inlined_call_operand.vmem [shape: f32[1,32], index: 4, kind: input, shape index: {}]   ;;  %s32673_s5 = inlined_call_operand.vmem [shape: f32[32,128], index: 5, kind: input, shape index: {}]   ;;  %s32674_s6 = inlined_call_operand.vmem [shape: f32[1,128], index: 6, kind: input, shape index: {}]   ;;  %s32675_s7 = inlined_call_operand.vmem [shape: f32[128,32], index: 7, kind: input, shape index: {}]   ;;  %s32676_s8 = inlined_call_operand.vmem [shape: f32[1,32], index: 8, kind: input, shape index: {}]   ;;  %s32677_s9 = inlined_call_operand.vmem [shape: f32[1,32], index: 9, kind: input, shape index: {}]   ;;  %s32678_s10 = inlined_call_operand.hbm [shape: f32[2,16,16,32], index: 10, kind: output, shape index: {}]  }
   0x1   :  { %17 = vsyncpa [#allocation3 + $0x1], 0  ;;  %s25513_s13 = smov 0   ;;  %s25515_s14 = smov 0  }
   0x2   :  { %s25517_s15 = smov 0   ;;  %s25519_s16 = smov 0  }
   0x3 LB: > { %s25534_s17 = sadd.s32 4294967295, %s25452_s16   ;;  %s16687_s18 = sadd.s32 4294967294, %s25452_s16   ;;  %s25452_s16 = sphi %s25519_s16, %s34711_s16   ;;  %s25448_s15 = sphi %s25517_s15, %s34710_s15   ;;  %s25444_s14 = sphi %s25515_s14, %s34709_s14   ;;  %s25440_s13 = sphi %s25513_s13, %s34708_s13  }
   0x4   : > { %s25538_s19 = sadd.s32 1, %s25452_s16   ;;  %s245_s20 = sadd.s32 1, %s25448_s15 }
   0x5   : > { %s242_s21 = ssub.s32 %s25452_s16, %s25538_s19  ;;  %p255_p0 = scmp.ne.s32.totalorder %s25448_s15, %s25444_s14 }
   0x6   : > { %p243_p1 = scmp.eq.s32.totalorder %s242_s21, 0  ;;  %p256_p2 = scmp.eq.s32.totalorder %s25534_s17, 1 }
   0x7   : > { %p261_p3 = scmp.ne.s32.totalorder %s25444_s14, %s25440_s13  ;;  %p262_p4 = scmp.eq.s32.totalorder %s16687_s18, 1 }
   0x8   : > { %s25549_s22 = scalar_select %p243_p1, %s25448_s15, %s245_s20  }
   0x9   : > { %p25551_p5 = por %p256_p2, %p255_p0  ;;  %p25555_p6 = por %p262_p4, %p261_p3 }
   0xa   : > { %33408 = sst [smem:[#allocation5_spill]] %s25549_s22  ;;  %p16690_p7 = scmp.ge.s32.totalorder %s25452_s16, 1 }
   0xb   : > { %p315_p8 = scmp.lt.s32.totalorder %s25452_s16, 3 }
   0xd   : > { %p316_p9 = pnand %p16690_p7, %p315_p8 }
   0xf   : > { %319 = sbr.rel (%p316_p9) target bundleno = 2815 (0xaff), region = 60 }
  0x16   : > { %v516_v0 = vld [vmem:[%s32669_s1 + $0x2e0] sm:$0xff]  ;;  %v517_v1 = vld [vmem:[%s32669_s1 + $0x2e8] sm:$0xff]  ;;  %p353_p10 = scmp.lt.s32.totalorder %s25534_s17, 1  ;;  %v518_v5 = vld [vmem:[%s32669_s1 + $0x2f0] sm:$0xff]  ;;  %vm668_vm0 = vcmask 1046528   ;;  %vm749_vm1 = vcmask 261120  }
  0x17   : > { %v428_v2 = vld [vmem:[%s32669_s1 + $0x20] sm:$0xff]  ;;  %v25571_v3 = vpack.c.bf16 %v517_v1, %v516_v0  ;;  %v429_v4 = vld [vmem:[%s32669_s1 + $0x28] sm:$0xff]  ;;  %v519_v6 = vld [vmem:[%s32669_s1 + $0x2f8] sm:$0xff]  ;;  %vm1328_vm2 = vcmask 1045504   ;;  %vm1730_vm3 = vcmask 1044480   ;;  %vm2132_vm4 = vcmask 1043456  }
  0x18   : > { %v23033_v7 = vpack.c.bf16 %v429_v4, %v428_v2  ;;  %v25582_v8 = vpack.c.bf16 %v519_v6, %v518_v5  ;;  %v430_v9 = vld [vmem:[%s32669_s1 + $0x30] sm:$0xff]  ;;  %v431_v10 = vld [vmem:[%s32669_s1 + $0x38] sm:$0xff]  ;;  %s354_s30 = scalar_select %p353_p10, %s25534_s17, 1  ;;  %v520_v11 = vld [vmem:[%s32669_s1 + $0x300] sm:$0xff]  ;;  %vm2534_vm5 = vcmask 1042432   ;;  %vm2936_vm6 = vcmask 1041408  }
  0x19   : > { %33411 = vst [vmem:[#allocation6_spill] sm:$0xff] %v25571_v3  ;;  %23218 = vmatprep.subr.bf16.mxu0 %v25571_v3  ;;  %v23037_v12 = vpack.c.bf16 %v431_v10, %v430_v9  ;;  %v521_v13 = vld [vmem:[%s32669_s1 + $0x308] sm:$0xff]  ;;  %v522_v14 = vld [vmem:[%s32669_s1 + $0x310] sm:$0xff]  ;;  %v424_v15 = vld [vmem:[%s32669_s1] sm:$0xff]  ;;  %s350_s25 = sand.u32 1, %s25444_s14   ;;  %s18304_s18 = sshll.u32 %s25534_s17, 12 }
  0x1a   : > { %33412 = vst [vmem:[#allocation7_spill] sm:$0xff] %v25582_v8  ;;  %23034 = vmatprep.subr.bf16.mxu1 %v23033_v7  ;;  %23220 = vmatpush3.bf16.msra.mxu0 %v25571_v3  ;;  %s25005_s21 = smul.u32 528, %s354_s30  ;;  %v25606_v16 = vpack.c.bf16 %v521_v13, %v520_v11  ;;  %v523_v17 = vld [vmem:[%s32669_s1 + $0x318] sm:$0xff]  ;;  %v524_v18 = vld [vmem:[%s32669_s1 + $0x320] sm:$0xff]  ;;  %v425_v19 = vld [vmem:[%s32669_s1 + $0x8] sm:$0xff]  ;;  %s16691_s12 = sshll.u32 %s350_s25, 8 }
  0x1b   : > { %23036 = vmatpush3.bf16.msra.mxu1 %v23033_v7  ;;  %23222 = vmatprep.subr.bf16.mxu0 %v25582_v8  ;;  %v525_v20 = vld [vmem:[%s32669_s1 + $0x328] sm:$0xff]  ;;  %v25625_v21 = vpack.c.bf16 %v425_v19, %v424_v15  ;;  %v426_v22 = vld [vmem:[%s32669_s1 + $0x10] sm:$0xff]  ;;  %v427_v23 = vld [vmem:[%s32669_s1 + $0x18] sm:$0xff]  ;;  %v25652_v32 = vpack.c.bf16 %v523_v17, %v522_v14  ;;  %s32616_s20 = scalar_lea.hbm %s32678_s10, %s18304_s18  ;;  %s32627_s17 = scalar_lea.sflag [#allocation3], %s350_s25 }
  0x1c   : > { %23038 = vmatprep.subr.bf16.mxu1 %v23037_v12  ;;  %s25620_s27 = scalar_lea.vmem %s32668_s0, %s25005_s21  ;;  %v25666_v38 = vpack.c.bf16 %v525_v20, %v524_v18  ;;  %v25668_v39 = vpack.c.bf16 %v427_v23, %v426_v22  ;;  %s25455_s28 = smov [#allocation2]  }
  0x1d   : > { %v25634_v24 = vld [vmem:[%s25620_s27] sm:$0xff]  ;;  %v25637_v25 = vld [vmem:[%s25620_s27 + $0x8] sm:$0xff]  ;;  %v25646_v29 = vld [vmem:[%s25620_s27 + $0x50] sm:$0xff]  ;;  %s25394_s29 = sshll.u32 %s25455_s28, 4  ;;  %s25395_s29 = int_to_ptr.vmem [resolvable:$false] %s25394_s29 }
  0x1e   : > { %v25640_v26 = vld [vmem:[%s25620_s27 + $0x48] sm:$0xff]  ;;  %23224 = vmatpush3.bf16.msra.mxu0 %v25582_v8  ;;  %v669_v27 = vrot.slane %v25634_v24, 1  ;;  %v670_v28 = vrot.slane %v25637_v25, 1  ;;  %v25650_v31 = vld [vmem:[%s25620_s27 + $0x10] sm:$0x3f]  ;;  %v1345_v33 = vrot.slane %v25646_v29, 2 }
  0x1f   : > { %v1344_v30 = vrot.slane %v25640_v26, 2  ;;  %33413 = vst [vmem:[#allocation8_spill] sm:$0xff] %v25650_v31  ;;  %23040 = vmatpush3.bf16.msra.mxu1 %v23037_v12  ;;  %23226 = vmatprep.subr.bf16.mxu0 %v25606_v16  ;;  %v672_v34 = vrot.slane %v25650_v31, 1  ;;  %v25658_v35 = vld [vmem:[%s25620_s27 + $0x58] sm:$0x3f]  ;;  %v25664_v37 = vld [vmem:[%s25620_s27 + $0x20] sm:$0xff] }
  0x20   : > { %v25661_v36 = vld [vmem:[%s25620_s27 + $0x18] sm:$0xff]  ;;  %v671_v40 = vsel %vm668_vm0, %v669_v27, %v670_v28  ;;  %v1347_v41 = vrot.slane %v25658_v35, 2  ;;  %v675_v43 = vrot.slane %v25664_v37, 1  ;;  %v25675_v44 = vld [vmem:[%s25620_s27 + $0x60] sm:$0xff]  ;;  %v25678_v45 = vld [vmem:[%s25620_s27 + $0x68] sm:$0xff]  ;;  %23042 = vmatprep.subr.bf16.mxu1 %v25625_v21  ;;  %v684_v12 = vrot.slane %v25640_v26, 1 }
  0x21   : > { %v674_v42 = vrot.slane %v25661_v36, 1  ;;  %v25681_v46 = vld [vmem:[%s25620_s27 + $0x30] sm:$0xff]  ;;  %20161 = vmatprep.mubr.msk.f32.mxu1 %vm749_vm1, %v671_v40  ;;  %v25686_v47 = vsel %vm1328_vm2, %v1344_v30, %v1345_v33  ;;  %v673_v48 = vsel %vm668_vm0, %v670_v28, %v672_v34  ;;  %v1349_v49 = vrot.slane %v25675_v44, 2  ;;  %v25692_v51 = vld [vmem:[%s25620_s27 + $0x28] sm:$0x3f]  ;;  %v25709_v57 = vld [vmem:[%s25620_s27 + $0x38] sm:$0xff] }
  0x22   : > { %33414 = vst [vmem:[#allocation9_spill] sm:$0xff] %v25686_v47  ;;  %v1350_v50 = vrot.slane %v25678_v45, 2  ;;  %33415 = vst [vmem:[#allocation10_spill] sm:$0xff] %v25692_v51  ;;  %v25695_v52 = vld [vmem:[%s25620_s27 + $0x70] sm:$0x3f]  ;;  %21449 = vmatprep.mubr.msk.f32.mxu0 %vm749_vm1, %v25686_v47  ;;  %20162 = vmatmul.mubr.msk.f32.vlgmr.msra.gmra.mrb[0].mxu1 %vm749_vm1, %v673_v48  ;;  %v25701_v53 = vsel %vm1328_vm2, %v1345_v33, %v1347_v41  ;;  %v677_v55 = vrot.slane %v25692_v51, 1 }
  0x23   : > { %33416 = vst [vmem:[#allocation11_spill] sm:$0xff] %v25701_v53  ;;  %v25704_v54 = vsel %vm668_vm0, %v674_v42, %v675_v43  ;;  %v1352_v56 = vrot.slane %v25695_v52, 2  ;;  %v25712_v58 = vld [vmem:[%s25620_s27 + $0x78] sm:$0xff]  ;;  %v25715_v59 = vld [vmem:[%s25620_s27 + $0x80] sm:$0xff]  ;;  %21450 = vmatmul.mubr.msk.f32.vlgmr.msra.gmra.mrb[0].mxu0 %vm749_vm1, %v25701_v53  ;;  %v679_v61 = vrot.slane %v25681_v46, 1  ;;  %v680_v62 = vrot.slane %v25709_v57, 1  ;;  %23044 = vmatpush3.bf16.msra.mxu1 %v25625_v21 }
  0x24   : > { %33417 = vst [vmem:[#allocation12_spill] sm:$0xff] %v25704_v54  ;;  %20164 = vmatprep.mubr.msk.f32.mxu1 %vm749_vm1, %v25704_v54  ;;  %v25722_v60 = vsel %vm1328_vm2, %v1349_v49, %v1350_v50  ;;  %v1354_v63 = vrot.slane %v25712_v58, 2  ;;  %v25728_v0 = vld [vmem:[%s25620_s27 + $0x40] sm:$0x3f]  ;;  %v25731_v1 = vld [vmem:[%s25620_s27 + $0x90] sm:$0xff]  ;;  %23228 = vmatpush3.bf16.msra.mxu0 %v25606_v16  ;;  %v25737_v2 = vsel %vm668_vm0, %v675_v43, %v677_v55  ;;  %v1355_v5 = vrot.slane %v25715_v59, 2 }
  0x25   : > { %33418 = vst [vmem:[#allocation13_spill] sm:$0xff] %v25722_v60  ;;  %33419 = vst [vmem:[#allocation14_spill] sm:$0xff] %v25728_v0  ;;  %21452 = vmatprep.mubr.msk.f32.mxu0 %vm749_vm1, %v25722_v60  ;;  %v25740_v4 = vsel %vm1328_vm2, %v1350_v50, %v1352_v56  ;;  %v682_v6 = vrot.slane %v25728_v0, 1  ;;  %v25745_v7 = vld [vmem:[%s25620_s27 + $0x88] sm:$0x3f]  ;;  %v25748_v9 = vld [vmem:[%s25620_s27 + $0x98] sm:$0xff]  ;;  %v25751_v10 = vsel %vm668_vm0, %v679_v61, %v680_v62  ;;  %23230 = vmatprep.subr.bf16.mxu0 %v25652_v32 }
  0x26   : > { %33420 = vst [vmem:[#allocation15_spill] sm:$0xff] %v25737_v2  ;;  %33421 = vst [vmem:[#allocation16_spill] sm:$0xff] %v25740_v4  ;;  %v1357_v11 = vrot.slane %v25745_v7, 2  ;;  %v685_v13 = vrot.slane %v25646_v29, 1  ;;  %v25757_v14 = vld [vmem:[%s25620_s27 + $0xa0] sm:$0x3f]  ;;  %20165 = vmatmul.mubr.msk.f32.gmra.mrb[2].mxu1 %vm749_vm1, %v25737_v2  ;;  %v25764_v15 = vsel %vm1328_vm2, %v1354_v63, %v1355_v5  ;;  %23046 = vmatprep.subr.bf16.mxu1 %v25668_v39 }
  0x27   : > { %33422 = vst [vmem:[#allocation17_spill] sm:$0xff] %v25751_v10  ;;  %33423 = vst [vmem:[#allocation18_spill] sm:$0xff] %v25764_v15  ;;  %v1359_v16 = vrot.slane %v25731_v1, 2  ;;  %v1360_v17 = vrot.slane %v25748_v9, 2  ;;  %v25769_v18 = vld [vmem:[%s25620_s27 + $0xa8] sm:$0xff]  ;;  %v25772_v19 = vld [vmem:[%s25620_s27 + $0xb0] sm:$0xff]  ;;  %21453 = vmatmul.mubr.msk.f32.gmra.mrb[2].mxu0 %vm749_vm1, %v25740_v4  ;;  %20167 = vmatprep.mubr.msk.f32.mxu1 %vm749_vm1, %v25751_v10  ;;  %v25780_v20 = vsel %vm668_vm0, %v680_v62, %v682_v6 }
  0x28   : > { %33424 = vst [vmem:[#allocation19_spill] sm:$0xff] %v25780_v20  ;;  %v25783_v21 = vsel %vm1328_vm2, %v1355_v5, %v1357_v11  ;;  %v687_v22 = vrot.slane %v25658_v35, 1  ;;  %21455 = vmatprep.mubr.msk.f32.mxu0 %vm749_vm1, %v25764_v15  ;;  %v25789_v23 = vsel %vm668_vm0, %v684_v12, %v685_v13  ;;  %v1362_v27 = vrot.slane %v25757_v14, 2  ;;  %v25795_v33 = vld [vmem:[%s25620_s27 + $0xb8] sm:$0x3f]  ;;  %23232 = vmatpush3.bf16.msra.mxu0 %v25652_v32  ;;  %v25808_v42 = vld [vmem:[%s25620_s27 + $0xc0] sm:$0xff] }
  0x29   : > { %33425 = vst [vmem:[#allocation20_spill] sm:$0xff] %v25783_v21  ;;  %33426 = vst [vmem:[#allocation21_spill] sm:$0xff] %v25789_v23  ;;  %v689_v28 = vrot.slane %v25675_v44, 1  ;;  %v690_v30 = vrot.slane %v25678_v45, 1  ;;  %v25799_v34 = vsel %vm1328_vm2, %v1359_v16, %v1360_v17  ;;  %v1364_v40 = vrot.slane %v25769_v18, 2  ;;  %23234 = vmatprep.subr.bf16.mxu0 %v25666_v38  ;;  %23048 = vmatpush3.bf16.msra.mxu1 %v25668_v39  ;;  %v25811_v43 = vld [vmem:[%s25620_s27 + $0xc8] sm:$0xff] }
  0x2a   : > { %33427 = vst [vmem:[#allocation22_spill] sm:$0xff] %v25799_v34  ;;  %v1365_v41 = vrot.slane %v25772_v19, 2  ;;  %20168 = vmatmul.mubr.msk.f32.gmra.mrb[4].mxu1 %vm749_vm1, %v25780_v20  ;;  %v25818_v32 = vsel %vm668_vm0, %v685_v13, %v687_v22  ;;  %v692_v39 = vrot.slane %v25695_v52, 1  ;;  %v1367_v48 = vrot.slane %v25795_v33, 2  ;;  %v25838_v5 = vld [vmem:[%s25620_s27 + $0xd0] sm:$0x3f] }
  0x2b   : > { %21456 = vmatmul.mubr.msk.f32.gmra.mrb[4].mxu0 %vm749_vm1, %v25783_v21  ;;  %20170 = vmatprep.mubr.msk.f32.mxu1 %vm749_vm1, %v25789_v23  ;;  %33428 = vst [vmem:[#allocation23_spill] sm:$0xff] %v25818_v32  ;;  %v25825_v49 = vsel %vm1328_vm2, %v1360_v17, %v1362_v27  ;;  %v25828_v50 = vsel %vm668_vm0, %v689_v28, %v690_v30  ;;  %v694_v55 = vrot.slane %v25712_v58, 1  ;;  %v695_v56 = vrot.slane %v25715_v59, 1  ;;  %v25843_v6 = vld [vmem:[%s25620_s27 + $0xd8] sm:$0xff]  ;;  %v25846_v11 = vld [vmem:[%s25620_s27 + $0xe0] sm:$0xff]  ;;  %v529_v21 = vld [vmem:[%s32669_s1 + $0x348] sm:$0xff] }
  0x2c   : > { %21458 = vmatprep.mubr.msk.f32.mxu0 %vm749_vm1, %v25799_v34  ;;  %33429 = vst [vmem:[#allocation24_spill] sm:$0xff] %v25825_v49  ;;  %33430 = vst [vmem:[#allocation25_spill] sm:$0xff] %v25828_v50  ;;  %v25833_v61 = vsel %vm1328_vm2, %v1364_v40, %v1365_v41  ;;  %v1369_v62 = vrot.slane %v25808_v42, 2  ;;  %v1370_v63 = vrot.slane %v25811_v43, 2  ;;  %v25853_v12 = vsel %vm668_vm0, %v690_v30, %v692_v39  ;;  %v25868_v40 = vld [vmem:[%s25620_s27 + $0xe8] sm:$0x3f] }
  0x2d   : > { %33431 = vst [vmem:[#allocation26_spill] sm:$0xff] %v25833_v61  ;;  %33432 = vst [vmem:[#allocation27_spill] sm:$0xff] %v25853_v12  ;;  %v25856_v13 = vsel %vm1328_vm2, %v1365_v41, %v1367_v48  ;;  %v697_v16 = vrot.slane %v25745_v7, 1  ;;  %v25862_v17 = vsel %vm668_vm0, %v694_v55, %v695_v56  ;;  %v1372_v22 = vrot.slane %v25838_v5, 2  ;;  %v25878_v48 = vld [vmem:[%s25620_s27 + $0xf0] sm:$0xff]  ;;  %v25881_v55 = vld [vmem:[%s25620_s27 + $0xf8] sm:$0xff] }
  0x2e   : > { %20171 = vmatmul.mubr.msk.f32.gmra.mrb[6].mxu1 %vm749_vm1, %v25818_v32  ;;  %33433 = vst [vmem:[#allocation28_spill] sm:$0xff] %v25856_v13  ;;  %33434 = vst [vmem:[#allocation29_spill] sm:$0xff] %v25862_v17  ;;  %v699_v27 = vrot.slane %v25731_v1, 1  ;;  %v700_v28 = vrot.slane %v25748_v9, 1  ;;  %v25871_v30 = vsel %vm1328_vm2, %v1369_v62, %v1370_v63  ;;  %v1374_v41 = vrot.slane %v25843_v6, 2  ;;  %s25396_s11 = scalar_lea.vmem %s25395_s29, 8192 }
  0x2f   : > { %21459 = vmatmul.mubr.msk.f32.gmra.mrb[6].mxu0 %vm749_vm1, %v25825_v49  ;;  %20173 = vmatprep.mubr.msk.f32.mxu1 %vm749_vm1, %v25828_v50  ;;  %33435 = vst [vmem:[#allocation30_spill] sm:$0xff] %v25868_v40  ;;  %33436 = vst [vmem:[#allocation31_spill] sm:$0xff] %v25871_v30  ;;  %v1375_v39 = vrot.slane %v25846_v11, 2  ;;  %v25888_v62 = vsel %vm668_vm0, %v695_v56, %v697_v16  ;;  %v702_v8 = vrot.slane %v25757_v14, 1  ;;  %v1377_v3 = vrot.slane %v25868_v40, 2 }
  0x30   : > { %21461 = vmatprep.mubr.msk.f32.mxu0 %vm749_vm1, %v25833_v61  ;;  %33437 = vst [vmem:[#allocation32_spill] sm:$0xff] %v25888_v62  ;;  %v25895_v32 = vsel %vm1328_vm2, %v1370_v63, %v1372_v22  ;;  %v25898_v23 = vsel %vm668_vm0, %v699_v27, %v700_v28  ;;  %v704_v20 = vrot.slane %v25769_v18, 1  ;;  %v705_v10 = vrot.slane %v25772_v19, 1  ;;  %v25908_v54 = vld [vmem:[%s25620_s27 + $0x100] sm:$0x3f] }
  0x31   : > { %33438 = vst [vmem:[#allocation33_spill] sm:$0xff] %v25895_v32  ;;  %33439 = vst [vmem:[#allocation34_spill] sm:$0xff] %v25898_v23  ;;  %v25903_v56 = vsel %vm1328_vm2, %v1374_v41, %v1375_v39  ;;  %v1379_v16 = vrot.slane %v25878_v48, 2  ;;  %v1380_v2 = vrot.slane %v25881_v55, 2  ;;  %v25917_v63 = vsel %vm668_vm0, %v700_v28, %v702_v8  ;;  %v26058_v61 = vld [vmem:[%s25620_s27 + $0x130] sm:$0x3f] }
  0x32   : > { %20174 = vmatmul.mubr.msk.f32.gmra.mrb[8].mxu1 %vm749_vm1, %v25853_v12  ;;  %33440 = vst [vmem:[#allocation35_spill] sm:$0xff] %v25903_v56  ;;  %33441 = vst [vmem:[#allocation36_spill] sm:$0xff] %v25917_v63  ;;  %v25920_v22 = vsel %vm1328_vm2, %v1375_v39, %v1377_v3  ;;  %v707_v27 = vrot.slane %v25795_v33, 1  ;;  %v25926_v41 = vsel %vm668_vm0, %v704_v20, %v705_v10  ;;  %v1746_v3 = vrot.slane %v25640_v26, 3  ;;  %v26093_v34 = vld [vmem:[%s25620_s27 + $0x148] sm:$0x3f] }
  0x33   : > { %21462 = vmatmul.mubr.msk.f32.gmra.mrb[8].mxu0 %vm749_vm1, %v25856_v13  ;;  %20176 = vmatprep.mubr.msk.f32.mxu1 %vm749_vm1, %v25862_v17  ;;  %33442 = vst [vmem:[#allocation37_spill] sm:$0xff] %v25920_v22  ;;  %33443 = vst [vmem:[#allocation38_spill] sm:$0xff] %v25926_v41  ;;  %v709_v17 = vrot.slane %v25808_v42, 1  ;;  %v25932_v8 = vsel %vm1328_vm2, %v1379_v16, %v1380_v2  ;;  %v1747_v28 = vrot.slane %v25646_v29, 3  ;;  %v712_v39 = vrot.slane %v25838_v5, 1 }
  0x34   : > { %21464 = vmatprep.mubr.msk.f32.mxu0 %vm749_vm1, %v25871_v30  ;;  %33444 = vst [vmem:[#allocation39_spill] sm:$0xff] %v25932_v8  ;;  %v25943_v20 = vsel %vm668_vm0, %v705_v10, %v707_v27  ;;  %v1749_v16 = vrot.slane %v25658_v35, 3  ;;  %v714_v50 = vrot.slane %v25843_v6, 1  ;;  %v1751_v27 = vrot.slane %v25675_v44, 3  ;;  %v26134_v53 = vld [vmem:[%s25620_s27 + $0x160] sm:$0x3f] }
  0x35   : > { %33445 = vst [vmem:[#allocation40_spill] sm:$0xff] %v25943_v20  ;;  %v25958_v10 = vsel %vm1730_vm3, %v1746_v3, %v1747_v28  ;;  %v1759_v30 = vrot.slane %v25745_v7, 3  ;;  %v737_v4 = vrot.slane %v26093_v34, 1  ;;  %v1774_v60 = vrot.slane %v25838_v5, 3  ;;  %v26172_v0 = vld [vmem:[%s25620_s27 + $0x178] sm:$0x3f] }
  0x36   : > { %20177 = vmatmul.mubr.msk.f32.gmra.mrb[10].mxu1 %vm749_vm1, %v25888_v62  ;;  %v1382_v62 = vrot.slane %v25908_v54, 2  ;;  %33448 = vst [vmem:[#allocation43_spill] sm:$0xff] %v25958_v10  ;;  %v25978_v3 = vsel %vm1730_vm3, %v1747_v28, %v1749_v16  ;;  %v1756_v28 = vrot.slane %v25712_v58, 3  ;;  %v25995_v16 = vld [vmem:[%s25620_s27 + $0x108] sm:$0xff]  ;;  %v1779_v47 = vrot.slane %v25868_v40, 3 }
  0x37   : > { %21465 = vmatmul.mubr.msk.f32.gmra.mrb[10].mxu0 %vm749_vm1, %v25895_v32  ;;  %20179 = vmatprep.mubr.msk.f32.mxu1 %vm749_vm1, %v25898_v23  ;;  %v710_v23 = vrot.slane %v25811_v43, 1  ;;  %33450 = vst [vmem:[#allocation45_spill] sm:$0xff] %v25978_v3  ;;  %v722_v32 = vrot.slane %v25908_v54, 1 }
  0x38   : > { %21467 = vmatprep.mubr.msk.f32.mxu0 %vm749_vm1, %v25903_v56  ;;  %v25950_v12 = vsel %vm1328_vm2, %v1380_v2, %v1382_v62  ;;  %v526_v2 = vld [vmem:[%s32669_s1 + $0x330] sm:$0xff]  ;;  %v1754_v56 = vrot.slane %v25695_v52, 3 }
  0x39   : > { %33446 = vst [vmem:[#allocation41_spill] sm:$0xff] %v25950_v12  ;;  %v25975_v62 = vsel %vm668_vm0, %v710_v23, %v712_v39  ;;  %v1757_v39 = vrot.slane %v25715_v59, 3 }
  0x3a   : > { %20180 = vmatmul.mubr.msk.f32.gmra.mrb[12].mxu1 %vm749_vm1, %v25917_v63  ;;  %v25953_v63 = vsel %vm668_vm0, %v709_v17, %v710_v23  ;;  %v527_v17 = vld [vmem:[%s32669_s1 + $0x338] sm:$0xff]  ;;  %33449 = vst [vmem:[#allocation44_spill] sm:$0xff] %v25975_v62 }
  0x3b   : > { %21468 = vmatmul.mubr.msk.f32.gmra.mrb[12].mxu0 %vm749_vm1, %v25920_v22  ;;  %20182 = vmatprep.mubr.msk.f32.mxu1 %vm749_vm1, %v25926_v41  ;;  %33447 = vst [vmem:[#allocation42_spill] sm:$0xff] %v25953_v63  ;;  %v715_v41 = vrot.slane %v25846_v11, 1  ;;  %v1752_v22 = vrot.slane %v25678_v45, 3 }
  0x3c   : > { %21470 = vmatprep.mubr.msk.f32.mxu0 %vm749_vm1, %v25932_v8 }
  0x3d   : > { %v25984_v8 = vsel %vm668_vm0, %v714_v50, %v715_v41  ;;  %v25990_v23 = vsel %vm1730_vm3, %v1751_v27, %v1752_v22  ;;  %v23237_v50 = vpack.c.bf16 %v527_v17, %v526_v2  ;;  %v26015_v2 = vsel %vm1730_vm3, %v1752_v22, %v1754_v56  ;;  %v26034_v56 = vld [vmem:[%s25620_s27 + $0x128] sm:$0xff] }
  0x3e   : > { %20183 = vmatmul.mubr.msk.f32.gmra.mrb[14].mxu1 %vm749_vm1, %v25943_v20  ;;  %v717_v20 = vrot.slane %v25868_v40, 1  ;;  %33451 = vst [vmem:[#allocation46_spill] sm:$0xff] %v25984_v8  ;;  %33452 = vst [vmem:[#allocation47_spill] sm:$0xff] %v25990_v23  ;;  %v26046_v22 = vsel %vm1730_vm3, %v1757_v39, %v1759_v30  ;;  %v1766_v30 = vrot.slane %v25769_v18, 3 }
  0x3f   : > { %21471 = vmatmul.mubr.msk.f32.gmra.mrb[14].mxu0 %vm749_vm1, %v25950_v12  ;;  %20185 = vmatprep.mubr.msk.f32.mxu1 %vm749_vm1, %v25953_v63  ;;  %v719_v12 = vrot.slane %v25878_v48, 1  ;;  %v720_v63 = vrot.slane %v25881_v55, 1  ;;  %33454 = vst [vmem:[#allocation49_spill] sm:$0xff] %v26015_v2  ;;  %33458 = vst [vmem:[#allocation53_spill] sm:$0xff] %v26046_v22 }
  0x40   : > { %21505 = vmatprep.mubr.msk.f32.mxu0 %vm749_vm1, %v25958_v10  ;;  %v25998_v10 = vld [vmem:[%s25620_s27 + $0x110] sm:$0xff]  ;;  %v26007_v27 = vsel %vm668_vm0, %v715_v41, %v717_v20  ;;  %v26023_v20 = vld [vmem:[%s25620_s27 + $0x118] sm:$0x3f] }
  0x41   : > { %33453 = vst [vmem:[#allocation48_spill] sm:$0xff] %v26007_v27  ;;  %v26018_v17 = vsel %vm668_vm0, %v719_v12, %v720_v63  ;;  %v725_v41 = vrot.slane %v25998_v10, 1  ;;  %v26043_v12 = vsel %vm668_vm0, %v720_v63, %v722_v32  ;;  %v1767_v63 = vrot.slane %v25772_v19, 3 }
  0x42   : > { %20186 = vmatmul.mubr.msk.f32.gmra.mrb[16].mxu1 %vm749_vm1, %v25975_v62  ;;  %33455 = vst [vmem:[#allocation50_spill] sm:$0xff] %v26018_v17  ;;  %v26026_v62 = vsel %vm1730_vm3, %v1756_v28, %v1757_v39  ;;  %33457 = vst [vmem:[#allocation52_spill] sm:$0xff] %v26043_v12  ;;  %v727_v28 = vrot.slane %v26023_v20, 1  ;;  %v26066_v39 = vld [vmem:[%s25620_s27 + $0x138] sm:$0xff] }
  0x43   : > { %21506 = vmatmul.mubr.msk.f32.vlgmr.msra.gmra.mrb[0].mxu0 %vm749_vm1, %v25978_v3  ;;  %20188 = vmatprep.mubr.msk.f32.mxu1 %vm749_vm1, %v25984_v8  ;;  %v724_v8 = vrot.slane %v25995_v16, 1  ;;  %33456 = vst [vmem:[#allocation51_spill] sm:$0xff] %v26026_v62  ;;  %v26031_v3 = vld [vmem:[%s25620_s27 + $0x120] sm:$0xff] }
  0x44   : > { %23236 = vmatpush3.bf16.msra.mxu0 %v25666_v38  ;;  %21508 = vmatprep.mubr.msk.f32.mxu0 %vm749_vm1, %v25990_v23  ;;  %v1761_v38 = vrot.slane %v25731_v1, 3  ;;  %v1762_v23 = vrot.slane %v25748_v9, 3  ;;  %v729_v13 = vrot.slane %v26031_v3, 1 }
  0x45   : > { %23238 = vmatprep.subr.bf16.mxu0 %v23237_v50 }
  0x46   : > { %20189 = vmatmul.mubr.msk.f32.gmra.mrb[18].mxu1 %vm749_vm1, %v26007_v27  ;;  %v26052_v27 = vsel %vm668_vm0, %v724_v8, %v725_v41  ;;  %v26061_v32 = vsel %vm1730_vm3, %v1761_v38, %v1762_v23  ;;  %v26069_v8 = vld [vmem:[%s25620_s27 + $0x140] sm:$0xff]  ;;  %v732_v38 = vrot.slane %v26058_v61, 1 }
  0x47   : > { %21509 = vmatmul.mubr.msk.f32.gmra.mrb[2].mxu0 %vm749_vm1, %v26015_v2  ;;  %20191 = vmatprep.mubr.msk.f32.mxu1 %vm749_vm1, %v26018_v17  ;;  %33459 = vst [vmem:[#allocation54_spill] sm:$0xff] %v26052_v27  ;;  %v1764_v2 = vrot.slane %v25757_v14, 3  ;;  %v730_v17 = vrot.slane %v26034_v56, 1  ;;  %33460 = vst [vmem:[#allocation55_spill] sm:$0xff] %v26061_v32 }
  0x48   : > { %21511 = vmatprep.mubr.msk.f32.mxu0 %vm749_vm1, %v26026_v62  ;;  %23240 = vmatpush3.bf16.msra.mxu0 %v23237_v50  ;;  %v26078_v50 = vsel %vm668_vm0, %v725_v41, %v727_v28  ;;  %v1769_v62 = vrot.slane %v25795_v33, 3  ;;  %v528_v41 = vld [vmem:[%s32669_s1 + $0x340] sm:$0xff]  ;;  %v26099_v28 = vsel %vm1730_vm3, %v1766_v30, %v1767_v63 }
  0x49   : > { %33461 = vst [vmem:[#allocation56_spill] sm:$0xff] %v26078_v50  ;;  %v26088_v49 = vsel %vm668_vm0, %v729_v13, %v730_v17  ;;  %33464 = vst [vmem:[#allocation59_spill] sm:$0xff] %v26099_v28  ;;  %v26104_v13 = vld [vmem:[%s25620_s27 + $0x150] sm:$0xff]  ;;  %v26119_v30 = vsel %vm668_vm0, %v730_v17, %v732_v38  ;;  %v26136_v17 = vpack.c.bf16 %v529_v21, %v528_v41  ;;  %v1777_v38 = vrot.slane %v25846_v11, 3 }
  0x4a   : > { %20192 = vmatmul.mubr.msk.f32.gmra.mrb[20].mxu1 %vm749_vm1, %v26043_v12  ;;  %v26085_v12 = vsel %vm1730_vm3, %v1762_v23, %v1764_v2  ;;  %33463 = vst [vmem:[#allocation58_spill] sm:$0xff] %v26088_v49  ;;  %v1772_v23 = vrot.slane %v25811_v43, 3  ;;  %v26107_v2 = vld [vmem:[%s25620_s27 + $0x158] sm:$0xff]  ;;  %33465 = vst [vmem:[#allocation60_spill] sm:$0xff] %v26119_v30  ;;  %v26122_v15 = vsel %vm1730_vm3, %v1767_v63, %v1769_v62  ;;  %v1776_v63 = vrot.slane %v25843_v6, 3 }
  0x4b   : > { %21512 = vmatmul.mubr.msk.f32.gmra.mrb[4].mxu0 %vm749_vm1, %v26046_v22  ;;  %20194 = vmatprep.mubr.msk.f32.mxu1 %vm749_vm1, %v26052_v27  ;;  %33462 = vst [vmem:[#allocation57_spill] sm:$0xff] %v26085_v12  ;;  %v734_v22 = vrot.slane %v26066_v39, 1  ;;  %v735_v27 = vrot.slane %v26069_v8, 1  ;;  %33466 = vst [vmem:[#allocation61_spill] sm:$0xff] %v26122_v15  ;;  %v742_v41 = vrot.slane %v26134_v53, 1  ;;  %v26198_v51 = vsel %vm1730_vm3, %v1777_v38, %v1779_v47 }
  0x4c   : > { %21514 = vmatprep.mubr.msk.f32.mxu0 %vm749_vm1, %v26061_v32  ;;  %v1771_v32 = vrot.slane %v25808_v42, 3  ;;  %23242 = vmatprep.subr.bf16.mxu0 %v26136_v17  ;;  %33474 = vst [vmem:[#allocation69_spill] sm:$0xff] %v26198_v51 }
  0x4d   : > { %v26157_v21 = vsel %vm668_vm0, %v735_v27, %v737_v4  ;;  %v26175_v4 = vsel %vm1730_vm3, %v1776_v63, %v1777_v38  ;;  %v1789_v38 = vrot.slane %v26023_v20, 3 }
  0x4e   : > { %20195 = vmatmul.mubr.msk.f32.gmra.mrb[22].mxu1 %vm749_vm1, %v26078_v50  ;;  %v26129_v50 = vsel %vm668_vm0, %v734_v22, %v735_v27  ;;  %v26139_v62 = vsel %vm1730_vm3, %v1771_v32, %v1772_v23  ;;  %v26147_v22 = vld [vmem:[%s25620_s27 + $0x170] sm:$0xff]  ;;  %33469 = vst [vmem:[#allocation64_spill] sm:$0xff] %v26157_v21  ;;  %v26160_v32 = vsel %vm1730_vm3, %v1772_v23, %v1774_v60  ;;  %33472 = vst [vmem:[#allocation67_spill] sm:$0xff] %v26175_v4  ;;  %v433_v23 = vld [vmem:[%s32669_s1 + $0x48] sm:$0xff] }
  0x4f   : > { %21515 = vmatmul.mubr.msk.f32.gmra.mrb[6].mxu0 %vm749_vm1, %v26085_v12  ;;  %20197 = vmatprep.mubr.msk.f32.mxu1 %vm749_vm1, %v26088_v49  ;;  %33467 = vst [vmem:[#allocation62_spill] sm:$0xff] %v26129_v50  ;;  %v739_v12 = vrot.slane %v26104_v13, 1  ;;  %v740_v49 = vrot.slane %v26107_v2, 1  ;;  %33468 = vst [vmem:[#allocation63_spill] sm:$0xff] %v26139_v62  ;;  %v1781_v60 = vrot.slane %v25878_v48, 3  ;;  %v1782_v27 = vrot.slane %v25881_v55, 3 }
  0x50   : > { %21517 = vmatprep.mubr.msk.f32.mxu0 %vm749_vm1, %v26099_v28  ;;  %v26144_v28 = vld [vmem:[%s25620_s27 + $0x168] sm:$0xff]  ;;  %33470 = vst [vmem:[#allocation65_spill] sm:$0xff] %v26160_v32 }
  0x51   : > { %v26192_v63 = vsel %vm668_vm0, %v740_v49, %v742_v41  ;;  %v26205_v40 = vsel %vm1730_vm3, %v1781_v60, %v1782_v27  ;;  %v1787_v41 = vrot.slane %v25998_v10, 3 }
  0x52   : > { %20198 = vmatmul.mubr.msk.f32.gmra.mrb[24].mxu1 %vm749_vm1, %v26119_v30  ;;  %v26166_v30 = vsel %vm668_vm0, %v739_v12, %v740_v49  ;;  %v432_v12 = vld [vmem:[%s32669_s1 + $0x40] sm:$0xff]  ;;  %33473 = vst [vmem:[#allocation68_spill] sm:$0xff] %v26192_v63  ;;  %33476 = vst [vmem:[#allocation71_spill] sm:$0xff] %v26205_v40  ;;  %v1786_v49 = vrot.slane %v25995_v16, 3 }
  0x53   : > { %21518 = vmatmul.mubr.msk.f32.gmra.mrb[8].mxu0 %vm749_vm1, %v26122_v15  ;;  %20200 = vmatprep.mubr.msk.f32.mxu1 %vm749_vm1, %v26129_v50  ;;  %33471 = vst [vmem:[#allocation66_spill] sm:$0xff] %v26166_v30  ;;  %v744_v15 = vrot.slane %v26144_v28, 1  ;;  %v745_v50 = vrot.slane %v26147_v22, 1 }
  0x54   : > { %21520 = vmatprep.mubr.msk.f32.mxu0 %vm749_vm1, %v26139_v62  ;;  %v747_v62 = vrot.slane %v26172_v0, 1  ;;  %v26225_v60 = vsel %vm1730_vm3, %v1786_v49, %v1787_v41 }
  0x55   : > { %v26201_v31 = vsel %vm668_vm0, %v744_v15, %v745_v50  ;;  %33479 = vst [vmem:[#allocation74_spill] sm:$0xff] %v26225_v60 }
  0x56   : > { %20201 = vmatmul.mubr.msk.f32.gmra.mrb[26].mxu1 %vm749_vm1, %v26157_v21  ;;  %33475 = vst [vmem:[#allocation70_spill] sm:$0xff] %v26201_v31  ;;  %v1784_v21 = vrot.slane %v25908_v54, 3  ;;  %v26216_v47 = vsel %vm668_vm0, %v745_v50, %v747_v62  ;;  %v434_v50 = vld [vmem:[%s32669_s1 + $0x50] sm:$0xff]  ;;  %v435_v62 = vld [vmem:[%s32669_s1 + $0x58] sm:$0xff] }
  0x57   : > { %21521 = vmatmul.mubr.msk.f32.gmra.mrb[10].mxu0 %vm749_vm1, %v26160_v32  ;;  %20203 = vmatprep.mubr.msk.f32.mxu1 %vm749_vm1, %v26166_v30  ;;  %v23049_v32 = vpack.c.bf16 %v433_v23, %v432_v12  ;;  %33477 = vst [vmem:[#allocation72_spill] sm:$0xff] %v26216_v47  ;;  %v1791_v12 = vrot.slane %v26031_v3, 3  ;;  %v1792_v23 = vrot.slane %v26034_v56, 3  ;;  %v1807_v30 = vrot.slane %v26147_v22, 3 }
  0x58   : > { %21523 = vmatprep.mubr.msk.f32.mxu0 %vm749_vm1, %v26175_v4  ;;  %v26221_v15 = vsel %vm1730_vm3, %v1782_v27, %v1784_v21  ;;  %v26244_v21 = vsel %vm1730_vm3, %v1787_v41, %v1789_v38  ;;  %v1794_v27 = vrot.slane %v26058_v61, 3  ;;  %v1799_v38 = vrot.slane %v26093_v34, 3 }
  0x59   : > { %23050 = vmatprep.subr.bf16.mxu1 %v23049_v32  ;;  %33478 = vst [vmem:[#allocation73_spill] sm:$0xff] %v26221_v15  ;;  %33480 = vst [vmem:[#allocation75_spill] sm:$0xff] %v26244_v21  ;;  %v26248_v49 = vsel %vm1730_vm3, %v1791_v12, %v1792_v23 }
  0x5a   : > { %20204 = vmatmul.mubr.msk.f32.gmra.mrb[28].mxu1 %vm749_vm1, %v26192_v63  ;;  %33481 = vst [vmem:[#allocation76_spill] sm:$0xff] %v26248_v49  ;;  %v23053_v63 = vpack.c.bf16 %v435_v62, %v434_v50  ;;  %v26261_v41 = vsel %vm1730_vm3, %v1792_v23, %v1794_v27  ;;  %v1801_v50 = vrot.slane %v26104_v13, 3  ;;  %v1802_v62 = vrot.slane %v26107_v2, 3 }
  0x5b   : > { %21524 = vmatmul.mubr.msk.f32.gmra.mrb[12].mxu0 %vm749_vm1, %v26198_v51  ;;  %20206 = vmatprep.mubr.msk.f32.mxu1 %vm749_vm1, %v26201_v31  ;;  %v1797_v31 = vrot.slane %v26069_v8, 3  ;;  %33482 = vst [vmem:[#allocation77_spill] sm:$0xff] %v26261_v41  ;;  %v1806_v27 = vrot.slane %v26144_v28, 3 }
  0x5c   : > { %21526 = vmatprep.mubr.msk.f32.mxu0 %vm749_vm1, %v26205_v40  ;;  %v26282_v23 = vsel %vm1730_vm3, %v1801_v50, %v1802_v62  ;;  %v26341_v40 = vld [vmem:[%s25620_s27 + $0x1b0] sm:$0xff] }
  0x5d   : > { %33485 = vst [vmem:[#allocation80_spill] sm:$0xff] %v26282_v23  ;;  %v26305_v50 = vsel %vm1730_vm3, %v1806_v27, %v1807_v30  ;;  %v7854_v4 = vrot.slane %v26341_v40, 3 }
  0x5e   : > { %20207 = vmatmul.mubr.msk.f32.gmra.mrb[30].mxu1 %vm749_vm1, %v26216_v47  ;;  %v1796_v47 = vrot.slane %v26066_v39, 3  ;;  %33487 = vst [vmem:[#allocation82_spill] sm:$0xff] %v26305_v50 }
  0x5f   : > { %21527 = vmatmul.mubr.msk.f32.gmra.mrb[14].mxu0 %vm749_vm1, %v26221_v15  ;;  %20217 = vmatprep.mubr.msk.f32.mxu1 %vm749_vm1, %v25634_v24 }
  0x60   : > { %21529 = vmatprep.mubr.msk.f32.mxu0 %vm749_vm1, %v26225_v60  ;;  %v26265_v12 = vsel %vm1730_vm3, %v1796_v47, %v1797_v31  ;;  %v1804_v47 = vrot.slane %v26134_v53, 3 }
  0x61   : > { %33483 = vst [vmem:[#allocation78_spill] sm:$0xff] %v26265_v12 }
  0x62   : > { %20218 = vmatmul.mubr.msk.f32.vlgmr.msra.gmra.mrb[0].mxu1 %vm749_vm1, %v25637_v25 }
  0x63   : > { %21530 = vmatmul.mubr.msk.f32.gmra.mrb[16].mxu0 %vm749_vm1, %v26244_v21  ;;  %20220 = vmatprep.mubr.msk.f32.mxu1 %vm749_vm1, %v25661_v36 }
  0x64   : > { %21532 = vmatprep.mubr.msk.f32.mxu0 %vm749_vm1, %v26248_v49  ;;  %23052 = vmatpush3.bf16.msra.mxu1 %v23049_v32  ;;  %v26278_v32 = vsel %vm1730_vm3, %v1797_v31, %v1799_v38  ;;  %v26292_v31 = vld [vmem:[%s25620_s27 + $0x188] sm:$0xff]  ;;  %v1809_v38 = vrot.slane %v26172_v0, 3  ;;  %v26310_v49 = vld [vmem:[%s25620_s27 + $0x190] sm:$0x3f] }
  0x65   : > { %23054 = vmatprep.subr.bf16.mxu1 %v23053_v63  ;;  %33484 = vst [vmem:[#allocation79_spill] sm:$0xff] %v26278_v32  ;;  %33488 = vst [vmem:[#allocation83_spill] sm:$0xff] %v26310_v49  ;;  %v4137_v27 = vrot.slane %v26310_v49, 3 }
  0x66   : > { %20221 = vmatmul.mubr.msk.f32.gmra.mrb[2].mxu1 %vm749_vm1, %v25664_v37 }
  0x67   : > { %21533 = vmatmul.mubr.msk.f32.gmra.mrb[18].mxu0 %vm749_vm1, %v26261_v41  ;;  %20223 = vmatprep.mubr.msk.f32.mxu1 %vm749_vm1, %v25681_v46 }
  0x68   : > { %21535 = vmatprep.mubr.msk.f32.mxu0 %vm749_vm1, %v26265_v12  ;;  %23056 = vmatpush3.bf16.msra.mxu1 %v23053_v63  ;;  %v26289_v12 = vld [vmem:[%s25620_s27 + $0x180] sm:$0xff]  ;;  %v26301_v63 = vsel %vm1730_vm3, %v1802_v62, %v1804_v47  ;;  %v26327_v47 = vsel %vm1730_vm3, %v1807_v30, %v1809_v38 }
  0x69   : > { %33486 = vst [vmem:[#allocation81_spill] sm:$0xff] %v26301_v63  ;;  %v4134_v41 = vrot.slane %v26289_v12, 3  ;;  %v26318_v62 = vld [vmem:[%s25620_s27 + $0x1a0] sm:$0xff]  ;;  %33491 = vst [vmem:[#allocation86_spill] sm:$0xff] %v26327_v47 }
  0x6a   : > { %20224 = vmatmul.mubr.msk.f32.gmra.mrb[4].mxu1 %vm749_vm1, %v25709_v57  ;;  %33490 = vst [vmem:[#allocation85_spill] sm:$0xff] %v26318_v62  ;;  %v5995_v15 = vrot.slane %v26318_v62, 3  ;;  %v436_v30 = vld [vmem:[%s32669_s1 + $0x60] sm:$0xff] }
  0x6b   : > { %21536 = vmatmul.mubr.msk.f32.gmra.mrb[20].mxu0 %vm749_vm1, %v26278_v32  ;;  %20226 = vmatprep.mubr.msk.f32.mxu1 %vm749_vm1, %v25640_v26  ;;  %v4135_v32 = vrot.slane %v26292_v31, 3 }
  0x6c   : > { %21538 = vmatprep.mubr.msk.f32.mxu0 %vm749_vm1, %v26282_v23  ;;  %v26315_v23 = vld [vmem:[%s25620_s27 + $0x198] sm:$0xff] }
  0x6d   : > { %33489 = vst [vmem:[#allocation84_spill] sm:$0xff] %v26315_v23  ;;  %v26331_v21 = vsel %vm1730_vm3, %v4134_v41, %v4135_v32  ;;  %v5994_v60 = vrot.slane %v26315_v23, 3  ;;  %v437_v41 = vld [vmem:[%s32669_s1 + $0x68] sm:$0xff]  ;;  %v26359_v38 = vsel %vm1730_vm3, %v4135_v32, %v4137_v27  ;;  %v26368_v23 = vld [vmem:[%s25620_s27 + $0x1c0] sm:$0x3f] }
  0x6e   : > { %20227 = vmatmul.mubr.msk.f32.gmra.mrb[6].mxu1 %vm749_vm1, %v25646_v29  ;;  %33492 = vst [vmem:[#allocation87_spill] sm:$0xff] %v26331_v21  ;;  %33493 = vst [vmem:[#allocation88_spill] sm:$0xff] %v26359_v38  ;;  %v26372_v49 = vpack.c.bf16 %v437_v41, %v436_v30  ;;  %v7857_v32 = vrot.slane %v26368_v23, 3  ;;  %v2148_v30 = vrot.slane %v25640_v26, 4  ;;  %v2149_v41 = vrot.slane %v25646_v29, 4 }
  0x6f   : > { %21539 = vmatmul.mubr.msk.f32.gmra.mrb[22].mxu0 %vm749_vm1, %v26301_v63  ;;  %20229 = vmatprep.mubr.msk.f32.mxu1 %vm749_vm1, %v25675_v44  ;;  %v26336_v63 = vld [vmem:[%s25620_s27 + $0x1a8] sm:$0x3f]  ;;  %v2151_v26 = vrot.slane %v25658_v35, 4 }
  0x70   : > { %21541 = vmatprep.mubr.msk.f32.mxu0 %vm749_vm1, %v26305_v50  ;;  %v26344_v50 = vld [vmem:[%s25620_s27 + $0x1b8] sm:$0xff]  ;;  %v5997_v51 = vrot.slane %v26336_v63, 3  ;;  %23058 = vmatprep.subr.bf16.mxu1 %v26372_v49  ;;  %v26403_v29 = vsel %vm2132_vm4, %v2148_v30, %v2149_v41  ;;  %v2159_v30 = vrot.slane %v25715_v59, 4 }
  0x71   : > { %v7855_v62 = vrot.slane %v26344_v50, 3  ;;  %33498 = vst [vmem:[#allocation93_spill] sm:$0xff] %v26403_v29  ;;  %v26422_v35 = vsel %vm2132_vm4, %v2149_v41, %v2151_v26  ;;  %v533_v41 = vld [vmem:[%s32669_s1 + $0x368] sm:$0xff]  ;;  %v2164_v26 = vrot.slane %v25748_v9, 4 }
  0x72   : > { %20230 = vmatmul.mubr.msk.f32.gmra.mrb[8].mxu1 %vm749_vm1, %v25678_v45  ;;  %33499 = vst [vmem:[#allocation94_spill] sm:$0xff] %v26422_v35 }
  0x73   : > { %21542 = vmatmul.mubr.msk.f32.gmra.mrb[24].mxu0 %vm749_vm1, %v26327_v47  ;;  %20232 = vmatprep.mubr.msk.f32.mxu1 %vm749_vm1, %v25712_v58  ;;  %v26363_v47 = vsel %vm1730_vm3, %v5994_v60, %v5995_v15  ;;  %v26381_v60 = vsel %vm1730_vm3, %v5995_v15, %v5997_v51  ;;  %v26386_v27 = vsel %vm1730_vm3, %v7854_v4, %v7855_v62  ;;  %v2153_v4 = vrot.slane %v25675_v44, 4 }
  0x74   : > { %21544 = vmatprep.mubr.msk.f32.mxu0 %vm749_vm1, %v26331_v21  ;;  %33494 = vst [vmem:[#allocation89_spill] sm:$0xff] %v26363_v47  ;;  %33495 = vst [vmem:[#allocation90_spill] sm:$0xff] %v26381_v60  ;;  %v26399_v51 = vsel %vm1730_vm3, %v7855_v62, %v7857_v32  ;;  %v2154_v15 = vrot.slane %v25678_v45, 4  ;;  %v531_v62 = vld [vmem:[%s32669_s1 + $0x358] sm:$0xff]  ;;  %v2156_v44 = vrot.slane %v25695_v52, 4  ;;  %v2158_v32 = vrot.slane %v25712_v58, 4 }
  0x75   : > { %33496 = vst [vmem:[#allocation91_spill] sm:$0xff] %v26386_v27  ;;  %33497 = vst [vmem:[#allocation92_spill] sm:$0xff] %v26399_v51  ;;  %v2161_v58 = vrot.slane %v25745_v7, 4  ;;  %v8152_v21 = vrot.slane %v26341_v40, 4 }
  0x76   : > { %20233 = vmatmul.mubr.msk.f32.gmra.mrb[10].mxu1 %vm749_vm1, %v25715_v59  ;;  %v26426_v45 = vsel %vm2132_vm4, %v2153_v4, %v2154_v15  ;;  %v26446_v52 = vsel %vm2132_vm4, %v2154_v15, %v2156_v44  ;;  %v26450_v59 = vsel %vm2132_vm4, %v2158_v32, %v2159_v30  ;;  %v2174_v15 = vrot.slane %v25811_v43, 4  ;;  %v33510_v32 = vld [vmem:[#allocation30_spill] sm:$0xff] }
  0x77   : > { %21545 = vmatmul.mubr.msk.f32.gmra.mrb[26].mxu0 %vm749_vm1, %v26359_v38  ;;  %20235 = vmatprep.mubr.msk.f32.mxu1 %vm749_vm1, %v25731_v1  ;;  %33500 = vst [vmem:[#allocation95_spill] sm:$0xff] %v26426_v45  ;;  %33501 = vst [vmem:[#allocation96_spill] sm:$0xff] %v26446_v52  ;;  %v26465_v7 = vsel %vm2132_vm4, %v2159_v30, %v2161_v58  ;;  %v2179_v44 = vrot.slane %v25846_v11, 4  ;;  %v2181_v30 = vrot.slane %v33510_v32, 4  ;;  %v438_v32 = vld [vmem:[%s32669_s1 + $0x70] sm:$0xff]  ;;  %v33540_v38 = vld [vmem:[#allocation18_spill] sm:$0xff] }
  0x78   : > { %21547 = vmatprep.mubr.msk.f32.mxu0 %vm749_vm1, %v26363_v47  ;;  %33502 = vst [vmem:[#allocation97_spill] sm:$0xff] %v26450_v59  ;;  %33503 = vst [vmem:[#allocation98_spill] sm:$0xff] %v26465_v7  ;;  %v33539_v47 = vld [vmem:[#allocation16_spill] sm:$0xff] }
  0x79   : > { %v26534_v58 = vsel %vm2132_vm4, %v2179_v44, %v2181_v30 }
  0x7a   : > { %20236 = vmatmul.mubr.msk.f32.gmra.mrb[12].mxu1 %vm749_vm1, %v25748_v9  ;;  %33512 = vst [vmem:[#allocation105_spill] sm:$0xff] %v26534_v58 }
  0x7b   : > { %21548 = vmatmul.mubr.msk.f32.gmra.mrb[28].mxu0 %vm749_vm1, %v26381_v60  ;;  %20238 = vmatprep.mubr.msk.f32.mxu1 %vm749_vm1, %v25769_v18  ;;  %v530_v60 = vld [vmem:[%s32669_s1 + $0x350] sm:$0xff] }
  0x7c   : > { %21550 = vmatprep.mubr.msk.f32.mxu0 %vm749_vm1, %v26386_v27  ;;  %v23245_v27 = vpack.c.bf16 %v531_v62, %v530_v60  ;;  %v2163_v60 = vrot.slane %v25731_v1, 4  ;;  %v2166_v1 = vrot.slane %v25757_v14, 4  ;;  %v2176_v62 = vrot.slane %v25838_v5, 4 }
  0x7e   : > { %20239 = vmatmul.mubr.msk.f32.gmra.mrb[14].mxu1 %vm749_vm1, %v25772_v19  ;;  %v26469_v9 = vsel %vm2132_vm4, %v2163_v60, %v2164_v26  ;;  %v26483_v14 = vsel %vm2132_vm4, %v2164_v26, %v2166_v1  ;;  %v26517_v5 = vsel %vm2132_vm4, %v2174_v15, %v2176_v62  ;;  %v2186_v60 = vrot.slane %v25908_v54, 4  ;;  %v33514_v54 = vld [vmem:[#allocation8_spill] sm:$0xff] }
  0x7f   : > { %21551 = vmatmul.mubr.msk.f32.gmra.mrb[30].mxu0 %vm749_vm1, %v26399_v51  ;;  %20241 = vmatprep.mubr.msk.f32.mxu1 %vm749_vm1, %v25808_v42  ;;  %v532_v51 = vld [vmem:[%s32669_s1 + $0x360] sm:$0xff]  ;;  %33504 = vst [vmem:[#allocation99_spill] sm:$0xff] %v26469_v9  ;;  %33505 = vst [vmem:[#allocation100_spill] sm:$0xff] %v26483_v14  ;;  %v2188_v1 = vrot.slane %v25995_v16, 4 }
  0x80   : > { %21561 = vmatprep.mubr.msk.f32.mxu0 %vm749_vm1, %v26403_v29  ;;  %v26454_v4 = vpack.c.bf16 %v533_v41, %v532_v51  ;;  %v2169_v51 = vrot.slane %v25772_v19, 4  ;;  %33509 = vst [vmem:[#allocation104_spill] sm:$0xff] %v26517_v5  ;;  %v2184_v41 = vrot.slane %v25881_v55, 4  ;;  %v26951_v29 = vld [vmem:[%s25620_s27 + $0xf8] sm:$0xff] }
  0x81   : > { %33577 = vst [vmem:[#allocation142_spill] sm:$0xff] %v26951_v29 }
  0x82   : > { %20242 = vmatmul.mubr.msk.f32.gmra.mrb[16].mxu1 %vm749_vm1, %v25811_v43  ;;  %v2178_v43 = vrot.slane %v25843_v6, 4 }
  0x83   : > { %21562 = vmatmul.mubr.msk.f32.vlgmr.msra.gmra.mrb[0].mxu0 %vm749_vm1, %v26422_v35  ;;  %20244 = vmatprep.mubr.msk.f32.mxu1 %vm749_vm1, %v25843_v6  ;;  %v26947_v35 = vld [vmem:[%s25620_s27 + $0xf0] sm:$0xff] }
  0x84   : > { %23244 = vmatpush3.bf16.msra.mxu0 %v26136_v17  ;;  %21564 = vmatprep.mubr.msk.f32.mxu0 %vm749_vm1, %v26426_v45  ;;  %v2168_v17 = vrot.slane %v25769_v18, 4  ;;  %v2171_v18 = vrot.slane %v25795_v33, 4  ;;  %v26521_v6 = vsel %vm2132_vm4, %v2178_v43, %v2179_v44  ;;  %v2193_v43 = vrot.slane %v26031_v3, 4 }
  0x85   : > { %23246 = vmatprep.subr.bf16.mxu0 %v23245_v27  ;;  %33511 = vst [vmem:[#allocation30_spill] sm:$0xff] %v26521_v6  ;;  %v2194_v44 = vrot.slane %v26034_v56, 4 }
  0x86   : > { %20245 = vmatmul.mubr.msk.f32.gmra.mrb[18].mxu1 %vm749_vm1, %v25846_v11  ;;  %v26487_v19 = vsel %vm2132_vm4, %v2168_v17, %v2169_v51  ;;  %v26500_v33 = vsel %vm2132_vm4, %v2169_v51, %v2171_v18  ;;  %v2183_v11 = vrot.slane %v25878_v48, 4  ;;  %v2189_v17 = vrot.slane %v25998_v10, 4 }
  0x87   : > { %21565 = vmatmul.mubr.msk.f32.gmra.mrb[2].mxu0 %vm749_vm1, %v26446_v52  ;;  %20247 = vmatprep.mubr.msk.f32.mxu1 %vm749_vm1, %v25878_v48  ;;  %33506 = vst [vmem:[#allocation101_spill] sm:$0xff] %v26487_v19  ;;  %33507 = vst [vmem:[#allocation102_spill] sm:$0xff] %v26500_v33  ;;  %v1329_v48 = vrot.slane %v25634_v24, 2  ;;  %v1332_v24 = vrot.slane %v33514_v54, 2  ;;  %v26555_v51 = vsel %vm2132_vm4, %v2184_v41, %v2186_v60  ;;  %v1340_v54 = vrot.slane %v25709_v57, 2 }
  0x88   : > { %21567 = vmatprep.mubr.msk.f32.mxu0 %vm749_vm1, %v26450_v59  ;;  %23248 = vmatpush3.bf16.msra.mxu0 %v23245_v27  ;;  %v2173_v27 = vrot.slane %v25808_v42, 4  ;;  %v26540_v26 = vsel %vm2132_vm4, %v2183_v11, %v2184_v41  ;;  %33515 = vst [vmem:[#allocation8_spill] sm:$0xff] %v26555_v51  ;;  %v26561_v62 = vsel %vm2132_vm4, %v2188_v1, %v2189_v17  ;;  %v33518_v11 = vld [vmem:[#allocation10_spill] sm:$0xff]  ;;  %v1339_v1 = vrot.slane %v25681_v46, 2  ;;  %v441_v46 = vld [vmem:[%s32669_s1 + $0x88] sm:$0xff] }
  0x89   : > { %23250 = vmatprep.subr.bf16.mxu0 %v26454_v4  ;;  %33513 = vst [vmem:[#allocation106_spill] sm:$0xff] %v26540_v26  ;;  %33516 = vst [vmem:[#allocation107_spill] sm:$0xff] %v26561_v62  ;;  %v1337_v41 = vrot.slane %v33518_v11, 2  ;;  %v1402_v59 = vrot.slane %v26134_v53, 2  ;;  %v26930_v52 = vld [vmem:[%s25620_s27 + $0xe8] sm:$0x3f] }
  0x8a   : > { %20248 = vmatmul.mubr.msk.f32.gmra.mrb[20].mxu1 %vm749_vm1, %v25881_v55  ;;  %v26504_v42 = vsel %vm2132_vm4, %v2173_v27, %v2174_v15  ;;  %v1330_v55 = vrot.slane %v25637_v25, 2  ;;  %v2191_v25 = vrot.slane %v26023_v20, 4  ;;  %v1334_v27 = vrot.slane %v25661_v36, 2  ;;  %v439_v36 = vld [vmem:[%s32669_s1 + $0x78] sm:$0xff] }
  0x8b   : > { %21568 = vmatmul.mubr.msk.f32.gmra.mrb[4].mxu0 %vm749_vm1, %v26465_v7  ;;  %20250 = vmatprep.mubr.msk.f32.mxu1 %vm749_vm1, %v25995_v16  ;;  %33508 = vst [vmem:[#allocation103_spill] sm:$0xff] %v26504_v42  ;;  %v1335_v15 = vrot.slane %v25664_v37, 2  ;;  %v26903_v7 = vld [vmem:[%s25620_s27 + $0xd0] sm:$0x3f]  ;;  %v2583_v45 = vrot.slane %v26930_v52, 5 }
  0x8c   : > { %21570 = vmatprep.mubr.msk.f32.mxu0 %vm749_vm1, %v26469_v9  ;;  %v1331_v18 = vsel %vm1328_vm2, %v1329_v48, %v1330_v55  ;;  %v1333_v37 = vsel %vm1328_vm2, %v1330_v55, %v1332_v24  ;;  %v26578_v30 = vsel %vm2132_vm4, %v2189_v17, %v2191_v25  ;;  %v2196_v48 = vrot.slane %v26058_v61, 4  ;;  %v440_v25 = vld [vmem:[%s32669_s1 + $0x80] sm:$0xff] }
  0x8d   : > { %33517 = vst [vmem:[#allocation108_spill] sm:$0xff] %v26578_v30  ;;  %v26584_v60 = vsel %vm1328_vm2, %v1334_v27, %v1335_v15  ;;  %v2198_v55 = vrot.slane %v26066_v39, 4  ;;  %v2199_v17 = vrot.slane %v26069_v8, 4  ;;  %v23061_v24 = vpack.c.bf16 %v439_v36, %v438_v32  ;;  %v33522_v27 = vld [vmem:[#allocation14_spill] sm:$0xff] }
  0x8e   : > { %20251 = vmatmul.mubr.msk.f32.gmra.mrb[22].mxu1 %vm749_vm1, %v25998_v10  ;;  %33519 = vst [vmem:[#allocation10_spill] sm:$0xff] %v26584_v60  ;;  %v26606_v57 = vsel %vm1328_vm2, %v1335_v15, %v1337_v41  ;;  %v26612_v32 = vsel %vm2132_vm4, %v2194_v44, %v2196_v48  ;;  %v26615_v36 = vsel %vm1328_vm2, %v1339_v1, %v1340_v54  ;;  %v2203_v15 = vrot.slane %v26104_v13, 4 }
  0x8f   : > { %21571 = vmatmul.mubr.msk.f32.gmra.mrb[6].mxu0 %vm749_vm1, %v26483_v14  ;;  %20253 = vmatprep.mubr.msk.f32.mxu1 %vm749_vm1, %v26031_v3  ;;  %33521 = vst [vmem:[#allocation110_spill] sm:$0xff] %v26606_v57  ;;  %33523 = vst [vmem:[#allocation14_spill] sm:$0xff] %v26612_v32  ;;  %v26620_v11 = vsel %vm2132_vm4, %v2198_v55, %v2199_v17  ;;  %v2204_v41 = vrot.slane %v26107_v2, 4  ;;  %v2206_v48 = vrot.slane %v26134_v53, 4  ;;  %v2208_v55 = vrot.slane %v26144_v28, 4  ;;  %v26877_v14 = vld [vmem:[%s25620_s27 + $0xc0] sm:$0xff] }
  0x90   : > { %21573 = vmatprep.mubr.msk.f32.mxu0 %vm749_vm1, %v26487_v19  ;;  %33524 = vst [vmem:[#allocation111_spill] sm:$0xff] %v26615_v36  ;;  %33525 = vst [vmem:[#allocation112_spill] sm:$0xff] %v26620_v11  ;;  %v2575_v9 = vrot.slane %v26877_v14, 5 }
  0x91   : > { %v26642_v1 = vsel %vm2132_vm4, %v2203_v15, %v2204_v41  ;;  %v33532_v15 = vld [vmem:[#allocation11_spill] sm:$0xff] }
  0x92   : > { %20254 = vmatmul.mubr.msk.f32.gmra.mrb[24].mxu1 %vm749_vm1, %v26034_v56  ;;  %33528 = vst [vmem:[#allocation115_spill] sm:$0xff] %v26642_v1 }
  0x93   : > { %21574 = vmatmul.mubr.msk.f32.gmra.mrb[8].mxu0 %vm749_vm1, %v26500_v33  ;;  %20256 = vmatprep.mubr.msk.f32.mxu1 %vm749_vm1, %v26066_v39  ;;  %v26860_v33 = vld [vmem:[%s25620_s27 + $0xb8] sm:$0x3f] }
  0x94   : > { %21576 = vmatprep.mubr.msk.f32.mxu0 %vm749_vm1, %v26504_v42  ;;  %v33564_v42 = vld [vmem:[#allocation41_spill] sm:$0xff]  ;;  %v2573_v19 = vrot.slane %v26860_v33, 5 }
  0x96   : > { %20257 = vmatmul.mubr.msk.f32.gmra.mrb[26].mxu1 %vm749_vm1, %v26069_v8 }
  0x97   : > { %21577 = vmatmul.mubr.msk.f32.gmra.mrb[10].mxu0 %vm749_vm1, %v26517_v5  ;;  %20259 = vmatprep.mubr.msk.f32.mxu1 %vm749_vm1, %v26104_v13  ;;  %v26845_v5 = vld [vmem:[%s25620_s27 + $0xb0] sm:$0xff] }
  0x98   : > { %21579 = vmatprep.mubr.msk.f32.mxu0 %vm749_vm1, %v26521_v6  ;;  %v1387_v6 = vrot.slane %v26023_v20, 2 }
  0x9a   : > { %20260 = vmatmul.mubr.msk.f32.gmra.mrb[28].mxu1 %vm749_vm1, %v26107_v2 }
  0x9b   : > { %21580 = vmatmul.mubr.msk.f32.gmra.mrb[12].mxu0 %vm749_vm1, %v26534_v58  ;;  %20262 = vmatprep.mubr.msk.f32.mxu1 %vm749_vm1, %v26144_v28  ;;  %v26811_v58 = vld [vmem:[%s25620_s27 + $0x98] sm:$0xff] }
  0x9c   : > { %21582 = vmatprep.mubr.msk.f32.mxu0 %vm749_vm1, %v26540_v26 }
  0x9e   : > { %20263 = vmatmul.mubr.msk.f32.gmra.mrb[30].mxu1 %vm749_vm1, %v26147_v22 }
  0x9f   : > { %21583 = vmatmul.mubr.msk.f32.gmra.mrb[14].mxu0 %vm749_vm1, %v26555_v51  ;;  %20273 = vmatprep.mubr.msk.f32.mxu1 %vm749_vm1, %v1331_v18  ;;  %v26590_v18 = vsel %vm2132_vm4, %v2193_v43, %v2194_v44  ;;  %v1342_v43 = vrot.slane %v33522_v27, 2  ;;  %v26624_v27 = vpack.c.bf16 %v441_v46, %v440_v25  ;;  %v2209_v25 = vrot.slane %v26147_v22, 4 }
  0xa0   : > { %21585 = vmatprep.mubr.msk.f32.mxu0 %vm749_vm1, %v26561_v62  ;;  %33520 = vst [vmem:[#allocation109_spill] sm:$0xff] %v26590_v18  ;;  %v26792_v62 = vld [vmem:[%s25620_s27 + $0x88] sm:$0x3f] }
  0xa1   : > { %v26660_v46 = vsel %vm2132_vm4, %v2208_v55, %v2209_v25 }
  0xa2   : > { %20274 = vmatmul.mubr.msk.f32.vlgmr.msra.gmra.mrb[0].mxu1 %vm749_vm1, %v1333_v37  ;;  %v2201_v37 = vrot.slane %v26093_v34, 4  ;;  %33531 = vst [vmem:[#allocation117_spill] sm:$0xff] %v26660_v46 }
  0xa3   : > { %21586 = vmatmul.mubr.msk.f32.gmra.mrb[16].mxu0 %vm749_vm1, %v26578_v30  ;;  %20276 = vmatprep.mubr.msk.f32.mxu1 %vm749_vm1, %v26584_v60  ;;  %v33555_v30 = vld [vmem:[#allocation33_spill] sm:$0xff] }
  0xa4   : > { %21588 = vmatprep.mubr.msk.f32.mxu0 %vm749_vm1, %v26590_v18  ;;  %23060 = vmatpush3.bf16.msra.mxu1 %v26372_v49  ;;  %v26633_v49 = vsel %vm1328_vm2, %v1340_v54, %v1342_v43  ;;  %v26638_v44 = vsel %vm2132_vm4, %v2199_v17, %v2201_v37  ;;  %v33529_v54 = vld [vmem:[#allocation9_spill] sm:$0xff]  ;;  %v26656_v17 = vsel %vm2132_vm4, %v2204_v41, %v2206_v48  ;;  %v4400_v43 = vrot.slane %v26289_v12, 4  ;;  %v33535_v48 = vld [vmem:[#allocation83_spill] sm:$0xff]  ;;  %v26776_v18 = vld [vmem:[%s25620_s27 + $0x80] sm:$0xff] }
  0xa5   : > { %23062 = vmatprep.subr.bf16.mxu1 %v23061_v24  ;;  %33526 = vst [vmem:[#allocation113_spill] sm:$0xff] %v26633_v49  ;;  %33527 = vst [vmem:[#allocation114_spill] sm:$0xff] %v26638_v44  ;;  %v4401_v37 = vrot.slane %v26292_v31, 4  ;;  %v4403_v55 = vrot.slane %v33535_v48, 4 }
  0xa6   : > { %20277 = vmatmul.mubr.msk.f32.gmra.mrb[2].mxu1 %vm749_vm1, %v26606_v57  ;;  %33530 = vst [vmem:[#allocation116_spill] sm:$0xff] %v26656_v17 }
  0xa7   : > { %21589 = vmatmul.mubr.msk.f32.gmra.mrb[18].mxu0 %vm749_vm1, %v26612_v32  ;;  %20279 = vmatprep.mubr.msk.f32.mxu1 %vm749_vm1, %v26615_v36  ;;  %v33537_v36 = vld [vmem:[#allocation84_spill] sm:$0xff]  ;;  %v26772_v32 = vld [vmem:[%s25620_s27 + $0x78] sm:$0xff] }
  0xa8   : > { %21591 = vmatprep.mubr.msk.f32.mxu0 %vm749_vm1, %v26620_v11  ;;  %23064 = vmatpush3.bf16.msra.mxu1 %v23061_v24  ;;  %v2211_v24 = vrot.slane %v26172_v0, 4  ;;  %v6260_v57 = vrot.slane %v33537_v36, 4 }
  0xa9   : > { %23066 = vmatprep.subr.bf16.mxu1 %v26624_v27 }
  0xaa   : > { %20280 = vmatmul.mubr.msk.f32.gmra.mrb[4].mxu1 %vm749_vm1, %v26633_v49  ;;  %v26673_v41 = vsel %vm2132_vm4, %v2209_v25, %v2211_v24  ;;  %v26677_v49 = vsel %vm2132_vm4, %v4400_v43, %v4401_v37  ;;  %v26690_v25 = vsel %vm2132_vm4, %v4401_v37, %v4403_v55  ;;  %v6263_v24 = vrot.slane %v26336_v63, 4 }
  0xab   : > { %21592 = vmatmul.mubr.msk.f32.gmra.mrb[20].mxu0 %vm749_vm1, %v26638_v44  ;;  %20282 = vmatprep.mubr.msk.f32.mxu1 %vm749_vm1, %v33529_v54  ;;  %v33533_v54 = vld [vmem:[#allocation13_spill] sm:$0xff]  ;;  %33534 = vst [vmem:[#allocation118_spill] sm:$0xff] %v26673_v41  ;;  %33536 = vst [vmem:[#allocation83_spill] sm:$0xff] %v26677_v49  ;;  %v8155_v37 = vrot.slane %v26368_v23, 4 }
  0xac   : > { %21594 = vmatprep.mubr.msk.f32.mxu0 %vm749_vm1, %v26642_v1  ;;  %33541 = vst [vmem:[#allocation84_spill] sm:$0xff] %v26690_v25  ;;  %v26765_v1 = vld [vmem:[%s25620_s27 + $0x70] sm:$0x3f] }
  0xad   : > { %v2558_v44 = vrot.slane %v26765_v1, 5 }
  0xae   : > { %20283 = vmatmul.mubr.msk.f32.gmra.mrb[6].mxu1 %vm749_vm1, %v33532_v15  ;;  %v33538_v15 = vld [vmem:[#allocation85_spill] sm:$0xff] }
  0xaf   : > { %21595 = vmatmul.mubr.msk.f32.gmra.mrb[22].mxu0 %vm749_vm1, %v26656_v17  ;;  %20285 = vmatprep.mubr.msk.f32.mxu1 %vm749_vm1, %v33533_v54  ;;  %v6261_v60 = vrot.slane %v33538_v15, 4  ;;  %v33543_v54 = vld [vmem:[#allocation20_spill] sm:$0xff] }
  0xb0   : > { %21597 = vmatprep.mubr.msk.f32.mxu0 %vm749_vm1, %v26660_v46  ;;  %v26740_v46 = vld [vmem:[%s25620_s27 + $0x60] sm:$0xff]  ;;  %v33551_v17 = vld [vmem:[#allocation28_spill] sm:$0xff] }
  0xb1   : > { %v26694_v43 = vsel %vm2132_vm4, %v6260_v57, %v6261_v60  ;;  %v26707_v57 = vsel %vm2132_vm4, %v6261_v60, %v6263_v24  ;;  %v33548_v60 = vld [vmem:[#allocation26_spill] sm:$0xff]  ;;  %v26733_v24 = vld [vmem:[%s25620_s27 + $0x58] sm:$0x3f] }
  0xb2   : > { %20286 = vmatmul.mubr.msk.f32.gmra.mrb[8].mxu1 %vm749_vm1, %v33539_v47  ;;  %33542 = vst [vmem:[#allocation85_spill] sm:$0xff] %v26694_v43  ;;  %v8153_v47 = vrot.slane %v26344_v50, 4  ;;  %33545 = vst [vmem:[#allocation119_spill] sm:$0xff] %v26707_v57 }
  0xb3   : > { %21598 = vmatmul.mubr.msk.f32.gmra.mrb[24].mxu0 %vm749_vm1, %v26673_v41  ;;  %20288 = vmatprep.mubr.msk.f32.mxu1 %vm749_vm1, %v33540_v38  ;;  %v33544_v38 = vld [vmem:[#allocation22_spill] sm:$0xff]  ;;  %v33547_v41 = vld [vmem:[#allocation24_spill] sm:$0xff] }
  0xb4   : > { %21600 = vmatprep.mubr.msk.f32.mxu0 %vm749_vm1, %v26677_v49  ;;  %v26711_v55 = vsel %vm2132_vm4, %v8152_v21, %v8153_v47  ;;  %v26714_v49 = vld [vmem:[%s25620_s27 + $0x48] sm:$0xff]  ;;  %v26730_v21 = vsel %vm2132_vm4, %v8153_v47, %v8155_v37  ;;  %v534_v47 = vld [vmem:[%s32669_s1 + $0x370] sm:$0xff] }
  0xb5   : > { %33546 = vst [vmem:[#allocation120_spill] sm:$0xff] %v26711_v55  ;;  %33549 = vst [vmem:[#allocation121_spill] sm:$0xff] %v26730_v21  ;;  %v33552_v37 = vld [vmem:[#allocation31_spill] sm:$0xff] }
  0xb6   : > { %20289 = vmatmul.mubr.msk.f32.gmra.mrb[10].mxu1 %vm749_vm1, %v33543_v54  ;;  %v26718_v54 = vld [vmem:[%s25620_s27 + $0x50] sm:$0xff] }
  0xb7   : > { %21601 = vmatmul.mubr.msk.f32.gmra.mrb[26].mxu0 %vm749_vm1, %v26690_v25  ;;  %20291 = vmatprep.mubr.msk.f32.mxu1 %vm749_vm1, %v33544_v38  ;;  %v2550_v25 = vrot.slane %v26714_v49, 5  ;;  %v2551_v38 = vrot.slane %v26718_v54, 5 }
  0xb8   : > { %21603 = vmatprep.mubr.msk.f32.mxu0 %vm749_vm1, %v26694_v43  ;;  %v2553_v43 = vrot.slane %v26733_v24, 5 }
  0xba   : > { %20292 = vmatmul.mubr.msk.f32.gmra.mrb[12].mxu1 %vm749_vm1, %v33547_v41  ;;  %v26737_v41 = vsel %vm2534_vm5, %v2550_v25, %v2551_v38  ;;  %v535_v25 = vld [vmem:[%s32669_s1 + $0x378] sm:$0xff] }
  0xbb   : > { %21604 = vmatmul.mubr.msk.f32.gmra.mrb[28].mxu0 %vm749_vm1, %v26707_v57  ;;  %20294 = vmatprep.mubr.msk.f32.mxu1 %vm749_vm1, %v33548_v60  ;;  %33550 = vst [vmem:[#allocation122_spill] sm:$0xff] %v26737_v41  ;;  %v2555_v57 = vrot.slane %v26740_v46, 5  ;;  %v26744_v60 = vld [vmem:[%s25620_s27 + $0x68] sm:$0xff] }
  0xbc   : > { %21606 = vmatprep.mubr.msk.f32.mxu0 %vm749_vm1, %v26711_v55  ;;  %v2556_v55 = vrot.slane %v26744_v60, 5 }
  0xbe   : > { %20295 = vmatmul.mubr.msk.f32.gmra.mrb[14].mxu1 %vm749_vm1, %v33551_v17  ;;  %v26762_v17 = vsel %vm2534_vm5, %v2551_v38, %v2553_v43  ;;  %v26769_v11 = vsel %vm2534_vm5, %v2555_v57, %v2556_v55  ;;  %v536_v38 = vld [vmem:[%s32669_s1 + $0x380] sm:$0xff]  ;;  %v537_v43 = vld [vmem:[%s32669_s1 + $0x388] sm:$0xff] }
  0xbf   : > { %21607 = vmatmul.mubr.msk.f32.gmra.mrb[30].mxu0 %vm749_vm1, %v26730_v21  ;;  %20297 = vmatprep.mubr.msk.f32.mxu1 %vm749_vm1, %v33552_v37  ;;  %33553 = vst [vmem:[#allocation123_spill] sm:$0xff] %v26762_v17  ;;  %33554 = vst [vmem:[#allocation124_spill] sm:$0xff] %v26769_v11  ;;  %v2560_v21 = vrot.slane %v26772_v32, 5  ;;  %v2561_v37 = vrot.slane %v26776_v18, 5  ;;  %v33556_v57 = vld [vmem:[#allocation35_spill] sm:$0xff] }
  0xc0   : > { %21617 = vmatprep.mubr.msk.f32.mxu0 %vm749_vm1, %v26737_v41  ;;  %v23253_v41 = vpack.c.bf16 %v535_v25, %v534_v47  ;;  %v2563_v47 = vrot.slane %v26792_v62, 5  ;;  %v26799_v25 = vsel %vm2534_vm5, %v2556_v55, %v2558_v44  ;;  %v26814_v44 = vpack.c.bf16 %v537_v43, %v536_v38  ;;  %v33559_v55 = vld [vmem:[#allocation37_spill] sm:$0xff]  ;;  %v26832_v43 = vld [vmem:[%s25620_s27 + $0xa0] sm:$0x3f] }
  0xc1   : > { %33557 = vst [vmem:[#allocation125_spill] sm:$0xff] %v26799_v25  ;;  %v26804_v51 = vsel %vm2534_vm5, %v2560_v21, %v2561_v37  ;;  %v33560_v21 = vld [vmem:[#allocation39_spill] sm:$0xff] }
  0xc2   : > { %20298 = vmatmul.mubr.msk.f32.gmra.mrb[16].mxu1 %vm749_vm1, %v33555_v30  ;;  %v1384_v30 = vrot.slane %v25995_v16, 2  ;;  %33558 = vst [vmem:[#allocation126_spill] sm:$0xff] %v26804_v51 }
  0xc3   : > { %21618 = vmatmul.mubr.msk.f32.vlgmr.msra.gmra.mrb[0].mxu0 %vm749_vm1, %v26762_v17  ;;  %20300 = vmatprep.mubr.msk.f32.mxu1 %vm749_vm1, %v33556_v57  ;;  %v1385_v17 = vrot.slane %v25998_v10, 2  ;;  %v26807_v57 = vld [vmem:[%s25620_s27 + $0x90] sm:$0xff] }
  0xc4   : > { %23252 = vmatpush3.bf16.msra.mxu0 %v26454_v4  ;;  %21620 = vmatprep.mubr.msk.f32.mxu0 %vm749_vm1, %v26769_v11  ;;  %v2565_v26 = vrot.slane %v26807_v57, 5  ;;  %v2566_v4 = vrot.slane %v26811_v58, 5  ;;  %v26823_v11 = vsel %vm2534_vm5, %v2561_v37, %v2563_v47  ;;  %v26841_v47 = vld [vmem:[%s25620_s27 + $0xa8] sm:$0xff] }
  0xc5   : > { %23254 = vmatprep.subr.bf16.mxu0 %v23253_v41  ;;  %33561 = vst [vmem:[#allocation127_spill] sm:$0xff] %v26823_v11  ;;  %v26829_v38 = vsel %vm1328_vm2, %v1384_v30, %v1385_v17  ;;  %v2571_v30 = vrot.slane %v26845_v5, 5 }
  0xc6   : > { %20301 = vmatmul.mubr.msk.f32.gmra.mrb[18].mxu1 %vm749_vm1, %v33559_v55  ;;  %33562 = vst [vmem:[#allocation128_spill] sm:$0xff] %v26829_v38  ;;  %v2568_v55 = vrot.slane %v26832_v43, 5  ;;  %v26838_v37 = vsel %vm2534_vm5, %v2565_v26, %v2566_v4  ;;  %v26856_v26 = vsel %vm1328_vm2, %v1385_v17, %v1387_v6  ;;  %v1395_v6 = vrot.slane %v26069_v8, 2 }
  0xc7   : > { %21621 = vmatmul.mubr.msk.f32.gmra.mrb[2].mxu0 %vm749_vm1, %v26799_v25  ;;  %20303 = vmatprep.mubr.msk.f32.mxu1 %vm749_vm1, %v33560_v21  ;;  %v1389_v25 = vrot.slane %v26031_v3, 2  ;;  %v1390_v21 = vrot.slane %v26034_v56, 2  ;;  %33563 = vst [vmem:[#allocation129_spill] sm:$0xff] %v26838_v37  ;;  %33565 = vst [vmem:[#allocation130_spill] sm:$0xff] %v26856_v26 }
  0xc8   : > { %21623 = vmatprep.mubr.msk.f32.mxu0 %vm749_vm1, %v26804_v51  ;;  %23256 = vmatpush3.bf16.msra.mxu0 %v23253_v41  ;;  %v2570_v51 = vrot.slane %v26841_v47, 5  ;;  %v1392_v41 = vrot.slane %v26058_v61, 2 }
  0xc9   : > { %23258 = vmatprep.subr.bf16.mxu0 %v26814_v44 }
  0xca   : > { %20304 = vmatmul.mubr.msk.f32.gmra.mrb[20].mxu1 %vm749_vm1, %v33564_v42  ;;  %v26866_v42 = vsel %vm2534_vm5, %v2566_v4, %v2568_v55  ;;  %v26874_v17 = vsel %vm2534_vm5, %v2570_v51, %v2571_v30  ;;  %v26891_v51 = vsel %vm1328_vm2, %v1390_v21, %v1392_v41  ;;  %v1397_v55 = vrot.slane %v26093_v34, 2 }
  0xcb   : > { %21624 = vmatmul.mubr.msk.f32.gmra.mrb[4].mxu0 %vm749_vm1, %v26823_v11  ;;  %20306 = vmatprep.mubr.msk.f32.mxu1 %vm749_vm1, %v26829_v38  ;;  %33566 = vst [vmem:[#allocation131_spill] sm:$0xff] %v26866_v42  ;;  %v26869_v11 = vsel %vm1328_vm2, %v1389_v25, %v1390_v21  ;;  %v1394_v38 = vrot.slane %v26066_v39, 2  ;;  %33568 = vst [vmem:[#allocation133_spill] sm:$0xff] %v26874_v17  ;;  %v26894_v25 = vsel %vm2534_vm5, %v2571_v30, %v2573_v19  ;;  %v26912_v30 = vld [vmem:[%s25620_s27 + $0xd8] sm:$0xff] }
  0xcc   : > { %21626 = vmatprep.mubr.msk.f32.mxu0 %vm749_vm1, %v26838_v37  ;;  %33567 = vst [vmem:[#allocation132_spill] sm:$0xff] %v26869_v11  ;;  %v26881_v37 = vld [vmem:[%s25620_s27 + $0xc8] sm:$0xff]  ;;  %33569 = vst [vmem:[#allocation134_spill] sm:$0xff] %v26891_v51  ;;  %v1400_v21 = vrot.slane %v26107_v2, 2  ;;  %v2580_v41 = vrot.slane %v26912_v30, 5 }
  0xcd   : > { %v2576_v4 = vrot.slane %v26881_v37, 5  ;;  %33570 = vst [vmem:[#allocation135_spill] sm:$0xff] %v26894_v25 }
  0xce   : > { %20307 = vmatmul.mubr.msk.f32.gmra.mrb[22].mxu1 %vm749_vm1, %v26856_v26  ;;  %v26900_v26 = vsel %vm1328_vm2, %v1394_v38, %v1395_v6 }
  0xcf   : > { %21627 = vmatmul.mubr.msk.f32.gmra.mrb[6].mxu0 %vm749_vm1, %v26866_v42  ;;  %20309 = vmatprep.mubr.msk.f32.mxu1 %vm749_vm1, %v26869_v11  ;;  %33571 = vst [vmem:[#allocation136_spill] sm:$0xff] %v26900_v26  ;;  %v2578_v42 = vrot.slane %v26903_v7, 5  ;;  %v1399_v11 = vrot.slane %v26104_v13, 2  ;;  %v26909_v19 = vsel %vm2534_vm5, %v2575_v9, %v2576_v4  ;;  %v26926_v9 = vsel %vm1328_vm2, %v1395_v6, %v1397_v55 }
  0xd0   : > { %21629 = vmatprep.mubr.msk.f32.mxu0 %vm749_vm1, %v26874_v17  ;;  %33572 = vst [vmem:[#allocation137_spill] sm:$0xff] %v26909_v19  ;;  %v26916_v17 = vld [vmem:[%s25620_s27 + $0xe0] sm:$0xff]  ;;  %33573 = vst [vmem:[#allocation138_spill] sm:$0xff] %v26926_v9  ;;  %v1405_v6 = vrot.slane %v26147_v22, 2 }
  0xd1   : > { %v2581_v38 = vrot.slane %v26916_v17, 5 }
  0xd2   : > { %20310 = vmatmul.mubr.msk.f32.gmra.mrb[24].mxu1 %vm749_vm1, %v26891_v51  ;;  %v26936_v51 = vsel %vm2534_vm5, %v2576_v4, %v2578_v42  ;;  %v2586_v42 = vrot.slane %v26951_v29, 5  ;;  %v26973_v29 = vld [vmem:[%s25620_s27 + $0x100] sm:$0x3f] }
  0xd3   : > { %21630 = vmatmul.mubr.msk.f32.gmra.mrb[8].mxu0 %vm749_vm1, %v26894_v25  ;;  %20312 = vmatprep.mubr.msk.f32.mxu1 %vm749_vm1, %v26900_v26  ;;  %33574 = vst [vmem:[#allocation139_spill] sm:$0xff] %v26936_v51  ;;  %v26939_v25 = vsel %vm1328_vm2, %v1399_v11, %v1400_v21  ;;  %v1404_v26 = vrot.slane %v26144_v28, 2  ;;  %v26944_v55 = vsel %vm2534_vm5, %v2580_v41, %v2581_v38  ;;  %v1407_v41 = vrot.slane %v26172_v0, 2 }
  0xd4   : > { %21632 = vmatprep.mubr.msk.f32.mxu0 %vm749_vm1, %v26909_v19  ;;  %33575 = vst [vmem:[#allocation140_spill] sm:$0xff] %v26939_v25  ;;  %33576 = vst [vmem:[#allocation141_spill] sm:$0xff] %v26944_v55  ;;  %v2585_v19 = vrot.slane %v26947_v35, 5  ;;  %v26961_v11 = vsel %vm1328_vm2, %v1400_v21, %v1402_v59  ;;  %v26964_v4 = vsel %vm2534_vm5, %v2581_v38, %v2583_v45  ;;  %v26981_v45 = vld [vmem:[%s25620_s27 + $0x8] sm:$0xff] }
  0xd5   : > { %33578 = vst [vmem:[#allocation143_spill] sm:$0xff] %v26961_v11  ;;  %33579 = vst [vmem:[#allocation144_spill] sm:$0xff] %v26964_v4  ;;  %v1732_v21 = vrot.slane %v26981_v45, 3 }
  0xd6   : > { %20313 = vmatmul.mubr.msk.f32.gmra.mrb[26].mxu1 %vm749_vm1, %v26926_v9  ;;  %v26970_v9 = vsel %vm1328_vm2, %v1404_v26, %v1405_v6  ;;  %33582 = vst [vmem:[#allocation147_spill] sm:$0xff] %v26981_v45  ;;  %v26985_v38 = vsel %vm2534_vm5, %v2585_v19, %v2586_v42  ;;  %v2590_v26 = vrot.slane %v25995_v16, 5  ;;  %v26999_v45 = vld [vmem:[%s25620_s27 + $0x10] sm:$0x3f]  ;;  %v2593_v16 = vrot.slane %v26023_v20, 5 }
  0xd7   : > { %21633 = vmatmul.mubr.msk.f32.gmra.mrb[10].mxu0 %vm749_vm1, %v26936_v51  ;;  %20315 = vmatprep.mubr.msk.f32.mxu1 %vm749_vm1, %v26939_v25  ;;  %33580 = vst [vmem:[#allocation145_spill] sm:$0xff] %v26970_v9  ;;  %v2588_v51 = vrot.slane %v26973_v29, 5  ;;  %v26977_v25 = vld [vmem:[%s25620_s27] sm:$0xff]  ;;  %33583 = vst [vmem:[#allocation148_spill] sm:$0xff] %v26985_v38  ;;  %v1734_v19 = vrot.slane %v26999_v45, 3 }
  0xd8   : > { %21635 = vmatprep.mubr.msk.f32.mxu0 %vm749_vm1, %v26944_v55  ;;  %33581 = vst [vmem:[#allocation146_spill] sm:$0xff] %v26977_v25  ;;  %v1731_v59 = vrot.slane %v26977_v25, 3  ;;  %v2591_v55 = vrot.slane %v25998_v10, 5  ;;  %v26996_v25 = vsel %vm1328_vm2, %v1405_v6, %v1407_v41  ;;  %v27014_v41 = vld [vmem:[%s25620_s27 + $0x20] sm:$0xff] }
  0xd9   : > { %33584 = vst [vmem:[#allocation149_spill] sm:$0xff] %v26996_v25  ;;  %v27006_v10 = vsel %vm2534_vm5, %v2586_v42, %v2588_v51  ;;  %33587 = vst [vmem:[#allocation152_spill] sm:$0xff] %v27014_v41  ;;  %v2596_v51 = vrot.slane %v26034_v56, 5  ;;  %v442_v42 = vld [vmem:[%s32669_s1 + $0x90] sm:$0xff] }
  0xda   : > { %20316 = vmatmul.mubr.msk.f32.gmra.mrb[28].mxu1 %vm749_vm1, %v26961_v11  ;;  %33585 = vst [vmem:[#allocation150_spill] sm:$0xff] %v27006_v10  ;;  %v1733_v11 = vsel %vm1730_vm3, %v1731_v59, %v1732_v21  ;;  %v27018_v20 = vsel %vm2534_vm5, %v2590_v26, %v2591_v55  ;;  %v443_v59 = vld [vmem:[%s32669_s1 + $0x98] sm:$0xff]  ;;  %v27035_v56 = vsel %vm2534_vm5, %v2591_v55, %v2593_v16  ;;  %v27038_v26 = vld [vmem:[%s25620_s27 + $0x28] sm:$0x3f]  ;;  %v2600_v16 = vrot.slane %v26066_v39, 5 }
  0xdb   : > { %21636 = vmatmul.mubr.msk.f32.gmra.mrb[12].mxu0 %vm749_vm1, %v26964_v4  ;;  %20318 = vmatprep.mubr.msk.f32.mxu1 %vm749_vm1, %v26970_v9  ;;  %v27010_v4 = vld [vmem:[%s25620_s27 + $0x18] sm:$0xff]  ;;  %v1737_v9 = vrot.slane %v27014_v41, 3  ;;  %33588 = vst [vmem:[#allocation153_spill] sm:$0xff] %v27018_v20  ;;  %33589 = vst [vmem:[#allocation154_spill] sm:$0xff] %v27035_v56 }
  0xdc   : > { %21638 = vmatprep.mubr.msk.f32.mxu0 %vm749_vm1, %v26985_v38  ;;  %33586 = vst [vmem:[#allocation151_spill] sm:$0xff] %v27010_v4  ;;  %v1736_v6 = vrot.slane %v27010_v4, 3  ;;  %v2595_v38 = vrot.slane %v26031_v3, 5  ;;  %v1735_v3 = vsel %vm1730_vm3, %v1732_v21, %v1734_v19  ;;  %v27048_v4 = vld [vmem:[%s25620_s27 + $0x30] sm:$0xff]  ;;  %v27052_v21 = vld [vmem:[%s25620_s27 + $0x38] sm:$0xff] }
  0xdd   : > { %33591 = vst [vmem:[#allocation156_spill] sm:$0xff] %v27048_v4  ;;  %v1742_v55 = vrot.slane %v27052_v21, 3 }
  0xde   : > { %20319 = vmatmul.mubr.msk.f32.gmra.mrb[30].mxu1 %vm749_vm1, %v26996_v25  ;;  %v1739_v25 = vrot.slane %v27038_v26, 3  ;;  %v27044_v41 = vsel %vm1730_vm3, %v1736_v6, %v1737_v9  ;;  %v27056_v19 = vsel %vm2534_vm5, %v2595_v38, %v2596_v51  ;;  %v23069_v6 = vpack.c.bf16 %v443_v59, %v442_v42 }
  0xdf   : > { %21639 = vmatmul.mubr.msk.f32.gmra.mrb[14].mxu0 %vm749_vm1, %v27006_v10  ;;  %20329 = vmatprep.mubr.msk.f32.mxu1 %vm749_vm1, %v1733_v11  ;;  %33590 = vst [vmem:[#allocation155_spill] sm:$0xff] %v27044_v41  ;;  %v2598_v10 = vrot.slane %v26058_v61, 5  ;;  %v1741_v11 = vrot.slane %v27048_v4, 3  ;;  %33592 = vst [vmem:[#allocation157_spill] sm:$0xff] %v27056_v19  ;;  %v444_v61 = vld [vmem:[%s32669_s1 + $0xa0] sm:$0xff]  ;;  %v445_v4 = vld [vmem:[%s32669_s1 + $0xa8] sm:$0xff] }
  0xe0   : > { %21641 = vmatprep.mubr.msk.f32.mxu0 %vm749_vm1, %v27018_v20  ;;  %v2601_v20 = vrot.slane %v26069_v8, 5  ;;  %v27072_v39 = vsel %vm1730_vm3, %v1737_v9, %v1739_v25  ;;  %v27075_v8 = vld [vmem:[%s25620_s27 + $0x40] sm:$0x3f]  ;;  %v2605_v9 = vrot.slane %v26104_v13, 5 }
  0xe1   : > { %33593 = vst [vmem:[#allocation158_spill] sm:$0xff] %v27072_v39  ;;  %v1744_v38 = vrot.slane %v27075_v8, 3  ;;  %v27081_v42 = vsel %vm2534_vm5, %v2596_v51, %v2598_v10  ;;  %v27084_v59 = vsel %vm1730_vm3, %v1741_v11, %v1742_v55  ;;  %v2611_v10 = vrot.slane %v26147_v22, 5 }
  0xe2   : > { %20330 = vmatmul.mubr.msk.f32.vlgmr.msra.gmra.mrb[0].mxu1 %vm749_vm1, %v1735_v3  ;;  %33594 = vst [vmem:[#allocation159_spill] sm:$0xff] %v27081_v42  ;;  %33595 = vst [vmem:[#allocation160_spill] sm:$0xff] %v27084_v59  ;;  %v2603_v3 = vrot.slane %v26093_v34, 5  ;;  %v27089_v25 = vsel %vm2534_vm5, %v2600_v16, %v2601_v20  ;;  %v4666_v51 = vrot.slane %v26289_v12, 5  ;;  %v4667_v11 = vrot.slane %v26292_v31, 5  ;;  %v33604_v16 = vld [vmem:[#allocation47_spill] sm:$0xff] }
  0xe3   : > { %21642 = vmatmul.mubr.msk.f32.gmra.mrb[16].mxu0 %vm749_vm1, %v27035_v56  ;;  %20332 = vmatprep.mubr.msk.f32.mxu1 %vm749_vm1, %v27044_v41  ;;  %33596 = vst [vmem:[#allocation161_spill] sm:$0xff] %v27089_v25  ;;  %v2606_v41 = vrot.slane %v26107_v2, 5  ;;  %v27093_v56 = vpack.c.bf16 %v445_v4, %v444_v61  ;;  %v27102_v34 = vsel %vm1730_vm3, %v1742_v55, %v1744_v38  ;;  %v2608_v2 = vrot.slane %v26134_v53, 5  ;;  %v33603_v55 = vld [vmem:[#allocation45_spill] sm:$0xff]  ;;  %v33608_v38 = vld [vmem:[#allocation51_spill] sm:$0xff] }
  0xe4   : > { %21644 = vmatprep.mubr.msk.f32.mxu0 %vm749_vm1, %v27056_v19  ;;  %23068 = vmatpush3.bf16.msra.mxu1 %v26624_v27  ;;  %33597 = vst [vmem:[#allocation162_spill] sm:$0xff] %v27102_v34  ;;  %v27107_v13 = vsel %vm2534_vm5, %v2601_v20, %v2603_v3  ;;  %v2610_v4 = vrot.slane %v26144_v28, 5  ;;  %v33600_v20 = vld [vmem:[#allocation43_spill] sm:$0xff]  ;;  %v2613_v28 = vrot.slane %v26172_v0, 5  ;;  %v27146_v12 = vsel %vm2534_vm5, %v4666_v51, %v4667_v11  ;;  %v33607_v61 = vld [vmem:[#allocation49_spill] sm:$0xff] }
  0xe5   : > { %23070 = vmatprep.subr.bf16.mxu1 %v23069_v6  ;;  %33598 = vst [vmem:[#allocation163_spill] sm:$0xff] %v27107_v13  ;;  %v27111_v27 = vsel %vm2534_vm5, %v2605_v9, %v2606_v41  ;;  %v27125_v53 = vsel %vm2534_vm5, %v2606_v41, %v2608_v2  ;;  %v4669_v41 = vrot.slane %v33535_v48, 5  ;;  %33606 = vst [vmem:[#allocation168_spill] sm:$0xff] %v27146_v12  ;;  %v6526_v31 = vrot.slane %v33537_v36, 5  ;;  %v33611_v2 = vld [vmem:[#allocation53_spill] sm:$0xff] }
  0xe6   : > { %20333 = vmatmul.mubr.msk.f32.gmra.mrb[2].mxu1 %vm749_vm1, %v27072_v39  ;;  %33599 = vst [vmem:[#allocation164_spill] sm:$0xff] %v27111_v27  ;;  %33601 = vst [vmem:[#allocation165_spill] sm:$0xff] %v27125_v53  ;;  %v27129_v22 = vsel %vm2534_vm5, %v2610_v4, %v2611_v10  ;;  %v27142_v0 = vsel %vm2534_vm5, %v2611_v10, %v2613_v28  ;;  %v6529_v3 = vrot.slane %v26336_v63, 5  ;;  %v8419_v9 = vrot.slane %v26344_v50, 5  ;;  %v33612_v4 = vld [vmem:[#allocation55_spill] sm:$0xff]  ;;  %v33615_v51 = vld [vmem:[#allocation57_spill] sm:$0xff] }
  0xe7   : > { %21645 = vmatmul.mubr.msk.f32.gmra.mrb[18].mxu0 %vm749_vm1, %v27081_v42  ;;  %20335 = vmatprep.mubr.msk.f32.mxu1 %vm749_vm1, %v27084_v59  ;;  %33602 = vst [vmem:[#allocation166_spill] sm:$0xff] %v27129_v22  ;;  %33605 = vst [vmem:[#allocation167_spill] sm:$0xff] %v27142_v0  ;;  %v27159_v48 = vsel %vm2534_vm5, %v4667_v11, %v4669_v41  ;;  %v8421_v10 = vrot.slane %v26368_v23, 5  ;;  %v2952_v50 = vrot.slane %v26714_v49, 6  ;;  %v2953_v28 = vrot.slane %v26718_v54, 6  ;;  %v33616_v11 = vld [vmem:[#allocation59_spill] sm:$0xff] }
  0xe8   : > { %21647 = vmatprep.mubr.msk.f32.mxu0 %vm749_vm1, %v27089_v25  ;;  %23072 = vmatpush3.bf16.msra.mxu1 %v23069_v6  ;;  %v6527_v6 = vrot.slane %v33538_v15, 5  ;;  %33609 = vst [vmem:[#allocation169_spill] sm:$0xff] %v27159_v48  ;;  %v8418_v15 = vrot.slane %v26341_v40, 5  ;;  %v2955_v49 = vrot.slane %v26733_v24, 6  ;;  %v2957_v41 = vrot.slane %v26740_v46, 6  ;;  %v33620_v24 = vld [vmem:[#allocation63_spill] sm:$0xff] }
  0xe9   : > { %23074 = vmatprep.subr.bf16.mxu1 %v27093_v56  ;;  %v27193_v23 = vsel %vm2534_vm5, %v8419_v9, %v8421_v10  ;;  %v27197_v54 = vsel %vm2936_vm6, %v2952_v50, %v2953_v28  ;;  %v2960_v10 = vrot.slane %v26765_v1, 6  ;;  %v33624_v1 = vld [vmem:[#allocation67_spill] sm:$0xff]  ;;  %v33636_v39 = vld [vmem:[#allocation76_spill] sm:$0xff] }
  0xea   : > { %20336 = vmatmul.mubr.msk.f32.gmra.mrb[4].mxu1 %vm749_vm1, %v27102_v34  ;;  %v27163_v36 = vsel %vm2534_vm5, %v6526_v31, %v6527_v6  ;;  %v27176_v63 = vsel %vm2534_vm5, %v6527_v6, %v6529_v3  ;;  %v27180_v40 = vsel %vm2534_vm5, %v8418_v15, %v8419_v9  ;;  %33617 = vst [vmem:[#allocation173_spill] sm:$0xff] %v27193_v23  ;;  %33618 = vst [vmem:[#allocation174_spill] sm:$0xff] %v27197_v54  ;;  %v33619_v6 = vld [vmem:[#allocation61_spill] sm:$0xff]  ;;  %v538_v3 = vld [vmem:[%s32669_s1 + $0x390] sm:$0xff] }
  0xeb   : > { %21648 = vmatmul.mubr.msk.f32.gmra.mrb[20].mxu0 %vm749_vm1, %v27107_v13  ;;  %20338 = vmatprep.mubr.msk.f32.mxu1 %vm749_vm1, %v33600_v20  ;;  %33610 = vst [vmem:[#allocation170_spill] sm:$0xff] %v27163_v36  ;;  %33613 = vst [vmem:[#allocation171_spill] sm:$0xff] %v27176_v63  ;;  %v2958_v31 = vrot.slane %v26744_v60, 6  ;;  %v539_v15 = vld [vmem:[%s32669_s1 + $0x398] sm:$0xff]  ;;  %v27216_v9 = vsel %vm2936_vm6, %v2953_v28, %v2955_v49  ;;  %v541_v28 = vld [vmem:[%s32669_s1 + $0x3a8] sm:$0xff]  ;;  %v2978_v34 = vrot.slane %v26881_v37, 6 }
  0xec   : > { %21650 = vmatprep.mubr.msk.f32.mxu0 %vm749_vm1, %v27111_v27  ;;  %33614 = vst [vmem:[#allocation172_spill] sm:$0xff] %v27180_v40  ;;  %33621 = vst [vmem:[#allocation175_spill] sm:$0xff] %v27216_v9  ;;  %v33627_v20 = vld [vmem:[#allocation69_spill] sm:$0xff]  ;;  %v33635_v59 = vld [vmem:[#allocation75_spill] sm:$0xff] }
  0xed   : > { %v27220_v50 = vsel %vm2936_vm6, %v2957_v41, %v2958_v31  ;;  %v27240_v49 = vsel %vm2936_vm6, %v2958_v31, %v2960_v10  ;;  %v2965_v41 = vrot.slane %v26792_v62, 6  ;;  %v2972_v31 = vrot.slane %v26841_v47, 6 }
  0xee   : > { %20339 = vmatmul.mubr.msk.f32.gmra.mrb[6].mxu1 %vm749_vm1, %v33603_v55  ;;  %33622 = vst [vmem:[#allocation176_spill] sm:$0xff] %v27220_v50  ;;  %33625 = vst [vmem:[#allocation177_spill] sm:$0xff] %v27240_v49  ;;  %v2973_v10 = vrot.slane %v26845_v5, 6 }
  0xef   : > { %21651 = vmatmul.mubr.msk.f32.gmra.mrb[22].mxu0 %vm749_vm1, %v27125_v53  ;;  %20341 = vmatprep.mubr.msk.f32.mxu1 %vm749_vm1, %v33604_v16 }
  0xf0   : > { %21653 = vmatprep.mubr.msk.f32.mxu0 %vm749_vm1, %v27129_v22 }
  0xf2   : > { %20342 = vmatmul.mubr.msk.f32.gmra.mrb[8].mxu1 %vm749_vm1, %v33607_v61 }
  0xf3   : > { %21654 = vmatmul.mubr.msk.f32.gmra.mrb[24].mxu0 %vm749_vm1, %v27142_v0  ;;  %20344 = vmatprep.mubr.msk.f32.mxu1 %vm749_vm1, %v33608_v38  ;;  %v33654_v38 = vld [vmem:[#allocation152_spill] sm:$0xff] }
  0xf4   : > { %21656 = vmatprep.mubr.msk.f32.mxu0 %vm749_vm1, %v27146_v12  ;;  %v2968_v12 = vrot.slane %v26811_v58, 6  ;;  %v2139_v61 = vrot.slane %v33654_v38, 4 }
  0xf6   : > { %20345 = vmatmul.mubr.msk.f32.gmra.mrb[10].mxu1 %vm749_vm1, %v33611_v2  ;;  %v33653_v2 = vld [vmem:[#allocation151_spill] sm:$0xff] }
  0xf7   : > { %21657 = vmatmul.mubr.msk.f32.gmra.mrb[26].mxu0 %vm749_vm1, %v27159_v48  ;;  %20347 = vmatprep.mubr.msk.f32.mxu1 %vm749_vm1, %v33612_v4  ;;  %v540_v48 = vld [vmem:[%s32669_s1 + $0x3a0] sm:$0xff] }
  0xf8   : > { %21659 = vmatprep.mubr.msk.f32.mxu0 %vm749_vm1, %v27163_v36  ;;  %v23261_v36 = vpack.c.bf16 %v539_v15, %v538_v3  ;;  %v2967_v15 = vrot.slane %v26807_v57, 6  ;;  %v27248_v55 = vpack.c.bf16 %v541_v28, %v540_v48  ;;  %v33631_v28 = vld [vmem:[#allocation73_spill] sm:$0xff] }
  0xfa   : > { %20348 = vmatmul.mubr.msk.f32.gmra.mrb[12].mxu1 %vm749_vm1, %v33615_v51  ;;  %v27263_v48 = vsel %vm2936_vm6, %v2967_v15, %v2968_v12  ;;  %v2977_v15 = vrot.slane %v26877_v14, 6 }
  0xfb   : > { %21660 = vmatmul.mubr.msk.f32.gmra.mrb[28].mxu0 %vm749_vm1, %v27176_v63  ;;  %20350 = vmatprep.mubr.msk.f32.mxu1 %vm749_vm1, %v33616_v11  ;;  %v2963_v63 = vrot.slane %v26776_v18, 6  ;;  %33630 = vst [vmem:[#allocation180_spill] sm:$0xff] %v27263_v48 }
  0xfc   : > { %21662 = vmatprep.mubr.msk.f32.mxu0 %vm749_vm1, %v27180_v40  ;;  %v2962_v40 = vrot.slane %v26772_v32, 6 }
  0xfd   : > { %v27259_v62 = vsel %vm2936_vm6, %v2963_v63, %v2965_v41  ;;  %v27281_v41 = vsel %vm2936_vm6, %v2972_v31, %v2973_v10  ;;  %v2982_v31 = vrot.slane %v26912_v30, 6 }
  0xfe   : > { %20351 = vmatmul.mubr.msk.f32.gmra.mrb[14].mxu1 %vm749_vm1, %v33619_v6  ;;  %v27244_v3 = vsel %vm2936_vm6, %v2962_v40, %v2963_v63  ;;  %33629 = vst [vmem:[#allocation179_spill] sm:$0xff] %v27259_v62  ;;  %v2970_v40 = vrot.slane %v26832_v43, 6  ;;  %v33632_v63 = vld [vmem:[#allocation74_spill] sm:$0xff]  ;;  %33634 = vst [vmem:[#allocation182_spill] sm:$0xff] %v27281_v41  ;;  %v25275_v6 = vld [vmem:[%s25620_s27 + $0x118] sm:$0x3f] }
  0xff   : > { %21663 = vmatmul.mubr.msk.f32.gmra.mrb[30].mxu0 %vm749_vm1, %v27193_v23  ;;  %20353 = vmatprep.mubr.msk.f32.mxu1 %vm749_vm1, %v33620_v24  ;;  %v33623_v23 = vld [vmem:[#allocation65_spill] sm:$0xff]  ;;  %33626 = vst [vmem:[#allocation178_spill] sm:$0xff] %v27244_v3  ;;  %v27341_v24 = vld [vmem:[%s25620_s27 + $0x110] sm:$0xff]  ;;  %v2995_v11 = vrot.slane %v25275_v6, 6 }
 0x100   : > { %21673 = vmatprep.mubr.msk.f32.mxu0 %vm749_vm1, %v27197_v54  ;;  %v27277_v43 = vsel %vm2936_vm6, %v2968_v12, %v2970_v40  ;;  %v2980_v12 = vrot.slane %v26903_v7, 6  ;;  %v27298_v40 = vsel %vm2936_vm6, %v2977_v15, %v2978_v34  ;;  %v2987_v15 = vrot.slane %v26947_v35, 6 }
 0x101   : > { %33633 = vst [vmem:[#allocation181_spill] sm:$0xff] %v27277_v43  ;;  %33638 = vst [vmem:[#allocation184_spill] sm:$0xff] %v27298_v40 }
 0x102   : > { %20354 = vmatmul.mubr.msk.f32.gmra.mrb[16].mxu1 %vm749_vm1, %v33623_v23  ;;  %v27311_v7 = vsel %vm2936_vm6, %v2978_v34, %v2980_v12  ;;  %v2990_v34 = vrot.slane %v26973_v29, 6  ;;  %v33647_v12 = vld [vmem:[#allocation146_spill] sm:$0xff]  ;;  %v27337_v23 = vld [vmem:[%s25620_s27 + $0x108] sm:$0xff] }
 0x103   : > { %21674 = vmatmul.mubr.msk.f32.vlgmr.msra.gmra.mrb[0].mxu0 %vm749_vm1, %v27216_v9  ;;  %20356 = vmatprep.mubr.msk.f32.mxu1 %vm749_vm1, %v33624_v1  ;;  %33641 = vst [vmem:[#allocation185_spill] sm:$0xff] %v27311_v7  ;;  %v33651_v29 = vld [vmem:[#allocation82_spill] sm:$0xff] }
 0x104   : > { %23260 = vmatpush3.bf16.msra.mxu0 %v26814_v44  ;;  %21676 = vmatprep.mubr.msk.f32.mxu0 %vm749_vm1, %v27220_v50  ;;  %v33628_v44 = vld [vmem:[#allocation71_spill] sm:$0xff]  ;;  %v33680_v50 = vld [vmem:[#allocation98_spill] sm:$0xff] }
 0x105   : > { %23262 = vmatprep.subr.bf16.mxu0 %v23261_v36 }
 0x106   : > { %20357 = vmatmul.mubr.msk.f32.gmra.mrb[18].mxu1 %vm749_vm1, %v33627_v20  ;;  %v33648_v20 = vld [vmem:[#allocation147_spill] sm:$0xff] }
 0x107   : > { %21677 = vmatmul.mubr.msk.f32.gmra.mrb[2].mxu0 %vm749_vm1, %v27240_v49  ;;  %20359 = vmatprep.mubr.msk.f32.mxu1 %vm749_vm1, %v33628_v44  ;;  %v33644_v44 = vld [vmem:[#allocation79_spill] sm:$0xff]  ;;  %v2134_v1 = vrot.slane %v33648_v20, 4  ;;  %v27543_v49 = vld [vmem:[%s25620_s27 + $0x1b8] sm:$0xff] }
 0x108   : > { %21679 = vmatprep.mubr.msk.f32.mxu0 %vm749_vm1, %v27244_v3  ;;  %23264 = vmatpush3.bf16.msra.mxu0 %v23261_v36  ;;  %v2975_v36 = vrot.slane %v26860_v33, 6 }
 0x109   : > { %23266 = vmatprep.subr.bf16.mxu0 %v27248_v55 }
 0x10a   : > { %20360 = vmatmul.mubr.msk.f32.gmra.mrb[20].mxu1 %vm749_vm1, %v33631_v28  ;;  %v27294_v33 = vsel %vm2936_vm6, %v2973_v10, %v2975_v36  ;;  %v2985_v10 = vrot.slane %v26930_v52, 6 }
 0x10b   : > { %21680 = vmatmul.mubr.msk.f32.gmra.mrb[4].mxu0 %vm749_vm1, %v27259_v62  ;;  %20362 = vmatprep.mubr.msk.f32.mxu1 %vm749_vm1, %v33632_v63  ;;  %33637 = vst [vmem:[#allocation183_spill] sm:$0xff] %v27294_v33  ;;  %v33639_v63 = vld [vmem:[#allocation77_spill] sm:$0xff] }
 0x10c   : > { %21682 = vmatprep.mubr.msk.f32.mxu0 %vm749_vm1, %v27263_v48  ;;  %v25281_v48 = vld [vmem:[%s25620_s27 + $0x148] sm:$0x3f] }
 0x10e   : > { %20363 = vmatmul.mubr.msk.f32.gmra.mrb[22].mxu1 %vm749_vm1, %v33635_v59  ;;  %v2983_v59 = vrot.slane %v26916_v17, 6 }
 0x10f   : > { %21683 = vmatmul.mubr.msk.f32.gmra.mrb[6].mxu0 %vm749_vm1, %v27277_v43  ;;  %20365 = vmatprep.mubr.msk.f32.mxu1 %vm749_vm1, %v33636_v39  ;;  %v33640_v39 = vld [vmem:[#allocation78_spill] sm:$0xff] }
 0x110   : > { %21685 = vmatprep.mubr.msk.f32.mxu0 %vm749_vm1, %v27281_v41  ;;  %v27315_v36 = vsel %vm2936_vm6, %v2982_v31, %v2983_v59  ;;  %v27328_v52 = vsel %vm2936_vm6, %v2983_v59, %v2985_v10  ;;  %v2133_v31 = vrot.slane %v33647_v12, 4  ;;  %v2993_v59 = vrot.slane %v27341_v24, 6  ;;  %v33650_v10 = vld [vmem:[#allocation81_spill] sm:$0xff]  ;;  %v33659_v41 = vld [vmem:[#allocation156_spill] sm:$0xff] }
 0x111   : > { %33642 = vst [vmem:[#allocation186_spill] sm:$0xff] %v27315_v36  ;;  %v2143_v43 = vrot.slane %v33659_v41, 4 }
 0x112   : > { %20366 = vmatmul.mubr.msk.f32.gmra.mrb[24].mxu1 %vm749_vm1, %v33639_v63  ;;  %v33643_v63 = vld [vmem:[#allocation142_spill] sm:$0xff]  ;;  %v2135_v4 = vsel %vm2132_vm4, %v2133_v31, %v2134_v1 }
 0x113   : > { %21686 = vmatmul.mubr.msk.f32.gmra.mrb[8].mxu0 %vm749_vm1, %v27294_v33  ;;  %20368 = vmatprep.mubr.msk.f32.mxu1 %vm749_vm1, %v33640_v39  ;;  %v2988_v28 = vrot.slane %v33643_v63, 6  ;;  %v33645_v39 = vld [vmem:[#allocation80_spill] sm:$0xff]  ;;  %33646 = vst [vmem:[#allocation142_spill] sm:$0xff] %v27328_v52 }
 0x114   : > { %21688 = vmatprep.mubr.msk.f32.mxu0 %vm749_vm1, %v27298_v40  ;;  %v25278_v40 = vld [vmem:[%s25620_s27 + $0x130] sm:$0x3f] }
 0x115   : > { %v27355_v51 = vsel %vm2936_vm6, %v2988_v28, %v2990_v34  ;;  %v446_v34 = vld [vmem:[%s32669_s1 + $0xb0] sm:$0xff]  ;;  %v3000_v33 = vrot.slane %v25278_v40, 6  ;;  %v448_v40 = vld [vmem:[%s32669_s1 + $0xc0] sm:$0xff] }
 0x116   : > { %20369 = vmatmul.mubr.msk.f32.gmra.mrb[26].mxu1 %vm749_vm1, %v33644_v44  ;;  %v27334_v44 = vsel %vm2936_vm6, %v2987_v15, %v2988_v28  ;;  %v2136_v15 = vrot.slane %v26999_v45, 4  ;;  %33652 = vst [vmem:[#allocation147_spill] sm:$0xff] %v27355_v51  ;;  %v33656_v28 = vld [vmem:[#allocation86_spill] sm:$0xff] }
 0x117   : > { %21689 = vmatmul.mubr.msk.f32.gmra.mrb[10].mxu0 %vm749_vm1, %v27311_v7  ;;  %20371 = vmatprep.mubr.msk.f32.mxu1 %vm749_vm1, %v33645_v39  ;;  %33649 = vst [vmem:[#allocation146_spill] sm:$0xff] %v27334_v44  ;;  %v2992_v39 = vrot.slane %v27337_v23, 6 }
 0x118   : > { %21691 = vmatprep.mubr.msk.f32.mxu0 %vm749_vm1, %v27315_v36  ;;  %v2137_v31 = vsel %vm2132_vm4, %v2134_v1, %v2136_v15  ;;  %v27384_v36 = vsel %vm2936_vm6, %v2993_v59, %v2995_v11  ;;  %v27399_v11 = vld [vmem:[%s25620_s27 + $0x138] sm:$0xff] }
 0x119   : > { %v27361_v16 = vsel %vm2936_vm6, %v2992_v39, %v2993_v59  ;;  %v447_v39 = vld [vmem:[%s32669_s1 + $0xb8] sm:$0xff]  ;;  %33657 = vst [vmem:[#allocation152_spill] sm:$0xff] %v27384_v36  ;;  %v3002_v1 = vrot.slane %v27399_v11, 6  ;;  %v27403_v59 = vld [vmem:[%s25620_s27 + $0x140] sm:$0xff] }
 0x11a   : > { %20372 = vmatmul.mubr.msk.f32.gmra.mrb[28].mxu1 %vm749_vm1, %v33650_v10  ;;  %v2138_v10 = vrot.slane %v33653_v2, 4  ;;  %33655 = vst [vmem:[#allocation151_spill] sm:$0xff] %v27361_v16  ;;  %v3003_v15 = vrot.slane %v27403_v59, 6 }
 0x11b   : > { %21692 = vmatmul.mubr.msk.f32.gmra.mrb[12].mxu0 %vm749_vm1, %v27328_v52  ;;  %20374 = vmatprep.mubr.msk.f32.mxu1 %vm749_vm1, %v33651_v29  ;;  %v27364_v29 = vld [vmem:[%s25620_s27 + $0x120] sm:$0xff]  ;;  %v27368_v52 = vld [vmem:[%s25620_s27 + $0x128] sm:$0xff] }
 0x11c   : > { %21694 = vmatprep.mubr.msk.f32.mxu0 %vm749_vm1, %v27334_v44  ;;  %v2997_v6 = vrot.slane %v27364_v29, 6  ;;  %v2998_v44 = vrot.slane %v27368_v52, 6  ;;  %v27390_v7 = vsel %vm2132_vm4, %v2138_v10, %v2139_v61  ;;  %v23077_v10 = vpack.c.bf16 %v447_v39, %v446_v34 }
 0x11d   : > { %33658 = vst [vmem:[#allocation187_spill] sm:$0xff] %v27390_v7  ;;  %v2146_v34 = vrot.slane %v27075_v8, 4 }
 0x11e   : > { %20375 = vmatmul.mubr.msk.f32.gmra.mrb[30].mxu1 %vm749_vm1, %v33656_v28  ;;  %v2141_v28 = vrot.slane %v27038_v26, 4  ;;  %v27424_v39 = vsel %vm2936_vm6, %v2998_v44, %v3000_v33  ;;  %v25284_v33 = vld [vmem:[%s25620_s27 + $0x160] sm:$0x3f] }
 0x11f   : > { %21695 = vmatmul.mubr.msk.f32.gmra.mrb[14].mxu0 %vm749_vm1, %v27355_v51  ;;  %20385 = vmatprep.mubr.msk.f32.mxu1 %vm749_vm1, %v2135_v4  ;;  %v2144_v51 = vrot.slane %v27052_v21, 4  ;;  %v27396_v4 = vsel %vm2936_vm6, %v2997_v6, %v2998_v44  ;;  %v449_v6 = vld [vmem:[%s32669_s1 + $0xc8] sm:$0xff]  ;;  %33662 = vst [vmem:[#allocation189_spill] sm:$0xff] %v27424_v39 }
 0x120   : > { %21697 = vmatprep.mubr.msk.f32.mxu0 %vm749_vm1, %v27361_v16  ;;  %33660 = vst [vmem:[#allocation156_spill] sm:$0xff] %v27396_v4  ;;  %v27418_v16 = vsel %vm2132_vm4, %v2139_v61, %v2141_v28  ;;  %v27435_v61 = vld [vmem:[%s25620_s27 + $0x150] sm:$0xff] }
 0x121   : > { %33661 = vst [vmem:[#allocation188_spill] sm:$0xff] %v27418_v16  ;;  %v3007_v28 = vrot.slane %v27435_v61, 6 }
 0x122   : > { %20386 = vmatmul.mubr.msk.f32.vlgmr.msra.gmra.mrb[0].mxu1 %vm749_vm1, %v2137_v31  ;;  %v27427_v31 = vsel %vm2132_vm4, %v2143_v43, %v2144_v51  ;;  %v27442_v43 = vpack.c.bf16 %v449_v6, %v448_v40  ;;  %v27463_v6 = vld [vmem:[%s25620_s27 + $0x168] sm:$0xff] }
 0x123   : > { %21698 = vmatmul.mubr.msk.f32.gmra.mrb[16].mxu0 %vm749_vm1, %v27384_v36  ;;  %20388 = vmatprep.mubr.msk.f32.mxu1 %vm749_vm1, %v27390_v7  ;;  %33663 = vst [vmem:[#allocation190_spill] sm:$0xff] %v27427_v31  ;;  %v3005_v36 = vrot.slane %v25281_v48, 6  ;;  %v27432_v7 = vsel %vm2936_vm6, %v3002_v1, %v3003_v15  ;;  %v3010_v1 = vrot.slane %v25284_v33, 6 }
 0x124   : > { %21700 = vmatprep.mubr.msk.f32.mxu0 %vm749_vm1, %v27396_v4  ;;  %23076 = vmatpush3.bf16.msra.mxu1 %v27093_v56  ;;  %33664 = vst [vmem:[#allocation191_spill] sm:$0xff] %v27432_v7  ;;  %v27439_v4 = vld [vmem:[%s25620_s27 + $0x158] sm:$0xff]  ;;  %v27451_v56 = vsel %vm2132_vm4, %v2144_v51, %v2146_v34  ;;  %v3012_v51 = vrot.slane %v27463_v6, 6  ;;  %v27467_v34 = vld [vmem:[%s25620_s27 + $0x170] sm:$0xff] }
 0x125   : > { %v3008_v44 = vrot.slane %v27439_v4, 6  ;;  %23078 = vmatprep.subr.bf16.mxu1 %v23077_v10  ;;  %33665 = vst [vmem:[#allocation192_spill] sm:$0xff] %v27451_v56  ;;  %v27456_v48 = vsel %vm2936_vm6, %v3003_v15, %v3005_v36  ;;  %v33668_v36 = vld [vmem:[#allocation93_spill] sm:$0xff] }
 0x126   : > { %20389 = vmatmul.mubr.msk.f32.gmra.mrb[2].mxu1 %vm749_vm1, %v27418_v16  ;;  %33666 = vst [vmem:[#allocation193_spill] sm:$0xff] %v27456_v48 }
 0x127   : > { %21701 = vmatmul.mubr.msk.f32.gmra.mrb[18].mxu0 %vm749_vm1, %v27424_v39  ;;  %20391 = vmatprep.mubr.msk.f32.mxu1 %vm749_vm1, %v27427_v31  ;;  %v27460_v40 = vsel %vm2936_vm6, %v3007_v28, %v3008_v44  ;;  %v3013_v31 = vrot.slane %v27467_v34, 6  ;;  %v27480_v15 = vsel %vm2936_vm6, %v3008_v44, %v3010_v1  ;;  %v33672_v44 = vld [vmem:[#allocation95_spill] sm:$0xff]  ;;  %v33675_v39 = vld [vmem:[#allocation96_spill] sm:$0xff] }
 0x128   : > { %21703 = vmatprep.mubr.msk.f32.mxu0 %vm749_vm1, %v27432_v7  ;;  %23080 = vmatpush3.bf16.msra.mxu1 %v23077_v10  ;;  %33667 = vst [vmem:[#allocation194_spill] sm:$0xff] %v27460_v40  ;;  %33669 = vst [vmem:[#allocation195_spill] sm:$0xff] %v27480_v15  ;;  %v25287_v10 = vld [vmem:[%s25620_s27 + $0x178] sm:$0x3f]  ;;  %v33671_v7 = vld [vmem:[#allocation94_spill] sm:$0xff] }
 0x129   : > { %23082 = vmatprep.subr.bf16.mxu1 %v27442_v43  ;;  %v3015_v28 = vrot.slane %v25287_v10, 6  ;;  %v27484_v33 = vsel %vm2936_vm6, %v3012_v51, %v3013_v31  ;;  %v27506_v51 = vld [vmem:[%s25620_s27 + $0x190] sm:$0x3f] }
 0x12a   : > { %20392 = vmatmul.mubr.msk.f32.gmra.mrb[4].mxu1 %vm749_vm1, %v27451_v56  ;;  %33670 = vst [vmem:[#allocation196_spill] sm:$0xff] %v27484_v33  ;;  %v27487_v56 = vld [vmem:[%s25620_s27 + $0x180] sm:$0xff]  ;;  %v4935_v10 = vrot.slane %v27506_v51, 6 }
 0x12b   : > { %21704 = vmatmul.mubr.msk.f32.gmra.mrb[20].mxu0 %vm749_vm1, %v27456_v48  ;;  %20394 = vmatprep.mubr.msk.f32.mxu1 %vm749_vm1, %v33668_v36  ;;  %v4932_v16 = vrot.slane %v27487_v56, 6  ;;  %v27491_v48 = vld [vmem:[%s25620_s27 + $0x188] sm:$0xff]  ;;  %v27503_v1 = vsel %vm2936_vm6, %v3013_v31, %v3015_v28  ;;  %v33676_v31 = vld [vmem:[#allocation97_spill] sm:$0xff] }
 0x12c   : > { %21706 = vmatprep.mubr.msk.f32.mxu0 %vm749_vm1, %v27460_v40  ;;  %v4933_v36 = vrot.slane %v27491_v48, 6  ;;  %33673 = vst [vmem:[#allocation197_spill] sm:$0xff] %v27503_v1  ;;  %v27532_v28 = vld [vmem:[%s25620_s27 + $0x1a8] sm:$0x3f] }
 0x12d   : > { %33678 = vst [vmem:[#allocation200_spill] sm:$0xff] %v27532_v28  ;;  %v6795_v62 = vrot.slane %v27532_v28, 6 }
 0x12e   : > { %20395 = vmatmul.mubr.msk.f32.gmra.mrb[6].mxu1 %vm749_vm1, %v33671_v7  ;;  %v27510_v7 = vsel %vm2936_vm6, %v4932_v16, %v4933_v36  ;;  %v27529_v16 = vsel %vm2936_vm6, %v4933_v36, %v4935_v10  ;;  %v33681_v36 = vld [vmem:[#allocation99_spill] sm:$0xff]  ;;  %v27558_v10 = vld [vmem:[%s25620_s27 + $0x1c0] sm:$0x3f] }
 0x12f   : > { %21707 = vmatmul.mubr.msk.f32.gmra.mrb[22].mxu0 %vm749_vm1, %v27480_v15  ;;  %20397 = vmatprep.mubr.msk.f32.mxu1 %vm749_vm1, %v33672_v44  ;;  %33674 = vst [vmem:[#allocation198_spill] sm:$0xff] %v27510_v7  ;;  %v27513_v15 = vld [vmem:[%s25620_s27 + $0x198] sm:$0xff]  ;;  %v27517_v44 = vld [vmem:[%s25620_s27 + $0x1a0] sm:$0xff]  ;;  %33677 = vst [vmem:[#allocation199_spill] sm:$0xff] %v27529_v16 }
 0x130   : > { %21709 = vmatprep.mubr.msk.f32.mxu0 %vm749_vm1, %v27484_v33  ;;  %v6792_v40 = vrot.slane %v27513_v15, 6  ;;  %v6793_v33 = vrot.slane %v27517_v44, 6 }
 0x132   : > { %20398 = vmatmul.mubr.msk.f32.gmra.mrb[8].mxu1 %vm749_vm1, %v33675_v39  ;;  %v27536_v3 = vsel %vm2936_vm6, %v6792_v40, %v6793_v33  ;;  %v27539_v39 = vld [vmem:[%s25620_s27 + $0x1b0] sm:$0xff]  ;;  %v27555_v40 = vsel %vm2936_vm6, %v6793_v33, %v6795_v62  ;;  %v33687_v33 = vld [vmem:[#allocation102_spill] sm:$0xff] }
 0x133   : > { %21710 = vmatmul.mubr.msk.f32.gmra.mrb[24].mxu0 %vm749_vm1, %v27503_v1  ;;  %20400 = vmatprep.mubr.msk.f32.mxu1 %vm749_vm1, %v33676_v31  ;;  %33679 = vst [vmem:[#allocation201_spill] sm:$0xff] %v27536_v3  ;;  %v8684_v1 = vrot.slane %v27539_v39, 6  ;;  %v8685_v31 = vrot.slane %v27543_v49, 6  ;;  %33682 = vst [vmem:[#allocation202_spill] sm:$0xff] %v27555_v40 }
 0x134   : > { %21712 = vmatprep.mubr.msk.f32.mxu0 %vm749_vm1, %v27510_v7  ;;  %v8687_v7 = vrot.slane %v27558_v10, 6 }
 0x135   : > { %v27562_v28 = vsel %vm2936_vm6, %v8684_v1, %v8685_v31  ;;  %v542_v1 = vld [vmem:[%s32669_s1 + $0x3b0] sm:$0xff] }
 0x136   : > { %20401 = vmatmul.mubr.msk.f32.gmra.mrb[10].mxu1 %vm749_vm1, %v33680_v50  ;;  %33683 = vst [vmem:[#allocation203_spill] sm:$0xff] %v27562_v28  ;;  %v33684_v50 = vld [vmem:[#allocation100_spill] sm:$0xff]  ;;  %v27573_v62 = vsel %vm2936_vm6, %v8685_v31, %v8687_v7 }
 0x137   : > { %21713 = vmatmul.mubr.msk.f32.gmra.mrb[26].mxu0 %vm749_vm1, %v27529_v16  ;;  %20403 = vmatprep.mubr.msk.f32.mxu1 %vm749_vm1, %v33681_v36  ;;  %v33685_v16 = vld [vmem:[#allocation101_spill] sm:$0xff]  ;;  %33686 = vst [vmem:[#allocation204_spill] sm:$0xff] %v27573_v62  ;;  %v33689_v31 = vld [vmem:[#allocation104_spill] sm:$0xff] }
 0x138   : > { %21715 = vmatprep.mubr.msk.f32.mxu0 %vm749_vm1, %v27536_v3  ;;  %v33688_v3 = vld [vmem:[#allocation103_spill] sm:$0xff] }
 0x13a   : > { %20404 = vmatmul.mubr.msk.f32.gmra.mrb[12].mxu1 %vm749_vm1, %v33684_v50 }
 0x13b   : > { %21716 = vmatmul.mubr.msk.f32.gmra.mrb[28].mxu0 %vm749_vm1, %v27555_v40  ;;  %20406 = vmatprep.mubr.msk.f32.mxu1 %vm749_vm1, %v33685_v16  ;;  %v543_v40 = vld [vmem:[%s32669_s1 + $0x3b8] sm:$0xff] }
 0x13c   : > { %21718 = vmatprep.mubr.msk.f32.mxu0 %vm749_vm1, %v27562_v28  ;;  %v23269_v7 = vpack.c.bf16 %v543_v40, %v542_v1  ;;  %v544_v28 = vld [vmem:[%s32669_s1 + $0x3c0] sm:$0xff]  ;;  %v33691_v40 = vld [vmem:[#allocation105_spill] sm:$0xff] }
 0x13d   : > { %v33692_v1 = vld [vmem:[#allocation106_spill] sm:$0xff] }
 0x13e   : > { %20407 = vmatmul.mubr.msk.f32.gmra.mrb[14].mxu1 %vm749_vm1, %v33687_v33  ;;  %v545_v33 = vld [vmem:[%s32669_s1 + $0x3c8] sm:$0xff] }
 0x13f   : > { %21719 = vmatmul.mubr.msk.f32.gmra.mrb[30].mxu0 %vm749_vm1, %v27573_v62  ;;  %20409 = vmatprep.mubr.msk.f32.mxu1 %vm749_vm1, %v33688_v3  ;;  %v33690_v62 = vld [vmem:[#allocation30_spill] sm:$0xff] }
 0x140   : > { %21729 = vmatprep.mubr.msk.f32.mxu0 %vm749_vm1, %v26740_v46  ;;  %v27604_v46 = vpack.c.bf16 %v545_v33, %v544_v28  ;;  %v33701_v28 = vld [vmem:[#allocation116_spill] sm:$0xff]  ;;  %v2540_v33 = vrot.slane %v33653_v2, 5 }
 0x142   : > { %20410 = vmatmul.mubr.msk.f32.gmra.mrb[16].mxu1 %vm749_vm1, %v33689_v31 }
 0x143   : > { %21730 = vmatmul.mubr.msk.f32.vlgmr.msra.gmra.mrb[0].mxu0 %vm749_vm1, %v26744_v60  ;;  %20412 = vmatprep.mubr.msk.f32.mxu1 %vm749_vm1, %v33690_v62  ;;  %v33693_v60 = vld [vmem:[#allocation8_spill] sm:$0xff] }
 0x144   : > { %23268 = vmatpush3.bf16.msra.mxu0 %v27248_v55  ;;  %21732 = vmatprep.mubr.msk.f32.mxu0 %vm749_vm1, %v26772_v32  ;;  %v33694_v32 = vld [vmem:[#allocation107_spill] sm:$0xff]  ;;  %v33697_v55 = vld [vmem:[#allocation14_spill] sm:$0xff] }
 0x145   : > { %23270 = vmatprep.subr.bf16.mxu0 %v23269_v7 }
 0x146   : > { %20413 = vmatmul.mubr.msk.f32.gmra.mrb[18].mxu1 %vm749_vm1, %v33691_v40 }
 0x147   : > { %21733 = vmatmul.mubr.msk.f32.gmra.mrb[2].mxu0 %vm749_vm1, %v26776_v18  ;;  %20415 = vmatprep.mubr.msk.f32.mxu1 %vm749_vm1, %v33692_v1  ;;  %v33695_v18 = vld [vmem:[#allocation108_spill] sm:$0xff]  ;;  %v2948_v1 = vrot.slane %v27052_v21, 6 }
 0x148   : > { %21735 = vmatprep.mubr.msk.f32.mxu0 %vm749_vm1, %v26807_v57  ;;  %23272 = vmatpush3.bf16.msra.mxu0 %v23269_v7  ;;  %v33696_v57 = vld [vmem:[#allocation109_spill] sm:$0xff]  ;;  %v2541_v7 = vrot.slane %v33654_v38, 5 }
 0x149   : > { %23274 = vmatprep.subr.bf16.mxu0 %v27604_v46 }
 0x14a   : > { %20416 = vmatmul.mubr.msk.f32.gmra.mrb[20].mxu1 %vm749_vm1, %v33693_v60  ;;  %v2947_v60 = vrot.slane %v33659_v41, 6 }
 0x14b   : > { %21736 = vmatmul.mubr.msk.f32.gmra.mrb[4].mxu0 %vm749_vm1, %v26811_v58  ;;  %20418 = vmatprep.mubr.msk.f32.mxu1 %vm749_vm1, %v33694_v32  ;;  %v33698_v58 = vld [vmem:[#allocation112_spill] sm:$0xff]  ;;  %v33740_v32 = vld [vmem:[#allocation54_spill] sm:$0xff] }
 0x14c   : > { %21738 = vmatprep.mubr.msk.f32.mxu0 %vm749_vm1, %v26841_v47  ;;  %v33699_v47 = vld [vmem:[#allocation114_spill] sm:$0xff] }
 0x14e   : > { %20419 = vmatmul.mubr.msk.f32.gmra.mrb[22].mxu1 %vm749_vm1, %v33695_v18  ;;  %v2938_v18 = vrot.slane %v33648_v20, 6 }
 0x14f   : > { %21739 = vmatmul.mubr.msk.f32.gmra.mrb[6].mxu0 %vm749_vm1, %v26845_v5  ;;  %20421 = vmatprep.mubr.msk.f32.mxu1 %vm749_vm1, %v33696_v57  ;;  %v33700_v5 = vld [vmem:[#allocation115_spill] sm:$0xff]  ;;  %v33727_v57 = vld [vmem:[#allocation34_spill] sm:$0xff] }
 0x150   : > { %21741 = vmatprep.mubr.msk.f32.mxu0 %vm749_vm1, %v26877_v14  ;;  %v2535_v14 = vrot.slane %v33647_v12, 5 }
 0x152   : > { %20422 = vmatmul.mubr.msk.f32.gmra.mrb[24].mxu1 %vm749_vm1, %v33697_v55 }
 0x153   : > { %21742 = vmatmul.mubr.msk.f32.gmra.mrb[8].mxu0 %vm749_vm1, %v26881_v37  ;;  %20424 = vmatprep.mubr.msk.f32.mxu1 %vm749_vm1, %v33698_v58  ;;  %v2536_v37 = vrot.slane %v33648_v20, 5  ;;  %v2546_v58 = vrot.slane %v27052_v21, 5  ;;  %v2943_v20 = vrot.slane %v33654_v38, 6  ;;  %v2945_v38 = vrot.slane %v27038_v26, 6 }
 0x154   : > { %21744 = vmatprep.mubr.msk.f32.mxu0 %vm749_vm1, %v26912_v30  ;;  %v33702_v30 = vld [vmem:[#allocation117_spill] sm:$0xff]  ;;  %v2950_v21 = vrot.slane %v27075_v8, 6 }
 0x156   : > { %20425 = vmatmul.mubr.msk.f32.gmra.mrb[26].mxu1 %vm749_vm1, %v33699_v47  ;;  %v2545_v47 = vrot.slane %v33659_v41, 5  ;;  %v27880_v41 = vsel %vm2936_vm6, %v2943_v20, %v2945_v38 }
 0x157   : > { %21745 = vmatmul.mubr.msk.f32.gmra.mrb[10].mxu0 %vm749_vm1, %v26916_v17  ;;  %20427 = vmatprep.mubr.msk.f32.mxu1 %vm749_vm1, %v33700_v5  ;;  %v2538_v17 = vrot.slane %v26999_v45, 5  ;;  %v33703_v5 = vld [vmem:[#allocation118_spill] sm:$0xff]  ;;  %33745 = vst [vmem:[#allocation210_spill] sm:$0xff] %v27880_v41 }
 0x158   : > { %21747 = vmatprep.mubr.msk.f32.mxu0 %vm749_vm1, %v26947_v35  ;;  %v2537_v35 = vsel %vm2534_vm5, %v2535_v14, %v2536_v37 }
 0x159   : > { %v2539_v14 = vsel %vm2534_vm5, %v2536_v37, %v2538_v17  ;;  %v453_v37 = vld [vmem:[%s32669_s1 + $0xe8] sm:$0xff] }
 0x15a   : > { %20428 = vmatmul.mubr.msk.f32.gmra.mrb[28].mxu1 %vm749_vm1, %v33701_v28  ;;  %v2543_v28 = vrot.slane %v27038_v26, 5  ;;  %v457_v26 = vld [vmem:[%s32669_s1 + $0x108] sm:$0xff] }
 0x15b   : > { %21748 = vmatmul.mubr.msk.f32.gmra.mrb[12].mxu0 %vm749_vm1, %v33643_v63  ;;  %20430 = vmatprep.mubr.msk.f32.mxu1 %vm749_vm1, %v33702_v30  ;;  %v450_v63 = vld [vmem:[%s32669_s1 + $0xd0] sm:$0xff]  ;;  %v451_v30 = vld [vmem:[%s32669_s1 + $0xd8] sm:$0xff] }
 0x15c   : > { %21750 = vmatprep.mubr.msk.f32.mxu0 %vm749_vm1, %v27337_v23  ;;  %v23085_v55 = vpack.c.bf16 %v451_v30, %v450_v63  ;;  %v27693_v17 = vsel %vm2534_vm5, %v2541_v7, %v2543_v28  ;;  %v2548_v30 = vrot.slane %v27075_v8, 5  ;;  %v27898_v8 = vsel %vm2936_vm6, %v2948_v1, %v2950_v21  ;;  %v33754_v21 = vld [vmem:[#allocation72_spill] sm:$0xff] }
 0x15d   : > { %33705 = vst [vmem:[#allocation206_spill] sm:$0xff] %v27693_v17  ;;  %33749 = vst [vmem:[#allocation212_spill] sm:$0xff] %v27898_v8 }
 0x15e   : > { %20431 = vmatmul.mubr.msk.f32.gmra.mrb[30].mxu1 %vm749_vm1, %v33703_v5  ;;  %v27677_v5 = vsel %vm2534_vm5, %v2540_v33, %v2541_v7  ;;  %v27699_v33 = vsel %vm2534_vm5, %v2545_v47, %v2546_v58  ;;  %v27711_v28 = vsel %vm2534_vm5, %v2546_v58, %v2548_v30  ;;  %v33709_v58 = vld [vmem:[#allocation123_spill] sm:$0xff]  ;;  %v33711_v47 = vld [vmem:[#allocation125_spill] sm:$0xff]  ;;  %v33712_v7 = vld [vmem:[#allocation126_spill] sm:$0xff] }
 0x15f   : > { %21751 = vmatmul.mubr.msk.f32.gmra.mrb[14].mxu0 %vm749_vm1, %v27341_v24  ;;  %20441 = vmatprep.mubr.msk.f32.mxu1 %vm749_vm1, %v2537_v35  ;;  %33704 = vst [vmem:[#allocation205_spill] sm:$0xff] %v27677_v5  ;;  %v452_v35 = vld [vmem:[%s32669_s1 + $0xe0] sm:$0xff]  ;;  %33706 = vst [vmem:[#allocation207_spill] sm:$0xff] %v27699_v33  ;;  %v33715_v30 = vld [vmem:[#allocation131_spill] sm:$0xff] }
 0x160   : > { %21753 = vmatprep.mubr.msk.f32.mxu0 %vm749_vm1, %v27364_v29  ;;  %v27702_v63 = vpack.c.bf16 %v453_v37, %v452_v35  ;;  %33707 = vst [vmem:[#allocation208_spill] sm:$0xff] %v27711_v28  ;;  %v33714_v35 = vld [vmem:[#allocation129_spill] sm:$0xff]  ;;  %v27749_v37 = vld [vmem:[%s25620_s27 + $0x1c8] sm:$0xff] }
 0x162   : > { %20442 = vmatmul.mubr.msk.f32.vlgmr.msra.gmra.mrb[0].mxu1 %vm749_vm1, %v2539_v14  ;;  %v33713_v14 = vld [vmem:[#allocation127_spill] sm:$0xff] }
 0x163   : > { %21754 = vmatmul.mubr.msk.f32.gmra.mrb[16].mxu0 %vm749_vm1, %v27368_v52  ;;  %20444 = vmatprep.mubr.msk.f32.mxu1 %vm749_vm1, %v27677_v5  ;;  %v33718_v5 = vld [vmem:[#allocation137_spill] sm:$0xff] }
 0x164   : > { %21756 = vmatprep.mubr.msk.f32.mxu0 %vm749_vm1, %v27399_v11  ;;  %23084 = vmatpush3.bf16.msra.mxu1 %v27442_v43  ;;  %v33708_v43 = vld [vmem:[#allocation122_spill] sm:$0xff] }
 0x165   : > { %23086 = vmatprep.subr.bf16.mxu1 %v23085_v55 }
 0x166   : > { %20445 = vmatmul.mubr.msk.f32.gmra.mrb[2].mxu1 %vm749_vm1, %v27693_v17  ;;  %v547_v17 = vld [vmem:[%s32669_s1 + $0x3d8] sm:$0xff] }
 0x167   : > { %21757 = vmatmul.mubr.msk.f32.gmra.mrb[18].mxu0 %vm749_vm1, %v27403_v59  ;;  %20447 = vmatprep.mubr.msk.f32.mxu1 %vm749_vm1, %v27699_v33  ;;  %v546_v33 = vld [vmem:[%s32669_s1 + $0x3d0] sm:$0xff] }
 0x168   : > { %21759 = vmatprep.mubr.msk.f32.mxu0 %vm749_vm1, %v27435_v61  ;;  %23088 = vmatpush3.bf16.msra.mxu1 %v23085_v55  ;;  %v33710_v55 = vld [vmem:[#allocation124_spill] sm:$0xff] }
 0x169   : > { %23090 = vmatprep.subr.bf16.mxu1 %v27702_v63 }
 0x16a   : > { %20448 = vmatmul.mubr.msk.f32.gmra.mrb[4].mxu1 %vm749_vm1, %v27711_v28  ;;  %v33717_v28 = vld [vmem:[#allocation135_spill] sm:$0xff] }
 0x16b   : > { %21760 = vmatmul.mubr.msk.f32.gmra.mrb[20].mxu0 %vm749_vm1, %v27439_v4  ;;  %20450 = vmatprep.mubr.msk.f32.mxu1 %vm749_vm1, %v33708_v43  ;;  %v27760_v43 = vld [vmem:[%s25620_s27 + $0x1d0] sm:$0xff] }
 0x16c   : > { %21762 = vmatprep.mubr.msk.f32.mxu0 %vm749_vm1, %v27463_v6 }
 0x16e   : > { %20451 = vmatmul.mubr.msk.f32.gmra.mrb[6].mxu1 %vm749_vm1, %v33709_v58  ;;  %v33716_v58 = vld [vmem:[#allocation133_spill] sm:$0xff] }
 0x16f   : > { %21763 = vmatmul.mubr.msk.f32.gmra.mrb[22].mxu0 %vm749_vm1, %v27467_v34  ;;  %20453 = vmatprep.mubr.msk.f32.mxu1 %vm749_vm1, %v33710_v55  ;;  %v33726_v55 = vld [vmem:[#allocation148_spill] sm:$0xff] }
 0x170   : > { %21765 = vmatprep.mubr.msk.f32.mxu0 %vm749_vm1, %v27487_v56 }
 0x172   : > { %20454 = vmatmul.mubr.msk.f32.gmra.mrb[8].mxu1 %vm749_vm1, %v33711_v47  ;;  %v33722_v47 = vld [vmem:[#allocation141_spill] sm:$0xff] }
 0x173   : > { %21766 = vmatmul.mubr.msk.f32.gmra.mrb[24].mxu0 %vm749_vm1, %v27491_v48  ;;  %20456 = vmatprep.mubr.msk.f32.mxu1 %vm749_vm1, %v33712_v7  ;;  %v33721_v7 = vld [vmem:[#allocation27_spill] sm:$0xff] }
 0x174   : > { %21768 = vmatprep.mubr.msk.f32.mxu0 %vm749_vm1, %v27513_v15 }
 0x176   : > { %20457 = vmatmul.mubr.msk.f32.gmra.mrb[10].mxu1 %vm749_vm1, %v33713_v14  ;;  %v549_v14 = vld [vmem:[%s32669_s1 + $0x3e8] sm:$0xff] }
 0x177   : > { %21769 = vmatmul.mubr.msk.f32.gmra.mrb[26].mxu0 %vm749_vm1, %v27517_v44  ;;  %20459 = vmatprep.mubr.msk.f32.mxu1 %vm749_vm1, %v33714_v35  ;;  %v33720_v35 = vld [vmem:[#allocation139_spill] sm:$0xff] }
 0x178   : > { %21771 = vmatprep.mubr.msk.f32.mxu0 %vm749_vm1, %v27539_v39 }
 0x17a   : > { %20460 = vmatmul.mubr.msk.f32.gmra.mrb[12].mxu1 %vm749_vm1, %v33715_v30  ;;  %v23277_v30 = vpack.c.bf16 %v547_v17, %v546_v33  ;;  %v33723_v17 = vld [vmem:[#allocation29_spill] sm:$0xff] }
 0x17b   : > { %21772 = vmatmul.mubr.msk.f32.gmra.mrb[28].mxu0 %vm749_vm1, %v27543_v49  ;;  %20462 = vmatprep.mubr.msk.f32.mxu1 %vm749_vm1, %v33716_v58  ;;  %v33719_v58 = vld [vmem:[#allocation25_spill] sm:$0xff] }
 0x17c   : > { %21774 = vmatprep.mubr.msk.f32.mxu0 %vm749_vm1, %v27749_v37 }
 0x17e   : > { %20463 = vmatmul.mubr.msk.f32.gmra.mrb[14].mxu1 %vm749_vm1, %v33717_v28  ;;  %v548_v28 = vld [vmem:[%s32669_s1 + $0x3e0] sm:$0xff] }
 0x17f   : > { %21775 = vmatmul.mubr.msk.f32.gmra.mrb[30].mxu0 %vm749_vm1, %v27760_v43  ;;  %20465 = vmatprep.mubr.msk.f32.mxu1 %vm749_vm1, %v33718_v5  ;;  %v27791_v33 = vpack.c.bf16 %v549_v14, %v548_v28  ;;  %v33725_v5 = vld [vmem:[#allocation32_spill] sm:$0xff]  ;;  %v33730_v14 = vld [vmem:[#allocation153_spill] sm:$0xff] }
 0x180   : > { %21785 = vmatprep.mubr.msk.f32.mxu0 %vm749_vm1, %v33719_v58  ;;  %v33729_v28 = vld [vmem:[#allocation36_spill] sm:$0xff] }
 0x182   : > { %20466 = vmatmul.mubr.msk.f32.gmra.mrb[16].mxu1 %vm749_vm1, %v33720_v35  ;;  %v33724_v35 = vld [vmem:[#allocation144_spill] sm:$0xff] }
 0x183   : > { %21786 = vmatmul.mubr.msk.f32.vlgmr.msra.gmra.mrb[0].mxu0 %vm749_vm1, %v33721_v7  ;;  %20468 = vmatprep.mubr.msk.f32.mxu1 %vm749_vm1, %v33722_v47  ;;  %v33732_v47 = vld [vmem:[#allocation154_spill] sm:$0xff] }
 0x184   : > { %23276 = vmatpush3.bf16.msra.mxu0 %v27604_v46  ;;  %21788 = vmatprep.mubr.msk.f32.mxu0 %vm749_vm1, %v33723_v17  ;;  %v33728_v46 = vld [vmem:[#allocation150_spill] sm:$0xff] }
 0x185   : > { %23278 = vmatprep.subr.bf16.mxu0 %v23277_v30 }
 0x186   : > { %20469 = vmatmul.mubr.msk.f32.gmra.mrb[18].mxu1 %vm749_vm1, %v33724_v35  ;;  %v33731_v35 = vld [vmem:[#allocation38_spill] sm:$0xff] }
 0x187   : > { %21789 = vmatmul.mubr.msk.f32.gmra.mrb[2].mxu0 %vm749_vm1, %v33725_v5  ;;  %20471 = vmatprep.mubr.msk.f32.mxu1 %vm749_vm1, %v33726_v55  ;;  %v33733_v55 = vld [vmem:[#allocation40_spill] sm:$0xff] }
 0x188   : > { %21791 = vmatprep.mubr.msk.f32.mxu0 %vm749_vm1, %v33727_v57  ;;  %23280 = vmatpush3.bf16.msra.mxu0 %v23277_v30  ;;  %v33734_v30 = vld [vmem:[#allocation42_spill] sm:$0xff] }
 0x189   : > { %23282 = vmatprep.subr.bf16.mxu0 %v27791_v33 }
 0x18a   : > { %20472 = vmatmul.mubr.msk.f32.gmra.mrb[20].mxu1 %vm749_vm1, %v33728_v46  ;;  %v33735_v46 = vld [vmem:[#allocation44_spill] sm:$0xff] }
 0x18b   : > { %21792 = vmatmul.mubr.msk.f32.gmra.mrb[4].mxu0 %vm749_vm1, %v33729_v28  ;;  %20474 = vmatprep.mubr.msk.f32.mxu1 %vm749_vm1, %v33730_v14  ;;  %v33736_v14 = vld [vmem:[#allocation46_spill] sm:$0xff] }
 0x18c   : > { %21794 = vmatprep.mubr.msk.f32.mxu0 %vm749_vm1, %v33731_v35 }
 0x18e   : > { %20475 = vmatmul.mubr.msk.f32.gmra.mrb[22].mxu1 %vm749_vm1, %v33732_v47  ;;  %v33737_v47 = vld [vmem:[#allocation48_spill] sm:$0xff] }
 0x18f   : > { %21795 = vmatmul.mubr.msk.f32.gmra.mrb[6].mxu0 %vm749_vm1, %v33733_v55  ;;  %20477 = vmatprep.mubr.msk.f32.mxu1 %vm749_vm1, %v27056_v19  ;;  %v33738_v19 = vld [vmem:[#allocation50_spill] sm:$0xff] }
 0x190   : > { %21797 = vmatprep.mubr.msk.f32.mxu0 %vm749_vm1, %v33734_v30 }
 0x192   : > { %20478 = vmatmul.mubr.msk.f32.gmra.mrb[24].mxu1 %vm749_vm1, %v27081_v42  ;;  %v2937_v42 = vrot.slane %v33647_v12, 6  ;;  %v2942_v12 = vrot.slane %v33653_v2, 6  ;;  %v33742_v2 = vld [vmem:[#allocation58_spill] sm:$0xff] }
 0x193   : > { %21798 = vmatmul.mubr.msk.f32.gmra.mrb[8].mxu0 %vm749_vm1, %v33735_v46  ;;  %20480 = vmatprep.mubr.msk.f32.mxu1 %vm749_vm1, %v27089_v25  ;;  %v33739_v25 = vld [vmem:[#allocation52_spill] sm:$0xff] }
 0x194   : > { %21800 = vmatprep.mubr.msk.f32.mxu0 %vm749_vm1, %v33736_v14 }
 0x196   : > { %20481 = vmatmul.mubr.msk.f32.gmra.mrb[26].mxu1 %vm749_vm1, %v27107_v13  ;;  %v2940_v13 = vrot.slane %v26999_v45, 6  ;;  %v455_v45 = vld [vmem:[%s32669_s1 + $0xf8] sm:$0xff] }
 0x197   : > { %21801 = vmatmul.mubr.msk.f32.gmra.mrb[10].mxu0 %vm749_vm1, %v33737_v47  ;;  %20483 = vmatprep.mubr.msk.f32.mxu1 %vm749_vm1, %v27111_v27  ;;  %v2939_v27 = vsel %vm2936_vm6, %v2937_v42, %v2938_v18 }
 0x198   : > { %21803 = vmatprep.mubr.msk.f32.mxu0 %vm749_vm1, %v33738_v19  ;;  %v2941_v42 = vsel %vm2936_vm6, %v2938_v18, %v2940_v13  ;;  %v33744_v13 = vld [vmem:[#allocation60_spill] sm:$0xff]  ;;  %v27886_v18 = vsel %vm2936_vm6, %v2947_v60, %v2948_v1  ;;  %v3602_v60 = vrot.slane %v27487_v56, 1  ;;  %v33752_v1 = vld [vmem:[#allocation70_spill] sm:$0xff] }
 0x199   : > { %33747 = vst [vmem:[#allocation211_spill] sm:$0xff] %v27886_v18 }
 0x19a   : > { %20484 = vmatmul.mubr.msk.f32.gmra.mrb[28].mxu1 %vm749_vm1, %v27125_v53  ;;  %v454_v53 = vld [vmem:[%s32669_s1 + $0xf0] sm:$0xff] }
 0x19b   : > { %21804 = vmatmul.mubr.msk.f32.gmra.mrb[12].mxu0 %vm749_vm1, %v33739_v25  ;;  %20486 = vmatprep.mubr.msk.f32.mxu1 %vm749_vm1, %v27129_v22  ;;  %v33741_v22 = vld [vmem:[#allocation56_spill] sm:$0xff]  ;;  %v23093_v40 = vpack.c.bf16 %v455_v45, %v454_v53  ;;  %v33746_v53 = vld [vmem:[#allocation62_spill] sm:$0xff] }
 0x19c   : > { %21806 = vmatprep.mubr.msk.f32.mxu0 %vm749_vm1, %v33740_v32  ;;  %v33748_v45 = vld [vmem:[#allocation64_spill] sm:$0xff] }
 0x19e   : > { %20487 = vmatmul.mubr.msk.f32.gmra.mrb[30].mxu1 %vm749_vm1, %v27142_v0  ;;  %v27864_v0 = vsel %vm2936_vm6, %v2942_v12, %v2943_v20  ;;  %v33750_v20 = vld [vmem:[#allocation66_spill] sm:$0xff] }
 0x19f   : > { %21807 = vmatmul.mubr.msk.f32.gmra.mrb[14].mxu0 %vm749_vm1, %v33741_v22  ;;  %20497 = vmatprep.mubr.msk.f32.mxu1 %vm749_vm1, %v2939_v27  ;;  %33743 = vst [vmem:[#allocation209_spill] sm:$0xff] %v27864_v0  ;;  %v456_v27 = vld [vmem:[%s32669_s1 + $0x100] sm:$0xff] }
 0x1a0   : > { %21809 = vmatprep.mubr.msk.f32.mxu0 %vm749_vm1, %v33742_v2  ;;  %v27889_v12 = vpack.c.bf16 %v457_v26, %v456_v27  ;;  %v5462_v27 = vrot.slane %v27513_v15, 1  ;;  %v5463_v26 = vrot.slane %v27517_v44, 1 }
 0x1a2   : > { %20498 = vmatmul.mubr.msk.f32.vlgmr.msra.gmra.mrb[0].mxu1 %vm749_vm1, %v2941_v42  ;;  %v33751_v42 = vld [vmem:[#allocation68_spill] sm:$0xff] }
 0x1a3   : > { %21810 = vmatmul.mubr.msk.f32.gmra.mrb[16].mxu0 %vm749_vm1, %v33744_v13  ;;  %20500 = vmatprep.mubr.msk.f32.mxu1 %vm749_vm1, %v27864_v0  ;;  %v7323_v0 = vrot.slane %v27543_v49, 1 }
 0x1a4   : > { %21812 = vmatprep.mubr.msk.f32.mxu0 %vm749_vm1, %v33746_v53  ;;  %23092 = vmatpush3.bf16.msra.mxu1 %v27702_v63  ;;  %v3603_v63 = vrot.slane %v27491_v48, 1 }
 0x1a5   : > { %23094 = vmatprep.subr.bf16.mxu1 %v23093_v40 }
 0x1a6   : > { %20501 = vmatmul.mubr.msk.f32.gmra.mrb[2].mxu1 %vm749_vm1, %v27880_v41  ;;  %v27915_v38 = vsel %vm668_vm0, %v3602_v60, %v3603_v63  ;;  %v27932_v41 = vsel %vm668_vm0, %v5462_v27, %v5463_v26 }
 0x1a7   : > { %21813 = vmatmul.mubr.msk.f32.gmra.mrb[18].mxu0 %vm749_vm1, %v33748_v45  ;;  %20503 = vmatprep.mubr.msk.f32.mxu1 %vm749_vm1, %v27886_v18  ;;  %33753 = vst [vmem:[#allocation213_spill] sm:$0xff] %v27915_v38 }
 0x1a8   : > { %21815 = vmatprep.mubr.msk.f32.mxu0 %vm749_vm1, %v33750_v20  ;;  %23096 = vmatpush3.bf16.msra.mxu1 %v23093_v40  ;;  %v3605_v40 = vrot.slane %v27506_v51, 1 }
 0x1a9   : > { %23098 = vmatprep.subr.bf16.mxu1 %v27889_v12 }
 0x1aa   : > { %20504 = vmatmul.mubr.msk.f32.gmra.mrb[4].mxu1 %vm749_vm1, %v27898_v8  ;;  %v33755_v8 = vld [vmem:[#allocation176_spill] sm:$0xff]  ;;  %v27928_v60 = vsel %vm668_vm0, %v3603_v63, %v3605_v40  ;;  %v7325_v40 = vrot.slane %v27558_v10, 1 }
 0x1ab   : > { %21816 = vmatmul.mubr.msk.f32.gmra.mrb[20].mxu0 %vm749_vm1, %v33751_v42  ;;  %20506 = vmatprep.mubr.msk.f32.mxu1 %vm749_vm1, %v27197_v54  ;;  %33756 = vst [vmem:[#allocation214_spill] sm:$0xff] %v27928_v60  ;;  %v33757_v54 = vld [vmem:[#allocation200_spill] sm:$0xff] }
 0x1ac   : > { %21818 = vmatprep.mubr.msk.f32.mxu0 %vm749_vm1, %v33752_v1  ;;  %v5465_v18 = vrot.slane %v33757_v54, 1  ;;  %33758 = vst [vmem:[#allocation200_spill] sm:$0xff] %v27932_v41  ;;  %v27954_v1 = vld [vmem:[%s25620_s27 + $0x1d8] sm:$0x3f] }
 0x1ae   : > { %20507 = vmatmul.mubr.msk.f32.gmra.mrb[6].mxu1 %vm749_vm1, %v27216_v9  ;;  %v7322_v9 = vrot.slane %v27539_v39, 1  ;;  %v27945_v63 = vsel %vm668_vm0, %v5463_v26, %v5465_v18  ;;  %v9217_v18 = vrot.slane %v27954_v1, 1 }
 0x1af   : > { %21819 = vmatmul.mubr.msk.f32.gmra.mrb[22].mxu0 %vm749_vm1, %v33754_v21  ;;  %20509 = vmatprep.mubr.msk.f32.mxu1 %vm749_vm1, %v33755_v8  ;;  %v33759_v21 = vld [vmem:[#allocation177_spill] sm:$0xff]  ;;  %v33760_v8 = vld [vmem:[#allocation178_spill] sm:$0xff]  ;;  %33761 = vst [vmem:[#allocation215_spill] sm:$0xff] %v27945_v63 }
 0x1b0   : > { %21821 = vmatprep.mubr.msk.f32.mxu0 %vm749_vm1, %v27915_v38  ;;  %v27949_v27 = vsel %vm668_vm0, %v7322_v9, %v7323_v0  ;;  %v9214_v38 = vrot.slane %v27749_v37, 1  ;;  %v27965_v9 = vsel %vm668_vm0, %v7323_v0, %v7325_v40  ;;  %v33770_v40 = vld [vmem:[#allocation183_spill] sm:$0xff] }
 0x1b1   : > { %33762 = vst [vmem:[#allocation216_spill] sm:$0xff] %v27949_v27  ;;  %33765 = vst [vmem:[#allocation217_spill] sm:$0xff] %v27965_v9 }
 0x1b2   : > { %20510 = vmatmul.mubr.msk.f32.gmra.mrb[8].mxu1 %vm749_vm1, %v33759_v21  ;;  %v9215_v21 = vrot.slane %v27760_v43, 1 }
 0x1b3   : > { %21822 = vmatmul.mubr.msk.f32.gmra.mrb[24].mxu0 %vm749_vm1, %v27928_v60  ;;  %20512 = vmatprep.mubr.msk.f32.mxu1 %vm749_vm1, %v33760_v8  ;;  %v33763_v60 = vld [vmem:[#allocation179_spill] sm:$0xff]  ;;  %v33767_v8 = vld [vmem:[#allocation181_spill] sm:$0xff] }
 0x1b4   : > { %21824 = vmatprep.mubr.msk.f32.mxu0 %vm749_vm1, %v27932_v41  ;;  %v33764_v41 = vld [vmem:[#allocation180_spill] sm:$0xff]  ;;  %v27969_v26 = vsel %vm668_vm0, %v9214_v38, %v9215_v21  ;;  %v27980_v0 = vsel %vm668_vm0, %v9215_v21, %v9217_v18  ;;  %v33773_v18 = vld [vmem:[#allocation185_spill] sm:$0xff] }
 0x1b5   : > { %33766 = vst [vmem:[#allocation218_spill] sm:$0xff] %v27969_v26  ;;  %33769 = vst [vmem:[#allocation219_spill] sm:$0xff] %v27980_v0  ;;  %v550_v38 = vld [vmem:[%s32669_s1 + $0x3f0] sm:$0xff] }
 0x1b6   : > { %20513 = vmatmul.mubr.msk.f32.gmra.mrb[10].mxu1 %vm749_vm1, %v33763_v60  ;;  %v33780_v60 = vld [vmem:[#allocation22_spill] sm:$0xff] }
 0x1b7   : > { %21825 = vmatmul.mubr.msk.f32.gmra.mrb[26].mxu0 %vm749_vm1, %v27945_v63  ;;  %20515 = vmatprep.mubr.msk.f32.mxu1 %vm749_vm1, %v33764_v41  ;;  %v33768_v63 = vld [vmem:[#allocation182_spill] sm:$0xff] }
 0x1b8   : > { %21827 = vmatprep.mubr.msk.f32.mxu0 %vm749_vm1, %v27949_v27  ;;  %v33771_v27 = vld [vmem:[#allocation184_spill] sm:$0xff]  ;;  %v33779_v41 = vld [vmem:[#allocation146_spill] sm:$0xff] }
 0x1ba   : > { %20516 = vmatmul.mubr.msk.f32.gmra.mrb[12].mxu1 %vm749_vm1, %v33767_v8  ;;  %v33774_v8 = vld [vmem:[#allocation16_spill] sm:$0xff] }
 0x1bb   : > { %21828 = vmatmul.mubr.msk.f32.gmra.mrb[28].mxu0 %vm749_vm1, %v27965_v9  ;;  %20518 = vmatprep.mubr.msk.f32.mxu1 %vm749_vm1, %v33768_v63  ;;  %v551_v9 = vld [vmem:[%s32669_s1 + $0x3f8] sm:$0xff]  ;;  %v553_v63 = vld [vmem:[%s32669_s1 + $0x408] sm:$0xff] }
 0x1bc   : > { %21830 = vmatprep.mubr.msk.f32.mxu0 %vm749_vm1, %v27969_v26  ;;  %v33772_v26 = vld [vmem:[#allocation13_spill] sm:$0xff]  ;;  %v23285_v21 = vpack.c.bf16 %v551_v9, %v550_v38  ;;  %v33776_v9 = vld [vmem:[#allocation18_spill] sm:$0xff] }
 0x1be   : > { %20519 = vmatmul.mubr.msk.f32.gmra.mrb[14].mxu1 %vm749_vm1, %v33770_v40  ;;  %v552_v40 = vld [vmem:[%s32669_s1 + $0x400] sm:$0xff] }
 0x1bf   : > { %21831 = vmatmul.mubr.msk.f32.gmra.mrb[30].mxu0 %vm749_vm1, %v27980_v0  ;;  %20521 = vmatprep.mubr.msk.f32.mxu1 %vm749_vm1, %v33771_v27  ;;  %v33775_v0 = vld [vmem:[#allocation186_spill] sm:$0xff]  ;;  %v28011_v38 = vpack.c.bf16 %v553_v63, %v552_v40  ;;  %v33778_v27 = vld [vmem:[#allocation20_spill] sm:$0xff]  ;;  %v33783_v40 = vld [vmem:[#allocation151_spill] sm:$0xff] }
 0x1c0   : > { %21841 = vmatprep.mubr.msk.f32.mxu0 %vm749_vm1, %v33772_v26  ;;  %v33782_v63 = vld [vmem:[#allocation24_spill] sm:$0xff] }
 0x1c2   : > { %20522 = vmatmul.mubr.msk.f32.gmra.mrb[16].mxu1 %vm749_vm1, %v33773_v18  ;;  %v33777_v18 = vld [vmem:[#allocation142_spill] sm:$0xff] }
 0x1c3   : > { %21842 = vmatmul.mubr.msk.f32.vlgmr.msra.gmra.mrb[0].mxu0 %vm749_vm1, %v33774_v8  ;;  %20524 = vmatprep.mubr.msk.f32.mxu1 %vm749_vm1, %v33775_v0  ;;  %v33785_v0 = vld [vmem:[#allocation152_spill] sm:$0xff] }
 0x1c4   : > { %23284 = vmatpush3.bf16.msra.mxu0 %v27791_v33  ;;  %21844 = vmatprep.mubr.msk.f32.mxu0 %vm749_vm1, %v33776_v9  ;;  %v33781_v33 = vld [vmem:[#allocation147_spill] sm:$0xff]  ;;  %v33807_v9 = vld [vmem:[#allocation140_spill] sm:$0xff] }
 0x1c5   : > { %23286 = vmatprep.subr.bf16.mxu0 %v23285_v21 }
 0x1c6   : > { %20525 = vmatmul.mubr.msk.f32.gmra.mrb[18].mxu1 %vm749_vm1, %v33777_v18  ;;  %v33784_v18 = vld [vmem:[#allocation26_spill] sm:$0xff] }
 0x1c7   : > { %21845 = vmatmul.mubr.msk.f32.gmra.mrb[2].mxu0 %vm749_vm1, %v33778_v27  ;;  %20527 = vmatprep.mubr.msk.f32.mxu1 %vm749_vm1, %v33779_v41  ;;  %v33786_v41 = vld [vmem:[#allocation28_spill] sm:$0xff]  ;;  %v33804_v27 = vld [vmem:[#allocation134_spill] sm:$0xff] }
 0x1c8   : > { %21847 = vmatprep.mubr.msk.f32.mxu0 %vm749_vm1, %v33780_v60  ;;  %23288 = vmatpush3.bf16.msra.mxu0 %v23285_v21  ;;  %v33787_v21 = vld [vmem:[#allocation156_spill] sm:$0xff]  ;;  %v33788_v60 = vld [vmem:[#allocation31_spill] sm:$0xff] }
 0x1c9   : > { %23290 = vmatprep.subr.bf16.mxu0 %v28011_v38 }
 0x1ca   : > { %20528 = vmatmul.mubr.msk.f32.gmra.mrb[20].mxu1 %vm749_vm1, %v33781_v33  ;;  %v33789_v33 = vld [vmem:[#allocation189_spill] sm:$0xff] }
 0x1cb   : > { %21848 = vmatmul.mubr.msk.f32.gmra.mrb[4].mxu0 %vm749_vm1, %v33782_v63  ;;  %20530 = vmatprep.mubr.msk.f32.mxu1 %vm749_vm1, %v33783_v40  ;;  %v33790_v63 = vld [vmem:[#allocation33_spill] sm:$0xff]  ;;  %v33791_v40 = vld [vmem:[#allocation191_spill] sm:$0xff] }
 0x1cc   : > { %21850 = vmatprep.mubr.msk.f32.mxu0 %vm749_vm1, %v33784_v18  ;;  %v460_v18 = vld [vmem:[%s32669_s1 + $0x120] sm:$0xff] }
 0x1ce   : > { %20531 = vmatmul.mubr.msk.f32.gmra.mrb[22].mxu1 %vm749_vm1, %v33785_v0  ;;  %v33792_v0 = vld [vmem:[#allocation35_spill] sm:$0xff] }
 0x1cf   : > { %21851 = vmatmul.mubr.msk.f32.gmra.mrb[6].mxu0 %vm749_vm1, %v33786_v41  ;;  %20533 = vmatprep.mubr.msk.f32.mxu1 %vm749_vm1, %v33787_v21  ;;  %v33793_v41 = vld [vmem:[#allocation193_spill] sm:$0xff] }
 0x1d0   : > { %21853 = vmatprep.mubr.msk.f32.mxu0 %vm749_vm1, %v33788_v60  ;;  %v33794_v21 = vld [vmem:[#allocation37_spill] sm:$0xff]  ;;  %v33795_v60 = vld [vmem:[#allocation194_spill] sm:$0xff] }
 0x1d2   : > { %20534 = vmatmul.mubr.msk.f32.gmra.mrb[24].mxu1 %vm749_vm1, %v33789_v33  ;;  %v33796_v33 = vld [vmem:[#allocation39_spill] sm:$0xff] }
 0x1d3   : > { %21854 = vmatmul.mubr.msk.f32.gmra.mrb[8].mxu0 %vm749_vm1, %v33790_v63  ;;  %20536 = vmatprep.mubr.msk.f32.mxu1 %vm749_vm1, %v33791_v40  ;;  %v33797_v63 = vld [vmem:[#allocation195_spill] sm:$0xff]  ;;  %v33798_v40 = vld [vmem:[#allocation41_spill] sm:$0xff] }
 0x1d4   : > { %21856 = vmatprep.mubr.msk.f32.mxu0 %vm749_vm1, %v33792_v0  ;;  %v33799_v0 = vld [vmem:[#allocation196_spill] sm:$0xff] }
 0x1d6   : > { %20537 = vmatmul.mubr.msk.f32.gmra.mrb[26].mxu1 %vm749_vm1, %v33793_v41  ;;  %v33800_v41 = vld [vmem:[#allocation128_spill] sm:$0xff] }
 0x1d7   : > { %21857 = vmatmul.mubr.msk.f32.gmra.mrb[10].mxu0 %vm749_vm1, %v33794_v21  ;;  %20539 = vmatprep.mubr.msk.f32.mxu1 %vm749_vm1, %v33795_v60  ;;  %v33801_v21 = vld [vmem:[#allocation197_spill] sm:$0xff]  ;;  %v458_v60 = vld [vmem:[%s32669_s1 + $0x110] sm:$0xff] }
 0x1d8   : > { %21859 = vmatprep.mubr.msk.f32.mxu0 %vm749_vm1, %v33796_v33  ;;  %v33802_v33 = vld [vmem:[#allocation130_spill] sm:$0xff] }
 0x1da   : > { %20540 = vmatmul.mubr.msk.f32.gmra.mrb[28].mxu1 %vm749_vm1, %v33797_v63  ;;  %v459_v63 = vld [vmem:[%s32669_s1 + $0x118] sm:$0xff] }
 0x1db   : > { %21860 = vmatmul.mubr.msk.f32.gmra.mrb[12].mxu0 %vm749_vm1, %v33798_v40  ;;  %20542 = vmatprep.mubr.msk.f32.mxu1 %vm749_vm1, %v33799_v0  ;;  %v25297_v40 = vld [vmem:[%s25620_s27 + $0x18] sm:$0xff]  ;;  %v33803_v0 = vld [vmem:[#allocation132_spill] sm:$0xff] }
 0x1dc   : > { %21862 = vmatprep.mubr.msk.f32.mxu0 %vm749_vm1, %v33800_v41  ;;  %v25298_v41 = vld [vmem:[%s25620_s27 + $0x20] sm:$0xff] }
 0x1de   : > { %20543 = vmatmul.mubr.msk.f32.gmra.mrb[30].mxu1 %vm749_vm1, %v33801_v21  ;;  %v23101_v21 = vpack.c.bf16 %v459_v63, %v458_v60  ;;  %v25300_v60 = vld [vmem:[%s25620_s27 + $0x38] sm:$0xff]  ;;  %v33806_v63 = vld [vmem:[#allocation138_spill] sm:$0xff] }
 0x1df   : > { %21863 = vmatmul.mubr.msk.f32.gmra.mrb[14].mxu0 %vm749_vm1, %v33802_v33  ;;  %20553 = vmatprep.mubr.msk.f32.mxu1 %vm749_vm1, %v25297_v40  ;;  %v461_v33 = vld [vmem:[%s32669_s1 + $0x128] sm:$0xff]  ;;  %v25299_v40 = vld [vmem:[%s25620_s27 + $0x30] sm:$0xff] }
 0x1e0   : > { %21865 = vmatprep.mubr.msk.f32.mxu0 %vm749_vm1, %v33803_v0  ;;  %v33805_v0 = vld [vmem:[#allocation136_spill] sm:$0xff] }
 0x1e2   : > { %20554 = vmatmul.mubr.msk.f32.vlgmr.msra.gmra.mrb[0].mxu1 %vm749_vm1, %v25298_v41  ;;  %v28091_v41 = vpack.c.bf16 %v461_v33, %v460_v18  ;;  %v3869_v18 = vrot.slane %v27491_v48, 2  ;;  %v25302_v33 = vld [vmem:[%s25620_s27 + $0x50] sm:$0xff] }
 0x1e3   : > { %21866 = vmatmul.mubr.msk.f32.gmra.mrb[16].mxu0 %vm749_vm1, %v33804_v27  ;;  %20556 = vmatprep.mubr.msk.f32.mxu1 %vm749_vm1, %v25299_v40  ;;  %v25301_v27 = vld [vmem:[%s25620_s27 + $0x48] sm:$0xff] }
 0x1e4   : > { %21868 = vmatprep.mubr.msk.f32.mxu0 %vm749_vm1, %v33805_v0  ;;  %23100 = vmatpush3.bf16.msra.mxu1 %v27889_v12  ;;  %v3868_v12 = vrot.slane %v27487_v56, 2  ;;  %v33808_v40 = vld [vmem:[#allocation143_spill] sm:$0xff] }
 0x1e5   : > { %23102 = vmatprep.subr.bf16.mxu1 %v23101_v21  ;;  %v25304_v0 = vld [vmem:[%s25620_s27 + $0x68] sm:$0xff] }
 0x1e6   : > { %20557 = vmatmul.mubr.msk.f32.gmra.mrb[2].mxu1 %vm749_vm1, %v25300_v60  ;;  %v25303_v60 = vld [vmem:[%s25620_s27 + $0x60] sm:$0xff] }
 0x1e7   : > { %21869 = vmatmul.mubr.msk.f32.gmra.mrb[18].mxu0 %vm749_vm1, %v33806_v63  ;;  %20559 = vmatprep.mubr.msk.f32.mxu1 %vm749_vm1, %v25301_v27  ;;  %v33809_v27 = vld [vmem:[#allocation145_spill] sm:$0xff]  ;;  %v5728_v63 = vrot.slane %v27513_v15, 2  ;;  %v5731_v15 = vrot.slane %v33757_v54, 2 }
 0x1e8   : > { %21871 = vmatprep.mubr.msk.f32.mxu0 %vm749_vm1, %v33807_v9  ;;  %23104 = vmatpush3.bf16.msra.mxu1 %v23101_v21  ;;  %v3871_v21 = vrot.slane %v27506_v51, 2  ;;  %v28114_v9 = vsel %vm1328_vm2, %v3868_v12, %v3869_v18  ;;  %v7589_v12 = vrot.slane %v27543_v49, 2  ;;  %v7591_v49 = vrot.slane %v27558_v10, 2 }
 0x1e9   : > { %23106 = vmatprep.subr.bf16.mxu1 %v28091_v41  ;;  %33810 = vst [vmem:[#allocation220_spill] sm:$0xff] %v28114_v9 }
 0x1ea   : > { %20560 = vmatmul.mubr.msk.f32.gmra.mrb[4].mxu1 %vm749_vm1, %v25302_v33  ;;  %v5729_v33 = vrot.slane %v27517_v44, 2  ;;  %v28130_v51 = vsel %vm1328_vm2, %v3869_v18, %v3871_v21  ;;  %v28146_v18 = vld [vmem:[%s25620_s27 + $0x90] sm:$0xff]  ;;  %v9481_v21 = vrot.slane %v27760_v43, 2  ;;  %v28176_v10 = vsel %vm1328_vm2, %v7589_v12, %v7591_v49  ;;  %v28200_v49 = vld [vmem:[%s25620_s27 + $0xc8] sm:$0xff] }
 0x1eb   : > { %21872 = vmatmul.mubr.msk.f32.gmra.mrb[20].mxu0 %vm749_vm1, %v33808_v40  ;;  %20562 = vmatprep.mubr.msk.f32.mxu1 %vm749_vm1, %v25303_v60  ;;  %v33811_v40 = vld [vmem:[#allocation149_spill] sm:$0xff]  ;;  %33813 = vst [vmem:[#allocation222_spill] sm:$0xff] %v28130_v51  ;;  %33816 = vst [vmem:[#allocation225_spill] sm:$0xff] %v28146_v18 }
 0x1ec   : > { %21874 = vmatprep.mubr.msk.f32.mxu0 %vm749_vm1, %v33809_v27  ;;  %v28123_v60 = vld [vmem:[%s25620_s27 + $0x78] sm:$0xff]  ;;  %v28134_v44 = vsel %vm1328_vm2, %v5728_v63, %v5729_v33  ;;  %v28153_v54 = vsel %vm1328_vm2, %v5729_v33, %v5731_v15  ;;  %v9480_v63 = vrot.slane %v27749_v37, 2  ;;  %v28169_v33 = vld [vmem:[%s25620_s27 + $0xa8] sm:$0xff]  ;;  %33821 = vst [vmem:[#allocation230_spill] sm:$0xff] %v28176_v10  ;;  %v9483_v15 = vrot.slane %v27954_v1, 2  ;;  %33826 = vst [vmem:[#allocation235_spill] sm:$0xff] %v28200_v49 }
 0x1ed   : > { %33812 = vst [vmem:[#allocation221_spill] sm:$0xff] %v28123_v60  ;;  %33814 = vst [vmem:[#allocation223_spill] sm:$0xff] %v28134_v44 }
 0x1ee   : > { %20563 = vmatmul.mubr.msk.f32.gmra.mrb[6].mxu1 %vm749_vm1, %v25304_v0  ;;  %v7588_v0 = vrot.slane %v27539_v39, 2  ;;  %33817 = vst [vmem:[#allocation226_spill] sm:$0xff] %v28153_v54  ;;  %33820 = vst [vmem:[#allocation229_spill] sm:$0xff] %v28169_v33 }
 0x1ef   : > { %21875 = vmatmul.mubr.msk.f32.gmra.mrb[22].mxu0 %vm749_vm1, %v33811_v40  ;;  %20565 = vmatprep.mubr.msk.f32.mxu1 %vm749_vm1, %v28123_v60  ;;  %v28139_v40 = vld [vmem:[%s25620_s27 + $0x80] sm:$0xff]  ;;  %v33851_v60 = vld [vmem:[#allocation17_spill] sm:$0xff] }
 0x1f0   : > { %21877 = vmatprep.mubr.msk.f32.mxu0 %vm749_vm1, %v28114_v9  ;;  %33815 = vst [vmem:[#allocation224_spill] sm:$0xff] %v28139_v40  ;;  %v28157_v39 = vsel %vm1328_vm2, %v7588_v0, %v7589_v12  ;;  %v28180_v0 = vsel %vm1328_vm2, %v9480_v63, %v9481_v21  ;;  %v28197_v12 = vsel %vm1328_vm2, %v9481_v21, %v9483_v15  ;;  %v554_v63 = vld [vmem:[%s32669_s1 + $0x410] sm:$0xff]  ;;  %v33828_v21 = vld [vmem:[#allocation47_spill] sm:$0xff] }
 0x1f1   : > { %33818 = vst [vmem:[#allocation227_spill] sm:$0xff] %v28157_v39  ;;  %33822 = vst [vmem:[#allocation231_spill] sm:$0xff] %v28180_v0 }
 0x1f2   : > { %20566 = vmatmul.mubr.msk.f32.gmra.mrb[8].mxu1 %vm749_vm1, %v28139_v40  ;;  %v28162_v40 = vld [vmem:[%s25620_s27 + $0x98] sm:$0xff]  ;;  %33825 = vst [vmem:[#allocation234_spill] sm:$0xff] %v28197_v12 }
 0x1f3   : > { %21878 = vmatmul.mubr.msk.f32.gmra.mrb[24].mxu0 %vm749_vm1, %v28130_v51  ;;  %20568 = vmatprep.mubr.msk.f32.mxu1 %vm749_vm1, %v28146_v18  ;;  %33819 = vst [vmem:[#allocation228_spill] sm:$0xff] %v28162_v40  ;;  %v33850_v18 = vld [vmem:[#allocation77_spill] sm:$0xff] }
 0x1f4   : > { %21880 = vmatprep.mubr.msk.f32.mxu0 %vm749_vm1, %v28134_v44  ;;  %v28183_v44 = vld [vmem:[%s25620_s27 + $0xb0] sm:$0xff] }
 0x1f5   : > { %33823 = vst [vmem:[#allocation232_spill] sm:$0xff] %v28183_v44 }
 0x1f6   : > { %20569 = vmatmul.mubr.msk.f32.gmra.mrb[10].mxu1 %vm749_vm1, %v28162_v40  ;;  %v465_v40 = vld [vmem:[%s32669_s1 + $0x148] sm:$0xff] }
 0x1f7   : > { %21881 = vmatmul.mubr.msk.f32.gmra.mrb[26].mxu0 %vm749_vm1, %v28153_v54  ;;  %20571 = vmatprep.mubr.msk.f32.mxu1 %vm749_vm1, %v28169_v33  ;;  %v28190_v54 = vld [vmem:[%s25620_s27 + $0xc0] sm:$0xff]  ;;  %v33849_v33 = vld [vmem:[#allocation15_spill] sm:$0xff] }
 0x1f8   : > { %21883 = vmatprep.mubr.msk.f32.mxu0 %vm749_vm1, %v28157_v39  ;;  %33824 = vst [vmem:[#allocation233_spill] sm:$0xff] %v28190_v54  ;;  %v28220_v39 = vld [vmem:[%s25620_s27 + $0xe0] sm:$0xff] }
 0x1f9   : > { %33829 = vst [vmem:[#allocation237_spill] sm:$0xff] %v28220_v39 }
 0x1fa   : > { %20572 = vmatmul.mubr.msk.f32.gmra.mrb[12].mxu1 %vm749_vm1, %v28183_v44  ;;  %v33834_v44 = vld [vmem:[#allocation53_spill] sm:$0xff] }
 0x1fb   : > { %21884 = vmatmul.mubr.msk.f32.gmra.mrb[28].mxu0 %vm749_vm1, %v28176_v10  ;;  %20574 = vmatprep.mubr.msk.f32.mxu1 %vm749_vm1, %v28190_v54  ;;  %v555_v10 = vld [vmem:[%s32669_s1 + $0x418] sm:$0xff] }
 0x1fc   : > { %21886 = vmatprep.mubr.msk.f32.mxu0 %vm749_vm1, %v28180_v0  ;;  %v28213_v0 = vld [vmem:[%s25620_s27 + $0xd8] sm:$0xff]  ;;  %v23293_v15 = vpack.c.bf16 %v555_v10, %v554_v63  ;;  %v33832_v10 = vld [vmem:[#allocation51_spill] sm:$0xff] }
 0x1fd   : > { %33827 = vst [vmem:[#allocation236_spill] sm:$0xff] %v28213_v0  ;;  %v33830_v54 = vld [vmem:[#allocation49_spill] sm:$0xff] }
 0x1fe   : > { %20575 = vmatmul.mubr.msk.f32.gmra.mrb[14].mxu1 %vm749_vm1, %v28200_v49  ;;  %v556_v49 = vld [vmem:[%s32669_s1 + $0x420] sm:$0xff] }
 0x1ff   : > { %21887 = vmatmul.mubr.msk.f32.gmra.mrb[30].mxu0 %vm749_vm1, %v28197_v12  ;;  %20577 = vmatprep.mubr.msk.f32.mxu1 %vm749_vm1, %v28213_v0  ;;  %v557_v12 = vld [vmem:[%s32669_s1 + $0x428] sm:$0xff]  ;;  %v28233_v0 = vld [vmem:[%s25620_s27 + $0xf0] sm:$0xff] }
 0x200   : > { %21897 = vmatprep.mubr.msk.f32.mxu0 %vm749_vm1, %v33828_v21  ;;  %33831 = vst [vmem:[#allocation238_spill] sm:$0xff] %v28233_v0  ;;  %v28240_v63 = vpack.c.bf16 %v557_v12, %v556_v49  ;;  %v33837_v12 = vld [vmem:[#allocation59_spill] sm:$0xff] }
 0x201   : > { %v33839_v49 = vld [vmem:[#allocation63_spill] sm:$0xff] }
 0x202   : > { %20578 = vmatmul.mubr.msk.f32.gmra.mrb[16].mxu1 %vm749_vm1, %v28220_v39  ;;  %v28243_v39 = vld [vmem:[%s25620_s27 + $0xf8] sm:$0xff] }
 0x203   : > { %21898 = vmatmul.mubr.msk.f32.vlgmr.msra.gmra.mrb[0].mxu0 %vm749_vm1, %v33830_v54  ;;  %20580 = vmatprep.mubr.msk.f32.mxu1 %vm749_vm1, %v28233_v0  ;;  %33833 = vst [vmem:[#allocation239_spill] sm:$0xff] %v28243_v39  ;;  %v33835_v0 = vld [vmem:[#allocation55_spill] sm:$0xff] }
 0x204   : > { %23292 = vmatpush3.bf16.msra.mxu0 %v28011_v38  ;;  %21900 = vmatprep.mubr.msk.f32.mxu0 %vm749_vm1, %v33832_v10  ;;  %v33836_v38 = vld [vmem:[#allocation57_spill] sm:$0xff] }
 0x205   : > { %23294 = vmatprep.subr.bf16.mxu0 %v23293_v15 }
 0x206   : > { %20581 = vmatmul.mubr.msk.f32.gmra.mrb[18].mxu1 %vm749_vm1, %v28243_v39 }
 0x207   : > { %21901 = vmatmul.mubr.msk.f32.gmra.mrb[2].mxu0 %vm749_vm1, %v33834_v44  ;;  %20583 = vmatprep.mubr.msk.f32.mxu1 %vm749_vm1, %v27337_v23  ;;  %v33838_v23 = vld [vmem:[#allocation61_spill] sm:$0xff] }
 0x208   : > { %21903 = vmatprep.mubr.msk.f32.mxu0 %vm749_vm1, %v33835_v0  ;;  %23296 = vmatpush3.bf16.msra.mxu0 %v23293_v15  ;;  %v33847_v15 = vld [vmem:[#allocation12_spill] sm:$0xff] }
 0x209   : > { %23298 = vmatprep.subr.bf16.mxu0 %v28240_v63 }
 0x20a   : > { %20584 = vmatmul.mubr.msk.f32.gmra.mrb[20].mxu1 %vm749_vm1, %v27341_v24  ;;  %v33840_v24 = vld [vmem:[#allocation65_spill] sm:$0xff] }
 0x20b   : > { %21904 = vmatmul.mubr.msk.f32.gmra.mrb[4].mxu0 %vm749_vm1, %v33836_v38  ;;  %20586 = vmatprep.mubr.msk.f32.mxu1 %vm749_vm1, %v27364_v29  ;;  %v33841_v29 = vld [vmem:[#allocation67_spill] sm:$0xff] }
 0x20c   : > { %21906 = vmatprep.mubr.msk.f32.mxu0 %vm749_vm1, %v33837_v12 }
 0x20e   : > { %20587 = vmatmul.mubr.msk.f32.gmra.mrb[22].mxu1 %vm749_vm1, %v27368_v52  ;;  %v33842_v52 = vld [vmem:[#allocation69_spill] sm:$0xff] }
 0x20f   : > { %21907 = vmatmul.mubr.msk.f32.gmra.mrb[6].mxu0 %vm749_vm1, %v33838_v23  ;;  %20589 = vmatprep.mubr.msk.f32.mxu1 %vm749_vm1, %v27399_v11  ;;  %v33843_v11 = vld [vmem:[#allocation71_spill] sm:$0xff] }
 0x210   : > { %21909 = vmatprep.mubr.msk.f32.mxu0 %vm749_vm1, %v33839_v49 }
 0x212   : > { %20590 = vmatmul.mubr.msk.f32.gmra.mrb[24].mxu1 %vm749_vm1, %v27403_v59  ;;  %v33844_v59 = vld [vmem:[#allocation73_spill] sm:$0xff] }
 0x213   : > { %21910 = vmatmul.mubr.msk.f32.gmra.mrb[8].mxu0 %vm749_vm1, %v33840_v24  ;;  %20592 = vmatprep.mubr.msk.f32.mxu1 %vm749_vm1, %v27435_v61  ;;  %v33845_v61 = vld [vmem:[#allocation74_spill] sm:$0xff] }
 0x214   : > { %21912 = vmatprep.mubr.msk.f32.mxu0 %vm749_vm1, %v33841_v29 }
 0x216   : > { %20593 = vmatmul.mubr.msk.f32.gmra.mrb[26].mxu1 %vm749_vm1, %v27439_v4  ;;  %v462_v4 = vld [vmem:[%s32669_s1 + $0x130] sm:$0xff] }
 0x217   : > { %21913 = vmatmul.mubr.msk.f32.gmra.mrb[10].mxu0 %vm749_vm1, %v33842_v52  ;;  %20595 = vmatprep.mubr.msk.f32.mxu1 %vm749_vm1, %v27463_v6  ;;  %v463_v6 = vld [vmem:[%s32669_s1 + $0x138] sm:$0xff] }
 0x218   : > { %21915 = vmatprep.mubr.msk.f32.mxu0 %vm749_vm1, %v33843_v11  ;;  %v23109_v39 = vpack.c.bf16 %v463_v6, %v462_v4  ;;  %v33853_v4 = vld [vmem:[#allocation19_spill] sm:$0xff] }
 0x219   : > { %v33854_v6 = vld [vmem:[#allocation79_spill] sm:$0xff] }
 0x21a   : > { %20596 = vmatmul.mubr.msk.f32.gmra.mrb[28].mxu1 %vm749_vm1, %v27467_v34  ;;  %v33846_v34 = vld [vmem:[#allocation75_spill] sm:$0xff] }
 0x21b   : > { %21916 = vmatmul.mubr.msk.f32.gmra.mrb[12].mxu0 %vm749_vm1, %v33844_v59  ;;  %20598 = vmatprep.mubr.msk.f32.mxu1 %vm749_vm1, %v27487_v56  ;;  %v33848_v56 = vld [vmem:[#allocation76_spill] sm:$0xff] }
 0x21c   : > { %21918 = vmatprep.mubr.msk.f32.mxu0 %vm749_vm1, %v33845_v61 }
 0x21e   : > { %20599 = vmatmul.mubr.msk.f32.gmra.mrb[30].mxu1 %vm749_vm1, %v27491_v48  ;;  %v464_v48 = vld [vmem:[%s32669_s1 + $0x140] sm:$0xff] }
 0x21f   : > { %21919 = vmatmul.mubr.msk.f32.gmra.mrb[14].mxu0 %vm749_vm1, %v33846_v34  ;;  %20609 = vmatprep.mubr.msk.f32.mxu1 %vm749_vm1, %v33847_v15  ;;  %v33852_v15 = vld [vmem:[#allocation78_spill] sm:$0xff] }
 0x220   : > { %21921 = vmatprep.mubr.msk.f32.mxu0 %vm749_vm1, %v33848_v56  ;;  %v33855_v56 = vld [vmem:[#allocation21_spill] sm:$0xff] }
 0x222   : > { %20610 = vmatmul.mubr.msk.f32.vlgmr.msra.gmra.mrb[0].mxu1 %vm749_vm1, %v33849_v33  ;;  %v28323_v33 = vpack.c.bf16 %v465_v40, %v464_v48  ;;  %v33859_v40 = vld [vmem:[#allocation82_spill] sm:$0xff] }
 0x223   : > { %21922 = vmatmul.mubr.msk.f32.gmra.mrb[16].mxu0 %vm749_vm1, %v33850_v18  ;;  %20612 = vmatprep.mubr.msk.f32.mxu1 %vm749_vm1, %v33851_v60  ;;  %v33856_v18 = vld [vmem:[#allocation80_spill] sm:$0xff]  ;;  %v33857_v60 = vld [vmem:[#allocation23_spill] sm:$0xff]  ;;  %v33860_v48 = vld [vmem:[#allocation86_spill] sm:$0xff] }
 0x224   : > { %21924 = vmatprep.mubr.msk.f32.mxu0 %vm749_vm1, %v33852_v15  ;;  %23108 = vmatpush3.bf16.msra.mxu1 %v28091_v41  ;;  %v33858_v41 = vld [vmem:[#allocation81_spill] sm:$0xff] }
 0x225   : > { %23110 = vmatprep.subr.bf16.mxu1 %v23109_v39 }
 0x226   : > { %20613 = vmatmul.mubr.msk.f32.gmra.mrb[2].mxu1 %vm749_vm1, %v33853_v4  ;;  %v33864_v4 = vld [vmem:[#allocation90_spill] sm:$0xff] }
 0x227   : > { %21925 = vmatmul.mubr.msk.f32.gmra.mrb[18].mxu0 %vm749_vm1, %v33854_v6  ;;  %20615 = vmatprep.mubr.msk.f32.mxu1 %vm749_vm1, %v33855_v56  ;;  %v9747_v56 = vrot.slane %v27760_v43, 3 }
 0x228   : > { %21927 = vmatprep.mubr.msk.f32.mxu0 %vm749_vm1, %v33856_v18  ;;  %23112 = vmatpush3.bf16.msra.mxu1 %v23109_v39  ;;  %v33861_v39 = vld [vmem:[#allocation87_spill] sm:$0xff] }
 0x229   : > { %23114 = vmatprep.subr.bf16.mxu1 %v28323_v33 }
 0x22a   : > { %20616 = vmatmul.mubr.msk.f32.gmra.mrb[4].mxu1 %vm749_vm1, %v33857_v60  ;;  %v33862_v60 = vld [vmem:[#allocation88_spill] sm:$0xff] }
 0x22b   : > { %21928 = vmatmul.mubr.msk.f32.gmra.mrb[20].mxu0 %vm749_vm1, %v33858_v41  ;;  %20618 = vmatprep.mubr.msk.f32.mxu1 %vm749_vm1, %v33719_v58  ;;  %v33863_v58 = vld [vmem:[#allocation89_spill] sm:$0xff] }
 0x22c   : > { %21930 = vmatprep.mubr.msk.f32.mxu0 %vm749_vm1, %v33859_v40 }
 0x22e   : > { %20619 = vmatmul.mubr.msk.f32.gmra.mrb[6].mxu1 %vm749_vm1, %v33721_v7  ;;  %v9746_v7 = vrot.slane %v27749_v37, 3 }
 0x22f   : > { %21931 = vmatmul.mubr.msk.f32.gmra.mrb[22].mxu0 %vm749_vm1, %v33860_v48  ;;  %20621 = vmatprep.mubr.msk.f32.mxu1 %vm749_vm1, %v33723_v17  ;;  %v33867_v17 = vld [vmem:[#allocation92_spill] sm:$0xff] }
 0x230   : > { %21933 = vmatprep.mubr.msk.f32.mxu0 %vm749_vm1, %v33861_v39 }
 0x232   : > { %20622 = vmatmul.mubr.msk.f32.gmra.mrb[8].mxu1 %vm749_vm1, %v33725_v5  ;;  %v33865_v5 = vld [vmem:[#allocation91_spill] sm:$0xff] }
 0x233   : > { %21934 = vmatmul.mubr.msk.f32.gmra.mrb[24].mxu0 %vm749_vm1, %v33862_v60  ;;  %20624 = vmatprep.mubr.msk.f32.mxu1 %vm749_vm1, %v33727_v57  ;;  %v9749_v57 = vrot.slane %v27954_v1, 3 }
 0x234   : > { %21936 = vmatprep.mubr.msk.f32.mxu0 %vm749_vm1, %v33863_v58  ;;  %v28370_v58 = vsel %vm1730_vm3, %v9746_v7, %v9747_v56  ;;  %v558_v7 = vld [vmem:[%s32669_s1 + $0x430] sm:$0xff] }
 0x235   : > { %33866 = vst [vmem:[#allocation12_spill] sm:$0xff] %v28370_v58 }
 0x236   : > { %20625 = vmatmul.mubr.msk.f32.gmra.mrb[10].mxu1 %vm749_vm1, %v33729_v28  ;;  %v10013_v28 = vrot.slane %v27760_v43, 4 }
 0x237   : > { %21937 = vmatmul.mubr.msk.f32.gmra.mrb[26].mxu0 %vm749_vm1, %v33864_v4  ;;  %20627 = vmatprep.mubr.msk.f32.mxu1 %vm749_vm1, %v33731_v35  ;;  %v28381_v4 = vsel %vm1730_vm3, %v9747_v56, %v9749_v57  ;;  %v560_v56 = vld [vmem:[%s32669_s1 + $0x440] sm:$0xff]  ;;  %v33902_v35 = vld [vmem:[#allocation85_spill] sm:$0xff] }
 0x238   : > { %21939 = vmatprep.mubr.msk.f32.mxu0 %vm749_vm1, %v33865_v5  ;;  %33868 = vst [vmem:[#allocation15_spill] sm:$0xff] %v28381_v4  ;;  %v561_v5 = vld [vmem:[%s32669_s1 + $0x448] sm:$0xff] }
 0x23a   : > { %20628 = vmatmul.mubr.msk.f32.gmra.mrb[12].mxu1 %vm749_vm1, %v33733_v55  ;;  %v33892_v55 = vld [vmem:[#allocation115_spill] sm:$0xff] }
 0x23b   : > { %21940 = vmatmul.mubr.msk.f32.gmra.mrb[28].mxu0 %vm749_vm1, %v33867_v17  ;;  %20630 = vmatprep.mubr.msk.f32.mxu1 %vm749_vm1, %v33734_v30  ;;  %v559_v17 = vld [vmem:[%s32669_s1 + $0x438] sm:$0xff] }
 0x23c   : > { %21942 = vmatprep.mubr.msk.f32.mxu0 %vm749_vm1, %v28370_v58  ;;  %v33869_v58 = vld [vmem:[#allocation95_spill] sm:$0xff]  ;;  %v23301_v57 = vpack.c.bf16 %v559_v17, %v558_v7  ;;  %v33871_v17 = vld [vmem:[#allocation97_spill] sm:$0xff]  ;;  %v28412_v7 = vpack.c.bf16 %v561_v5, %v560_v56  ;;  %v33873_v5 = vld [vmem:[#allocation102_spill] sm:$0xff] }
 0x23d   : > { %v33876_v56 = vld [vmem:[#allocation106_spill] sm:$0xff]  ;;  %v33891_v30 = vld [vmem:[#allocation9_spill] sm:$0xff] }
 0x23e   : > { %20631 = vmatmul.mubr.msk.f32.gmra.mrb[14].mxu1 %vm749_vm1, %v33735_v46  ;;  %v33870_v46 = vld [vmem:[#allocation96_spill] sm:$0xff] }
 0x23f   : > { %21943 = vmatmul.mubr.msk.f32.gmra.mrb[30].mxu0 %vm749_vm1, %v28381_v4  ;;  %20633 = vmatprep.mubr.msk.f32.mxu1 %vm749_vm1, %v33736_v14  ;;  %v33872_v4 = vld [vmem:[#allocation98_spill] sm:$0xff]  ;;  %v33887_v14 = vld [vmem:[#allocation111_spill] sm:$0xff] }
 0x240   : > { %21953 = vmatprep.mubr.msk.f32.mxu0 %vm749_vm1, %v33869_v58 }
 0x242   : > { %20634 = vmatmul.mubr.msk.f32.gmra.mrb[16].mxu1 %vm749_vm1, %v33737_v47  ;;  %v33886_v47 = vld [vmem:[#allocation14_spill] sm:$0xff] }
 0x243   : > { %21954 = vmatmul.mubr.msk.f32.vlgmr.msra.gmra.mrb[0].mxu0 %vm749_vm1, %v33870_v46  ;;  %20636 = vmatprep.mubr.msk.f32.mxu1 %vm749_vm1, %v33738_v19  ;;  %v469_v19 = vld [vmem:[%s32669_s1 + $0x168] sm:$0xff] }
 0x244   : > { %23300 = vmatpush3.bf16.msra.mxu0 %v28240_v63  ;;  %21956 = vmatprep.mubr.msk.f32.mxu0 %vm749_vm1, %v33871_v17  ;;  %v33874_v63 = vld [vmem:[#allocation105_spill] sm:$0xff] }
 0x245   : > { %23302 = vmatprep.subr.bf16.mxu0 %v23301_v57 }
 0x246   : > { %20637 = vmatmul.mubr.msk.f32.gmra.mrb[18].mxu1 %vm749_vm1, %v33739_v25  ;;  %v33885_v25 = vld [vmem:[#allocation110_spill] sm:$0xff] }
 0x247   : > { %21957 = vmatmul.mubr.msk.f32.gmra.mrb[2].mxu0 %vm749_vm1, %v33872_v4  ;;  %20639 = vmatprep.mubr.msk.f32.mxu1 %vm749_vm1, %v33740_v32 }
 0x248   : > { %21959 = vmatprep.mubr.msk.f32.mxu0 %vm749_vm1, %v33681_v36  ;;  %23304 = vmatpush3.bf16.msra.mxu0 %v23301_v57  ;;  %v33875_v57 = vld [vmem:[#allocation70_spill] sm:$0xff] }
 0x249   : > { %23306 = vmatprep.subr.bf16.mxu0 %v28412_v7 }
 0x24a   : > { %20640 = vmatmul.mubr.msk.f32.gmra.mrb[20].mxu1 %vm749_vm1, %v33741_v22  ;;  %v33883_v22 = vld [vmem:[#allocation10_spill] sm:$0xff] }
 0x24b   : > { %21960 = vmatmul.mubr.msk.f32.gmra.mrb[4].mxu0 %vm749_vm1, %v33684_v50  ;;  %20642 = vmatprep.mubr.msk.f32.mxu1 %vm749_vm1, %v33742_v2  ;;  %v33882_v2 = vld [vmem:[#allocation108_spill] sm:$0xff] }
 0x24c   : > { %21962 = vmatprep.mubr.msk.f32.mxu0 %vm749_vm1, %v33685_v16 }
 0x24e   : > { %20643 = vmatmul.mubr.msk.f32.gmra.mrb[22].mxu1 %vm749_vm1, %v33744_v13  ;;  %v33880_v13 = vld [vmem:[#allocation107_spill] sm:$0xff] }
 0x24f   : > { %21963 = vmatmul.mubr.msk.f32.gmra.mrb[6].mxu0 %vm749_vm1, %v33873_v5  ;;  %20645 = vmatprep.mubr.msk.f32.mxu1 %vm749_vm1, %v33746_v53  ;;  %v33878_v53 = vld [vmem:[#allocation8_spill] sm:$0xff] }
 0x250   : > { %21965 = vmatprep.mubr.msk.f32.mxu0 %vm749_vm1, %v33688_v3 }
 0x252   : > { %20646 = vmatmul.mubr.msk.f32.gmra.mrb[24].mxu1 %vm749_vm1, %v33748_v45  ;;  %v33877_v45 = vld [vmem:[#allocation72_spill] sm:$0xff] }
 0x253   : > { %21966 = vmatmul.mubr.msk.f32.gmra.mrb[8].mxu0 %vm749_vm1, %v33689_v31  ;;  %20648 = vmatprep.mubr.msk.f32.mxu1 %vm749_vm1, %v33750_v20  ;;  %v33879_v20 = vld [vmem:[#allocation213_spill] sm:$0xff] }
 0x254   : > { %21968 = vmatprep.mubr.msk.f32.mxu0 %vm749_vm1, %v33690_v62 }
 0x256   : > { %20649 = vmatmul.mubr.msk.f32.gmra.mrb[26].mxu1 %vm749_vm1, %v33751_v42  ;;  %v33881_v42 = vld [vmem:[#allocation214_spill] sm:$0xff] }
 0x257   : > { %21969 = vmatmul.mubr.msk.f32.gmra.mrb[10].mxu0 %vm749_vm1, %v33874_v63  ;;  %20651 = vmatprep.mubr.msk.f32.mxu1 %vm749_vm1, %v33875_v57  ;;  %v466_v57 = vld [vmem:[%s32669_s1 + $0x150] sm:$0xff] }
 0x258   : > { %21971 = vmatprep.mubr.msk.f32.mxu0 %vm749_vm1, %v33876_v56 }
 0x25a   : > { %20652 = vmatmul.mubr.msk.f32.gmra.mrb[28].mxu1 %vm749_vm1, %v33877_v45  ;;  %v467_v45 = vld [vmem:[%s32669_s1 + $0x158] sm:$0xff] }
 0x25b   : > { %21972 = vmatmul.mubr.msk.f32.gmra.mrb[12].mxu0 %vm749_vm1, %v33878_v53  ;;  %20654 = vmatprep.mubr.msk.f32.mxu1 %vm749_vm1, %v33879_v20  ;;  %v33884_v20 = vld [vmem:[#allocation109_spill] sm:$0xff]  ;;  %v23117_v32 = vpack.c.bf16 %v467_v45, %v466_v57  ;;  %v33890_v57 = vld [vmem:[#allocation114_spill] sm:$0xff] }
 0x25c   : > { %21974 = vmatprep.mubr.msk.f32.mxu0 %vm749_vm1, %v33880_v13  ;;  %v33889_v45 = vld [vmem:[#allocation113_spill] sm:$0xff] }
 0x25e   : > { %20655 = vmatmul.mubr.msk.f32.gmra.mrb[30].mxu1 %vm749_vm1, %v33881_v42  ;;  %v468_v42 = vld [vmem:[%s32669_s1 + $0x160] sm:$0xff] }
 0x25f   : > { %21975 = vmatmul.mubr.msk.f32.gmra.mrb[14].mxu0 %vm749_vm1, %v33882_v2  ;;  %20665 = vmatprep.mubr.msk.f32.mxu1 %vm749_vm1, %v33883_v22  ;;  %v33888_v22 = vld [vmem:[#allocation112_spill] sm:$0xff] }
 0x260   : > { %21977 = vmatprep.mubr.msk.f32.mxu0 %vm749_vm1, %v33884_v20 }
 0x262   : > { %20666 = vmatmul.mubr.msk.f32.vlgmr.msra.gmra.mrb[0].mxu1 %vm749_vm1, %v33885_v25  ;;  %v28492_v25 = vpack.c.bf16 %v469_v19, %v468_v42  ;;  %v33894_v19 = vld [vmem:[#allocation116_spill] sm:$0xff]  ;;  %v33895_v42 = vld [vmem:[#allocation117_spill] sm:$0xff] }
 0x263   : > { %21978 = vmatmul.mubr.msk.f32.gmra.mrb[16].mxu0 %vm749_vm1, %v33886_v47  ;;  %20668 = vmatprep.mubr.msk.f32.mxu1 %vm749_vm1, %v33887_v14  ;;  %v33893_v14 = vld [vmem:[#allocation11_spill] sm:$0xff] }
 0x264   : > { %21980 = vmatprep.mubr.msk.f32.mxu0 %vm749_vm1, %v33888_v22  ;;  %23116 = vmatpush3.bf16.msra.mxu1 %v28323_v33  ;;  %v33896_v33 = vld [vmem:[#allocation118_spill] sm:$0xff] }
 0x265   : > { %23118 = vmatprep.subr.bf16.mxu1 %v23117_v32 }
 0x266   : > { %20669 = vmatmul.mubr.msk.f32.gmra.mrb[2].mxu1 %vm749_vm1, %v33889_v45  ;;  %v33900_v45 = vld [vmem:[#allocation84_spill] sm:$0xff] }
 0x267   : > { %21981 = vmatmul.mubr.msk.f32.gmra.mrb[18].mxu0 %vm749_vm1, %v33890_v57  ;;  %20671 = vmatprep.mubr.msk.f32.mxu1 %vm749_vm1, %v33891_v30  ;;  %v33898_v30 = vld [vmem:[#allocation83_spill] sm:$0xff] }
 0x268   : > { %21983 = vmatprep.mubr.msk.f32.mxu0 %vm749_vm1, %v33892_v55  ;;  %23120 = vmatpush3.bf16.msra.mxu1 %v23117_v32  ;;  %v33897_v32 = vld [vmem:[#allocation18_spill] sm:$0xff] }
 0x269   : > { %23122 = vmatprep.subr.bf16.mxu1 %v28492_v25 }
 0x26a   : > { %20672 = vmatmul.mubr.msk.f32.gmra.mrb[4].mxu1 %vm749_vm1, %v33893_v14  ;;  %v33899_v14 = vld [vmem:[#allocation20_spill] sm:$0xff] }
 0x26b   : > { %21984 = vmatmul.mubr.msk.f32.gmra.mrb[20].mxu0 %vm749_vm1, %v33894_v19  ;;  %20674 = vmatprep.mubr.msk.f32.mxu1 %vm749_vm1, %v33772_v26  ;;  %v33901_v26 = vld [vmem:[#allocation22_spill] sm:$0xff] }
 0x26c   : > { %21986 = vmatprep.mubr.msk.f32.mxu0 %vm749_vm1, %v33895_v42  ;;  %v33909_v42 = vld [vmem:[#allocation121_spill] sm:$0xff] }
 0x26e   : > { %20675 = vmatmul.mubr.msk.f32.gmra.mrb[6].mxu1 %vm749_vm1, %v33774_v8  ;;  %v10012_v8 = vrot.slane %v27749_v37, 4 }
 0x26f   : > { %21987 = vmatmul.mubr.msk.f32.gmra.mrb[22].mxu0 %vm749_vm1, %v33896_v33  ;;  %20677 = vmatprep.mubr.msk.f32.mxu1 %vm749_vm1, %v33897_v32  ;;  %v33903_v32 = vld [vmem:[#allocation24_spill] sm:$0xff] }
 0x270   : > { %21989 = vmatprep.mubr.msk.f32.mxu0 %vm749_vm1, %v33898_v30  ;;  %v33904_v30 = vld [vmem:[#allocation119_spill] sm:$0xff]  ;;  %v33908_v33 = vld [vmem:[#allocation28_spill] sm:$0xff] }
 0x272   : > { %20678 = vmatmul.mubr.msk.f32.gmra.mrb[8].mxu1 %vm749_vm1, %v33899_v14  ;;  %v33905_v14 = vld [vmem:[#allocation26_spill] sm:$0xff] }
 0x273   : > { %21990 = vmatmul.mubr.msk.f32.gmra.mrb[24].mxu0 %vm749_vm1, %v33900_v45  ;;  %20680 = vmatprep.mubr.msk.f32.mxu1 %vm749_vm1, %v33901_v26  ;;  %v33906_v45 = vld [vmem:[#allocation120_spill] sm:$0xff]  ;;  %v10015_v26 = vrot.slane %v27954_v1, 4 }
 0x274   : > { %21992 = vmatprep.mubr.msk.f32.mxu0 %vm749_vm1, %v33902_v35  ;;  %v28539_v35 = vsel %vm2132_vm4, %v10012_v8, %v10013_v28  ;;  %v562_v8 = vld [vmem:[%s32669_s1 + $0x450] sm:$0xff] }
 0x275   : > { %33907 = vst [vmem:[#allocation10_spill] sm:$0xff] %v28539_v35 }
 0x276   : > { %20681 = vmatmul.mubr.msk.f32.gmra.mrb[10].mxu1 %vm749_vm1, %v33903_v32  ;;  %v33910_v32 = vld [vmem:[#allocation31_spill] sm:$0xff] }
 0x277   : > { %21993 = vmatmul.mubr.msk.f32.gmra.mrb[26].mxu0 %vm749_vm1, %v33904_v30  ;;  %20683 = vmatprep.mubr.msk.f32.mxu1 %vm749_vm1, %v33905_v14  ;;  %v28550_v30 = vsel %vm2132_vm4, %v10013_v28, %v10015_v26  ;;  %v33915_v26 = vld [vmem:[#allocation37_spill] sm:$0xff] }
 0x278   : > { %21995 = vmatprep.mubr.msk.f32.mxu0 %vm749_vm1, %v33906_v45  ;;  %33911 = vst [vmem:[#allocation110_spill] sm:$0xff] %v28550_v30  ;;  %v33912_v45 = vld [vmem:[#allocation33_spill] sm:$0xff] }
 0x279   : > { %v33916_v14 = vld [vmem:[#allocation125_spill] sm:$0xff] }
 0x27a   : > { %20684 = vmatmul.mubr.msk.f32.gmra.mrb[12].mxu1 %vm749_vm1, %v33908_v33  ;;  %v565_v33 = vld [vmem:[%s32669_s1 + $0x468] sm:$0xff] }
 0x27b   : > { %21996 = vmatmul.mubr.msk.f32.gmra.mrb[28].mxu0 %vm749_vm1, %v33909_v42  ;;  %20686 = vmatprep.mubr.msk.f32.mxu1 %vm749_vm1, %v33910_v32  ;;  %v563_v42 = vld [vmem:[%s32669_s1 + $0x458] sm:$0xff]  ;;  %v33913_v32 = vld [vmem:[#allocation35_spill] sm:$0xff] }
 0x27c   : > { %21998 = vmatprep.mubr.msk.f32.mxu0 %vm749_vm1, %v28539_v35  ;;  %v33914_v35 = vld [vmem:[#allocation124_spill] sm:$0xff]  ;;  %v23309_v28 = vpack.c.bf16 %v563_v42, %v562_v8  ;;  %v33918_v42 = vld [vmem:[#allocation126_spill] sm:$0xff] }
 0x27e   : > { %20687 = vmatmul.mubr.msk.f32.gmra.mrb[14].mxu1 %vm749_vm1, %v33912_v45  ;;  %v564_v45 = vld [vmem:[%s32669_s1 + $0x460] sm:$0xff] }
 0x27f   : > { %21999 = vmatmul.mubr.msk.f32.gmra.mrb[30].mxu0 %vm749_vm1, %v28550_v30  ;;  %20689 = vmatprep.mubr.msk.f32.mxu1 %vm749_vm1, %v33913_v32  ;;  %v33917_v30 = vld [vmem:[#allocation39_spill] sm:$0xff]  ;;  %v28581_v8 = vpack.c.bf16 %v565_v33, %v564_v45  ;;  %v33925_v33 = vld [vmem:[#allocation132_spill] sm:$0xff] }
 0x280   : > { %22009 = vmatprep.mubr.msk.f32.mxu0 %vm749_vm1, %v33914_v35  ;;  %v33920_v32 = vld [vmem:[#allocation127_spill] sm:$0xff]  ;;  %v33921_v35 = vld [vmem:[#allocation128_spill] sm:$0xff] }
 0x281   : > { %v33924_v45 = vld [vmem:[#allocation131_spill] sm:$0xff] }
 0x282   : > { %20690 = vmatmul.mubr.msk.f32.gmra.mrb[16].mxu1 %vm749_vm1, %v33915_v26  ;;  %v33919_v26 = vld [vmem:[#allocation41_spill] sm:$0xff] }
 0x283   : > { %22010 = vmatmul.mubr.msk.f32.vlgmr.msra.gmra.mrb[0].mxu0 %vm749_vm1, %v33916_v14  ;;  %20692 = vmatprep.mubr.msk.f32.mxu1 %vm749_vm1, %v33917_v30  ;;  %v33922_v14 = vld [vmem:[#allocation129_spill] sm:$0xff]  ;;  %v33927_v30 = vld [vmem:[#allocation134_spill] sm:$0xff] }
 0x284   : > { %23308 = vmatpush3.bf16.msra.mxu0 %v28412_v7  ;;  %22012 = vmatprep.mubr.msk.f32.mxu0 %vm749_vm1, %v33918_v42  ;;  %v33923_v7 = vld [vmem:[#allocation130_spill] sm:$0xff] }
 0x285   : > { %23310 = vmatprep.subr.bf16.mxu0 %v23309_v28 }
 0x286   : > { %20693 = vmatmul.mubr.msk.f32.gmra.mrb[18].mxu1 %vm749_vm1, %v33919_v26  ;;  %v33926_v26 = vld [vmem:[#allocation133_spill] sm:$0xff] }
 0x287   : > { %22013 = vmatmul.mubr.msk.f32.gmra.mrb[2].mxu0 %vm749_vm1, %v33920_v32  ;;  %20695 = vmatprep.mubr.msk.f32.mxu1 %vm749_vm1, %v33921_v35  ;;  %v33928_v35 = vld [vmem:[#allocation135_spill] sm:$0xff] }
 0x288   : > { %22015 = vmatprep.mubr.msk.f32.mxu0 %vm749_vm1, %v33922_v14  ;;  %23312 = vmatpush3.bf16.msra.mxu0 %v23309_v28  ;;  %v33929_v28 = vld [vmem:[#allocation136_spill] sm:$0xff]  ;;  %v33930_v14 = vld [vmem:[#allocation137_spill] sm:$0xff] }
 0x289   : > { %23314 = vmatprep.subr.bf16.mxu0 %v28581_v8 }
 0x28a   : > { %20696 = vmatmul.mubr.msk.f32.gmra.mrb[20].mxu1 %vm749_vm1, %v33923_v7  ;;  %v33931_v7 = vld [vmem:[#allocation138_spill] sm:$0xff] }
 0x28b   : > { %22016 = vmatmul.mubr.msk.f32.gmra.mrb[4].mxu0 %vm749_vm1, %v33924_v45  ;;  %20698 = vmatprep.mubr.msk.f32.mxu1 %vm749_vm1, %v33925_v33  ;;  %v33932_v45 = vld [vmem:[#allocation139_spill] sm:$0xff]  ;;  %v33933_v33 = vld [vmem:[#allocation140_spill] sm:$0xff] }
 0x28c   : > { %22018 = vmatprep.mubr.msk.f32.mxu0 %vm749_vm1, %v33926_v26  ;;  %v33934_v26 = vld [vmem:[#allocation141_spill] sm:$0xff] }
 0x28e   : > { %20699 = vmatmul.mubr.msk.f32.gmra.mrb[22].mxu1 %vm749_vm1, %v33927_v30  ;;  %v33935_v30 = vld [vmem:[#allocation143_spill] sm:$0xff] }
 0x28f   : > { %22019 = vmatmul.mubr.msk.f32.gmra.mrb[6].mxu0 %vm749_vm1, %v33928_v35  ;;  %20701 = vmatprep.mubr.msk.f32.mxu1 %vm749_vm1, %v33929_v28  ;;  %v33936_v35 = vld [vmem:[#allocation144_spill] sm:$0xff] }
 0x290   : > { %22021 = vmatprep.mubr.msk.f32.mxu0 %vm749_vm1, %v33930_v14  ;;  %v33937_v28 = vld [vmem:[#allocation148_spill] sm:$0xff] }
 0x292   : > { %20702 = vmatmul.mubr.msk.f32.gmra.mrb[24].mxu1 %vm749_vm1, %v33931_v7  ;;  %v33938_v7 = vld [vmem:[#allocation149_spill] sm:$0xff] }
 0x293   : > { %22022 = vmatmul.mubr.msk.f32.gmra.mrb[8].mxu0 %vm749_vm1, %v33932_v45  ;;  %20704 = vmatprep.mubr.msk.f32.mxu1 %vm749_vm1, %v33933_v33  ;;  %v33939_v45 = vld [vmem:[#allocation150_spill] sm:$0xff]  ;;  %v33940_v33 = vld [vmem:[#allocation153_spill] sm:$0xff] }
 0x294   : > { %22024 = vmatprep.mubr.msk.f32.mxu0 %vm749_vm1, %v33934_v26  ;;  %v33945_v26 = vld [vmem:[#allocation159_spill] sm:$0xff] }
 0x296   : > { %20705 = vmatmul.mubr.msk.f32.gmra.mrb[26].mxu1 %vm749_vm1, %v33935_v30  ;;  %v33941_v30 = vld [vmem:[#allocation154_spill] sm:$0xff] }
 0x297   : > { %22025 = vmatmul.mubr.msk.f32.gmra.mrb[10].mxu0 %vm749_vm1, %v33936_v35  ;;  %20707 = vmatprep.mubr.msk.f32.mxu1 %vm749_vm1, %v33809_v27  ;;  %v470_v27 = vld [vmem:[%s32669_s1 + $0x170] sm:$0xff]  ;;  %v473_v35 = vld [vmem:[%s32669_s1 + $0x188] sm:$0xff] }
 0x298   : > { %22027 = vmatprep.mubr.msk.f32.mxu0 %vm749_vm1, %v33937_v28  ;;  %v33944_v28 = vld [vmem:[#allocation158_spill] sm:$0xff] }
 0x29a   : > { %20708 = vmatmul.mubr.msk.f32.gmra.mrb[28].mxu1 %vm749_vm1, %v33938_v7  ;;  %v471_v7 = vld [vmem:[%s32669_s1 + $0x178] sm:$0xff] }
 0x29b   : > { %22028 = vmatmul.mubr.msk.f32.gmra.mrb[12].mxu0 %vm749_vm1, %v33939_v45  ;;  %20710 = vmatprep.mubr.msk.f32.mxu1 %vm749_vm1, %v28114_v9  ;;  %v33942_v45 = vld [vmem:[#allocation155_spill] sm:$0xff]  ;;  %v33943_v9 = vld [vmem:[#allocation157_spill] sm:$0xff] }
 0x29c   : > { %22030 = vmatprep.mubr.msk.f32.mxu0 %vm749_vm1, %v33940_v33  ;;  %v23125_v33 = vpack.c.bf16 %v471_v7, %v470_v27  ;;  %v33948_v7 = vld [vmem:[#allocation162_spill] sm:$0xff] }
 0x29e   : > { %20711 = vmatmul.mubr.msk.f32.gmra.mrb[30].mxu1 %vm749_vm1, %v28130_v51  ;;  %v472_v51 = vld [vmem:[%s32669_s1 + $0x180] sm:$0xff] }
 0x29f   : > { %22031 = vmatmul.mubr.msk.f32.gmra.mrb[14].mxu0 %vm749_vm1, %v33941_v30  ;;  %20721 = vmatprep.mubr.msk.f32.mxu1 %vm749_vm1, %v33942_v45  ;;  %v33946_v30 = vld [vmem:[#allocation160_spill] sm:$0xff]  ;;  %v33947_v45 = vld [vmem:[#allocation161_spill] sm:$0xff]  ;;  %v28661_v27 = vpack.c.bf16 %v473_v35, %v472_v51  ;;  %v33954_v51 = vld [vmem:[#allocation166_spill] sm:$0xff] }
 0x2a0   : > { %22033 = vmatprep.mubr.msk.f32.mxu0 %vm749_vm1, %v33943_v9  ;;  %v33950_v9 = vld [vmem:[#allocation43_spill] sm:$0xff]  ;;  %v33953_v35 = vld [vmem:[#allocation165_spill] sm:$0xff] }
 0x2a2   : > { %20722 = vmatmul.mubr.msk.f32.vlgmr.msra.gmra.mrb[0].mxu1 %vm749_vm1, %v33944_v28  ;;  %v33949_v28 = vld [vmem:[#allocation163_spill] sm:$0xff] }
 0x2a3   : > { %22034 = vmatmul.mubr.msk.f32.gmra.mrb[16].mxu0 %vm749_vm1, %v33945_v26  ;;  %20724 = vmatprep.mubr.msk.f32.mxu1 %vm749_vm1, %v33946_v30  ;;  %v33951_v26 = vld [vmem:[#allocation164_spill] sm:$0xff]  ;;  %v33952_v30 = vld [vmem:[#allocation45_spill] sm:$0xff] }
 0x2a4   : > { %22036 = vmatprep.mubr.msk.f32.mxu0 %vm749_vm1, %v33947_v45  ;;  %23124 = vmatpush3.bf16.msra.mxu1 %v28492_v25  ;;  %v33955_v25 = vld [vmem:[#allocation167_spill] sm:$0xff] }
 0x2a5   : > { %23126 = vmatprep.subr.bf16.mxu1 %v23125_v33 }
 0x2a6   : > { %20725 = vmatmul.mubr.msk.f32.gmra.mrb[2].mxu1 %vm749_vm1, %v33948_v7  ;;  %v33959_v7 = vld [vmem:[#allocation171_spill] sm:$0xff] }
 0x2a7   : > { %22037 = vmatmul.mubr.msk.f32.gmra.mrb[18].mxu0 %vm749_vm1, %v33949_v28  ;;  %20727 = vmatprep.mubr.msk.f32.mxu1 %vm749_vm1, %v33950_v9  ;;  %v10279_v9 = vrot.slane %v27760_v43, 5  ;;  %v33962_v43 = vld [vmem:[#allocation173_spill] sm:$0xff] }
 0x2a8   : > { %22039 = vmatprep.mubr.msk.f32.mxu0 %vm749_vm1, %v33951_v26  ;;  %23128 = vmatpush3.bf16.msra.mxu1 %v23125_v33  ;;  %v33956_v33 = vld [vmem:[#allocation168_spill] sm:$0xff] }
 0x2a9   : > { %23130 = vmatprep.subr.bf16.mxu1 %v28661_v27 }
 0x2aa   : > { %20728 = vmatmul.mubr.msk.f32.gmra.mrb[4].mxu1 %vm749_vm1, %v33952_v30  ;;  %v33957_v30 = vld [vmem:[#allocation169_spill] sm:$0xff] }
 0x2ab   : > { %22040 = vmatmul.mubr.msk.f32.gmra.mrb[20].mxu0 %vm749_vm1, %v33953_v35  ;;  %20730 = vmatprep.mubr.msk.f32.mxu1 %vm749_vm1, %v33828_v21  ;;  %v33958_v21 = vld [vmem:[#allocation170_spill] sm:$0xff] }
 0x2ac   : > { %22042 = vmatprep.mubr.msk.f32.mxu0 %vm749_vm1, %v33954_v51 }
 0x2ae   : > { %20731 = vmatmul.mubr.msk.f32.gmra.mrb[6].mxu1 %vm749_vm1, %v33830_v54  ;;  %v10278_v54 = vrot.slane %v27749_v37, 5 }
 0x2af   : > { %22043 = vmatmul.mubr.msk.f32.gmra.mrb[22].mxu0 %vm749_vm1, %v33955_v25  ;;  %20733 = vmatprep.mubr.msk.f32.mxu1 %vm749_vm1, %v33832_v10  ;;  %v33991_v10 = vld [vmem:[#allocation194_spill] sm:$0xff] }
 0x2b0   : > { %22045 = vmatprep.mubr.msk.f32.mxu0 %vm749_vm1, %v33956_v33 }
 0x2b2   : > { %20734 = vmatmul.mubr.msk.f32.gmra.mrb[8].mxu1 %vm749_vm1, %v33834_v44  ;;  %v33960_v44 = vld [vmem:[#allocation172_spill] sm:$0xff] }
 0x2b3   : > { %22046 = vmatmul.mubr.msk.f32.gmra.mrb[24].mxu0 %vm749_vm1, %v33957_v30  ;;  %20736 = vmatprep.mubr.msk.f32.mxu1 %vm749_vm1, %v33835_v0  ;;  %v10281_v0 = vrot.slane %v27954_v1, 5 }
 0x2b4   : > { %22048 = vmatprep.mubr.msk.f32.mxu0 %vm749_vm1, %v33958_v21  ;;  %v28708_v21 = vsel %vm2534_vm5, %v10278_v54, %v10279_v9  ;;  %v566_v54 = vld [vmem:[%s32669_s1 + $0x470] sm:$0xff] }
 0x2b5   : > { %33961 = vst [vmem:[#allocation155_spill] sm:$0xff] %v28708_v21  ;;  %v28719_v37 = vsel %vm2534_vm5, %v10279_v9, %v10281_v0  ;;  %v568_v0 = vld [vmem:[%s32669_s1 + $0x480] sm:$0xff] }
 0x2b6   : > { %20737 = vmatmul.mubr.msk.f32.gmra.mrb[10].mxu1 %vm749_vm1, %v33836_v38  ;;  %33963 = vst [vmem:[#allocation158_spill] sm:$0xff] %v28719_v37  ;;  %v33990_v38 = vld [vmem:[#allocation93_spill] sm:$0xff] }
 0x2b7   : > { %22049 = vmatmul.mubr.msk.f32.gmra.mrb[26].mxu0 %vm749_vm1, %v33959_v7  ;;  %20739 = vmatprep.mubr.msk.f32.mxu1 %vm749_vm1, %v33837_v12  ;;  %v33965_v7 = vld [vmem:[#allocation177_spill] sm:$0xff]  ;;  %v33986_v12 = vld [vmem:[#allocation190_spill] sm:$0xff] }
 0x2b8   : > { %22051 = vmatprep.mubr.msk.f32.mxu0 %vm749_vm1, %v33960_v44  ;;  %v569_v44 = vld [vmem:[%s32669_s1 + $0x488] sm:$0xff] }
 0x2ba   : > { %20740 = vmatmul.mubr.msk.f32.gmra.mrb[12].mxu1 %vm749_vm1, %v33838_v23  ;;  %v33985_v23 = vld [vmem:[#allocation189_spill] sm:$0xff] }
 0x2bb   : > { %22052 = vmatmul.mubr.msk.f32.gmra.mrb[28].mxu0 %vm749_vm1, %v33962_v43  ;;  %20742 = vmatprep.mubr.msk.f32.mxu1 %vm749_vm1, %v33839_v49  ;;  %v567_v43 = vld [vmem:[%s32669_s1 + $0x478] sm:$0xff]  ;;  %v477_v49 = vld [vmem:[%s32669_s1 + $0x1a8] sm:$0xff] }
 0x2bc   : > { %22054 = vmatprep.mubr.msk.f32.mxu0 %vm749_vm1, %v28708_v21  ;;  %v33964_v21 = vld [vmem:[#allocation176_spill] sm:$0xff]  ;;  %v23317_v9 = vpack.c.bf16 %v567_v43, %v566_v54  ;;  %v33966_v43 = vld [vmem:[#allocation178_spill] sm:$0xff]  ;;  %v28750_v54 = vpack.c.bf16 %v569_v44, %v568_v0  ;;  %v33969_v44 = vld [vmem:[#allocation181_spill] sm:$0xff] }
 0x2bd   : > { %v33971_v0 = vld [vmem:[#allocation182_spill] sm:$0xff] }
 0x2be   : > { %20743 = vmatmul.mubr.msk.f32.gmra.mrb[14].mxu1 %vm749_vm1, %v33840_v24  ;;  %v33984_v24 = vld [vmem:[#allocation188_spill] sm:$0xff] }
 0x2bf   : > { %22055 = vmatmul.mubr.msk.f32.gmra.mrb[30].mxu0 %vm749_vm1, %v28719_v37  ;;  %20745 = vmatprep.mubr.msk.f32.mxu1 %vm749_vm1, %v33841_v29  ;;  %v33967_v37 = vld [vmem:[#allocation179_spill] sm:$0xff] }
 0x2c0   : > { %22065 = vmatprep.mubr.msk.f32.mxu0 %vm749_vm1, %v33964_v21 }
 0x2c2   : > { %20746 = vmatmul.mubr.msk.f32.gmra.mrb[16].mxu1 %vm749_vm1, %v33842_v52  ;;  %v33968_v52 = vld [vmem:[#allocation180_spill] sm:$0xff] }
 0x2c3   : > { %22066 = vmatmul.mubr.msk.f32.vlgmr.msra.gmra.mrb[0].mxu0 %vm749_vm1, %v33965_v7  ;;  %20748 = vmatprep.mubr.msk.f32.mxu1 %vm749_vm1, %v33843_v11  ;;  %v33982_v11 = vld [vmem:[#allocation187_spill] sm:$0xff] }
 0x2c4   : > { %23316 = vmatpush3.bf16.msra.mxu0 %v28581_v8  ;;  %22068 = vmatprep.mubr.msk.f32.mxu0 %vm749_vm1, %v33966_v43  ;;  %v33970_v8 = vld [vmem:[#allocation76_spill] sm:$0xff] }
 0x2c5   : > { %23318 = vmatprep.subr.bf16.mxu0 %v23317_v9 }
 0x2c6   : > { %20749 = vmatmul.mubr.msk.f32.gmra.mrb[18].mxu1 %vm749_vm1, %v33844_v59  ;;  %v33972_v59 = vld [vmem:[#allocation77_spill] sm:$0xff] }
 0x2c7   : > { %22069 = vmatmul.mubr.msk.f32.gmra.mrb[2].mxu0 %vm749_vm1, %v33967_v37  ;;  %20751 = vmatprep.mubr.msk.f32.mxu1 %vm749_vm1, %v33845_v61  ;;  %v33973_v61 = vld [vmem:[#allocation183_spill] sm:$0xff] }
 0x2c8   : > { %22071 = vmatprep.mubr.msk.f32.mxu0 %vm749_vm1, %v33968_v52  ;;  %23320 = vmatpush3.bf16.msra.mxu0 %v23317_v9  ;;  %v33974_v9 = vld [vmem:[#allocation184_spill] sm:$0xff] }
 0x2c9   : > { %23322 = vmatprep.subr.bf16.mxu0 %v28750_v54 }
 0x2ca   : > { %20752 = vmatmul.mubr.msk.f32.gmra.mrb[20].mxu1 %vm749_vm1, %v33846_v34  ;;  %v33975_v34 = vld [vmem:[#allocation185_spill] sm:$0xff] }
 0x2cb   : > { %22072 = vmatmul.mubr.msk.f32.gmra.mrb[4].mxu0 %vm749_vm1, %v33969_v44  ;;  %20754 = vmatprep.mubr.msk.f32.mxu1 %vm749_vm1, %v33970_v8  ;;  %v33976_v8 = vld [vmem:[#allocation186_spill] sm:$0xff] }
 0x2cc   : > { %22074 = vmatprep.mubr.msk.f32.mxu0 %vm749_vm1, %v33971_v0 }
 0x2ce   : > { %20755 = vmatmul.mubr.msk.f32.gmra.mrb[22].mxu1 %vm749_vm1, %v33972_v59  ;;  %v33977_v59 = vld [vmem:[#allocation142_spill] sm:$0xff] }
 0x2cf   : > { %22075 = vmatmul.mubr.msk.f32.gmra.mrb[6].mxu0 %vm749_vm1, %v33973_v61  ;;  %20757 = vmatprep.mubr.msk.f32.mxu1 %vm749_vm1, %v33852_v15  ;;  %v33978_v15 = vld [vmem:[#allocation146_spill] sm:$0xff] }
 0x2d0   : > { %22077 = vmatprep.mubr.msk.f32.mxu0 %vm749_vm1, %v33974_v9 }
 0x2d2   : > { %20758 = vmatmul.mubr.msk.f32.gmra.mrb[24].mxu1 %vm749_vm1, %v33854_v6  ;;  %v33979_v6 = vld [vmem:[#allocation147_spill] sm:$0xff] }
 0x2d3   : > { %22078 = vmatmul.mubr.msk.f32.gmra.mrb[8].mxu0 %vm749_vm1, %v33975_v34  ;;  %20760 = vmatprep.mubr.msk.f32.mxu1 %vm749_vm1, %v33856_v18  ;;  %v33980_v18 = vld [vmem:[#allocation151_spill] sm:$0xff] }
 0x2d4   : > { %22080 = vmatprep.mubr.msk.f32.mxu0 %vm749_vm1, %v33976_v8 }
 0x2d6   : > { %20761 = vmatmul.mubr.msk.f32.gmra.mrb[26].mxu1 %vm749_vm1, %v33858_v41  ;;  %v33981_v41 = vld [vmem:[#allocation152_spill] sm:$0xff] }
 0x2d7   : > { %22081 = vmatmul.mubr.msk.f32.gmra.mrb[10].mxu0 %vm749_vm1, %v33977_v59  ;;  %20763 = vmatprep.mubr.msk.f32.mxu1 %vm749_vm1, %v33859_v40  ;;  %v474_v40 = vld [vmem:[%s32669_s1 + $0x190] sm:$0xff] }
 0x2d8   : > { %22083 = vmatprep.mubr.msk.f32.mxu0 %vm749_vm1, %v33978_v15 }
 0x2da   : > { %20764 = vmatmul.mubr.msk.f32.gmra.mrb[28].mxu1 %vm749_vm1, %v33860_v48  ;;  %v475_v48 = vld [vmem:[%s32669_s1 + $0x198] sm:$0xff] }
 0x2db   : > { %22084 = vmatmul.mubr.msk.f32.gmra.mrb[12].mxu0 %vm749_vm1, %v33979_v6  ;;  %20766 = vmatprep.mubr.msk.f32.mxu1 %vm749_vm1, %v33861_v39  ;;  %v33983_v39 = vld [vmem:[#allocation156_spill] sm:$0xff]  ;;  %v23133_v29 = vpack.c.bf16 %v475_v48, %v474_v40  ;;  %v33989_v48 = vld [vmem:[#allocation193_spill] sm:$0xff] }
 0x2dc   : > { %22086 = vmatprep.mubr.msk.f32.mxu0 %vm749_vm1, %v33980_v18  ;;  %v33988_v40 = vld [vmem:[#allocation192_spill] sm:$0xff] }
 0x2de   : > { %20767 = vmatmul.mubr.msk.f32.gmra.mrb[30].mxu1 %vm749_vm1, %v33862_v60  ;;  %v476_v60 = vld [vmem:[%s32669_s1 + $0x1a0] sm:$0xff] }
 0x2df   : > { %22087 = vmatmul.mubr.msk.f32.gmra.mrb[14].mxu0 %vm749_vm1, %v33981_v41  ;;  %20777 = vmatprep.mubr.msk.f32.mxu1 %vm749_vm1, %v33982_v11  ;;  %v33987_v11 = vld [vmem:[#allocation191_spill] sm:$0xff] }
 0x2e0   : > { %22089 = vmatprep.mubr.msk.f32.mxu0 %vm749_vm1, %v33983_v39 }
 0x2e2   : > { %20778 = vmatmul.mubr.msk.f32.vlgmr.msra.gmra.mrb[0].mxu1 %vm749_vm1, %v33984_v24  ;;  %v28830_v24 = vpack.c.bf16 %v477_v49, %v476_v60  ;;  %v33993_v60 = vld [vmem:[#allocation195_spill] sm:$0xff]  ;;  %v33994_v49 = vld [vmem:[#allocation196_spill] sm:$0xff] }
 0x2e3   : > { %22090 = vmatmul.mubr.msk.f32.gmra.mrb[16].mxu0 %vm749_vm1, %v33985_v23  ;;  %20780 = vmatprep.mubr.msk.f32.mxu1 %vm749_vm1, %v33986_v12  ;;  %v28870_v12 = vld [vmem:[%s25620_s27 + $0x1d0] sm:$0xff] }
 0x2e4   : > { %22092 = vmatprep.mubr.msk.f32.mxu0 %vm749_vm1, %v33987_v11  ;;  %23132 = vmatpush3.bf16.msra.mxu1 %v28661_v27  ;;  %v33992_v27 = vld [vmem:[#allocation94_spill] sm:$0xff] }
 0x2e5   : > { %23134 = vmatprep.subr.bf16.mxu1 %v23133_v29 }
 0x2e6   : > { %20781 = vmatmul.mubr.msk.f32.gmra.mrb[2].mxu1 %vm749_vm1, %v33988_v40 }
 0x2e7   : > { %22093 = vmatmul.mubr.msk.f32.gmra.mrb[18].mxu0 %vm749_vm1, %v33989_v48  ;;  %20783 = vmatprep.mubr.msk.f32.mxu1 %vm749_vm1, %v33990_v38  ;;  %v33995_v38 = vld [vmem:[#allocation197_spill] sm:$0xff] }
 0x2e8   : > { %22095 = vmatprep.mubr.msk.f32.mxu0 %vm749_vm1, %v33991_v10  ;;  %23136 = vmatpush3.bf16.msra.mxu1 %v23133_v29  ;;  %v33996_v29 = vld [vmem:[#allocation198_spill] sm:$0xff] }
 0x2e9   : > { %23138 = vmatprep.subr.bf16.mxu1 %v28830_v24 }
 0x2ea   : > { %20784 = vmatmul.mubr.msk.f32.gmra.mrb[4].mxu1 %vm749_vm1, %v33992_v27  ;;  %v33997_v27 = vld [vmem:[#allocation199_spill] sm:$0xff] }
 0x2eb   : > { %22096 = vmatmul.mubr.msk.f32.gmra.mrb[20].mxu0 %vm749_vm1, %v33993_v60  ;;  %20786 = vmatprep.mubr.msk.f32.mxu1 %vm749_vm1, %v33869_v58  ;;  %v33998_v58 = vld [vmem:[#allocation201_spill] sm:$0xff] }
 0x2ec   : > { %22098 = vmatprep.mubr.msk.f32.mxu0 %vm749_vm1, %v33994_v49 }
 0x2ee   : > { %20787 = vmatmul.mubr.msk.f32.gmra.mrb[6].mxu1 %vm749_vm1, %v33870_v46  ;;  %v28866_v46 = vld [vmem:[%s25620_s27 + $0x1c8] sm:$0xff] }
 0x2ef   : > { %22099 = vmatmul.mubr.msk.f32.gmra.mrb[22].mxu0 %vm749_vm1, %v33995_v38  ;;  %20789 = vmatprep.mubr.msk.f32.mxu1 %vm749_vm1, %v33871_v17  ;;  %v10544_v40 = vrot.slane %v28866_v46, 6  ;;  %v10545_v17 = vrot.slane %v28870_v12, 6 }
 0x2f0   : > { %22101 = vmatprep.mubr.msk.f32.mxu0 %vm749_vm1, %v33996_v29  ;;  %v34002_v29 = vld [vmem:[#allocation204_spill] sm:$0xff] }
 0x2f2   : > { %20790 = vmatmul.mubr.msk.f32.gmra.mrb[8].mxu1 %vm749_vm1, %v33872_v4  ;;  %v33999_v4 = vld [vmem:[#allocation202_spill] sm:$0xff] }
 0x2f3   : > { %22102 = vmatmul.mubr.msk.f32.gmra.mrb[24].mxu0 %vm749_vm1, %v33997_v27  ;;  %20792 = vmatprep.mubr.msk.f32.mxu1 %vm749_vm1, %v33681_v36  ;;  %v34000_v36 = vld [vmem:[#allocation203_spill] sm:$0xff]  ;;  %v28883_v27 = vsel %vm2936_vm6, %v10544_v40, %v10545_v17  ;;  %v571_v40 = vld [vmem:[%s32669_s1 + $0x498] sm:$0xff] }
 0x2f4   : > { %22104 = vmatprep.mubr.msk.f32.mxu0 %vm749_vm1, %v33998_v58  ;;  %v10547_v58 = vrot.slane %v27954_v1, 6  ;;  %34001 = vst [vmem:[#allocation187_spill] sm:$0xff] %v28883_v27  ;;  %v570_v1 = vld [vmem:[%s32669_s1 + $0x490] sm:$0xff] }
 0x2f6   : > { %20793 = vmatmul.mubr.msk.f32.gmra.mrb[10].mxu1 %vm749_vm1, %v33684_v50  ;;  %v34059_v50 = vld [vmem:[#allocation210_spill] sm:$0xff] }
 0x2f7   : > { %22105 = vmatmul.mubr.msk.f32.gmra.mrb[26].mxu0 %vm749_vm1, %v33999_v4  ;;  %20795 = vmatprep.mubr.msk.f32.mxu1 %vm749_vm1, %v33685_v16  ;;  %v28894_v4 = vsel %vm2936_vm6, %v10545_v17, %v10547_v58  ;;  %v23325_v58 = vpack.c.bf16 %v571_v40, %v570_v1  ;;  %v572_v17 = vld [vmem:[%s32669_s1 + $0x4a0] sm:$0xff]  ;;  %v34007_v40 = vld [vmem:[#allocation228_spill] sm:$0xff]  ;;  %v34057_v16 = vld [vmem:[#allocation209_spill] sm:$0xff] }
 0x2f8   : > { %22107 = vmatprep.mubr.msk.f32.mxu0 %vm749_vm1, %v34000_v36  ;;  %34003 = vst [vmem:[#allocation188_spill] sm:$0xff] %v28894_v4  ;;  %v34005_v36 = vld [vmem:[#allocation224_spill] sm:$0xff] }
 0x2fa   : > { %20796 = vmatmul.mubr.msk.f32.gmra.mrb[12].mxu1 %vm749_vm1, %v33873_v5  ;;  %v34042_v5 = vld [vmem:[#allocation38_spill] sm:$0xff] }
 0x2fb   : > { %22108 = vmatmul.mubr.msk.f32.gmra.mrb[28].mxu0 %vm749_vm1, %v34002_v29  ;;  %20798 = vmatprep.mubr.msk.f32.mxu1 %vm749_vm1, %v33688_v3  ;;  %v573_v29 = vld [vmem:[%s32669_s1 + $0x4a8] sm:$0xff]  ;;  %v34041_v3 = vld [vmem:[#allocation153_spill] sm:$0xff] }
 0x2fc   : > { %22110 = vmatprep.mubr.msk.f32.mxu0 %vm749_vm1, %v28883_v27  ;;  %v34004_v27 = vld [vmem:[#allocation221_spill] sm:$0xff]  ;;  %v28925_v1 = vpack.c.bf16 %v573_v29, %v572_v17  ;;  %v34012_v17 = vld [vmem:[#allocation236_spill] sm:$0xff] }
 0x2fd   : > { %v34010_v29 = vld [vmem:[#allocation233_spill] sm:$0xff] }
 0x2fe   : > { %20799 = vmatmul.mubr.msk.f32.gmra.mrb[14].mxu1 %vm749_vm1, %v33689_v31  ;;  %v34037_v31 = vld [vmem:[#allocation148_spill] sm:$0xff] }
 0x2ff   : > { %22111 = vmatmul.mubr.msk.f32.gmra.mrb[30].mxu0 %vm749_vm1, %v28894_v4  ;;  %20801 = vmatprep.mubr.msk.f32.mxu1 %vm749_vm1, %v33690_v62  ;;  %v478_v4 = vld [vmem:[%s32669_s1 + $0x1b0] sm:$0xff] }
 0x300   : > { %22121 = vmatprep.mubr.msk.f32.mxu0 %vm749_vm1, %v34004_v27  ;;  %v34006_v27 = vld [vmem:[#allocation225_spill] sm:$0xff]  ;;  %v34036_v62 = vld [vmem:[#allocation32_spill] sm:$0xff] }
 0x302   : > { %20802 = vmatmul.mubr.msk.f32.gmra.mrb[16].mxu1 %vm749_vm1, %v33874_v63  ;;  %v34031_v63 = vld [vmem:[#allocation135_spill] sm:$0xff] }
 0x303   : > { %22122 = vmatmul.mubr.msk.f32.vlgmr.msra.gmra.mrb[0].mxu0 %vm749_vm1, %v34005_v36  ;;  %20804 = vmatprep.mubr.msk.f32.mxu1 %vm749_vm1, %v33876_v56  ;;  %v34008_v36 = vld [vmem:[#allocation229_spill] sm:$0xff] }
 0x304   : > { %23324 = vmatpush3.bf16.msra.mxu0 %v28750_v54  ;;  %22124 = vmatprep.mubr.msk.f32.mxu0 %vm749_vm1, %v34006_v27  ;;  %v34009_v54 = vld [vmem:[#allocation232_spill] sm:$0xff]  ;;  %v34013_v27 = vld [vmem:[#allocation237_spill] sm:$0xff] }
 0x305   : > { %23326 = vmatprep.subr.bf16.mxu0 %v23325_v58  ;;  %v34030_v56 = vld [vmem:[#allocation133_spill] sm:$0xff] }
 0x306   : > { %20805 = vmatmul.mubr.msk.f32.gmra.mrb[18].mxu1 %vm749_vm1, %v33878_v53  ;;  %v25334_v53 = vld [vmem:[%s25620_s27 + $0x1b8] sm:$0xff] }
 0x307   : > { %22125 = vmatmul.mubr.msk.f32.gmra.mrb[2].mxu0 %vm749_vm1, %v34007_v40  ;;  %20807 = vmatprep.mubr.msk.f32.mxu1 %vm749_vm1, %v33880_v13  ;;  %v34014_v40 = vld [vmem:[#allocation238_spill] sm:$0xff]  ;;  %v25333_v13 = vld [vmem:[%s25620_s27 + $0x1b0] sm:$0xff] }
 0x308   : > { %22127 = vmatprep.mubr.msk.f32.mxu0 %vm749_vm1, %v34008_v36  ;;  %23328 = vmatpush3.bf16.msra.mxu0 %v23325_v58  ;;  %v34011_v58 = vld [vmem:[#allocation235_spill] sm:$0xff] }
 0x309   : > { %23330 = vmatprep.subr.bf16.mxu0 %v28925_v1  ;;  %v34015_v36 = vld [vmem:[#allocation239_spill] sm:$0xff] }
 0x30a   : > { %20808 = vmatmul.mubr.msk.f32.gmra.mrb[20].mxu1 %vm749_vm1, %v33882_v2  ;;  %v29038_v2 = vld [vmem:[%s25620_s27 + $0x168] sm:$0xff] }
 0x30b   : > { %22128 = vmatmul.mubr.msk.f32.gmra.mrb[4].mxu0 %vm749_vm1, %v34009_v54  ;;  %20810 = vmatprep.mubr.msk.f32.mxu1 %vm749_vm1, %v33884_v20  ;;  %v34016_v54 = vld [vmem:[#allocation117_spill] sm:$0xff] }
 0x30c   : > { %22130 = vmatprep.mubr.msk.f32.mxu0 %vm749_vm1, %v34010_v29  ;;  %v28967_v29 = vld [vmem:[%s25620_s27 + $0x108] sm:$0xff]  ;;  %v29031_v20 = vld [vmem:[%s25620_s27 + $0x158] sm:$0xff] }
 0x30e   : > { %20811 = vmatmul.mubr.msk.f32.gmra.mrb[22].mxu1 %vm749_vm1, %v33886_v47  ;;  %v34022_v47 = vld [vmem:[#allocation207_spill] sm:$0xff] }
 0x30f   : > { %22131 = vmatmul.mubr.msk.f32.gmra.mrb[6].mxu0 %vm749_vm1, %v34011_v58  ;;  %20813 = vmatprep.mubr.msk.f32.mxu1 %vm749_vm1, %v33888_v22  ;;  %v34017_v58 = vld [vmem:[#allocation118_spill] sm:$0xff]  ;;  %v481_v22 = vld [vmem:[%s32669_s1 + $0x1c8] sm:$0xff] }
 0x310   : > { %22133 = vmatprep.mubr.msk.f32.mxu0 %vm749_vm1, %v34012_v17  ;;  %v28974_v17 = vld [vmem:[%s25620_s27 + $0x110] sm:$0xff] }
 0x312   : > { %20814 = vmatmul.mubr.msk.f32.gmra.mrb[24].mxu1 %vm749_vm1, %v33890_v57  ;;  %v480_v57 = vld [vmem:[%s32669_s1 + $0x1c0] sm:$0xff] }
 0x313   : > { %22134 = vmatmul.mubr.msk.f32.gmra.mrb[8].mxu0 %vm749_vm1, %v34013_v27  ;;  %20816 = vmatprep.mubr.msk.f32.mxu1 %vm749_vm1, %v33892_v55  ;;  %v34018_v27 = vld [vmem:[#allocation83_spill] sm:$0xff]  ;;  %v34021_v55 = vld [vmem:[#allocation206_spill] sm:$0xff] }
 0x314   : > { %22136 = vmatprep.mubr.msk.f32.mxu0 %vm749_vm1, %v34014_v40  ;;  %v28981_v40 = vld [vmem:[%s25620_s27 + $0x120] sm:$0xff] }
 0x316   : > { %20817 = vmatmul.mubr.msk.f32.gmra.mrb[26].mxu1 %vm749_vm1, %v33894_v19  ;;  %v29001_v19 = vld [vmem:[%s25620_s27 + $0x138] sm:$0xff] }
 0x317   : > { %22137 = vmatmul.mubr.msk.f32.gmra.mrb[10].mxu0 %vm749_vm1, %v34015_v36  ;;  %20819 = vmatprep.mubr.msk.f32.mxu1 %vm749_vm1, %v34016_v54  ;;  %v34019_v36 = vld [vmem:[#allocation84_spill] sm:$0xff]  ;;  %v28994_v54 = vld [vmem:[%s25620_s27 + $0x128] sm:$0xff] }
 0x318   : > { %22139 = vmatprep.mubr.msk.f32.mxu0 %vm749_vm1, %v28967_v29 }
 0x31a   : > { %20820 = vmatmul.mubr.msk.f32.gmra.mrb[28].mxu1 %vm749_vm1, %v34017_v58  ;;  %v479_v58 = vld [vmem:[%s32669_s1 + $0x1b8] sm:$0xff] }
 0x31b   : > { %22140 = vmatmul.mubr.msk.f32.gmra.mrb[12].mxu0 %vm749_vm1, %v28974_v17  ;;  %20822 = vmatprep.mubr.msk.f32.mxu1 %vm749_vm1, %v34018_v27  ;;  %v34020_v27 = vld [vmem:[#allocation205_spill] sm:$0xff] }
 0x31c   : > { %22142 = vmatprep.mubr.msk.f32.mxu0 %vm749_vm1, %v28981_v40 }
 0x31e   : > { %20823 = vmatmul.mubr.msk.f32.gmra.mrb[30].mxu1 %vm749_vm1, %v34019_v36  ;;  %v23141_v36 = vpack.c.bf16 %v479_v58, %v478_v4  ;;  %v29021_v4 = vld [vmem:[%s25620_s27 + $0x150] sm:$0xff] }
 0x31f   : > { %22143 = vmatmul.mubr.msk.f32.gmra.mrb[14].mxu0 %vm749_vm1, %v28994_v54  ;;  %20833 = vmatprep.mubr.msk.f32.mxu1 %vm749_vm1, %v34020_v27  ;;  %v29014_v27 = vld [vmem:[%s25620_s27 + $0x140] sm:$0xff]  ;;  %v34023_v58 = vld [vmem:[#allocation208_spill] sm:$0xff] }
 0x320   : > { %22145 = vmatprep.mubr.msk.f32.mxu0 %vm749_vm1, %v29001_v19 }
 0x322   : > { %20834 = vmatmul.mubr.msk.f32.vlgmr.msra.gmra.mrb[0].mxu1 %vm749_vm1, %v34021_v55  ;;  %v29026_v55 = vpack.c.bf16 %v481_v22, %v480_v57  ;;  %v34025_v22 = vld [vmem:[#allocation123_spill] sm:$0xff]  ;;  %v29046_v57 = vld [vmem:[%s25620_s27 + $0x170] sm:$0xff] }
 0x323   : > { %22146 = vmatmul.mubr.msk.f32.gmra.mrb[16].mxu0 %vm749_vm1, %v29014_v27  ;;  %20836 = vmatprep.mubr.msk.f32.mxu1 %vm749_vm1, %v34022_v47  ;;  %v34024_v47 = vld [vmem:[#allocation122_spill] sm:$0xff] }
 0x324   : > { %22148 = vmatprep.mubr.msk.f32.mxu0 %vm749_vm1, %v29021_v4  ;;  %23140 = vmatpush3.bf16.msra.mxu1 %v28830_v24  ;;  %v34026_v24 = vld [vmem:[#allocation124_spill] sm:$0xff] }
 0x325   : > { %23142 = vmatprep.subr.bf16.mxu1 %v23141_v36 }
 0x326   : > { %20837 = vmatmul.mubr.msk.f32.gmra.mrb[2].mxu1 %vm749_vm1, %v34023_v58  ;;  %v29060_v58 = vld [vmem:[%s25620_s27 + $0x188] sm:$0xff] }
 0x327   : > { %22149 = vmatmul.mubr.msk.f32.gmra.mrb[18].mxu0 %vm749_vm1, %v29031_v20  ;;  %20839 = vmatprep.mubr.msk.f32.mxu1 %vm749_vm1, %v34024_v47  ;;  %v29053_v47 = vld [vmem:[%s25620_s27 + $0x180] sm:$0xff] }
 0x328   : > { %22151 = vmatprep.mubr.msk.f32.mxu0 %vm749_vm1, %v29038_v2  ;;  %23144 = vmatpush3.bf16.msra.mxu1 %v23141_v36  ;;  %v34027_v36 = vld [vmem:[#allocation125_spill] sm:$0xff] }
 0x329   : > { %23146 = vmatprep.subr.bf16.mxu1 %v29026_v55 }
 0x32a   : > { %20840 = vmatmul.mubr.msk.f32.gmra.mrb[4].mxu1 %vm749_vm1, %v34025_v22  ;;  %v29067_v22 = vld [vmem:[%s25620_s27 + $0x198] sm:$0xff] }
 0x32b   : > { %22152 = vmatmul.mubr.msk.f32.gmra.mrb[20].mxu0 %vm749_vm1, %v29046_v57  ;;  %20842 = vmatprep.mubr.msk.f32.mxu1 %vm749_vm1, %v34026_v24  ;;  %v29074_v24 = vld [vmem:[%s25620_s27 + $0x1a0] sm:$0xff] }
 0x32c   : > { %22154 = vmatprep.mubr.msk.f32.mxu0 %vm749_vm1, %v29053_v47 }
 0x32e   : > { %20843 = vmatmul.mubr.msk.f32.gmra.mrb[6].mxu1 %vm749_vm1, %v34027_v36  ;;  %v34028_v36 = vld [vmem:[#allocation129_spill] sm:$0xff] }
 0x32f   : > { %22155 = vmatmul.mubr.msk.f32.gmra.mrb[22].mxu0 %vm749_vm1, %v29060_v58  ;;  %20845 = vmatprep.mubr.msk.f32.mxu1 %vm749_vm1, %v33918_v42  ;;  %v34029_v42 = vld [vmem:[#allocation131_spill] sm:$0xff] }
 0x330   : > { %22157 = vmatprep.mubr.msk.f32.mxu0 %vm749_vm1, %v29067_v22 }
 0x332   : > { %20846 = vmatmul.mubr.msk.f32.gmra.mrb[8].mxu1 %vm749_vm1, %v33920_v32  ;;  %v29091_v32 = vld [vmem:[%s25620_s27 + $0x1e0] sm:$0xff] }
 0x333   : > { %22158 = vmatmul.mubr.msk.f32.gmra.mrb[24].mxu0 %vm749_vm1, %v29074_v24  ;;  %20848 = vmatprep.mubr.msk.f32.mxu1 %vm749_vm1, %v34028_v36  ;;  %v577_v36 = vld [vmem:[%s32669_s1 + $0x4c8] sm:$0xff] }
 0x334   : > { %22160 = vmatprep.mubr.msk.f32.mxu0 %vm749_vm1, %v25333_v13  ;;  %v29102_v13 = vld [vmem:[%s25620_s27 + $0x1e8] sm:$0xff] }
 0x336   : > { %20849 = vmatmul.mubr.msk.f32.gmra.mrb[10].mxu1 %vm749_vm1, %v34029_v42  ;;  %v34035_v42 = vld [vmem:[#allocation144_spill] sm:$0xff] }
 0x337   : > { %22161 = vmatmul.mubr.msk.f32.gmra.mrb[26].mxu0 %vm749_vm1, %v25334_v53  ;;  %20851 = vmatprep.mubr.msk.f32.mxu1 %vm749_vm1, %v34030_v56  ;;  %v34032_v53 = vld [vmem:[#allocation139_spill] sm:$0xff] }
 0x338   : > { %22163 = vmatprep.mubr.msk.f32.mxu0 %vm749_vm1, %v28866_v46  ;;  %v574_v46 = vld [vmem:[%s32669_s1 + $0x4b0] sm:$0xff] }
 0x33a   : > { %20852 = vmatmul.mubr.msk.f32.gmra.mrb[12].mxu1 %vm749_vm1, %v34031_v63  ;;  %v575_v63 = vld [vmem:[%s32669_s1 + $0x4b8] sm:$0xff] }
 0x33b   : > { %22164 = vmatmul.mubr.msk.f32.gmra.mrb[28].mxu0 %vm749_vm1, %v28870_v12  ;;  %20854 = vmatprep.mubr.msk.f32.mxu1 %vm749_vm1, %v33930_v14  ;;  %v34033_v12 = vld [vmem:[#allocation141_spill] sm:$0xff]  ;;  %v23333_v56 = vpack.c.bf16 %v575_v63, %v574_v46  ;;  %v34038_v63 = vld [vmem:[#allocation34_spill] sm:$0xff] }
 0x33c   : > { %22166 = vmatprep.mubr.msk.f32.mxu0 %vm749_vm1, %v29091_v32  ;;  %v34034_v14 = vld [vmem:[#allocation29_spill] sm:$0xff] }
 0x33e   : > { %20855 = vmatmul.mubr.msk.f32.gmra.mrb[14].mxu1 %vm749_vm1, %v34032_v53  ;;  %v576_v53 = vld [vmem:[%s32669_s1 + $0x4c0] sm:$0xff] }
 0x33f   : > { %22167 = vmatmul.mubr.msk.f32.gmra.mrb[30].mxu0 %vm749_vm1, %v29102_v13  ;;  %20857 = vmatprep.mubr.msk.f32.mxu1 %vm749_vm1, %v34033_v12  ;;  %v29133_v46 = vpack.c.bf16 %v577_v36, %v576_v53  ;;  %v34040_v12 = vld [vmem:[#allocation36_spill] sm:$0xff]  ;;  %v34045_v53 = vld [vmem:[#allocation157_spill] sm:$0xff] }
 0x340   : > { %22177 = vmatprep.mubr.msk.f32.mxu0 %vm749_vm1, %v34034_v14  ;;  %v34044_v36 = vld [vmem:[#allocation40_spill] sm:$0xff] }
 0x342   : > { %20858 = vmatmul.mubr.msk.f32.gmra.mrb[16].mxu1 %vm749_vm1, %v34035_v42  ;;  %v34039_v42 = vld [vmem:[#allocation150_spill] sm:$0xff] }
 0x343   : > { %22178 = vmatmul.mubr.msk.f32.vlgmr.msra.gmra.mrb[0].mxu0 %vm749_vm1, %v34036_v62  ;;  %20860 = vmatprep.mubr.msk.f32.mxu1 %vm749_vm1, %v34037_v31  ;;  %v34047_v31 = vld [vmem:[#allocation159_spill] sm:$0xff] }
 0x344   : > { %23332 = vmatpush3.bf16.msra.mxu0 %v28925_v1  ;;  %22180 = vmatprep.mubr.msk.f32.mxu0 %vm749_vm1, %v34038_v63  ;;  %v34043_v1 = vld [vmem:[#allocation154_spill] sm:$0xff] }
 0x345   : > { %23334 = vmatprep.subr.bf16.mxu0 %v23333_v56 }
 0x346   : > { %20861 = vmatmul.mubr.msk.f32.gmra.mrb[18].mxu1 %vm749_vm1, %v34039_v42  ;;  %v34046_v42 = vld [vmem:[#allocation42_spill] sm:$0xff] }
 0x347   : > { %22181 = vmatmul.mubr.msk.f32.gmra.mrb[2].mxu0 %vm749_vm1, %v34040_v12  ;;  %20863 = vmatprep.mubr.msk.f32.mxu1 %vm749_vm1, %v34041_v3  ;;  %v34048_v3 = vld [vmem:[#allocation44_spill] sm:$0xff] }
 0x348   : > { %22183 = vmatprep.mubr.msk.f32.mxu0 %vm749_vm1, %v34042_v5  ;;  %23336 = vmatpush3.bf16.msra.mxu0 %v23333_v56  ;;  %v34049_v56 = vld [vmem:[#allocation46_spill] sm:$0xff] }
 0x349   : > { %23338 = vmatprep.subr.bf16.mxu0 %v29133_v46 }
 0x34a   : > { %20864 = vmatmul.mubr.msk.f32.gmra.mrb[20].mxu1 %vm749_vm1, %v34043_v1  ;;  %v34050_v1 = vld [vmem:[#allocation48_spill] sm:$0xff] }
 0x34b   : > { %22184 = vmatmul.mubr.msk.f32.gmra.mrb[4].mxu0 %vm749_vm1, %v34044_v36  ;;  %20866 = vmatprep.mubr.msk.f32.mxu1 %vm749_vm1, %v34045_v53  ;;  %v34051_v53 = vld [vmem:[#allocation50_spill] sm:$0xff] }
 0x34c   : > { %22186 = vmatprep.mubr.msk.f32.mxu0 %vm749_vm1, %v34046_v42 }
 0x34e   : > { %20867 = vmatmul.mubr.msk.f32.gmra.mrb[22].mxu1 %vm749_vm1, %v34047_v31  ;;  %v34052_v31 = vld [vmem:[#allocation52_spill] sm:$0xff] }
 0x34f   : > { %22187 = vmatmul.mubr.msk.f32.gmra.mrb[6].mxu0 %vm749_vm1, %v34048_v3  ;;  %20869 = vmatprep.mubr.msk.f32.mxu1 %vm749_vm1, %v33947_v45  ;;  %v34053_v45 = vld [vmem:[#allocation54_spill] sm:$0xff] }
 0x350   : > { %22189 = vmatprep.mubr.msk.f32.mxu0 %vm749_vm1, %v34049_v56 }
 0x352   : > { %20870 = vmatmul.mubr.msk.f32.gmra.mrb[24].mxu1 %vm749_vm1, %v33949_v28  ;;  %v34054_v28 = vld [vmem:[#allocation56_spill] sm:$0xff] }
 0x353   : > { %22190 = vmatmul.mubr.msk.f32.gmra.mrb[8].mxu0 %vm749_vm1, %v34050_v1  ;;  %20872 = vmatprep.mubr.msk.f32.mxu1 %vm749_vm1, %v33951_v26  ;;  %v34055_v26 = vld [vmem:[#allocation58_spill] sm:$0xff] }
 0x354   : > { %22192 = vmatprep.mubr.msk.f32.mxu0 %vm749_vm1, %v34051_v53 }
 0x356   : > { %20873 = vmatmul.mubr.msk.f32.gmra.mrb[26].mxu1 %vm749_vm1, %v33953_v35  ;;  %v34056_v35 = vld [vmem:[#allocation60_spill] sm:$0xff] }
 0x357   : > { %22193 = vmatmul.mubr.msk.f32.gmra.mrb[10].mxu0 %vm749_vm1, %v34052_v31  ;;  %20875 = vmatprep.mubr.msk.f32.mxu1 %vm749_vm1, %v33954_v51  ;;  %v482_v51 = vld [vmem:[%s32669_s1 + $0x1d0] sm:$0xff] }
 0x358   : > { %22195 = vmatprep.mubr.msk.f32.mxu0 %vm749_vm1, %v34053_v45  ;;  %v34060_v45 = vld [vmem:[#allocation64_spill] sm:$0xff] }
 0x35a   : > { %20876 = vmatmul.mubr.msk.f32.gmra.mrb[28].mxu1 %vm749_vm1, %v33955_v25  ;;  %v483_v25 = vld [vmem:[%s32669_s1 + $0x1d8] sm:$0xff] }
 0x35b   : > { %22196 = vmatmul.mubr.msk.f32.gmra.mrb[12].mxu0 %vm749_vm1, %v34054_v28  ;;  %20878 = vmatprep.mubr.msk.f32.mxu1 %vm749_vm1, %v33956_v33  ;;  %v34058_v33 = vld [vmem:[#allocation62_spill] sm:$0xff]  ;;  %v485_v28 = vld [vmem:[%s32669_s1 + $0x1e8] sm:$0xff] }
 0x35c   : > { %22198 = vmatprep.mubr.msk.f32.mxu0 %vm749_vm1, %v34055_v26  ;;  %v23149_v26 = vpack.c.bf16 %v483_v25, %v482_v51  ;;  %v34063_v51 = vld [vmem:[#allocation212_spill] sm:$0xff] }
 0x35d   : > { %v34064_v25 = vld [vmem:[#allocation68_spill] sm:$0xff] }
 0x35e   : > { %20879 = vmatmul.mubr.msk.f32.gmra.mrb[30].mxu1 %vm749_vm1, %v33957_v30  ;;  %v484_v30 = vld [vmem:[%s32669_s1 + $0x1e0] sm:$0xff] }
 0x35f   : > { %22199 = vmatmul.mubr.msk.f32.gmra.mrb[14].mxu0 %vm749_vm1, %v34056_v35  ;;  %20889 = vmatprep.mubr.msk.f32.mxu1 %vm749_vm1, %v34057_v16  ;;  %v34061_v35 = vld [vmem:[#allocation211_spill] sm:$0xff]  ;;  %v34062_v16 = vld [vmem:[#allocation66_spill] sm:$0xff] }
 0x360   : > { %22201 = vmatprep.mubr.msk.f32.mxu0 %vm749_vm1, %v34058_v33  ;;  %v34065_v33 = vld [vmem:[#allocation174_spill] sm:$0xff] }
 0x362   : > { %20890 = vmatmul.mubr.msk.f32.vlgmr.msra.gmra.mrb[0].mxu1 %vm749_vm1, %v34059_v50  ;;  %v29213_v50 = vpack.c.bf16 %v485_v28, %v484_v30  ;;  %v34068_v30 = vld [vmem:[#allocation72_spill] sm:$0xff]  ;;  %v34069_v28 = vld [vmem:[#allocation213_spill] sm:$0xff] }
 0x363   : > { %22202 = vmatmul.mubr.msk.f32.gmra.mrb[16].mxu0 %vm749_vm1, %v34060_v45  ;;  %20892 = vmatprep.mubr.msk.f32.mxu1 %vm749_vm1, %v34061_v35  ;;  %v34066_v45 = vld [vmem:[#allocation70_spill] sm:$0xff]  ;;  %v29251_v35 = vld [vmem:[%s25620_s27 + $0x1f0] sm:$0x3f] }
 0x364   : > { %22204 = vmatprep.mubr.msk.f32.mxu0 %vm749_vm1, %v34062_v16  ;;  %23148 = vmatpush3.bf16.msra.mxu1 %v29026_v55  ;;  %v34067_v55 = vld [vmem:[#allocation175_spill] sm:$0xff] }
 0x365   : > { %23150 = vmatprep.subr.bf16.mxu1 %v23149_v26 }
 0x366   : > { %20893 = vmatmul.mubr.msk.f32.gmra.mrb[2].mxu1 %vm749_vm1, %v34063_v51  ;;  %v11075_v51 = vrot.slane %v29102_v13, 1 }
 0x367   : > { %22205 = vmatmul.mubr.msk.f32.gmra.mrb[18].mxu0 %vm749_vm1, %v34064_v25  ;;  %20895 = vmatprep.mubr.msk.f32.mxu1 %vm749_vm1, %v34065_v33  ;;  %v34070_v33 = vld [vmem:[#allocation214_spill] sm:$0xff] }
 0x368   : > { %22207 = vmatprep.mubr.msk.f32.mxu0 %vm749_vm1, %v34066_v45  ;;  %23152 = vmatpush3.bf16.msra.mxu1 %v23149_v26  ;;  %v34071_v26 = vld [vmem:[#allocation200_spill] sm:$0xff] }
 0x369   : > { %23154 = vmatprep.subr.bf16.mxu1 %v29213_v50 }
 0x36a   : > { %20896 = vmatmul.mubr.msk.f32.gmra.mrb[4].mxu1 %vm749_vm1, %v34067_v55  ;;  %v34072_v55 = vld [vmem:[#allocation215_spill] sm:$0xff] }
 0x36b   : > { %22208 = vmatmul.mubr.msk.f32.gmra.mrb[20].mxu0 %vm749_vm1, %v34068_v30  ;;  %20898 = vmatprep.mubr.msk.f32.mxu1 %vm749_vm1, %v33964_v21  ;;  %v34073_v21 = vld [vmem:[#allocation216_spill] sm:$0xff] }
 0x36c   : > { %22210 = vmatprep.mubr.msk.f32.mxu0 %vm749_vm1, %v34069_v28 }
 0x36e   : > { %20899 = vmatmul.mubr.msk.f32.gmra.mrb[6].mxu1 %vm749_vm1, %v33965_v7  ;;  %v11074_v7 = vrot.slane %v29091_v32, 1 }
 0x36f   : > { %22211 = vmatmul.mubr.msk.f32.gmra.mrb[22].mxu0 %vm749_vm1, %v34070_v33  ;;  %20901 = vmatprep.mubr.msk.f32.mxu1 %vm749_vm1, %v33966_v43  ;;  %v34074_v43 = vld [vmem:[#allocation217_spill] sm:$0xff] }
 0x370   : > { %22213 = vmatprep.mubr.msk.f32.mxu0 %vm749_vm1, %v34071_v26 }
 0x372   : > { %20902 = vmatmul.mubr.msk.f32.gmra.mrb[8].mxu1 %vm749_vm1, %v33967_v37  ;;  %v34075_v37 = vld [vmem:[#allocation218_spill] sm:$0xff] }
 0x373   : > { %22214 = vmatmul.mubr.msk.f32.gmra.mrb[24].mxu0 %vm749_vm1, %v34072_v55  ;;  %20904 = vmatprep.mubr.msk.f32.mxu1 %vm749_vm1, %v33968_v52  ;;  %v29263_v52 = vsel %vm668_vm0, %v11074_v7, %v11075_v51  ;;  %v34077_v55 = vld [vmem:[#allocation219_spill] sm:$0xff]  ;;  %v578_v7 = vld [vmem:[%s32669_s1 + $0x4d0] sm:$0xff] }
 0x374   : > { %22216 = vmatprep.mubr.msk.f32.mxu0 %vm749_vm1, %v34073_v21  ;;  %v11077_v21 = vrot.slane %v29251_v35, 1  ;;  %34076 = vst [vmem:[#allocation221_spill] sm:$0xff] %v29263_v52 }
 0x376   : > { %20905 = vmatmul.mubr.msk.f32.gmra.mrb[10].mxu1 %vm749_vm1, %v33969_v44  ;;  %v34099_v44 = vld [vmem:[#allocation140_spill] sm:$0xff] }
 0x377   : > { %22217 = vmatmul.mubr.msk.f32.gmra.mrb[26].mxu0 %vm749_vm1, %v34074_v43  ;;  %20907 = vmatprep.mubr.msk.f32.mxu1 %vm749_vm1, %v33971_v0  ;;  %v29274_v43 = vsel %vm668_vm0, %v11075_v51, %v11077_v21  ;;  %v580_v51 = vld [vmem:[%s32669_s1 + $0x4e0] sm:$0xff] }
 0x378   : > { %22219 = vmatprep.mubr.msk.f32.mxu0 %vm749_vm1, %v34075_v37  ;;  %34078 = vst [vmem:[#allocation224_spill] sm:$0xff] %v29274_v43  ;;  %v581_v37 = vld [vmem:[%s32669_s1 + $0x4e8] sm:$0xff]  ;;  %v34098_v0 = vld [vmem:[#allocation138_spill] sm:$0xff] }
 0x37a   : > { %20908 = vmatmul.mubr.msk.f32.gmra.mrb[12].mxu1 %vm749_vm1, %v33973_v61  ;;  %v489_v61 = vld [vmem:[%s32669_s1 + $0x208] sm:$0xff] }
 0x37b   : > { %22220 = vmatmul.mubr.msk.f32.gmra.mrb[28].mxu0 %vm749_vm1, %v34077_v55  ;;  %20910 = vmatprep.mubr.msk.f32.mxu1 %vm749_vm1, %v33974_v9  ;;  %v579_v55 = vld [vmem:[%s32669_s1 + $0x4d8] sm:$0xff]  ;;  %v488_v9 = vld [vmem:[%s32669_s1 + $0x200] sm:$0xff] }
 0x37c   : > { %22222 = vmatprep.mubr.msk.f32.mxu0 %vm749_vm1, %v29263_v52  ;;  %v34079_v52 = vld [vmem:[#allocation18_spill] sm:$0xff]  ;;  %v23341_v21 = vpack.c.bf16 %v579_v55, %v578_v7  ;;  %v29305_v7 = vpack.c.bf16 %v581_v37, %v580_v51  ;;  %v34084_v37 = vld [vmem:[#allocation28_spill] sm:$0xff]  ;;  %v34086_v51 = vld [vmem:[#allocation33_spill] sm:$0xff] }
 0x37d   : > { %v34081_v55 = vld [vmem:[#allocation22_spill] sm:$0xff] }
 0x37e   : > { %20911 = vmatmul.mubr.msk.f32.gmra.mrb[14].mxu1 %vm749_vm1, %v33975_v34  ;;  %v34080_v34 = vld [vmem:[#allocation20_spill] sm:$0xff] }
 0x37f   : > { %22223 = vmatmul.mubr.msk.f32.gmra.mrb[30].mxu0 %vm749_vm1, %v29274_v43  ;;  %20913 = vmatprep.mubr.msk.f32.mxu1 %vm749_vm1, %v33976_v8  ;;  %v34082_v43 = vld [vmem:[#allocation24_spill] sm:$0xff]  ;;  %v25336_v8 = vld [vmem:[%s25620_s27 + $0x38] sm:$0xff] }
 0x380   : > { %22233 = vmatprep.mubr.msk.f32.mxu0 %vm749_vm1, %v34079_v52 }
 0x382   : > { %20914 = vmatmul.mubr.msk.f32.gmra.mrb[16].mxu1 %vm749_vm1, %v33977_v59  ;;  %v34083_v59 = vld [vmem:[#allocation26_spill] sm:$0xff] }
 0x383   : > { %22234 = vmatmul.mubr.msk.f32.vlgmr.msra.gmra.mrb[0].mxu0 %vm749_vm1, %v34080_v34  ;;  %20916 = vmatprep.mubr.msk.f32.mxu1 %vm749_vm1, %v33978_v15  ;;  %v25335_v15 = vld [vmem:[%s25620_s27 + $0x30] sm:$0xff] }
 0x384   : > { %23340 = vmatpush3.bf16.msra.mxu0 %v29133_v46  ;;  %22236 = vmatprep.mubr.msk.f32.mxu0 %vm749_vm1, %v34081_v55  ;;  %v34085_v46 = vld [vmem:[#allocation31_spill] sm:$0xff] }
 0x385   : > { %23342 = vmatprep.subr.bf16.mxu0 %v23341_v21 }
 0x386   : > { %20917 = vmatmul.mubr.msk.f32.gmra.mrb[18].mxu1 %vm749_vm1, %v33979_v6  ;;  %v34096_v6 = vld [vmem:[#allocation134_spill] sm:$0xff] }
 0x387   : > { %22237 = vmatmul.mubr.msk.f32.gmra.mrb[2].mxu0 %vm749_vm1, %v34082_v43  ;;  %20919 = vmatprep.mubr.msk.f32.mxu1 %vm749_vm1, %v33980_v18  ;;  %v34095_v18 = vld [vmem:[#allocation199_spill] sm:$0xff] }
 0x388   : > { %22239 = vmatprep.mubr.msk.f32.mxu0 %vm749_vm1, %v34083_v59  ;;  %23344 = vmatpush3.bf16.msra.mxu0 %v23341_v21  ;;  %v34087_v21 = vld [vmem:[#allocation35_spill] sm:$0xff] }
 0x389   : > { %23346 = vmatprep.subr.bf16.mxu0 %v29305_v7 }
 0x38a   : > { %20920 = vmatmul.mubr.msk.f32.gmra.mrb[20].mxu1 %vm749_vm1, %v33981_v41  ;;  %v34088_v41 = vld [vmem:[#allocation37_spill] sm:$0xff] }
 0x38b   : > { %22240 = vmatmul.mubr.msk.f32.gmra.mrb[4].mxu0 %vm749_vm1, %v34084_v37  ;;  %20922 = vmatprep.mubr.msk.f32.mxu1 %vm749_vm1, %v33983_v39  ;;  %v34093_v39 = vld [vmem:[#allocation198_spill] sm:$0xff] }
 0x38c   : > { %22242 = vmatprep.mubr.msk.f32.mxu0 %vm749_vm1, %v34085_v46 }
 0x38e   : > { %20923 = vmatmul.mubr.msk.f32.gmra.mrb[22].mxu1 %vm749_vm1, %v33985_v23  ;;  %v34089_v23 = vld [vmem:[#allocation39_spill] sm:$0xff] }
 0x38f   : > { %22243 = vmatmul.mubr.msk.f32.gmra.mrb[6].mxu0 %vm749_vm1, %v34086_v51  ;;  %20925 = vmatprep.mubr.msk.f32.mxu1 %vm749_vm1, %v33987_v11  ;;  %v34090_v11 = vld [vmem:[#allocation41_spill] sm:$0xff] }
 0x390   : > { %22245 = vmatprep.mubr.msk.f32.mxu0 %vm749_vm1, %v34087_v21 }
 0x392   : > { %20926 = vmatmul.mubr.msk.f32.gmra.mrb[24].mxu1 %vm749_vm1, %v33989_v48  ;;  %v34091_v48 = vld [vmem:[#allocation128_spill] sm:$0xff] }
 0x393   : > { %22246 = vmatmul.mubr.msk.f32.gmra.mrb[8].mxu0 %vm749_vm1, %v34088_v41  ;;  %20928 = vmatprep.mubr.msk.f32.mxu1 %vm749_vm1, %v33991_v10  ;;  %v34092_v10 = vld [vmem:[#allocation130_spill] sm:$0xff] }
 0x394   : > { %22248 = vmatprep.mubr.msk.f32.mxu0 %vm749_vm1, %v34089_v23 }
 0x396   : > { %20929 = vmatmul.mubr.msk.f32.gmra.mrb[26].mxu1 %vm749_vm1, %v33993_v60  ;;  %v34094_v60 = vld [vmem:[#allocation132_spill] sm:$0xff] }
 0x397   : > { %22249 = vmatmul.mubr.msk.f32.gmra.mrb[10].mxu0 %vm749_vm1, %v34090_v11  ;;  %20931 = vmatprep.mubr.msk.f32.mxu1 %vm749_vm1, %v33994_v49  ;;  %v486_v49 = vld [vmem:[%s32669_s1 + $0x1f0] sm:$0xff] }
 0x398   : > { %22251 = vmatprep.mubr.msk.f32.mxu0 %vm749_vm1, %v34091_v48 }
 0x39a   : > { %20932 = vmatmul.mubr.msk.f32.gmra.mrb[28].mxu1 %vm749_vm1, %v33995_v38  ;;  %v487_v38 = vld [vmem:[%s32669_s1 + $0x1f8] sm:$0xff] }
 0x39b   : > { %22252 = vmatmul.mubr.msk.f32.gmra.mrb[12].mxu0 %vm749_vm1, %v34092_v10  ;;  %20934 = vmatprep.mubr.msk.f32.mxu1 %vm749_vm1, %v34093_v39  ;;  %v34097_v39 = vld [vmem:[#allocation136_spill] sm:$0xff] }
 0x39c   : > { %22254 = vmatprep.mubr.msk.f32.mxu0 %vm749_vm1, %v34094_v60 }
 0x39e   : > { %20935 = vmatmul.mubr.msk.f32.gmra.mrb[30].mxu1 %vm749_vm1, %v34095_v18  ;;  %v23157_v18 = vpack.c.bf16 %v487_v38, %v486_v49  ;;  %v29385_v38 = vpack.c.bf16 %v489_v61, %v488_v9  ;;  %v34100_v49 = vld [vmem:[#allocation143_spill] sm:$0xff]  ;;  %v34102_v9 = vld [vmem:[#allocation149_spill] sm:$0xff] }
 0x39f   : > { %22255 = vmatmul.mubr.msk.f32.gmra.mrb[14].mxu0 %vm749_vm1, %v34096_v6  ;;  %20945 = vmatprep.mubr.msk.f32.mxu1 %vm749_vm1, %v25335_v15  ;;  %v25337_v15 = vld [vmem:[%s25620_s27 + $0x48] sm:$0xff] }
 0x3a0   : > { %22257 = vmatprep.mubr.msk.f32.mxu0 %vm749_vm1, %v34097_v39  ;;  %v25340_v61 = vld [vmem:[%s25620_s27 + $0x68] sm:$0xff] }
 0x3a2   : > { %20946 = vmatmul.mubr.msk.f32.vlgmr.msra.gmra.mrb[0].mxu1 %vm749_vm1, %v25336_v8  ;;  %v25338_v8 = vld [vmem:[%s25620_s27 + $0x50] sm:$0xff] }
 0x3a3   : > { %22258 = vmatmul.mubr.msk.f32.gmra.mrb[16].mxu0 %vm749_vm1, %v34098_v0  ;;  %20948 = vmatprep.mubr.msk.f32.mxu1 %vm749_vm1, %v25337_v15  ;;  %v25339_v0 = vld [vmem:[%s25620_s27 + $0x60] sm:$0xff]  ;;  %v34101_v15 = vld [vmem:[#allocation145_spill] sm:$0xff] }
 0x3a4   : > { %22260 = vmatprep.mubr.msk.f32.mxu0 %vm749_vm1, %v34099_v44  ;;  %23156 = vmatpush3.bf16.msra.mxu1 %v29213_v50  ;;  %v25341_v50 = vld [vmem:[%s25620_s27 + $0x78] sm:$0xff]  ;;  %v29450_v44 = vld [vmem:[%s25620_s27 + $0xc8] sm:$0xff] }
 0x3a5   : > { %23158 = vmatprep.subr.bf16.mxu1 %v23157_v18  ;;  %34116 = vst [vmem:[#allocation236_spill] sm:$0xff] %v29450_v44 }
 0x3a6   : > { %20949 = vmatmul.mubr.msk.f32.gmra.mrb[2].mxu1 %vm749_vm1, %v25338_v8  ;;  %v34103_v8 = vld [vmem:[#allocation220_spill] sm:$0xff] }
 0x3a7   : > { %22261 = vmatmul.mubr.msk.f32.gmra.mrb[18].mxu0 %vm749_vm1, %v34100_v49  ;;  %20951 = vmatprep.mubr.msk.f32.mxu1 %vm749_vm1, %v25339_v0  ;;  %v25342_v0 = vld [vmem:[%s25620_s27 + $0x80] sm:$0xff] }
 0x3a8   : > { %22263 = vmatprep.mubr.msk.f32.mxu0 %vm749_vm1, %v34101_v15  ;;  %23160 = vmatpush3.bf16.msra.mxu1 %v23157_v18  ;;  %v34104_v18 = vld [vmem:[#allocation222_spill] sm:$0xff]  ;;  %v29409_v15 = vld [vmem:[%s25620_s27 + $0x90] sm:$0xff] }
 0x3a9   : > { %23162 = vmatprep.subr.bf16.mxu1 %v29385_v38  ;;  %34105 = vst [vmem:[#allocation225_spill] sm:$0xff] %v29409_v15 }
 0x3aa   : > { %20952 = vmatmul.mubr.msk.f32.gmra.mrb[4].mxu1 %vm749_vm1, %v25340_v61  ;;  %v34106_v61 = vld [vmem:[#allocation223_spill] sm:$0xff] }
 0x3ab   : > { %22264 = vmatmul.mubr.msk.f32.gmra.mrb[20].mxu0 %vm749_vm1, %v34102_v9  ;;  %20954 = vmatprep.mubr.msk.f32.mxu1 %vm749_vm1, %v25341_v50  ;;  %v29416_v50 = vld [vmem:[%s25620_s27 + $0x98] sm:$0xff]  ;;  %v29432_v9 = vld [vmem:[%s25620_s27 + $0xb0] sm:$0xff] }
 0x3ac   : > { %22266 = vmatprep.mubr.msk.f32.mxu0 %vm749_vm1, %v34103_v8  ;;  %34107 = vst [vmem:[#allocation228_spill] sm:$0xff] %v29416_v50  ;;  %v34108_v8 = vld [vmem:[#allocation226_spill] sm:$0xff]  ;;  %34111 = vst [vmem:[#allocation232_spill] sm:$0xff] %v29432_v9 }
 0x3ae   : > { %20955 = vmatmul.mubr.msk.f32.gmra.mrb[6].mxu1 %vm749_vm1, %v25342_v0  ;;  %v29423_v0 = vld [vmem:[%s25620_s27 + $0xa8] sm:$0xff] }
 0x3af   : > { %22267 = vmatmul.mubr.msk.f32.gmra.mrb[22].mxu0 %vm749_vm1, %v34104_v18  ;;  %20957 = vmatprep.mubr.msk.f32.mxu1 %vm749_vm1, %v29409_v15  ;;  %34109 = vst [vmem:[#allocation229_spill] sm:$0xff] %v29423_v0  ;;  %v34110_v18 = vld [vmem:[#allocation227_spill] sm:$0xff]  ;;  %v11340_v15 = vrot.slane %v29091_v32, 2 }
 0x3b0   : > { %22269 = vmatprep.mubr.msk.f32.mxu0 %vm749_vm1, %v34106_v61  ;;  %v11341_v61 = vrot.slane %v29102_v13, 2 }
 0x3b2   : > { %20958 = vmatmul.mubr.msk.f32.gmra.mrb[8].mxu1 %vm749_vm1, %v29416_v50  ;;  %v34112_v50 = vld [vmem:[#allocation230_spill] sm:$0xff]  ;;  %v29447_v49 = vsel %vm1328_vm2, %v11340_v15, %v11341_v61 }
 0x3b3   : > { %22270 = vmatmul.mubr.msk.f32.gmra.mrb[24].mxu0 %vm749_vm1, %v34108_v8  ;;  %20960 = vmatprep.mubr.msk.f32.mxu1 %vm749_vm1, %v29423_v0  ;;  %v29439_v8 = vld [vmem:[%s25620_s27 + $0xc0] sm:$0xff]  ;;  %v34114_v0 = vld [vmem:[#allocation231_spill] sm:$0xff]  ;;  %34115 = vst [vmem:[#allocation235_spill] sm:$0xff] %v29447_v49 }
 0x3b4   : > { %22272 = vmatprep.mubr.msk.f32.mxu0 %vm749_vm1, %v34110_v18  ;;  %34113 = vst [vmem:[#allocation233_spill] sm:$0xff] %v29439_v8  ;;  %v11343_v18 = vrot.slane %v29251_v35, 2 }
 0x3b6   : > { %20961 = vmatmul.mubr.msk.f32.gmra.mrb[10].mxu1 %vm749_vm1, %v29432_v9  ;;  %v29457_v9 = vld [vmem:[%s25620_s27 + $0xd8] sm:$0xff]  ;;  %v29464_v15 = vsel %vm1328_vm2, %v11341_v61, %v11343_v18  ;;  %v34122_v18 = vld [vmem:[#allocation51_spill] sm:$0xff] }
 0x3b7   : > { %22273 = vmatmul.mubr.msk.f32.gmra.mrb[26].mxu0 %vm749_vm1, %v34112_v50  ;;  %20963 = vmatprep.mubr.msk.f32.mxu1 %vm749_vm1, %v29439_v8  ;;  %v34117_v50 = vld [vmem:[#allocation234_spill] sm:$0xff]  ;;  %34118 = vst [vmem:[#allocation237_spill] sm:$0xff] %v29457_v9  ;;  %34119 = vst [vmem:[#allocation238_spill] sm:$0xff] %v29464_v15  ;;  %v34124_v8 = vld [vmem:[#allocation53_spill] sm:$0xff] }
 0x3b8   : > { %22275 = vmatprep.mubr.msk.f32.mxu0 %vm749_vm1, %v34114_v0  ;;  %v29467_v0 = vld [vmem:[%s25620_s27 + $0xe0] sm:$0xff] }
 0x3b9   : > { %34120 = vst [vmem:[#allocation239_spill] sm:$0xff] %v29467_v0 }
 0x3ba   : > { %20964 = vmatmul.mubr.msk.f32.gmra.mrb[12].mxu1 %vm749_vm1, %v29450_v44  ;;  %v583_v44 = vld [vmem:[%s32669_s1 + $0x4f8] sm:$0xff] }
 0x3bb   : > { %22276 = vmatmul.mubr.msk.f32.gmra.mrb[28].mxu0 %vm749_vm1, %v34117_v50  ;;  %20966 = vmatprep.mubr.msk.f32.mxu1 %vm749_vm1, %v29457_v9  ;;  %v582_v50 = vld [vmem:[%s32669_s1 + $0x4f0] sm:$0xff]  ;;  %v584_v9 = vld [vmem:[%s32669_s1 + $0x500] sm:$0xff] }
 0x3bc   : > { %22278 = vmatprep.mubr.msk.f32.mxu0 %vm749_vm1, %v29447_v49  ;;  %v29480_v49 = vld [vmem:[%s25620_s27 + $0xf0] sm:$0xff]  ;;  %v23349_v61 = vpack.c.bf16 %v583_v44, %v582_v50  ;;  %v34125_v44 = vld [vmem:[#allocation55_spill] sm:$0xff] }
 0x3bd   : > { %34121 = vst [vmem:[#allocation205_spill] sm:$0xff] %v29480_v49 }
 0x3be   : > { %20967 = vmatmul.mubr.msk.f32.gmra.mrb[14].mxu1 %vm749_vm1, %v29467_v0  ;;  %v29487_v0 = vld [vmem:[%s25620_s27 + $0xf8] sm:$0xff] }
 0x3bf   : > { %22279 = vmatmul.mubr.msk.f32.gmra.mrb[30].mxu0 %vm749_vm1, %v29464_v15  ;;  %20969 = vmatprep.mubr.msk.f32.mxu1 %vm749_vm1, %v29480_v49  ;;  %34123 = vst [vmem:[#allocation206_spill] sm:$0xff] %v29487_v0  ;;  %v585_v15 = vld [vmem:[%s32669_s1 + $0x508] sm:$0xff] }
 0x3c0   : > { %22289 = vmatprep.mubr.msk.f32.mxu0 %vm749_vm1, %v34122_v18  ;;  %v29504_v50 = vpack.c.bf16 %v585_v15, %v584_v9  ;;  %v34127_v49 = vld [vmem:[#allocation59_spill] sm:$0xff]  ;;  %v34139_v9 = vld [vmem:[#allocation17_spill] sm:$0xff] }
 0x3c2   : > { %20970 = vmatmul.mubr.msk.f32.gmra.mrb[16].mxu1 %vm749_vm1, %v29487_v0  ;;  %v34126_v0 = vld [vmem:[#allocation57_spill] sm:$0xff] }
 0x3c3   : > { %22290 = vmatmul.mubr.msk.f32.vlgmr.msra.gmra.mrb[0].mxu0 %vm749_vm1, %v34124_v8  ;;  %20972 = vmatprep.mubr.msk.f32.mxu1 %vm749_vm1, %v28967_v29  ;;  %v34128_v29 = vld [vmem:[#allocation61_spill] sm:$0xff] }
 0x3c4   : > { %23348 = vmatpush3.bf16.msra.mxu0 %v29305_v7  ;;  %22292 = vmatprep.mubr.msk.f32.mxu0 %vm749_vm1, %v34125_v44  ;;  %v34131_v7 = vld [vmem:[#allocation67_spill] sm:$0xff] }
 0x3c5   : > { %23350 = vmatprep.subr.bf16.mxu0 %v23349_v61 }
 0x3c6   : > { %20973 = vmatmul.mubr.msk.f32.gmra.mrb[18].mxu1 %vm749_vm1, %v28974_v17  ;;  %v34129_v17 = vld [vmem:[#allocation63_spill] sm:$0xff] }
 0x3c7   : > { %22293 = vmatmul.mubr.msk.f32.gmra.mrb[2].mxu0 %vm749_vm1, %v34126_v0  ;;  %20975 = vmatprep.mubr.msk.f32.mxu1 %vm749_vm1, %v28981_v40  ;;  %v34130_v40 = vld [vmem:[#allocation65_spill] sm:$0xff] }
 0x3c8   : > { %22295 = vmatprep.mubr.msk.f32.mxu0 %vm749_vm1, %v34127_v49  ;;  %23352 = vmatpush3.bf16.msra.mxu0 %v23349_v61  ;;  %v34141_v61 = vld [vmem:[#allocation19_spill] sm:$0xff] }
 0x3c9   : > { %23354 = vmatprep.subr.bf16.mxu0 %v29504_v50 }
 0x3ca   : > { %20976 = vmatmul.mubr.msk.f32.gmra.mrb[20].mxu1 %vm749_vm1, %v28994_v54  ;;  %v34132_v54 = vld [vmem:[#allocation69_spill] sm:$0xff] }
 0x3cb   : > { %22296 = vmatmul.mubr.msk.f32.gmra.mrb[4].mxu0 %vm749_vm1, %v34128_v29  ;;  %20978 = vmatprep.mubr.msk.f32.mxu1 %vm749_vm1, %v29001_v19  ;;  %v34133_v19 = vld [vmem:[#allocation71_spill] sm:$0xff] }
 0x3cc   : > { %22298 = vmatprep.mubr.msk.f32.mxu0 %vm749_vm1, %v34129_v17 }
 0x3ce   : > { %20979 = vmatmul.mubr.msk.f32.gmra.mrb[22].mxu1 %vm749_vm1, %v29014_v27  ;;  %v34134_v27 = vld [vmem:[#allocation73_spill] sm:$0xff] }
 0x3cf   : > { %22299 = vmatmul.mubr.msk.f32.gmra.mrb[6].mxu0 %vm749_vm1, %v34130_v40  ;;  %20981 = vmatprep.mubr.msk.f32.mxu1 %vm749_vm1, %v29021_v4  ;;  %v34135_v4 = vld [vmem:[#allocation74_spill] sm:$0xff] }
 0x3d0   : > { %22301 = vmatprep.mubr.msk.f32.mxu0 %vm749_vm1, %v34131_v7 }
 0x3d2   : > { %20982 = vmatmul.mubr.msk.f32.gmra.mrb[24].mxu1 %vm749_vm1, %v29031_v20  ;;  %v34136_v20 = vld [vmem:[#allocation75_spill] sm:$0xff] }
 0x3d3   : > { %22302 = vmatmul.mubr.msk.f32.gmra.mrb[8].mxu0 %vm749_vm1, %v34132_v54  ;;  %20984 = vmatprep.mubr.msk.f32.mxu1 %vm749_vm1, %v29038_v2  ;;  %v34137_v2 = vld [vmem:[#allocation76_spill] sm:$0xff] }
 0x3d4   : > { %22304 = vmatprep.mubr.msk.f32.mxu0 %vm749_vm1, %v34133_v19 }
 0x3d6   : > { %20985 = vmatmul.mubr.msk.f32.gmra.mrb[26].mxu1 %vm749_vm1, %v29046_v57  ;;  %v34138_v57 = vld [vmem:[#allocation77_spill] sm:$0xff] }
 0x3d7   : > { %22305 = vmatmul.mubr.msk.f32.gmra.mrb[10].mxu0 %vm749_vm1, %v34134_v27  ;;  %20987 = vmatprep.mubr.msk.f32.mxu1 %vm749_vm1, %v29053_v47  ;;  %v490_v47 = vld [vmem:[%s32669_s1 + $0x210] sm:$0xff] }
 0x3d8   : > { %22307 = vmatprep.mubr.msk.f32.mxu0 %vm749_vm1, %v34135_v4 }
 0x3da   : > { %20988 = vmatmul.mubr.msk.f32.gmra.mrb[28].mxu1 %vm749_vm1, %v29060_v58  ;;  %v491_v58 = vld [vmem:[%s32669_s1 + $0x218] sm:$0xff] }
 0x3db   : > { %22308 = vmatmul.mubr.msk.f32.gmra.mrb[12].mxu0 %vm749_vm1, %v34136_v20  ;;  %20990 = vmatprep.mubr.msk.f32.mxu1 %vm749_vm1, %v29067_v22  ;;  %v34140_v22 = vld [vmem:[#allocation78_spill] sm:$0xff]  ;;  %v23165_v15 = vpack.c.bf16 %v491_v58, %v490_v47  ;;  %v34142_v20 = vld [vmem:[#allocation79_spill] sm:$0xff] }
 0x3dc   : > { %22310 = vmatprep.mubr.msk.f32.mxu0 %vm749_vm1, %v34137_v2  ;;  %v493_v2 = vld [vmem:[%s32669_s1 + $0x228] sm:$0xff] }
 0x3dd   : > { %v34145_v58 = vld [vmem:[#allocation23_spill] sm:$0xff] }
 0x3de   : > { %20991 = vmatmul.mubr.msk.f32.gmra.mrb[30].mxu1 %vm749_vm1, %v29074_v24  ;;  %v492_v24 = vld [vmem:[%s32669_s1 + $0x220] sm:$0xff] }
 0x3df   : > { %22311 = vmatmul.mubr.msk.f32.gmra.mrb[14].mxu0 %vm749_vm1, %v34138_v57  ;;  %21001 = vmatprep.mubr.msk.f32.mxu1 %vm749_vm1, %v34139_v9  ;;  %v34143_v57 = vld [vmem:[#allocation21_spill] sm:$0xff]  ;;  %v34144_v9 = vld [vmem:[#allocation80_spill] sm:$0xff]  ;;  %v29584_v47 = vpack.c.bf16 %v493_v2, %v492_v24  ;;  %v34151_v2 = vld [vmem:[#allocation87_spill] sm:$0xff] }
 0x3e0   : > { %22313 = vmatprep.mubr.msk.f32.mxu0 %vm749_vm1, %v34140_v22  ;;  %v34147_v22 = vld [vmem:[#allocation25_spill] sm:$0xff]  ;;  %v34152_v24 = vld [vmem:[#allocation88_spill] sm:$0xff] }
 0x3e2   : > { %21002 = vmatmul.mubr.msk.f32.vlgmr.msra.gmra.mrb[0].mxu1 %vm749_vm1, %v34141_v61  ;;  %v34146_v61 = vld [vmem:[#allocation81_spill] sm:$0xff] }
 0x3e3   : > { %22314 = vmatmul.mubr.msk.f32.gmra.mrb[16].mxu0 %vm749_vm1, %v34142_v20  ;;  %21004 = vmatprep.mubr.msk.f32.mxu1 %vm749_vm1, %v34143_v57  ;;  %v34148_v20 = vld [vmem:[#allocation82_spill] sm:$0xff]  ;;  %v34149_v57 = vld [vmem:[#allocation27_spill] sm:$0xff] }
 0x3e4   : > { %22316 = vmatprep.mubr.msk.f32.mxu0 %vm749_vm1, %v34144_v9  ;;  %23164 = vmatpush3.bf16.msra.mxu1 %v29385_v38  ;;  %v34150_v38 = vld [vmem:[#allocation86_spill] sm:$0xff] }
 0x3e5   : > { %23166 = vmatprep.subr.bf16.mxu1 %v23165_v15 }
 0x3e6   : > { %21005 = vmatmul.mubr.msk.f32.gmra.mrb[2].mxu1 %vm749_vm1, %v34145_v58  ;;  %v34156_v58 = vld [vmem:[#allocation92_spill] sm:$0xff] }
 0x3e7   : > { %22317 = vmatmul.mubr.msk.f32.gmra.mrb[18].mxu0 %vm749_vm1, %v34146_v61  ;;  %21007 = vmatprep.mubr.msk.f32.mxu1 %vm749_vm1, %v34147_v22  ;;  %v11607_v22 = vrot.slane %v29102_v13, 3 }
 0x3e8   : > { %22319 = vmatprep.mubr.msk.f32.mxu0 %vm749_vm1, %v34148_v20  ;;  %23168 = vmatpush3.bf16.msra.mxu1 %v23165_v15  ;;  %v34153_v15 = vld [vmem:[#allocation89_spill] sm:$0xff] }
 0x3e9   : > { %23170 = vmatprep.subr.bf16.mxu1 %v29584_v47 }
 0x3ea   : > { %21008 = vmatmul.mubr.msk.f32.gmra.mrb[4].mxu1 %vm749_vm1, %v34149_v57  ;;  %v34154_v57 = vld [vmem:[#allocation90_spill] sm:$0xff] }
 0x3eb   : > { %22320 = vmatmul.mubr.msk.f32.gmra.mrb[20].mxu0 %vm749_vm1, %v34150_v38  ;;  %21010 = vmatprep.mubr.msk.f32.mxu1 %vm749_vm1, %v34034_v14  ;;  %v34155_v14 = vld [vmem:[#allocation91_spill] sm:$0xff] }
 0x3ec   : > { %22322 = vmatprep.mubr.msk.f32.mxu0 %vm749_vm1, %v34151_v2 }
 0x3ee   : > { %21011 = vmatmul.mubr.msk.f32.gmra.mrb[6].mxu1 %vm749_vm1, %v34036_v62  ;;  %v11606_v62 = vrot.slane %v29091_v32, 3 }
 0x3ef   : > { %22323 = vmatmul.mubr.msk.f32.gmra.mrb[22].mxu0 %vm749_vm1, %v34152_v24  ;;  %21013 = vmatprep.mubr.msk.f32.mxu1 %vm749_vm1, %v34038_v63  ;;  %v34159_v63 = vld [vmem:[#allocation15_spill] sm:$0xff] }
 0x3f0   : > { %22325 = vmatprep.mubr.msk.f32.mxu0 %vm749_vm1, %v34153_v15 }
 0x3f2   : > { %21014 = vmatmul.mubr.msk.f32.gmra.mrb[8].mxu1 %vm749_vm1, %v34040_v12  ;;  %v34157_v12 = vld [vmem:[#allocation12_spill] sm:$0xff] }
 0x3f3   : > { %22326 = vmatmul.mubr.msk.f32.gmra.mrb[24].mxu0 %vm749_vm1, %v34154_v57  ;;  %21016 = vmatprep.mubr.msk.f32.mxu1 %vm749_vm1, %v34042_v5  ;;  %v11609_v5 = vrot.slane %v29251_v35, 3 }
 0x3f4   : > { %22328 = vmatprep.mubr.msk.f32.mxu0 %vm749_vm1, %v34155_v14  ;;  %v29631_v14 = vsel %vm1730_vm3, %v11606_v62, %v11607_v22  ;;  %v586_v62 = vld [vmem:[%s32669_s1 + $0x510] sm:$0xff] }
 0x3f5   : > { %34158 = vst [vmem:[#allocation209_spill] sm:$0xff] %v29631_v14 }
 0x3f6   : > { %21017 = vmatmul.mubr.msk.f32.gmra.mrb[10].mxu1 %vm749_vm1, %v34044_v36  ;;  %v34184_v36 = vld [vmem:[#allocation111_spill] sm:$0xff] }
 0x3f7   : > { %22329 = vmatmul.mubr.msk.f32.gmra.mrb[26].mxu0 %vm749_vm1, %v34156_v58  ;;  %21019 = vmatprep.mubr.msk.f32.mxu1 %vm749_vm1, %v34046_v42  ;;  %v29642_v58 = vsel %vm1730_vm3, %v11607_v22, %v11609_v5  ;;  %v588_v22 = vld [vmem:[%s32669_s1 + $0x520] sm:$0xff] }
 0x3f8   : > { %22331 = vmatprep.mubr.msk.f32.mxu0 %vm749_vm1, %v34157_v12  ;;  %34160 = vst [vmem:[#allocation210_spill] sm:$0xff] %v29642_v58  ;;  %v589_v12 = vld [vmem:[%s32669_s1 + $0x528] sm:$0xff]  ;;  %v34183_v42 = vld [vmem:[#allocation14_spill] sm:$0xff] }
 0x3fa   : > { %21020 = vmatmul.mubr.msk.f32.gmra.mrb[12].mxu1 %vm749_vm1, %v34048_v3  ;;  %v34168_v3 = vld [vmem:[#allocation101_spill] sm:$0xff] }
 0x3fb   : > { %22332 = vmatmul.mubr.msk.f32.gmra.mrb[28].mxu0 %vm749_vm1, %v34159_v63  ;;  %21022 = vmatprep.mubr.msk.f32.mxu1 %vm749_vm1, %v34049_v56  ;;  %v587_v63 = vld [vmem:[%s32669_s1 + $0x518] sm:$0xff]  ;;  %v34167_v56 = vld [vmem:[#allocation58_spill] sm:$0xff] }
 0x3fc   : > { %22334 = vmatprep.mubr.msk.f32.mxu0 %vm749_vm1, %v29631_v14  ;;  %v34161_v14 = vld [vmem:[#allocation97_spill] sm:$0xff]  ;;  %v23357_v5 = vpack.c.bf16 %v587_v63, %v586_v62  ;;  %v34164_v63 = vld [vmem:[#allocation99_spill] sm:$0xff]  ;;  %v29673_v62 = vpack.c.bf16 %v589_v12, %v588_v22  ;;  %v34170_v12 = vld [vmem:[#allocation102_spill] sm:$0xff] }
 0x3fd   : > { %v34171_v22 = vld [vmem:[#allocation62_spill] sm:$0xff] }
 0x3fe   : > { %21023 = vmatmul.mubr.msk.f32.gmra.mrb[14].mxu1 %vm749_vm1, %v34050_v1  ;;  %v34162_v1 = vld [vmem:[#allocation98_spill] sm:$0xff] }
 0x3ff   : > { %22335 = vmatmul.mubr.msk.f32.gmra.mrb[30].mxu0 %vm749_vm1, %v29642_v58  ;;  %21025 = vmatprep.mubr.msk.f32.mxu1 %vm749_vm1, %v34051_v53  ;;  %v34163_v58 = vld [vmem:[#allocation54_spill] sm:$0xff]  ;;  %v34166_v53 = vld [vmem:[#allocation100_spill] sm:$0xff] }
 0x400   : > { %22345 = vmatprep.mubr.msk.f32.mxu0 %vm749_vm1, %v34161_v14 }
 0x402   : > { %21026 = vmatmul.mubr.msk.f32.gmra.mrb[16].mxu1 %vm749_vm1, %v34052_v31  ;;  %v34165_v31 = vld [vmem:[#allocation56_spill] sm:$0xff] }
 0x403   : > { %22346 = vmatmul.mubr.msk.f32.vlgmr.msra.gmra.mrb[0].mxu0 %vm749_vm1, %v34162_v1  ;;  %21028 = vmatprep.mubr.msk.f32.mxu1 %vm749_vm1, %v34163_v58  ;;  %v34173_v58 = vld [vmem:[#allocation64_spill] sm:$0xff] }
 0x404   : > { %23356 = vmatpush3.bf16.msra.mxu0 %v29504_v50  ;;  %22348 = vmatprep.mubr.msk.f32.mxu0 %vm749_vm1, %v34164_v63  ;;  %v34169_v50 = vld [vmem:[#allocation60_spill] sm:$0xff] }
 0x405   : > { %23358 = vmatprep.subr.bf16.mxu0 %v23357_v5 }
 0x406   : > { %21029 = vmatmul.mubr.msk.f32.gmra.mrb[18].mxu1 %vm749_vm1, %v34165_v31  ;;  %v34172_v31 = vld [vmem:[#allocation103_spill] sm:$0xff] }
 0x407   : > { %22349 = vmatmul.mubr.msk.f32.gmra.mrb[2].mxu0 %vm749_vm1, %v34166_v53  ;;  %21031 = vmatprep.mubr.msk.f32.mxu1 %vm749_vm1, %v34167_v56  ;;  %v34174_v56 = vld [vmem:[#allocation104_spill] sm:$0xff] }
 0x408   : > { %22351 = vmatprep.mubr.msk.f32.mxu0 %vm749_vm1, %v34168_v3  ;;  %23360 = vmatpush3.bf16.msra.mxu0 %v23357_v5  ;;  %v34175_v5 = vld [vmem:[#allocation30_spill] sm:$0xff] }
 0x409   : > { %23362 = vmatprep.subr.bf16.mxu0 %v29673_v62 }
 0x40a   : > { %21032 = vmatmul.mubr.msk.f32.gmra.mrb[20].mxu1 %vm749_vm1, %v34169_v50  ;;  %v34176_v50 = vld [vmem:[#allocation105_spill] sm:$0xff] }
 0x40b   : > { %22352 = vmatmul.mubr.msk.f32.gmra.mrb[4].mxu0 %vm749_vm1, %v34170_v12  ;;  %21034 = vmatprep.mubr.msk.f32.mxu1 %vm749_vm1, %v34171_v22  ;;  %v34177_v22 = vld [vmem:[#allocation106_spill] sm:$0xff] }
 0x40c   : > { %22354 = vmatprep.mubr.msk.f32.mxu0 %vm749_vm1, %v34172_v31 }
 0x40e   : > { %21035 = vmatmul.mubr.msk.f32.gmra.mrb[22].mxu1 %vm749_vm1, %v34173_v58  ;;  %v34178_v58 = vld [vmem:[#allocation8_spill] sm:$0xff] }
 0x40f   : > { %22355 = vmatmul.mubr.msk.f32.gmra.mrb[6].mxu0 %vm749_vm1, %v34174_v56  ;;  %21037 = vmatprep.mubr.msk.f32.mxu1 %vm749_vm1, %v34062_v16  ;;  %v34179_v16 = vld [vmem:[#allocation107_spill] sm:$0xff] }
 0x410   : > { %22357 = vmatprep.mubr.msk.f32.mxu0 %vm749_vm1, %v34175_v5 }
 0x412   : > { %21038 = vmatmul.mubr.msk.f32.gmra.mrb[24].mxu1 %vm749_vm1, %v34064_v25  ;;  %v34180_v25 = vld [vmem:[#allocation108_spill] sm:$0xff] }
 0x413   : > { %22358 = vmatmul.mubr.msk.f32.gmra.mrb[8].mxu0 %vm749_vm1, %v34176_v50  ;;  %21040 = vmatprep.mubr.msk.f32.mxu1 %vm749_vm1, %v34066_v45  ;;  %v34181_v45 = vld [vmem:[#allocation109_spill] sm:$0xff] }
 0x414   : > { %22360 = vmatprep.mubr.msk.f32.mxu0 %vm749_vm1, %v34177_v22 }
 0x416   : > { %21041 = vmatmul.mubr.msk.f32.gmra.mrb[26].mxu1 %vm749_vm1, %v34068_v30  ;;  %v34182_v30 = vld [vmem:[#allocation215_spill] sm:$0xff] }
 0x417   : > { %22361 = vmatmul.mubr.msk.f32.gmra.mrb[10].mxu0 %vm749_vm1, %v34178_v58  ;;  %21043 = vmatprep.mubr.msk.f32.mxu1 %vm749_vm1, %v34069_v28  ;;  %v494_v28 = vld [vmem:[%s32669_s1 + $0x230] sm:$0xff]  ;;  %v34187_v58 = vld [vmem:[#allocation114_spill] sm:$0xff] }
 0x418   : > { %22363 = vmatprep.mubr.msk.f32.mxu0 %vm749_vm1, %v34179_v16  ;;  %v497_v16 = vld [vmem:[%s32669_s1 + $0x248] sm:$0xff] }
 0x41a   : > { %21044 = vmatmul.mubr.msk.f32.gmra.mrb[28].mxu1 %vm749_vm1, %v34070_v33  ;;  %v495_v33 = vld [vmem:[%s32669_s1 + $0x238] sm:$0xff] }
 0x41b   : > { %22364 = vmatmul.mubr.msk.f32.gmra.mrb[12].mxu0 %vm749_vm1, %v34180_v25  ;;  %21046 = vmatprep.mubr.msk.f32.mxu1 %vm749_vm1, %v34071_v26  ;;  %v34185_v26 = vld [vmem:[#allocation112_spill] sm:$0xff]  ;;  %v34186_v25 = vld [vmem:[#allocation113_spill] sm:$0xff] }
 0x41c   : > { %22366 = vmatprep.mubr.msk.f32.mxu0 %vm749_vm1, %v34181_v45  ;;  %v23173_v45 = vpack.c.bf16 %v495_v33, %v494_v28  ;;  %v34191_v28 = vld [vmem:[#allocation116_spill] sm:$0xff] }
 0x41e   : > { %21047 = vmatmul.mubr.msk.f32.gmra.mrb[30].mxu1 %vm749_vm1, %v34182_v30  ;;  %v496_v30 = vld [vmem:[%s32669_s1 + $0x240] sm:$0xff] }
 0x41f   : > { %22367 = vmatmul.mubr.msk.f32.gmra.mrb[14].mxu0 %vm749_vm1, %v34183_v42  ;;  %21057 = vmatprep.mubr.msk.f32.mxu1 %vm749_vm1, %v34184_v36  ;;  %v34188_v42 = vld [vmem:[#allocation9_spill] sm:$0xff]  ;;  %v34189_v36 = vld [vmem:[#allocation115_spill] sm:$0xff]  ;;  %v29753_v33 = vpack.c.bf16 %v497_v16, %v496_v30  ;;  %v34195_v16 = vld [vmem:[#allocation118_spill] sm:$0xff] }
 0x420   : > { %22369 = vmatprep.mubr.msk.f32.mxu0 %vm749_vm1, %v34185_v26  ;;  %v34192_v26 = vld [vmem:[#allocation13_spill] sm:$0xff]  ;;  %v34196_v30 = vld [vmem:[#allocation83_spill] sm:$0xff] }
 0x422   : > { %21058 = vmatmul.mubr.msk.f32.vlgmr.msra.gmra.mrb[0].mxu1 %vm749_vm1, %v34186_v25  ;;  %v34190_v25 = vld [vmem:[#allocation11_spill] sm:$0xff] }
 0x423   : > { %22370 = vmatmul.mubr.msk.f32.gmra.mrb[16].mxu0 %vm749_vm1, %v34187_v58  ;;  %21060 = vmatprep.mubr.msk.f32.mxu1 %vm749_vm1, %v34188_v42  ;;  %v34193_v58 = vld [vmem:[#allocation117_spill] sm:$0xff]  ;;  %v34194_v42 = vld [vmem:[#allocation16_spill] sm:$0xff] }
 0x424   : > { %22372 = vmatprep.mubr.msk.f32.mxu0 %vm749_vm1, %v34189_v36  ;;  %23172 = vmatpush3.bf16.msra.mxu1 %v29584_v47  ;;  %v34199_v47 = vld [vmem:[#allocation119_spill] sm:$0xff] }
 0x425   : > { %23174 = vmatprep.subr.bf16.mxu1 %v23173_v45 }
 0x426   : > { %21061 = vmatmul.mubr.msk.f32.gmra.mrb[2].mxu1 %vm749_vm1, %v34190_v25  ;;  %v11873_v25 = vrot.slane %v29102_v13, 4 }
 0x427   : > { %22373 = vmatmul.mubr.msk.f32.gmra.mrb[18].mxu0 %vm749_vm1, %v34191_v28  ;;  %21063 = vmatprep.mubr.msk.f32.mxu1 %vm749_vm1, %v34192_v26  ;;  %v34197_v26 = vld [vmem:[#allocation84_spill] sm:$0xff] }
 0x428   : > { %22375 = vmatprep.mubr.msk.f32.mxu0 %vm749_vm1, %v34193_v58  ;;  %23176 = vmatpush3.bf16.msra.mxu1 %v23173_v45  ;;  %v34198_v45 = vld [vmem:[#allocation85_spill] sm:$0xff] }
 0x429   : > { %23178 = vmatprep.subr.bf16.mxu1 %v29753_v33 }
 0x42a   : > { %21064 = vmatmul.mubr.msk.f32.gmra.mrb[4].mxu1 %vm749_vm1, %v34194_v42  ;;  %v34201_v42 = vld [vmem:[#allocation121_spill] sm:$0xff] }
 0x42b   : > { %22376 = vmatmul.mubr.msk.f32.gmra.mrb[20].mxu0 %vm749_vm1, %v34195_v16  ;;  %21066 = vmatprep.mubr.msk.f32.mxu1 %vm749_vm1, %v34079_v52  ;;  %v34200_v52 = vld [vmem:[#allocation120_spill] sm:$0xff] }
 0x42c   : > { %22378 = vmatprep.mubr.msk.f32.mxu0 %vm749_vm1, %v34196_v30 }
 0x42e   : > { %21067 = vmatmul.mubr.msk.f32.gmra.mrb[6].mxu1 %vm749_vm1, %v34080_v34  ;;  %v11872_v34 = vrot.slane %v29091_v32, 4 }
 0x42f   : > { %22379 = vmatmul.mubr.msk.f32.gmra.mrb[22].mxu0 %vm749_vm1, %v34197_v26  ;;  %21069 = vmatprep.mubr.msk.f32.mxu1 %vm749_vm1, %v34081_v55  ;;  %v34204_v55 = vld [vmem:[#allocation110_spill] sm:$0xff] }
 0x430   : > { %22381 = vmatprep.mubr.msk.f32.mxu0 %vm749_vm1, %v34198_v45 }
 0x432   : > { %21070 = vmatmul.mubr.msk.f32.gmra.mrb[8].mxu1 %vm749_vm1, %v34082_v43  ;;  %v34202_v43 = vld [vmem:[#allocation10_spill] sm:$0xff] }
 0x433   : > { %22382 = vmatmul.mubr.msk.f32.gmra.mrb[24].mxu0 %vm749_vm1, %v34199_v47  ;;  %21072 = vmatprep.mubr.msk.f32.mxu1 %vm749_vm1, %v34083_v59  ;;  %v11875_v59 = vrot.slane %v29251_v35, 4 }
 0x434   : > { %22384 = vmatprep.mubr.msk.f32.mxu0 %vm749_vm1, %v34200_v52  ;;  %v29800_v52 = vsel %vm2132_vm4, %v11872_v34, %v11873_v25  ;;  %v590_v34 = vld [vmem:[%s32669_s1 + $0x530] sm:$0xff] }
 0x435   : > { %34203 = vst [vmem:[#allocation18_spill] sm:$0xff] %v29800_v52 }
 0x436   : > { %21073 = vmatmul.mubr.msk.f32.gmra.mrb[10].mxu1 %vm749_vm1, %v34084_v37  ;;  %v34228_v37 = vld [vmem:[#allocation157_spill] sm:$0xff] }
 0x437   : > { %22385 = vmatmul.mubr.msk.f32.gmra.mrb[26].mxu0 %vm749_vm1, %v34201_v42  ;;  %21075 = vmatprep.mubr.msk.f32.mxu1 %vm749_vm1, %v34085_v46  ;;  %v29811_v42 = vsel %vm2132_vm4, %v11873_v25, %v11875_v59  ;;  %v592_v25 = vld [vmem:[%s32669_s1 + $0x540] sm:$0xff] }
 0x438   : > { %22387 = vmatprep.mubr.msk.f32.mxu0 %vm749_vm1, %v34202_v43  ;;  %34205 = vst [vmem:[#allocation20_spill] sm:$0xff] %v29811_v42  ;;  %v593_v43 = vld [vmem:[%s32669_s1 + $0x548] sm:$0xff]  ;;  %v34226_v46 = vld [vmem:[#allocation154_spill] sm:$0xff] }
 0x43a   : > { %21076 = vmatmul.mubr.msk.f32.gmra.mrb[12].mxu1 %vm749_vm1, %v34086_v51  ;;  %v34224_v51 = vld [vmem:[#allocation153_spill] sm:$0xff] }
 0x43b   : > { %22388 = vmatmul.mubr.msk.f32.gmra.mrb[28].mxu0 %vm749_vm1, %v34204_v55  ;;  %21078 = vmatprep.mubr.msk.f32.mxu1 %vm749_vm1, %v34087_v21  ;;  %v591_v55 = vld [vmem:[%s32669_s1 + $0x538] sm:$0xff]  ;;  %v34222_v21 = vld [vmem:[#allocation150_spill] sm:$0xff] }
 0x43c   : > { %22390 = vmatprep.mubr.msk.f32.mxu0 %vm749_vm1, %v29800_v52  ;;  %v34206_v52 = vld [vmem:[#allocation126_spill] sm:$0xff]  ;;  %v23365_v59 = vpack.c.bf16 %v591_v55, %v590_v34  ;;  %v34208_v55 = vld [vmem:[#allocation129_spill] sm:$0xff]  ;;  %v29842_v34 = vpack.c.bf16 %v593_v43, %v592_v25  ;;  %v34211_v43 = vld [vmem:[#allocation135_spill] sm:$0xff] }
 0x43d   : > { %v34213_v25 = vld [vmem:[#allocation138_spill] sm:$0xff] }
 0x43e   : > { %21079 = vmatmul.mubr.msk.f32.gmra.mrb[14].mxu1 %vm749_vm1, %v34088_v41  ;;  %v34207_v41 = vld [vmem:[#allocation127_spill] sm:$0xff] }
 0x43f   : > { %22391 = vmatmul.mubr.msk.f32.gmra.mrb[30].mxu0 %vm749_vm1, %v29811_v42  ;;  %21081 = vmatprep.mubr.msk.f32.mxu1 %vm749_vm1, %v34089_v23  ;;  %v34209_v42 = vld [vmem:[#allocation131_spill] sm:$0xff]  ;;  %v34220_v23 = vld [vmem:[#allocation148_spill] sm:$0xff] }
 0x440   : > { %22401 = vmatprep.mubr.msk.f32.mxu0 %vm749_vm1, %v34206_v52 }
 0x442   : > { %21082 = vmatmul.mubr.msk.f32.gmra.mrb[16].mxu1 %vm749_vm1, %v34090_v11  ;;  %v34210_v11 = vld [vmem:[#allocation133_spill] sm:$0xff] }
 0x443   : > { %22402 = vmatmul.mubr.msk.f32.vlgmr.msra.gmra.mrb[0].mxu0 %vm749_vm1, %v34207_v41  ;;  %21084 = vmatprep.mubr.msk.f32.mxu1 %vm749_vm1, %v34091_v48  ;;  %v34218_v48 = vld [vmem:[#allocation144_spill] sm:$0xff] }
 0x444   : > { %23364 = vmatpush3.bf16.msra.mxu0 %v29673_v62  ;;  %22404 = vmatprep.mubr.msk.f32.mxu0 %vm749_vm1, %v34208_v55  ;;  %v34212_v62 = vld [vmem:[#allocation137_spill] sm:$0xff] }
 0x445   : > { %23366 = vmatprep.subr.bf16.mxu0 %v23365_v59 }
 0x446   : > { %21085 = vmatmul.mubr.msk.f32.gmra.mrb[18].mxu1 %vm749_vm1, %v34092_v10  ;;  %v34216_v10 = vld [vmem:[#allocation141_spill] sm:$0xff] }
 0x447   : > { %22405 = vmatmul.mubr.msk.f32.gmra.mrb[2].mxu0 %vm749_vm1, %v34209_v42  ;;  %21087 = vmatprep.mubr.msk.f32.mxu1 %vm749_vm1, %v34094_v60  ;;  %v34214_v60 = vld [vmem:[#allocation139_spill] sm:$0xff] }
 0x448   : > { %22407 = vmatprep.mubr.msk.f32.mxu0 %vm749_vm1, %v34210_v11  ;;  %23368 = vmatpush3.bf16.msra.mxu0 %v23365_v59  ;;  %v34215_v59 = vld [vmem:[#allocation140_spill] sm:$0xff] }
 0x449   : > { %23370 = vmatprep.subr.bf16.mxu0 %v29842_v34 }
 0x44a   : > { %21088 = vmatmul.mubr.msk.f32.gmra.mrb[20].mxu1 %vm749_vm1, %v34096_v6  ;;  %v34217_v6 = vld [vmem:[#allocation143_spill] sm:$0xff] }
 0x44b   : > { %22408 = vmatmul.mubr.msk.f32.gmra.mrb[4].mxu0 %vm749_vm1, %v34211_v43  ;;  %21090 = vmatprep.mubr.msk.f32.mxu1 %vm749_vm1, %v34097_v39  ;;  %v34219_v39 = vld [vmem:[#allocation145_spill] sm:$0xff] }
 0x44c   : > { %22410 = vmatprep.mubr.msk.f32.mxu0 %vm749_vm1, %v34212_v62 }
 0x44e   : > { %21091 = vmatmul.mubr.msk.f32.gmra.mrb[22].mxu1 %vm749_vm1, %v34213_v25  ;;  %v34221_v25 = vld [vmem:[#allocation149_spill] sm:$0xff] }
 0x44f   : > { %22411 = vmatmul.mubr.msk.f32.gmra.mrb[6].mxu0 %vm749_vm1, %v34214_v60  ;;  %21093 = vmatprep.mubr.msk.f32.mxu1 %vm749_vm1, %v34215_v59  ;;  %v34223_v59 = vld [vmem:[#allocation220_spill] sm:$0xff] }
 0x450   : > { %22413 = vmatprep.mubr.msk.f32.mxu0 %vm749_vm1, %v34216_v10 }
 0x452   : > { %21094 = vmatmul.mubr.msk.f32.gmra.mrb[24].mxu1 %vm749_vm1, %v34217_v6  ;;  %v34225_v6 = vld [vmem:[#allocation222_spill] sm:$0xff] }
 0x453   : > { %22414 = vmatmul.mubr.msk.f32.gmra.mrb[8].mxu0 %vm749_vm1, %v34218_v48  ;;  %21096 = vmatprep.mubr.msk.f32.mxu1 %vm749_vm1, %v34219_v39  ;;  %v34227_v39 = vld [vmem:[#allocation223_spill] sm:$0xff] }
 0x454   : > { %22416 = vmatprep.mubr.msk.f32.mxu0 %vm749_vm1, %v34220_v23  ;;  %v501_v23 = vld [vmem:[%s32669_s1 + $0x268] sm:$0xff] }
 0x455   : > { %v34234_v48 = vld [vmem:[#allocation163_spill] sm:$0xff] }
 0x456   : > { %21097 = vmatmul.mubr.msk.f32.gmra.mrb[26].mxu1 %vm749_vm1, %v34221_v25  ;;  %v34229_v25 = vld [vmem:[#allocation226_spill] sm:$0xff] }
 0x457   : > { %22417 = vmatmul.mubr.msk.f32.gmra.mrb[10].mxu0 %vm749_vm1, %v34222_v21  ;;  %21099 = vmatprep.mubr.msk.f32.mxu1 %vm749_vm1, %v34223_v59  ;;  %v498_v59 = vld [vmem:[%s32669_s1 + $0x250] sm:$0xff]  ;;  %v34233_v21 = vld [vmem:[#allocation162_spill] sm:$0xff] }
 0x458   : > { %22419 = vmatprep.mubr.msk.f32.mxu0 %vm749_vm1, %v34224_v51  ;;  %v34230_v51 = vld [vmem:[#allocation159_spill] sm:$0xff] }
 0x45a   : > { %21100 = vmatmul.mubr.msk.f32.gmra.mrb[28].mxu1 %vm749_vm1, %v34225_v6  ;;  %v499_v6 = vld [vmem:[%s32669_s1 + $0x258] sm:$0xff] }
 0x45b   : > { %22420 = vmatmul.mubr.msk.f32.gmra.mrb[12].mxu0 %vm749_vm1, %v34226_v46  ;;  %21102 = vmatprep.mubr.msk.f32.mxu1 %vm749_vm1, %v34227_v39  ;;  %v34231_v46 = vld [vmem:[#allocation160_spill] sm:$0xff]  ;;  %v34232_v39 = vld [vmem:[#allocation161_spill] sm:$0xff] }
 0x45c   : > { %22422 = vmatprep.mubr.msk.f32.mxu0 %vm749_vm1, %v34228_v37  ;;  %v23181_v37 = vpack.c.bf16 %v499_v6, %v498_v59  ;;  %v34238_v59 = vld [vmem:[#allocation165_spill] sm:$0xff] }
 0x45e   : > { %21103 = vmatmul.mubr.msk.f32.gmra.mrb[30].mxu1 %vm749_vm1, %v34229_v25  ;;  %v500_v25 = vld [vmem:[%s32669_s1 + $0x260] sm:$0xff] }
 0x45f   : > { %22423 = vmatmul.mubr.msk.f32.gmra.mrb[14].mxu0 %vm749_vm1, %v34230_v51  ;;  %21113 = vmatprep.mubr.msk.f32.mxu1 %vm749_vm1, %v34231_v46  ;;  %v34235_v51 = vld [vmem:[#allocation43_spill] sm:$0xff]  ;;  %v34236_v46 = vld [vmem:[#allocation164_spill] sm:$0xff]  ;;  %v29922_v6 = vpack.c.bf16 %v501_v23, %v500_v25  ;;  %v34244_v25 = vld [vmem:[#allocation169_spill] sm:$0xff] }
 0x460   : > { %22425 = vmatprep.mubr.msk.f32.mxu0 %vm749_vm1, %v34232_v39  ;;  %v34239_v39 = vld [vmem:[#allocation47_spill] sm:$0xff] }
 0x461   : > { %v34242_v23 = vld [vmem:[#allocation167_spill] sm:$0xff] }
 0x462   : > { %21114 = vmatmul.mubr.msk.f32.vlgmr.msra.gmra.mrb[0].mxu1 %vm749_vm1, %v34233_v21  ;;  %v34237_v21 = vld [vmem:[#allocation45_spill] sm:$0xff] }
 0x463   : > { %22426 = vmatmul.mubr.msk.f32.gmra.mrb[16].mxu0 %vm749_vm1, %v34234_v48  ;;  %21116 = vmatprep.mubr.msk.f32.mxu1 %vm749_vm1, %v34235_v51  ;;  %v34240_v48 = vld [vmem:[#allocation166_spill] sm:$0xff]  ;;  %v34241_v51 = vld [vmem:[#allocation49_spill] sm:$0xff] }
 0x464   : > { %22428 = vmatprep.mubr.msk.f32.mxu0 %vm749_vm1, %v34236_v46  ;;  %23180 = vmatpush3.bf16.msra.mxu1 %v29753_v33  ;;  %v34243_v33 = vld [vmem:[#allocation168_spill] sm:$0xff] }
 0x465   : > { %23182 = vmatprep.subr.bf16.mxu1 %v23181_v37 }
 0x466   : > { %21117 = vmatmul.mubr.msk.f32.gmra.mrb[2].mxu1 %vm749_vm1, %v34237_v21  ;;  %v34248_v21 = vld [vmem:[#allocation173_spill] sm:$0xff] }
 0x467   : > { %22429 = vmatmul.mubr.msk.f32.gmra.mrb[18].mxu0 %vm749_vm1, %v34238_v59  ;;  %21119 = vmatprep.mubr.msk.f32.mxu1 %vm749_vm1, %v34239_v39  ;;  %v34246_v39 = vld [vmem:[#allocation171_spill] sm:$0xff] }
 0x468   : > { %22431 = vmatprep.mubr.msk.f32.mxu0 %vm749_vm1, %v34240_v48  ;;  %23184 = vmatpush3.bf16.msra.mxu1 %v23181_v37  ;;  %v34245_v37 = vld [vmem:[#allocation170_spill] sm:$0xff] }
 0x469   : > { %23186 = vmatprep.subr.bf16.mxu1 %v29922_v6 }
 0x46a   : > { %21120 = vmatmul.mubr.msk.f32.gmra.mrb[4].mxu1 %vm749_vm1, %v34241_v51  ;;  %v12139_v51 = vrot.slane %v29102_v13, 5 }
 0x46b   : > { %22432 = vmatmul.mubr.msk.f32.gmra.mrb[20].mxu0 %vm749_vm1, %v34242_v23  ;;  %21122 = vmatprep.mubr.msk.f32.mxu1 %vm749_vm1, %v34122_v18  ;;  %v34247_v18 = vld [vmem:[#allocation172_spill] sm:$0xff] }
 0x46c   : > { %22434 = vmatprep.mubr.msk.f32.mxu0 %vm749_vm1, %v34243_v33 }
 0x46e   : > { %21123 = vmatmul.mubr.msk.f32.gmra.mrb[6].mxu1 %vm749_vm1, %v34124_v8  ;;  %v12138_v8 = vrot.slane %v29091_v32, 5  ;;  %v34251_v32 = vld [vmem:[#allocation158_spill] sm:$0xff] }
 0x46f   : > { %22435 = vmatmul.mubr.msk.f32.gmra.mrb[22].mxu0 %vm749_vm1, %v34244_v25  ;;  %21125 = vmatprep.mubr.msk.f32.mxu1 %vm749_vm1, %v34125_v44  ;;  %v34277_v44 = vld [vmem:[#allocation193_spill] sm:$0xff] }
 0x470   : > { %22437 = vmatprep.mubr.msk.f32.mxu0 %vm749_vm1, %v34245_v37 }
 0x472   : > { %21126 = vmatmul.mubr.msk.f32.gmra.mrb[8].mxu1 %vm749_vm1, %v34126_v0  ;;  %v34249_v0 = vld [vmem:[#allocation155_spill] sm:$0xff] }
 0x473   : > { %22438 = vmatmul.mubr.msk.f32.gmra.mrb[24].mxu0 %vm749_vm1, %v34246_v39  ;;  %21128 = vmatprep.mubr.msk.f32.mxu1 %vm749_vm1, %v34127_v49  ;;  %v12141_v49 = vrot.slane %v29251_v35, 5 }
 0x474   : > { %22440 = vmatprep.mubr.msk.f32.mxu0 %vm749_vm1, %v34247_v18  ;;  %v29969_v18 = vsel %vm2534_vm5, %v12138_v8, %v12139_v51  ;;  %v594_v8 = vld [vmem:[%s32669_s1 + $0x550] sm:$0xff] }
 0x475   : > { %34250 = vst [vmem:[#allocation17_spill] sm:$0xff] %v29969_v18  ;;  %v29980_v13 = vsel %vm2534_vm5, %v12139_v51, %v12141_v49  ;;  %v596_v49 = vld [vmem:[%s32669_s1 + $0x560] sm:$0xff] }
 0x476   : > { %21129 = vmatmul.mubr.msk.f32.gmra.mrb[10].mxu1 %vm749_vm1, %v34128_v29  ;;  %34252 = vst [vmem:[#allocation19_spill] sm:$0xff] %v29980_v13  ;;  %v505_v29 = vld [vmem:[%s32669_s1 + $0x288] sm:$0xff] }
 0x477   : > { %22441 = vmatmul.mubr.msk.f32.gmra.mrb[26].mxu0 %vm749_vm1, %v34248_v21  ;;  %21131 = vmatprep.mubr.msk.f32.mxu1 %vm749_vm1, %v34129_v17  ;;  %v34254_v21 = vld [vmem:[#allocation179_spill] sm:$0xff]  ;;  %v34276_v17 = vld [vmem:[#allocation192_spill] sm:$0xff] }
 0x478   : > { %22443 = vmatprep.mubr.msk.f32.mxu0 %vm749_vm1, %v34249_v0  ;;  %v597_v0 = vld [vmem:[%s32669_s1 + $0x568] sm:$0xff] }
 0x47a   : > { %21132 = vmatmul.mubr.msk.f32.gmra.mrb[12].mxu1 %vm749_vm1, %v34130_v40 }
 0x47b   : > { %22444 = vmatmul.mubr.msk.f32.gmra.mrb[28].mxu0 %vm749_vm1, %v34251_v32  ;;  %21134 = vmatprep.mubr.msk.f32.mxu1 %vm749_vm1, %v34131_v7  ;;  %v595_v32 = vld [vmem:[%s32669_s1 + $0x558] sm:$0xff]  ;;  %v34274_v7 = vld [vmem:[#allocation190_spill] sm:$0xff] }
 0x47c   : > { %22446 = vmatprep.mubr.msk.f32.mxu0 %vm749_vm1, %v29969_v18  ;;  %v34253_v18 = vld [vmem:[#allocation178_spill] sm:$0xff]  ;;  %v23373_v51 = vpack.c.bf16 %v595_v32, %v594_v8  ;;  %v34255_v32 = vld [vmem:[#allocation180_spill] sm:$0xff]  ;;  %v30011_v8 = vpack.c.bf16 %v597_v0, %v596_v49  ;;  %v34261_v0 = vld [vmem:[#allocation183_spill] sm:$0xff] }
 0x47d   : > { %v34262_v49 = vld [vmem:[#allocation78_spill] sm:$0xff] }
 0x47e   : > { %21135 = vmatmul.mubr.msk.f32.gmra.mrb[14].mxu1 %vm749_vm1, %v34132_v54  ;;  %v34259_v54 = vld [vmem:[#allocation182_spill] sm:$0xff] }
 0x47f   : > { %22447 = vmatmul.mubr.msk.f32.gmra.mrb[30].mxu0 %vm749_vm1, %v29980_v13  ;;  %21137 = vmatprep.mubr.msk.f32.mxu1 %vm749_vm1, %v34133_v19  ;;  %v34256_v13 = vld [vmem:[#allocation75_spill] sm:$0xff]  ;;  %v34258_v19 = vld [vmem:[#allocation76_spill] sm:$0xff] }
 0x480   : > { %22457 = vmatprep.mubr.msk.f32.mxu0 %vm749_vm1, %v34253_v18 }
 0x482   : > { %21138 = vmatmul.mubr.msk.f32.gmra.mrb[16].mxu1 %vm749_vm1, %v34134_v27  ;;  %v34257_v27 = vld [vmem:[#allocation181_spill] sm:$0xff] }
 0x483   : > { %22458 = vmatmul.mubr.msk.f32.vlgmr.msra.gmra.mrb[0].mxu0 %vm749_vm1, %v34254_v21  ;;  %21140 = vmatprep.mubr.msk.f32.mxu1 %vm749_vm1, %v34135_v4  ;;  %v34264_v4 = vld [vmem:[#allocation79_spill] sm:$0xff] }
 0x484   : > { %23372 = vmatpush3.bf16.msra.mxu0 %v29842_v34  ;;  %22460 = vmatprep.mubr.msk.f32.mxu0 %vm749_vm1, %v34255_v32  ;;  %v34260_v34 = vld [vmem:[#allocation77_spill] sm:$0xff] }
 0x485   : > { %23374 = vmatprep.subr.bf16.mxu0 %v23373_v51 }
 0x486   : > { %21141 = vmatmul.mubr.msk.f32.gmra.mrb[18].mxu1 %vm749_vm1, %v34256_v13  ;;  %v34263_v13 = vld [vmem:[#allocation184_spill] sm:$0xff] }
 0x487   : > { %22461 = vmatmul.mubr.msk.f32.gmra.mrb[2].mxu0 %vm749_vm1, %v34257_v27  ;;  %21143 = vmatprep.mubr.msk.f32.mxu1 %vm749_vm1, %v34258_v19  ;;  %v34265_v19 = vld [vmem:[#allocation185_spill] sm:$0xff] }
 0x488   : > { %22463 = vmatprep.mubr.msk.f32.mxu0 %vm749_vm1, %v34259_v54  ;;  %23376 = vmatpush3.bf16.msra.mxu0 %v23373_v51  ;;  %v34266_v51 = vld [vmem:[#allocation186_spill] sm:$0xff] }
 0x489   : > { %23378 = vmatprep.subr.bf16.mxu0 %v30011_v8 }
 0x48a   : > { %21144 = vmatmul.mubr.msk.f32.gmra.mrb[20].mxu1 %vm749_vm1, %v34260_v34  ;;  %v34267_v34 = vld [vmem:[#allocation142_spill] sm:$0xff] }
 0x48b   : > { %22464 = vmatmul.mubr.msk.f32.gmra.mrb[4].mxu0 %vm749_vm1, %v34261_v0  ;;  %21146 = vmatprep.mubr.msk.f32.mxu1 %vm749_vm1, %v34262_v49  ;;  %v34268_v49 = vld [vmem:[#allocation146_spill] sm:$0xff] }
 0x48c   : > { %22466 = vmatprep.mubr.msk.f32.mxu0 %vm749_vm1, %v34263_v13 }
 0x48e   : > { %21147 = vmatmul.mubr.msk.f32.gmra.mrb[22].mxu1 %vm749_vm1, %v34264_v4  ;;  %v34269_v4 = vld [vmem:[#allocation147_spill] sm:$0xff] }
 0x48f   : > { %22467 = vmatmul.mubr.msk.f32.gmra.mrb[6].mxu0 %vm749_vm1, %v34265_v19  ;;  %21149 = vmatprep.mubr.msk.f32.mxu1 %vm749_vm1, %v34144_v9  ;;  %v34270_v9 = vld [vmem:[#allocation151_spill] sm:$0xff] }
 0x490   : > { %22469 = vmatprep.mubr.msk.f32.mxu0 %vm749_vm1, %v34266_v51 }
 0x492   : > { %21150 = vmatmul.mubr.msk.f32.gmra.mrb[24].mxu1 %vm749_vm1, %v34146_v61  ;;  %v34271_v61 = vld [vmem:[#allocation152_spill] sm:$0xff] }
 0x493   : > { %22470 = vmatmul.mubr.msk.f32.gmra.mrb[8].mxu0 %vm749_vm1, %v34267_v34  ;;  %21152 = vmatprep.mubr.msk.f32.mxu1 %vm749_vm1, %v34148_v20  ;;  %v34272_v20 = vld [vmem:[#allocation156_spill] sm:$0xff] }
 0x494   : > { %22472 = vmatprep.mubr.msk.f32.mxu0 %vm749_vm1, %v34268_v49 }
 0x496   : > { %21153 = vmatmul.mubr.msk.f32.gmra.mrb[26].mxu1 %vm749_vm1, %v34150_v38  ;;  %v34273_v38 = vld [vmem:[#allocation189_spill] sm:$0xff] }
 0x497   : > { %22473 = vmatmul.mubr.msk.f32.gmra.mrb[10].mxu0 %vm749_vm1, %v34269_v4  ;;  %21155 = vmatprep.mubr.msk.f32.mxu1 %vm749_vm1, %v34151_v2  ;;  %v502_v2 = vld [vmem:[%s32669_s1 + $0x270] sm:$0xff] }
 0x498   : > { %22475 = vmatprep.mubr.msk.f32.mxu0 %vm749_vm1, %v34270_v9 }
 0x49a   : > { %21156 = vmatmul.mubr.msk.f32.gmra.mrb[28].mxu1 %vm749_vm1, %v34152_v24  ;;  %v503_v24 = vld [vmem:[%s32669_s1 + $0x278] sm:$0xff] }
 0x49b   : > { %22476 = vmatmul.mubr.msk.f32.gmra.mrb[12].mxu0 %vm749_vm1, %v34271_v61  ;;  %21158 = vmatprep.mubr.msk.f32.mxu1 %vm749_vm1, %v34153_v15  ;;  %v34275_v15 = vld [vmem:[#allocation191_spill] sm:$0xff]  ;;  %v23189_v40 = vpack.c.bf16 %v503_v24, %v502_v2  ;;  %v34280_v2 = vld [vmem:[#allocation94_spill] sm:$0xff] }
 0x49c   : > { %22478 = vmatprep.mubr.msk.f32.mxu0 %vm749_vm1, %v34272_v20  ;;  %v34281_v24 = vld [vmem:[#allocation195_spill] sm:$0xff] }
 0x49e   : > { %21159 = vmatmul.mubr.msk.f32.gmra.mrb[30].mxu1 %vm749_vm1, %v34154_v57  ;;  %v504_v57 = vld [vmem:[%s32669_s1 + $0x280] sm:$0xff] }
 0x49f   : > { %22479 = vmatmul.mubr.msk.f32.gmra.mrb[14].mxu0 %vm749_vm1, %v34273_v38  ;;  %21169 = vmatprep.mubr.msk.f32.mxu1 %vm749_vm1, %v34274_v7  ;;  %v34278_v38 = vld [vmem:[#allocation93_spill] sm:$0xff]  ;;  %v34279_v7 = vld [vmem:[#allocation194_spill] sm:$0xff] }
 0x4a0   : > { %22481 = vmatprep.mubr.msk.f32.mxu0 %vm749_vm1, %v34275_v15  ;;  %v34282_v15 = vld [vmem:[#allocation95_spill] sm:$0xff] }
 0x4a2   : > { %21170 = vmatmul.mubr.msk.f32.vlgmr.msra.gmra.mrb[0].mxu1 %vm749_vm1, %v34276_v17  ;;  %v30091_v17 = vpack.c.bf16 %v505_v29, %v504_v57  ;;  %v34285_v29 = vld [vmem:[#allocation197_spill] sm:$0xff]  ;;  %v34286_v57 = vld [vmem:[#allocation198_spill] sm:$0xff] }
 0x4a3   : > { %22482 = vmatmul.mubr.msk.f32.gmra.mrb[16].mxu0 %vm749_vm1, %v34277_v44  ;;  %21172 = vmatprep.mubr.msk.f32.mxu1 %vm749_vm1, %v34278_v38  ;;  %v34283_v44 = vld [vmem:[#allocation196_spill] sm:$0xff] }
 0x4a4   : > { %22484 = vmatprep.mubr.msk.f32.mxu0 %vm749_vm1, %v34279_v7  ;;  %23188 = vmatpush3.bf16.msra.mxu1 %v29922_v6  ;;  %v34284_v38 = vld [vmem:[#allocation96_spill] sm:$0xff]  ;;  %v34289_v6 = vld [vmem:[#allocation202_spill] sm:$0xff] }
 0x4a5   : > { %23190 = vmatprep.subr.bf16.mxu1 %v23189_v40 }
 0x4a6   : > { %21173 = vmatmul.mubr.msk.f32.gmra.mrb[2].mxu1 %vm749_vm1, %v34280_v2 }
 0x4a7   : > { %22485 = vmatmul.mubr.msk.f32.gmra.mrb[18].mxu0 %vm749_vm1, %v34281_v24  ;;  %21175 = vmatprep.mubr.msk.f32.mxu1 %vm749_vm1, %v34282_v15  ;;  %v34287_v15 = vld [vmem:[#allocation199_spill] sm:$0xff] }
 0x4a8   : > { %22487 = vmatprep.mubr.msk.f32.mxu0 %vm749_vm1, %v34283_v44  ;;  %23192 = vmatpush3.bf16.msra.mxu1 %v23189_v40  ;;  %v34288_v40 = vld [vmem:[#allocation201_spill] sm:$0xff] }
 0x4a9   : > { %23194 = vmatprep.subr.bf16.mxu1 %v30091_v17 }
 0x4aa   : > { %21176 = vmatmul.mubr.msk.f32.gmra.mrb[4].mxu1 %vm749_vm1, %v34284_v38  ;;  %v30131_v38 = vld [vmem:[%s25620_s27 + $0x1e8] sm:$0xff] }
 0x4ab   : > { %22488 = vmatmul.mubr.msk.f32.gmra.mrb[20].mxu0 %vm749_vm1, %v34285_v29  ;;  %21178 = vmatprep.mubr.msk.f32.mxu1 %vm749_vm1, %v34161_v14  ;;  %v34290_v14 = vld [vmem:[#allocation203_spill] sm:$0xff] }
 0x4ac   : > { %22490 = vmatprep.mubr.msk.f32.mxu0 %vm749_vm1, %v34286_v57 }
 0x4ae   : > { %21179 = vmatmul.mubr.msk.f32.gmra.mrb[6].mxu1 %vm749_vm1, %v34162_v1  ;;  %v30127_v1 = vld [vmem:[%s25620_s27 + $0x1e0] sm:$0xff] }
 0x4af   : > { %22491 = vmatmul.mubr.msk.f32.gmra.mrb[22].mxu0 %vm749_vm1, %v34287_v15  ;;  %21181 = vmatprep.mubr.msk.f32.mxu1 %vm749_vm1, %v34164_v63  ;;  %v12404_v2 = vrot.slane %v30127_v1, 6  ;;  %v12405_v63 = vrot.slane %v30131_v38, 6 }
 0x4b0   : > { %22493 = vmatprep.mubr.msk.f32.mxu0 %vm749_vm1, %v34288_v40  ;;  %v34294_v40 = vld [vmem:[#allocation188_spill] sm:$0xff] }
 0x4b2   : > { %21182 = vmatmul.mubr.msk.f32.gmra.mrb[8].mxu1 %vm749_vm1, %v34166_v53  ;;  %v34291_v53 = vld [vmem:[#allocation204_spill] sm:$0xff] }
 0x4b3   : > { %22494 = vmatmul.mubr.msk.f32.gmra.mrb[24].mxu0 %vm749_vm1, %v34289_v6  ;;  %21184 = vmatprep.mubr.msk.f32.mxu1 %vm749_vm1, %v34168_v3  ;;  %v34292_v3 = vld [vmem:[#allocation187_spill] sm:$0xff]  ;;  %v30144_v6 = vsel %vm2936_vm6, %v12404_v2, %v12405_v63  ;;  %v599_v2 = vld [vmem:[%s32669_s1 + $0x578] sm:$0xff] }
 0x4b4   : > { %22496 = vmatprep.mubr.msk.f32.mxu0 %vm749_vm1, %v34290_v14  ;;  %v12407_v14 = vrot.slane %v29251_v35, 6  ;;  %34293 = vst [vmem:[#allocation97_spill] sm:$0xff] %v30144_v6  ;;  %v598_v35 = vld [vmem:[%s32669_s1 + $0x570] sm:$0xff] }
 0x4b6   : > { %21185 = vmatmul.mubr.msk.f32.gmra.mrb[10].mxu1 %vm749_vm1, %v34170_v12  ;;  %v513_v12 = vld [vmem:[%s32669_s1 + $0x2c8] sm:$0xff] }
 0x4b7   : > { %22497 = vmatmul.mubr.msk.f32.gmra.mrb[26].mxu0 %vm749_vm1, %v34291_v53  ;;  %21187 = vmatprep.mubr.msk.f32.mxu1 %vm749_vm1, %v34172_v31  ;;  %v30155_v53 = vsel %vm2936_vm6, %v12405_v63, %v12407_v14  ;;  %v23381_v63 = vpack.c.bf16 %v599_v2, %v598_v35  ;;  %v34297_v14 = vld [vmem:[#allocation8_spill] sm:$0xff] }
 0x4b8   : > { %22499 = vmatprep.mubr.msk.f32.mxu0 %vm749_vm1, %v34292_v3  ;;  %34295 = vst [vmem:[#allocation98_spill] sm:$0xff] %v30155_v53  ;;  %v601_v3 = vld [vmem:[%s32669_s1 + $0x588] sm:$0xff]  ;;  %v34301_v2 = vld [vmem:[#allocation108_spill] sm:$0xff] }
 0x4ba   : > { %21188 = vmatmul.mubr.msk.f32.gmra.mrb[12].mxu1 %vm749_vm1, %v34174_v56  ;;  %v34344_v56 = vld [vmem:[#allocation211_spill] sm:$0xff] }
 0x4bb   : > { %22500 = vmatmul.mubr.msk.f32.gmra.mrb[28].mxu0 %vm749_vm1, %v34294_v40  ;;  %21190 = vmatprep.mubr.msk.f32.mxu1 %vm749_vm1, %v34175_v5  ;;  %v600_v40 = vld [vmem:[%s32669_s1 + $0x580] sm:$0xff] }
 0x4bc   : > { %22502 = vmatprep.mubr.msk.f32.mxu0 %vm749_vm1, %v30144_v6  ;;  %v34296_v6 = vld [vmem:[#allocation225_spill] sm:$0xff]  ;;  %v30186_v35 = vpack.c.bf16 %v601_v3, %v600_v40  ;;  %v34306_v3 = vld [vmem:[#allocation236_spill] sm:$0xff]  ;;  %v34329_v5 = vld [vmem:[#allocation42_spill] sm:$0xff] }
 0x4bd   : > { %v34307_v40 = vld [vmem:[#allocation112_spill] sm:$0xff] }
 0x4be   : > { %21191 = vmatmul.mubr.msk.f32.gmra.mrb[14].mxu1 %vm749_vm1, %v34176_v50  ;;  %v34298_v50 = vld [vmem:[#allocation228_spill] sm:$0xff] }
 0x4bf   : > { %22503 = vmatmul.mubr.msk.f32.gmra.mrb[30].mxu0 %vm749_vm1, %v30155_v53  ;;  %21193 = vmatprep.mubr.msk.f32.mxu1 %vm749_vm1, %v34177_v22  ;;  %v34299_v53 = vld [vmem:[#allocation107_spill] sm:$0xff]  ;;  %v34303_v22 = vld [vmem:[#allocation109_spill] sm:$0xff] }
 0x4c0   : > { %22513 = vmatprep.mubr.msk.f32.mxu0 %vm749_vm1, %v34296_v6  ;;  %v34300_v6 = vld [vmem:[#allocation229_spill] sm:$0xff] }
 0x4c2   : > { %21194 = vmatmul.mubr.msk.f32.gmra.mrb[16].mxu1 %vm749_vm1, %v34297_v14  ;;  %v34302_v14 = vld [vmem:[#allocation232_spill] sm:$0xff] }
 0x4c3   : > { %22514 = vmatmul.mubr.msk.f32.vlgmr.msra.gmra.mrb[0].mxu0 %vm749_vm1, %v34298_v50  ;;  %21196 = vmatprep.mubr.msk.f32.mxu1 %vm749_vm1, %v34299_v53  ;;  %v34304_v50 = vld [vmem:[#allocation233_spill] sm:$0xff] }
 0x4c4   : > { %23380 = vmatpush3.bf16.msra.mxu0 %v30011_v8  ;;  %22516 = vmatprep.mubr.msk.f32.mxu0 %vm749_vm1, %v34300_v6  ;;  %v34305_v8 = vld [vmem:[#allocation14_spill] sm:$0xff]  ;;  %v34328_v53 = vld [vmem:[#allocation157_spill] sm:$0xff] }
 0x4c5   : > { %23382 = vmatprep.subr.bf16.mxu0 %v23381_v63  ;;  %v34309_v6 = vld [vmem:[#allocation114_spill] sm:$0xff] }
 0x4c6   : > { %21197 = vmatmul.mubr.msk.f32.gmra.mrb[18].mxu1 %vm749_vm1, %v34301_v2  ;;  %v30305_v2 = vld [vmem:[%s25620_s27 + $0x180] sm:$0xff] }
 0x4c7   : > { %22517 = vmatmul.mubr.msk.f32.gmra.mrb[2].mxu0 %vm749_vm1, %v34302_v14  ;;  %21199 = vmatprep.mubr.msk.f32.mxu1 %vm749_vm1, %v34303_v22  ;;  %v34308_v14 = vld [vmem:[#allocation237_spill] sm:$0xff]  ;;  %v30298_v22 = vld [vmem:[%s25620_s27 + $0x170] sm:$0xff] }
 0x4c8   : > { %22519 = vmatprep.mubr.msk.f32.mxu0 %vm749_vm1, %v34304_v50  ;;  %23384 = vmatpush3.bf16.msra.mxu0 %v23381_v63  ;;  %v34310_v63 = vld [vmem:[#allocation239_spill] sm:$0xff]  ;;  %v34311_v50 = vld [vmem:[#allocation205_spill] sm:$0xff] }
 0x4c9   : > { %23386 = vmatprep.subr.bf16.mxu0 %v30186_v35 }
 0x4ca   : > { %21200 = vmatmul.mubr.msk.f32.gmra.mrb[20].mxu1 %vm749_vm1, %v34305_v8  ;;  %v34315_v8 = vld [vmem:[#allocation122_spill] sm:$0xff] }
 0x4cb   : > { %22520 = vmatmul.mubr.msk.f32.gmra.mrb[4].mxu0 %vm749_vm1, %v34306_v3  ;;  %21202 = vmatprep.mubr.msk.f32.mxu1 %vm749_vm1, %v34307_v40  ;;  %v34312_v3 = vld [vmem:[#allocation206_spill] sm:$0xff]  ;;  %v509_v40 = vld [vmem:[%s32669_s1 + $0x2a8] sm:$0xff] }
 0x4cc   : > { %22522 = vmatprep.mubr.msk.f32.mxu0 %vm749_vm1, %v34308_v14  ;;  %v30220_v14 = vld [vmem:[%s25620_s27 + $0x108] sm:$0xff] }
 0x4ce   : > { %21203 = vmatmul.mubr.msk.f32.gmra.mrb[22].mxu1 %vm749_vm1, %v34309_v6  ;;  %v508_v6 = vld [vmem:[%s32669_s1 + $0x2a0] sm:$0xff] }
 0x4cf   : > { %22523 = vmatmul.mubr.msk.f32.gmra.mrb[6].mxu0 %vm749_vm1, %v34310_v63  ;;  %21205 = vmatprep.mubr.msk.f32.mxu1 %vm749_vm1, %v34189_v36  ;;  %v30227_v63 = vld [vmem:[%s25620_s27 + $0x110] sm:$0xff] }
 0x4d0   : > { %22525 = vmatprep.mubr.msk.f32.mxu0 %vm749_vm1, %v34311_v50  ;;  %v30234_v50 = vld [vmem:[%s25620_s27 + $0x120] sm:$0xff]  ;;  %v34314_v36 = vld [vmem:[#allocation208_spill] sm:$0xff] }
 0x4d2   : > { %21206 = vmatmul.mubr.msk.f32.gmra.mrb[24].mxu1 %vm749_vm1, %v34191_v28  ;;  %v30268_v28 = vld [vmem:[%s25620_s27 + $0x150] sm:$0xff] }
 0x4d3   : > { %22526 = vmatmul.mubr.msk.f32.gmra.mrb[8].mxu0 %vm749_vm1, %v34312_v3  ;;  %21208 = vmatprep.mubr.msk.f32.mxu1 %vm749_vm1, %v34193_v58  ;;  %v30241_v3 = vld [vmem:[%s25620_s27 + $0x128] sm:$0xff]  ;;  %v30261_v58 = vld [vmem:[%s25620_s27 + $0x140] sm:$0xff] }
 0x4d4   : > { %22528 = vmatprep.mubr.msk.f32.mxu0 %vm749_vm1, %v30220_v14 }
 0x4d6   : > { %21209 = vmatmul.mubr.msk.f32.gmra.mrb[26].mxu1 %vm749_vm1, %v34195_v16  ;;  %v30248_v16 = vld [vmem:[%s25620_s27 + $0x138] sm:$0xff] }
 0x4d7   : > { %22529 = vmatmul.mubr.msk.f32.gmra.mrb[10].mxu0 %vm749_vm1, %v30227_v63  ;;  %21211 = vmatprep.mubr.msk.f32.mxu1 %vm749_vm1, %v34196_v30  ;;  %v507_v30 = vld [vmem:[%s32669_s1 + $0x298] sm:$0xff] }
 0x4d8   : > { %22531 = vmatprep.mubr.msk.f32.mxu0 %vm749_vm1, %v30234_v50 }
 0x4da   : > { %21212 = vmatmul.mubr.msk.f32.gmra.mrb[28].mxu1 %vm749_vm1, %v34197_v26  ;;  %v506_v26 = vld [vmem:[%s32669_s1 + $0x290] sm:$0xff] }
 0x4db   : > { %22532 = vmatmul.mubr.msk.f32.gmra.mrb[12].mxu0 %vm749_vm1, %v30241_v3  ;;  %21214 = vmatprep.mubr.msk.f32.mxu1 %vm749_vm1, %v34198_v45  ;;  %v34313_v45 = vld [vmem:[#allocation207_spill] sm:$0xff] }
 0x4dc   : > { %22534 = vmatprep.mubr.msk.f32.mxu0 %vm749_vm1, %v30248_v16 }
 0x4de   : > { %21215 = vmatmul.mubr.msk.f32.gmra.mrb[30].mxu1 %vm749_vm1, %v34199_v47  ;;  %v23197_v47 = vpack.c.bf16 %v507_v30, %v506_v26  ;;  %v30288_v30 = vld [vmem:[%s25620_s27 + $0x168] sm:$0xff] }
 0x4df   : > { %22535 = vmatmul.mubr.msk.f32.gmra.mrb[14].mxu0 %vm749_vm1, %v30261_v58  ;;  %21225 = vmatprep.mubr.msk.f32.mxu1 %vm749_vm1, %v34313_v45  ;;  %v30281_v45 = vld [vmem:[%s25620_s27 + $0x158] sm:$0xff]  ;;  %v34316_v26 = vld [vmem:[#allocation123_spill] sm:$0xff] }
 0x4e0   : > { %22537 = vmatprep.mubr.msk.f32.mxu0 %vm749_vm1, %v30268_v28 }
 0x4e2   : > { %21226 = vmatmul.mubr.msk.f32.vlgmr.msra.gmra.mrb[0].mxu1 %vm749_vm1, %v34314_v36  ;;  %v30293_v36 = vpack.c.bf16 %v509_v40, %v508_v6  ;;  %v30313_v40 = vld [vmem:[%s25620_s27 + $0x188] sm:$0xff]  ;;  %v30320_v6 = vld [vmem:[%s25620_s27 + $0x198] sm:$0xff] }
 0x4e3   : > { %22538 = vmatmul.mubr.msk.f32.gmra.mrb[16].mxu0 %vm749_vm1, %v30281_v45  ;;  %21228 = vmatprep.mubr.msk.f32.mxu1 %vm749_vm1, %v34315_v8  ;;  %v34317_v8 = vld [vmem:[#allocation124_spill] sm:$0xff] }
 0x4e4   : > { %22540 = vmatprep.mubr.msk.f32.mxu0 %vm749_vm1, %v30288_v30  ;;  %23196 = vmatpush3.bf16.msra.mxu1 %v30091_v17  ;;  %v34318_v17 = vld [vmem:[#allocation125_spill] sm:$0xff] }
 0x4e5   : > { %23198 = vmatprep.subr.bf16.mxu1 %v23197_v47 }
 0x4e6   : > { %21229 = vmatmul.mubr.msk.f32.gmra.mrb[2].mxu1 %vm749_vm1, %v34316_v26  ;;  %v30334_v26 = vld [vmem:[%s25620_s27 + $0x1b0] sm:$0xff] }
 0x4e7   : > { %22541 = vmatmul.mubr.msk.f32.gmra.mrb[18].mxu0 %vm749_vm1, %v30298_v22  ;;  %21231 = vmatprep.mubr.msk.f32.mxu1 %vm749_vm1, %v34317_v8  ;;  %v25372_v8 = vld [vmem:[%s25620_s27 + $0x1d0] sm:$0xff] }
 0x4e8   : > { %22543 = vmatprep.mubr.msk.f32.mxu0 %vm749_vm1, %v30305_v2  ;;  %23200 = vmatpush3.bf16.msra.mxu1 %v23197_v47  ;;  %v30327_v47 = vld [vmem:[%s25620_s27 + $0x1a0] sm:$0xff] }
 0x4e9   : > { %23202 = vmatprep.subr.bf16.mxu1 %v30293_v36 }
 0x4ea   : > { %21232 = vmatmul.mubr.msk.f32.gmra.mrb[4].mxu1 %vm749_vm1, %v34318_v17  ;;  %v30358_v17 = vld [vmem:[%s25620_s27 + $0x1f8] sm:$0xff] }
 0x4eb   : > { %22544 = vmatmul.mubr.msk.f32.gmra.mrb[20].mxu0 %vm749_vm1, %v30313_v40  ;;  %21234 = vmatprep.mubr.msk.f32.mxu1 %vm749_vm1, %v34206_v52  ;;  %v30341_v52 = vld [vmem:[%s25620_s27 + $0x1b8] sm:$0xff] }
 0x4ec   : > { %22546 = vmatprep.mubr.msk.f32.mxu0 %vm749_vm1, %v30320_v6 }
 0x4ee   : > { %21235 = vmatmul.mubr.msk.f32.gmra.mrb[6].mxu1 %vm749_vm1, %v34207_v41  ;;  %v25371_v41 = vld [vmem:[%s25620_s27 + $0x1c8] sm:$0xff] }
 0x4ef   : > { %22547 = vmatmul.mubr.msk.f32.gmra.mrb[22].mxu0 %vm749_vm1, %v30327_v47  ;;  %21237 = vmatprep.mubr.msk.f32.mxu1 %vm749_vm1, %v34208_v55  ;;  %v34324_v55 = vld [vmem:[#allocation153_spill] sm:$0xff] }
 0x4f0   : > { %22549 = vmatprep.mubr.msk.f32.mxu0 %vm749_vm1, %v30334_v26 }
 0x4f2   : > { %21238 = vmatmul.mubr.msk.f32.gmra.mrb[8].mxu1 %vm749_vm1, %v34209_v42  ;;  %v34323_v42 = vld [vmem:[#allocation36_spill] sm:$0xff] }
 0x4f3   : > { %22550 = vmatmul.mubr.msk.f32.gmra.mrb[24].mxu0 %vm749_vm1, %v30341_v52  ;;  %21240 = vmatprep.mubr.msk.f32.mxu1 %vm749_vm1, %v34210_v11  ;;  %v605_v11 = vld [vmem:[%s32669_s1 + $0x5a8] sm:$0xff] }
 0x4f4   : > { %22552 = vmatprep.mubr.msk.f32.mxu0 %vm749_vm1, %v25371_v41  ;;  %v30369_v41 = vld [vmem:[%s25620_s27 + $0x200] sm:$0xff] }
 0x4f6   : > { %21241 = vmatmul.mubr.msk.f32.gmra.mrb[10].mxu1 %vm749_vm1, %v34211_v43  ;;  %v34322_v43 = vld [vmem:[#allocation150_spill] sm:$0xff] }
 0x4f7   : > { %22553 = vmatmul.mubr.msk.f32.gmra.mrb[26].mxu0 %vm749_vm1, %v25372_v8  ;;  %21243 = vmatprep.mubr.msk.f32.mxu1 %vm749_vm1, %v34212_v62  ;;  %v34319_v8 = vld [vmem:[#allocation144_spill] sm:$0xff] }
 0x4f8   : > { %22555 = vmatprep.mubr.msk.f32.mxu0 %vm749_vm1, %v30127_v1  ;;  %v602_v1 = vld [vmem:[%s32669_s1 + $0x590] sm:$0xff] }
 0x4fa   : > { %21244 = vmatmul.mubr.msk.f32.gmra.mrb[12].mxu1 %vm749_vm1, %v34214_v60  ;;  %v603_v60 = vld [vmem:[%s32669_s1 + $0x598] sm:$0xff] }
 0x4fb   : > { %22556 = vmatmul.mubr.msk.f32.gmra.mrb[28].mxu0 %vm749_vm1, %v30131_v38  ;;  %21246 = vmatprep.mubr.msk.f32.mxu1 %vm749_vm1, %v34216_v10  ;;  %v34320_v38 = vld [vmem:[#allocation148_spill] sm:$0xff]  ;;  %v34321_v10 = vld [vmem:[#allocation34_spill] sm:$0xff]  ;;  %v23389_v62 = vpack.c.bf16 %v603_v60, %v602_v1 }
 0x4fc   : > { %22558 = vmatprep.mubr.msk.f32.mxu0 %vm749_vm1, %v30358_v17  ;;  %v34325_v60 = vld [vmem:[#allocation38_spill] sm:$0xff] }
 0x4fe   : > { %21247 = vmatmul.mubr.msk.f32.gmra.mrb[14].mxu1 %vm749_vm1, %v34319_v8  ;;  %v604_v8 = vld [vmem:[%s32669_s1 + $0x5a0] sm:$0xff] }
 0x4ff   : > { %22559 = vmatmul.mubr.msk.f32.gmra.mrb[30].mxu0 %vm749_vm1, %v30369_v41  ;;  %21249 = vmatprep.mubr.msk.f32.mxu1 %vm749_vm1, %v34320_v38  ;;  %v30400_v1 = vpack.c.bf16 %v605_v11, %v604_v8  ;;  %v34327_v38 = vld [vmem:[#allocation40_spill] sm:$0xff]  ;;  %v34332_v8 = vld [vmem:[#allocation161_spill] sm:$0xff] }
 0x500   : > { %22569 = vmatprep.mubr.msk.f32.mxu0 %vm749_vm1, %v34321_v10  ;;  %v34331_v11 = vld [vmem:[#allocation44_spill] sm:$0xff] }
 0x502   : > { %21250 = vmatmul.mubr.msk.f32.gmra.mrb[16].mxu1 %vm749_vm1, %v34322_v43  ;;  %v34326_v43 = vld [vmem:[#allocation154_spill] sm:$0xff] }
 0x503   : > { %22570 = vmatmul.mubr.msk.f32.vlgmr.msra.gmra.mrb[0].mxu0 %vm749_vm1, %v34323_v42  ;;  %21252 = vmatprep.mubr.msk.f32.mxu1 %vm749_vm1, %v34324_v55  ;;  %v34334_v55 = vld [vmem:[#allocation163_spill] sm:$0xff] }
 0x504   : > { %23388 = vmatpush3.bf16.msra.mxu0 %v30186_v35  ;;  %22572 = vmatprep.mubr.msk.f32.mxu0 %vm749_vm1, %v34325_v60  ;;  %v34330_v35 = vld [vmem:[#allocation159_spill] sm:$0xff] }
 0x505   : > { %23390 = vmatprep.subr.bf16.mxu0 %v23389_v62 }
 0x506   : > { %21253 = vmatmul.mubr.msk.f32.gmra.mrb[18].mxu1 %vm749_vm1, %v34326_v43  ;;  %v34333_v43 = vld [vmem:[#allocation46_spill] sm:$0xff] }
 0x507   : > { %22573 = vmatmul.mubr.msk.f32.gmra.mrb[2].mxu0 %vm749_vm1, %v34327_v38  ;;  %21255 = vmatprep.mubr.msk.f32.mxu1 %vm749_vm1, %v34328_v53  ;;  %v34335_v53 = vld [vmem:[#allocation48_spill] sm:$0xff] }
 0x508   : > { %22575 = vmatprep.mubr.msk.f32.mxu0 %vm749_vm1, %v34329_v5  ;;  %23392 = vmatpush3.bf16.msra.mxu0 %v23389_v62  ;;  %v34336_v62 = vld [vmem:[#allocation50_spill] sm:$0xff] }
 0x509   : > { %23394 = vmatprep.subr.bf16.mxu0 %v30400_v1 }
 0x50a   : > { %21256 = vmatmul.mubr.msk.f32.gmra.mrb[20].mxu1 %vm749_vm1, %v34330_v35  ;;  %v34337_v35 = vld [vmem:[#allocation52_spill] sm:$0xff] }
 0x50b   : > { %22576 = vmatmul.mubr.msk.f32.gmra.mrb[4].mxu0 %vm749_vm1, %v34331_v11  ;;  %21258 = vmatprep.mubr.msk.f32.mxu1 %vm749_vm1, %v34332_v8  ;;  %v34338_v8 = vld [vmem:[#allocation54_spill] sm:$0xff] }
 0x50c   : > { %22578 = vmatprep.mubr.msk.f32.mxu0 %vm749_vm1, %v34333_v43 }
 0x50e   : > { %21259 = vmatmul.mubr.msk.f32.gmra.mrb[22].mxu1 %vm749_vm1, %v34334_v55  ;;  %v34339_v55 = vld [vmem:[#allocation56_spill] sm:$0xff] }
 0x50f   : > { %22579 = vmatmul.mubr.msk.f32.gmra.mrb[6].mxu0 %vm749_vm1, %v34335_v53  ;;  %21261 = vmatprep.mubr.msk.f32.mxu1 %vm749_vm1, %v34236_v46  ;;  %v34340_v46 = vld [vmem:[#allocation58_spill] sm:$0xff] }
 0x510   : > { %22581 = vmatprep.mubr.msk.f32.mxu0 %vm749_vm1, %v34336_v62 }
 0x512   : > { %21262 = vmatmul.mubr.msk.f32.gmra.mrb[24].mxu1 %vm749_vm1, %v34238_v59  ;;  %v34341_v59 = vld [vmem:[#allocation60_spill] sm:$0xff] }
 0x513   : > { %22582 = vmatmul.mubr.msk.f32.gmra.mrb[8].mxu0 %vm749_vm1, %v34337_v35  ;;  %21264 = vmatprep.mubr.msk.f32.mxu1 %vm749_vm1, %v34240_v48  ;;  %v34342_v48 = vld [vmem:[#allocation62_spill] sm:$0xff] }
 0x514   : > { %22584 = vmatprep.mubr.msk.f32.mxu0 %vm749_vm1, %v34338_v8 }
 0x516   : > { %21265 = vmatmul.mubr.msk.f32.gmra.mrb[26].mxu1 %vm749_vm1, %v34242_v23  ;;  %v34343_v23 = vld [vmem:[#allocation64_spill] sm:$0xff] }
 0x517   : > { %22585 = vmatmul.mubr.msk.f32.gmra.mrb[10].mxu0 %vm749_vm1, %v34339_v55  ;;  %21267 = vmatprep.mubr.msk.f32.mxu1 %vm749_vm1, %v34243_v33  ;;  %v510_v33 = vld [vmem:[%s32669_s1 + $0x2b0] sm:$0xff] }
 0x518   : > { %22587 = vmatprep.mubr.msk.f32.mxu0 %vm749_vm1, %v34340_v46 }
 0x51a   : > { %21268 = vmatmul.mubr.msk.f32.gmra.mrb[28].mxu1 %vm749_vm1, %v34244_v25  ;;  %v511_v25 = vld [vmem:[%s32669_s1 + $0x2b8] sm:$0xff] }
 0x51b   : > { %22588 = vmatmul.mubr.msk.f32.gmra.mrb[12].mxu0 %vm749_vm1, %v34341_v59  ;;  %21270 = vmatprep.mubr.msk.f32.mxu1 %vm749_vm1, %v34245_v37  ;;  %v34345_v37 = vld [vmem:[#allocation66_spill] sm:$0xff]  ;;  %v23205_v31 = vpack.c.bf16 %v511_v25, %v510_v33  ;;  %v34347_v59 = vld [vmem:[#allocation68_spill] sm:$0xff]  ;;  %v34350_v33 = vld [vmem:[#allocation175_spill] sm:$0xff] }
 0x51c   : > { %22590 = vmatprep.mubr.msk.f32.mxu0 %vm749_vm1, %v34342_v48  ;;  %v34346_v48 = vld [vmem:[#allocation212_spill] sm:$0xff] }
 0x51d   : > { %v34351_v25 = vld [vmem:[#allocation72_spill] sm:$0xff] }
 0x51e   : > { %21271 = vmatmul.mubr.msk.f32.gmra.mrb[30].mxu1 %vm749_vm1, %v34246_v39  ;;  %v512_v39 = vld [vmem:[%s32669_s1 + $0x2c0] sm:$0xff] }
 0x51f   : > { %22591 = vmatmul.mubr.msk.f32.gmra.mrb[14].mxu0 %vm749_vm1, %v34343_v23  ;;  %21281 = vmatprep.mubr.msk.f32.mxu1 %vm749_vm1, %v34344_v56  ;;  %v34348_v23 = vld [vmem:[#allocation174_spill] sm:$0xff] }
 0x520   : > { %22593 = vmatprep.mubr.msk.f32.mxu0 %vm749_vm1, %v34345_v37  ;;  %v34349_v56 = vld [vmem:[#allocation70_spill] sm:$0xff]  ;;  %v34352_v37 = vld [vmem:[#allocation176_spill] sm:$0xff] }
 0x522   : > { %21282 = vmatmul.mubr.msk.f32.vlgmr.msra.gmra.mrb[0].mxu1 %vm749_vm1, %v34346_v48  ;;  %v30480_v48 = vpack.c.bf16 %v513_v12, %v512_v39  ;;  %v34355_v39 = vld [vmem:[#allocation214_spill] sm:$0xff]  ;;  %v34356_v12 = vld [vmem:[#allocation200_spill] sm:$0xff] }
 0x523   : > { %22594 = vmatmul.mubr.msk.f32.gmra.mrb[16].mxu0 %vm749_vm1, %v34347_v59  ;;  %21284 = vmatprep.mubr.msk.f32.mxu1 %vm749_vm1, %v34348_v23  ;;  %v34353_v59 = vld [vmem:[#allocation213_spill] sm:$0xff] }
 0x524   : > { %22596 = vmatprep.mubr.msk.f32.mxu0 %vm749_vm1, %v34349_v56  ;;  %23204 = vmatpush3.bf16.msra.mxu1 %v30293_v36  ;;  %v34354_v23 = vld [vmem:[#allocation177_spill] sm:$0xff] }
 0x525   : > { %23206 = vmatprep.subr.bf16.mxu1 %v23205_v31  ;;  %v34359_v36 = vld [vmem:[#allocation217_spill] sm:$0xff] }
 0x526   : > { %21285 = vmatmul.mubr.msk.f32.gmra.mrb[2].mxu1 %vm749_vm1, %v34350_v33  ;;  %v12935_v33 = vrot.slane %v30369_v41, 1 }
 0x527   : > { %22597 = vmatmul.mubr.msk.f32.gmra.mrb[18].mxu0 %vm749_vm1, %v34351_v25  ;;  %21287 = vmatprep.mubr.msk.f32.mxu1 %vm749_vm1, %v34352_v37  ;;  %v34357_v37 = vld [vmem:[#allocation215_spill] sm:$0xff] }
 0x528   : > { %22599 = vmatprep.mubr.msk.f32.mxu0 %vm749_vm1, %v34353_v59  ;;  %23208 = vmatpush3.bf16.msra.mxu1 %v23205_v31  ;;  %v34358_v31 = vld [vmem:[#allocation216_spill] sm:$0xff] }
 0x529   : > { %23210 = vmatprep.subr.bf16.mxu1 %v30480_v48 }
 0x52a   : > { %21288 = vmatmul.mubr.msk.f32.gmra.mrb[4].mxu1 %vm749_vm1, %v34354_v23  ;;  %v30518_v23 = vld [vmem:[%s25620_s27 + $0x208] sm:$0x3f] }
 0x52b   : > { %22600 = vmatmul.mubr.msk.f32.gmra.mrb[20].mxu0 %vm749_vm1, %v34355_v39  ;;  %21290 = vmatprep.mubr.msk.f32.mxu1 %vm749_vm1, %v34253_v18  ;;  %v34360_v18 = vld [vmem:[#allocation218_spill] sm:$0xff] }
 0x52c   : > { %22602 = vmatprep.mubr.msk.f32.mxu0 %vm749_vm1, %v34356_v12 }
 0x52e   : > { %21291 = vmatmul.mubr.msk.f32.gmra.mrb[6].mxu1 %vm749_vm1, %v34254_v21  ;;  %v12934_v21 = vrot.slane %v30358_v17, 1 }
 0x52f   : > { %22603 = vmatmul.mubr.msk.f32.gmra.mrb[22].mxu0 %vm749_vm1, %v34357_v37  ;;  %21293 = vmatprep.mubr.msk.f32.mxu1 %vm749_vm1, %v34255_v32  ;;  %v34361_v32 = vld [vmem:[#allocation219_spill] sm:$0xff] }
 0x530   : > { %22605 = vmatprep.mubr.msk.f32.mxu0 %vm749_vm1, %v34358_v31 }
 0x532   : > { %21294 = vmatmul.mubr.msk.f32.gmra.mrb[8].mxu1 %vm749_vm1, %v34257_v27  ;;  %v34362_v27 = vld [vmem:[#allocation221_spill] sm:$0xff] }
 0x533   : > { %22606 = vmatmul.mubr.msk.f32.gmra.mrb[24].mxu0 %vm749_vm1, %v34359_v36  ;;  %21296 = vmatprep.mubr.msk.f32.mxu1 %vm749_vm1, %v34259_v54  ;;  %v12936_v54 = vsel %vm668_vm0, %v12934_v21, %v12935_v33  ;;  %v34363_v36 = vld [vmem:[#allocation224_spill] sm:$0xff]  ;;  %v607_v21 = vld [vmem:[%s32669_s1 + $0x5b8] sm:$0xff] }
 0x534   : > { %22608 = vmatprep.mubr.msk.f32.mxu0 %vm749_vm1, %v34360_v18  ;;  %v12937_v18 = vrot.slane %v30518_v23, 1 }
 0x536   : > { %21297 = vmatmul.mubr.msk.f32.gmra.mrb[10].mxu1 %vm749_vm1, %v34261_v0  ;;  %v34397_v0 = vld [vmem:[#allocation234_spill] sm:$0xff] }
 0x537   : > { %22609 = vmatmul.mubr.msk.f32.gmra.mrb[26].mxu0 %vm749_vm1, %v34361_v32  ;;  %21299 = vmatprep.mubr.msk.f32.mxu1 %vm749_vm1, %v34263_v13  ;;  %v12938_v32 = vsel %vm668_vm0, %v12935_v33, %v12937_v18  ;;  %v608_v33 = vld [vmem:[%s32669_s1 + $0x5c0] sm:$0xff]  ;;  %v609_v18 = vld [vmem:[%s32669_s1 + $0x5c8] sm:$0xff] }
 0x538   : > { %22611 = vmatprep.mubr.msk.f32.mxu0 %vm749_vm1, %v34362_v27  ;;  %v606_v27 = vld [vmem:[%s32669_s1 + $0x5b0] sm:$0xff]  ;;  %v25384_v13 = vld [vmem:[%s25620_s27 + $0xc8] sm:$0xff] }
 0x53a   : > { %21300 = vmatmul.mubr.msk.f32.gmra.mrb[12].mxu1 %vm749_vm1, %v34265_v19  ;;  %v13200_v19 = vrot.slane %v30358_v17, 2 }
 0x53b   : > { %22612 = vmatmul.mubr.msk.f32.gmra.mrb[28].mxu0 %vm749_vm1, %v34363_v36  ;;  %21302 = vmatprep.mubr.msk.f32.mxu1 %vm749_vm1, %v34266_v51  ;;  %v34364_v36 = vld [vmem:[#allocation22_spill] sm:$0xff] }
 0x53c   : > { %22614 = vmatprep.mubr.msk.f32.mxu0 %vm749_vm1, %v12936_v54  ;;  %v23397_v54 = vpack.c.bf16 %v607_v21, %v606_v27  ;;  %v30566_v27 = vpack.c.bf16 %v609_v18, %v608_v33  ;;  %v34367_v21 = vld [vmem:[#allocation28_spill] sm:$0xff]  ;;  %v34371_v33 = vld [vmem:[#allocation191_spill] sm:$0xff]  ;;  %v25383_v51 = vld [vmem:[%s25620_s27 + $0xc0] sm:$0xff] }
 0x53d   : > { %v34372_v18 = vld [vmem:[#allocation35_spill] sm:$0xff] }
 0x53e   : > { %21303 = vmatmul.mubr.msk.f32.gmra.mrb[14].mxu1 %vm749_vm1, %v34267_v34  ;;  %v34365_v34 = vld [vmem:[#allocation24_spill] sm:$0xff] }
 0x53f   : > { %22615 = vmatmul.mubr.msk.f32.gmra.mrb[30].mxu0 %vm749_vm1, %v12938_v32  ;;  %21305 = vmatprep.mubr.msk.f32.mxu1 %vm749_vm1, %v34268_v49  ;;  %v34366_v32 = vld [vmem:[#allocation26_spill] sm:$0xff]  ;;  %v25382_v49 = vld [vmem:[%s25620_s27 + $0xb0] sm:$0xff] }
 0x540   : > { %22625 = vmatprep.mubr.msk.f32.mxu0 %vm749_vm1, %v34364_v36  ;;  %v34370_v36 = vld [vmem:[#allocation33_spill] sm:$0xff] }
 0x542   : > { %21306 = vmatmul.mubr.msk.f32.gmra.mrb[16].mxu1 %vm749_vm1, %v34269_v4  ;;  %v25381_v4 = vld [vmem:[%s25620_s27 + $0xa8] sm:$0xff] }
 0x543   : > { %22626 = vmatmul.mubr.msk.f32.vlgmr.msra.gmra.mrb[0].mxu0 %vm749_vm1, %v34365_v34  ;;  %21308 = vmatprep.mubr.msk.f32.mxu1 %vm749_vm1, %v34270_v9  ;;  %v34368_v34 = vld [vmem:[#allocation31_spill] sm:$0xff] }
 0x544   : > { %23396 = vmatpush3.bf16.msra.mxu0 %v30400_v1  ;;  %22628 = vmatprep.mubr.msk.f32.mxu0 %vm749_vm1, %v34366_v32  ;;  %v34369_v1 = vld [vmem:[#allocation189_spill] sm:$0xff]  ;;  %v34392_v9 = vld [vmem:[#allocation223_spill] sm:$0xff] }
 0x545   : > { %23398 = vmatprep.subr.bf16.mxu0 %v23397_v54  ;;  %v34373_v32 = vld [vmem:[#allocation193_spill] sm:$0xff] }
 0x546   : > { %21309 = vmatmul.mubr.msk.f32.gmra.mrb[18].mxu1 %vm749_vm1, %v34271_v61  ;;  %v34391_v61 = vld [vmem:[#allocation222_spill] sm:$0xff] }
 0x547   : > { %22629 = vmatmul.mubr.msk.f32.gmra.mrb[2].mxu0 %vm749_vm1, %v34367_v21  ;;  %21311 = vmatprep.mubr.msk.f32.mxu1 %vm749_vm1, %v34272_v20  ;;  %v34374_v21 = vld [vmem:[#allocation37_spill] sm:$0xff] }
 0x548   : > { %22631 = vmatprep.mubr.msk.f32.mxu0 %vm749_vm1, %v34368_v34  ;;  %23400 = vmatpush3.bf16.msra.mxu0 %v23397_v54  ;;  %v34375_v54 = vld [vmem:[#allocation39_spill] sm:$0xff]  ;;  %v34376_v34 = vld [vmem:[#allocation41_spill] sm:$0xff] }
 0x549   : > { %23402 = vmatprep.subr.bf16.mxu0 %v30566_v27  ;;  %v34387_v20 = vld [vmem:[#allocation145_spill] sm:$0xff] }
 0x54a   : > { %21312 = vmatmul.mubr.msk.f32.gmra.mrb[20].mxu1 %vm749_vm1, %v34369_v1  ;;  %v25375_v1 = vld [vmem:[%s25620_s27 + $0x60] sm:$0xff] }
 0x54b   : > { %22632 = vmatmul.mubr.msk.f32.gmra.mrb[4].mxu0 %vm749_vm1, %v34370_v36  ;;  %21314 = vmatprep.mubr.msk.f32.mxu1 %vm749_vm1, %v34371_v33  ;;  %v34377_v36 = vld [vmem:[#allocation128_spill] sm:$0xff]  ;;  %v34386_v33 = vld [vmem:[#allocation143_spill] sm:$0xff] }
 0x54c   : > { %22634 = vmatprep.mubr.msk.f32.mxu0 %vm749_vm1, %v34372_v18  ;;  %v34378_v18 = vld [vmem:[#allocation130_spill] sm:$0xff] }
 0x54e   : > { %21315 = vmatmul.mubr.msk.f32.gmra.mrb[22].mxu1 %vm749_vm1, %v34373_v32  ;;  %v25374_v32 = vld [vmem:[%s25620_s27 + $0x50] sm:$0xff] }
 0x54f   : > { %22635 = vmatmul.mubr.msk.f32.gmra.mrb[6].mxu0 %vm749_vm1, %v34374_v21  ;;  %21317 = vmatprep.mubr.msk.f32.mxu1 %vm749_vm1, %v34279_v7  ;;  %v34379_v21 = vld [vmem:[#allocation132_spill] sm:$0xff] }
 0x550   : > { %22637 = vmatprep.mubr.msk.f32.mxu0 %vm749_vm1, %v34375_v54  ;;  %v34380_v54 = vld [vmem:[#allocation134_spill] sm:$0xff]  ;;  %v34385_v7 = vld [vmem:[#allocation140_spill] sm:$0xff] }
 0x552   : > { %21318 = vmatmul.mubr.msk.f32.gmra.mrb[24].mxu1 %vm749_vm1, %v34281_v24  ;;  %v34384_v24 = vld [vmem:[#allocation138_spill] sm:$0xff] }
 0x553   : > { %22638 = vmatmul.mubr.msk.f32.gmra.mrb[8].mxu0 %vm749_vm1, %v34376_v34  ;;  %21320 = vmatprep.mubr.msk.f32.mxu1 %vm749_vm1, %v34283_v44  ;;  %v34381_v34 = vld [vmem:[#allocation201_spill] sm:$0xff]  ;;  %v34383_v44 = vld [vmem:[#allocation202_spill] sm:$0xff] }
 0x554   : > { %22640 = vmatprep.mubr.msk.f32.mxu0 %vm749_vm1, %v34377_v36 }
 0x556   : > { %21321 = vmatmul.mubr.msk.f32.gmra.mrb[26].mxu1 %vm749_vm1, %v34285_v29  ;;  %v34382_v29 = vld [vmem:[#allocation136_spill] sm:$0xff] }
 0x557   : > { %22641 = vmatmul.mubr.msk.f32.gmra.mrb[10].mxu0 %vm749_vm1, %v34378_v18  ;;  %21323 = vmatprep.mubr.msk.f32.mxu1 %vm749_vm1, %v34286_v57  ;;  %v514_v57 = vld [vmem:[%s32669_s1 + $0x2d0] sm:$0xff] }
 0x558   : > { %22643 = vmatprep.mubr.msk.f32.mxu0 %vm749_vm1, %v34379_v21 }
 0x55a   : > { %21324 = vmatmul.mubr.msk.f32.gmra.mrb[28].mxu1 %vm749_vm1, %v34287_v15  ;;  %v515_v15 = vld [vmem:[%s32669_s1 + $0x2d8] sm:$0xff] }
 0x55b   : > { %22644 = vmatmul.mubr.msk.f32.gmra.mrb[12].mxu0 %vm749_vm1, %v34380_v54  ;;  %21326 = vmatprep.mubr.msk.f32.mxu1 %vm749_vm1, %v34381_v34  ;;  %v25373_v34 = vld [vmem:[%s25620_s27 + $0x48] sm:$0xff] }
 0x55c   : > { %22646 = vmatprep.mubr.msk.f32.mxu0 %vm749_vm1, %v34382_v29 }
 0x55e   : > { %21327 = vmatmul.mubr.msk.f32.gmra.mrb[30].mxu1 %vm749_vm1, %v34383_v44  ;;  %v23213_v44 = vpack.c.bf16 %v515_v15, %v514_v57  ;;  %v34388_v57 = vld [vmem:[#allocation149_spill] sm:$0xff] }
 0x55f   : > { %22647 = vmatmul.mubr.msk.f32.gmra.mrb[14].mxu0 %vm749_vm1, %v34384_v24  ;;  %21337 = vmatprep.mubr.msk.f32.mxu1 %vm749_vm1, %v25373_v34  ;;  %v25376_v34 = vld [vmem:[%s25620_s27 + $0x68] sm:$0xff]  ;;  %v25377_v15 = vld [vmem:[%s25620_s27 + $0x78] sm:$0xff] }
 0x560   : > { %22649 = vmatprep.mubr.msk.f32.mxu0 %vm749_vm1, %v34385_v7 }
 0x562   : > { %21338 = vmatmul.mubr.msk.f32.vlgmr.msra.gmra.mrb[0].mxu1 %vm749_vm1, %v25374_v32  ;;  %v34389_v32 = vld [vmem:[#allocation220_spill] sm:$0xff] }
 0x563   : > { %22650 = vmatmul.mubr.msk.f32.gmra.mrb[16].mxu0 %vm749_vm1, %v34386_v33  ;;  %21340 = vmatprep.mubr.msk.f32.mxu1 %vm749_vm1, %v25375_v1  ;;  %v34390_v1 = vld [vmem:[#allocation6_spill] sm:$0xff] }
 0x564   : > { %22652 = vmatprep.mubr.msk.f32.mxu0 %vm749_vm1, %v34387_v20  ;;  %23212 = vmatpush3.bf16.msra.mxu1 %v30480_v48  ;;  %v25378_v48 = vld [vmem:[%s25620_s27 + $0x80] sm:$0xff] }
 0x565   : > { %23214 = vmatprep.subr.bf16.mxu1 %v23213_v44 }
 0x566   : > { %21341 = vmatmul.mubr.msk.f32.gmra.mrb[2].mxu1 %vm749_vm1, %v25376_v34  ;;  %v25379_v34 = vld [vmem:[%s25620_s27 + $0x90] sm:$0xff] }
 0x567   : > { %22653 = vmatmul.mubr.msk.f32.gmra.mrb[18].mxu0 %vm749_vm1, %v34388_v57  ;;  %21343 = vmatprep.mubr.msk.f32.mxu1 %vm749_vm1, %v25377_v15  ;;  %v25380_v15 = vld [vmem:[%s25620_s27 + $0x98] sm:$0xff] }
 0x568   : > { %22655 = vmatprep.mubr.msk.f32.mxu0 %vm749_vm1, %v34389_v32  ;;  %23216 = vmatpush3.bf16.msra.mxu1 %v23213_v44  ;;  %v34393_v44 = vld [vmem:[#allocation226_spill] sm:$0xff] }
 0x569   : > { %23465 = vmatprep.subr.bf16.mxu1 %v34390_v1 }
 0x56a   : > { %21344 = vmatmul.mubr.msk.f32.gmra.mrb[4].mxu1 %vm749_vm1, %v25378_v48  ;;  %v34394_v48 = vld [vmem:[#allocation227_spill] sm:$0xff] }
 0x56b   : > { %22656 = vmatmul.mubr.msk.f32.gmra.mrb[20].mxu0 %vm749_vm1, %v34391_v61  ;;  %21346 = vmatprep.mubr.msk.f32.mxu1 %vm749_vm1, %v25379_v34  ;;  %v34395_v34 = vld [vmem:[#allocation230_spill] sm:$0xff] }
 0x56c   : > { %22658 = vmatprep.mubr.msk.f32.mxu0 %vm749_vm1, %v34392_v9 }
 0x56e   : > { %21347 = vmatmul.mubr.msk.f32.gmra.mrb[6].mxu1 %vm749_vm1, %v25380_v15  ;;  %v34396_v15 = vld [vmem:[#allocation231_spill] sm:$0xff] }
 0x56f   : > { %22659 = vmatmul.mubr.msk.f32.gmra.mrb[22].mxu0 %vm749_vm1, %v34393_v44  ;;  %21349 = vmatprep.mubr.msk.f32.mxu1 %vm749_vm1, %v25381_v4  ;;  %v13201_v4 = vrot.slane %v30369_v41, 2  ;;  %v34399_v44 = vld [vmem:[#allocation238_spill] sm:$0xff] }
 0x570   : > { %22661 = vmatprep.mubr.msk.f32.mxu0 %vm749_vm1, %v34394_v48  ;;  %v25386_v48 = vld [vmem:[%s25620_s27 + $0xe0] sm:$0xff] }
 0x572   : > { %21350 = vmatmul.mubr.msk.f32.gmra.mrb[8].mxu1 %vm749_vm1, %v25382_v49  ;;  %v25385_v49 = vld [vmem:[%s25620_s27 + $0xd8] sm:$0xff] }
 0x573   : > { %22662 = vmatmul.mubr.msk.f32.gmra.mrb[24].mxu0 %vm749_vm1, %v34395_v34  ;;  %21352 = vmatprep.mubr.msk.f32.mxu1 %vm749_vm1, %v25383_v51  ;;  %v34398_v34 = vld [vmem:[#allocation235_spill] sm:$0xff]  ;;  %v13203_v51 = vrot.slane %v30518_v23, 2 }
 0x574   : > { %22664 = vmatprep.mubr.msk.f32.mxu0 %vm749_vm1, %v34396_v15  ;;  %v13202_v15 = vsel %vm1328_vm2, %v13200_v19, %v13201_v4  ;;  %v610_v19 = vld [vmem:[%s32669_s1 + $0x5d0] sm:$0xff] }
 0x576   : > { %21353 = vmatmul.mubr.msk.f32.gmra.mrb[10].mxu1 %vm749_vm1, %v25384_v13  ;;  %v25387_v13 = vld [vmem:[%s25620_s27 + $0xf0] sm:$0xff] }
 0x577   : > { %22665 = vmatmul.mubr.msk.f32.gmra.mrb[26].mxu0 %vm749_vm1, %v34397_v0  ;;  %21355 = vmatprep.mubr.msk.f32.mxu1 %vm749_vm1, %v25385_v49  ;;  %v13204_v0 = vsel %vm1328_vm2, %v13201_v4, %v13203_v51  ;;  %v25388_v49 = vld [vmem:[%s25620_s27 + $0xf8] sm:$0xff]  ;;  %v612_v4 = vld [vmem:[%s32669_s1 + $0x5e0] sm:$0xff]  ;;  %v613_v51 = vld [vmem:[%s32669_s1 + $0x5e8] sm:$0xff]  ;;  %s32460_s27 = scalar_lea.vmem [#allocation2], %s16691_s12 }
 0x578   : > { %22667 = vmatprep.mubr.msk.f32.mxu0 %vm749_vm1, %v34398_v34  ;;  %s16625_s22 = sshll.u32 %s32460_s27, 4  ;;  %s32618_s22 = int_to_ptr.vmem [resolvable:$true] %s16625_s22 }
 0x579   : > { %s25390_s26 = scalar_lea.vmem %s32618_s22, 4096  ;;  %p25397_p0 = scmp.lt.s32.totalorder %s32618_s22, %s25395_s29 }
 0x57a   : > { %21356 = vmatmul.mubr.msk.f32.gmra.mrb[12].mxu1 %vm749_vm1, %v25386_v48  ;;  %v611_v48 = vld [vmem:[%s32669_s1 + $0x5d8] sm:$0xff]  ;;  %p25391_p11 = scmp.ne.s32.totalorder %s32618_s22, %s25390_s26  ;;  %p25398_p1 = scmp.lt.s32.totalorder %s25396_s11, %s25390_s26 }
 0x57b   : > { %22668 = vmatmul.mubr.msk.f32.gmra.mrb[28].mxu0 %vm749_vm1, %v34399_v44  ;;  %21358 = vmatprep.mubr.msk.f32.mxu1 %vm749_vm1, %v25387_v13  ;;  %v34400_v44 = vld [vmem:[#allocation55_spill] sm:$0xff]  ;;  %v23405_v34 = vpack.c.bf16 %v611_v48, %v610_v19  ;;  %v34403_v13 = vld [vmem:[#allocation61_spill] sm:$0xff]  ;;  %v34421_v48 = vld [vmem:[#allocation82_spill] sm:$0xff] }
 0x57c   : > { %22670 = vmatprep.mubr.msk.f32.mxu0 %vm749_vm1, %v13202_v15  ;;  %v34401_v15 = vld [vmem:[#allocation57_spill] sm:$0xff]  ;;  %p25392_p12 = pnand %p25391_p11, %p25551_p5  ;;  %p25399_p2 = por %p25398_p1, %p25397_p0 }
 0x57d   : > { %v34419_v19 = vld [vmem:[#allocation81_spill] sm:$0xff] }
 0x57e   : > { %21359 = vmatmul.mubr.msk.f32.gmra.mrb[14].mxu1 %vm749_vm1, %v25388_v49  ;;  %v34417_v49 = vld [vmem:[#allocation80_spill] sm:$0xff]  ;;  %p25393_p13 = pneg %p25392_p12 }
 0x57f   : > { %22671 = vmatmul.mubr.msk.f32.gmra.mrb[30].mxu0 %vm749_vm1, %v13204_v0  ;;  %21361 = vmatprep.mubr.msk.f32.mxu1 %vm749_vm1, %v30220_v14  ;;  %v34402_v14 = vld [vmem:[#allocation59_spill] sm:$0xff] }
 0x580   : > { %22681 = vmatprep.mubr.msk.f32.mxu0 %vm749_vm1, %v34400_v44  ;;  %v34404_v0 = vld [vmem:[#allocation63_spill] sm:$0xff]  ;;  %p25400_p3 = pnand %p25399_p2, %p25393_p13 }
 0x582   : > { %21362 = vmatmul.mubr.msk.f32.gmra.mrb[16].mxu1 %vm749_vm1, %v30227_v63  ;;  %v30721_v63 = vpack.c.bf16 %v613_v51, %v612_v4  ;;  %v34424_v4 = vld [vmem:[#allocation86_spill] sm:$0xff]  ;;  %v34425_v51 = vld [vmem:[#allocation29_spill] sm:$0xff] }
 0x583   : > { %22682 = vmatmul.mubr.msk.f32.vlgmr.msra.gmra.mrb[0].mxu0 %vm749_vm1, %v34401_v15  ;;  %21364 = vmatprep.mubr.msk.f32.mxu1 %vm749_vm1, %v30234_v50  ;;  %v34405_v50 = vld [vmem:[#allocation65_spill] sm:$0xff] }
 0x584   : > { %23404 = vmatpush3.bf16.msra.mxu0 %v30566_v27  ;;  %22684 = vmatprep.mubr.msk.f32.mxu0 %vm749_vm1, %v34402_v14  ;;  %v34408_v27 = vld [vmem:[#allocation71_spill] sm:$0xff] }
 0x585   : > { %23406 = vmatprep.subr.bf16.mxu0 %v23405_v34 }
 0x586   : > { %21365 = vmatmul.mubr.msk.f32.gmra.mrb[18].mxu1 %vm749_vm1, %v30241_v3  ;;  %v34406_v3 = vld [vmem:[#allocation67_spill] sm:$0xff] }
 0x587   : > { %22685 = vmatmul.mubr.msk.f32.gmra.mrb[2].mxu0 %vm749_vm1, %v34403_v13  ;;  %21367 = vmatprep.mubr.msk.f32.mxu1 %vm749_vm1, %v30248_v16  ;;  %v34407_v16 = vld [vmem:[#allocation69_spill] sm:$0xff] }
 0x588   : > { %22687 = vmatprep.mubr.msk.f32.mxu0 %vm749_vm1, %v34404_v0  ;;  %23408 = vmatpush3.bf16.msra.mxu0 %v23405_v34  ;;  %v34423_v34 = vld [vmem:[#allocation27_spill] sm:$0xff] }
 0x589   : > { %23410 = vmatprep.subr.bf16.mxu0 %v30721_v63 }
 0x58a   : > { %21368 = vmatmul.mubr.msk.f32.gmra.mrb[20].mxu1 %vm749_vm1, %v30261_v58  ;;  %v34409_v58 = vld [vmem:[#allocation73_spill] sm:$0xff] }
 0x58b   : > { %22688 = vmatmul.mubr.msk.f32.gmra.mrb[4].mxu0 %vm749_vm1, %v34405_v50  ;;  %21370 = vmatprep.mubr.msk.f32.mxu1 %vm749_vm1, %v30268_v28  ;;  %v34410_v28 = vld [vmem:[#allocation74_spill] sm:$0xff] }
 0x58c   : > { %22690 = vmatprep.mubr.msk.f32.mxu0 %vm749_vm1, %v34406_v3 }
 0x58e   : > { %21371 = vmatmul.mubr.msk.f32.gmra.mrb[22].mxu1 %vm749_vm1, %v30281_v45  ;;  %v34411_v45 = vld [vmem:[#allocation75_spill] sm:$0xff] }
 0x58f   : > { %22691 = vmatmul.mubr.msk.f32.gmra.mrb[6].mxu0 %vm749_vm1, %v34407_v16  ;;  %21373 = vmatprep.mubr.msk.f32.mxu1 %vm749_vm1, %v30288_v30  ;;  %v34412_v30 = vld [vmem:[#allocation76_spill] sm:$0xff] }
 0x590   : > { %22693 = vmatprep.mubr.msk.f32.mxu0 %vm749_vm1, %v34408_v27 }
 0x592   : > { %21374 = vmatmul.mubr.msk.f32.gmra.mrb[24].mxu1 %vm749_vm1, %v30298_v22  ;;  %v34413_v22 = vld [vmem:[#allocation77_spill] sm:$0xff] }
 0x593   : > { %22694 = vmatmul.mubr.msk.f32.gmra.mrb[8].mxu0 %vm749_vm1, %v34409_v58  ;;  %21376 = vmatprep.mubr.msk.f32.mxu1 %vm749_vm1, %v30305_v2  ;;  %v34414_v2 = vld [vmem:[#allocation78_spill] sm:$0xff] }
 0x594   : > { %22696 = vmatprep.mubr.msk.f32.mxu0 %vm749_vm1, %v34410_v28 }
 0x596   : > { %21377 = vmatmul.mubr.msk.f32.gmra.mrb[26].mxu1 %vm749_vm1, %v30313_v40  ;;  %v34415_v40 = vld [vmem:[#allocation79_spill] sm:$0xff] }
 0x597   : > { %22697 = vmatmul.mubr.msk.f32.gmra.mrb[10].mxu0 %vm749_vm1, %v34411_v45  ;;  %21379 = vmatprep.mubr.msk.f32.mxu1 %vm749_vm1, %v30320_v6  ;;  %v34416_v6 = vld [vmem:[#allocation21_spill] sm:$0xff] }
 0x598   : > { %22699 = vmatprep.mubr.msk.f32.mxu0 %vm749_vm1, %v34412_v30 }
 0x59a   : > { %21380 = vmatmul.mubr.msk.f32.gmra.mrb[28].mxu1 %vm749_vm1, %v30327_v47  ;;  %v34418_v47 = vld [vmem:[#allocation23_spill] sm:$0xff] }
 0x59b   : > { %22700 = vmatmul.mubr.msk.f32.gmra.mrb[12].mxu0 %vm749_vm1, %v34413_v22  ;;  %21382 = vmatprep.mubr.msk.f32.mxu1 %vm749_vm1, %v30334_v26  ;;  %v34420_v26 = vld [vmem:[#allocation25_spill] sm:$0xff] }
 0x59c   : > { %22702 = vmatprep.mubr.msk.f32.mxu0 %vm749_vm1, %v34414_v2 }
 0x59e   : > { %21383 = vmatmul.mubr.msk.f32.gmra.mrb[30].mxu1 %vm749_vm1, %v30341_v52  ;;  %v34422_v52 = vld [vmem:[#allocation7_spill] sm:$0xff] }
 0x59f   : > { %22703 = vmatmul.mubr.msk.f32.gmra.mrb[14].mxu0 %vm749_vm1, %v34415_v40  ;;  %21393 = vmatprep.mubr.msk.f32.mxu1 %vm749_vm1, %v34416_v6  ;;  %v34426_v6 = vld [vmem:[#allocation87_spill] sm:$0xff] }
 0x5a0   : > { %22705 = vmatprep.mubr.msk.f32.mxu0 %vm749_vm1, %v34417_v49 }
 0x5a2   : > { %21394 = vmatmul.mubr.msk.f32.vlgmr.msra.gmra.mrb[0].mxu1 %vm749_vm1, %v34418_v47  ;;  %v34427_v47 = vld [vmem:[#allocation32_spill] sm:$0xff] }
 0x5a3   : > { %22706 = vmatmul.mubr.msk.f32.gmra.mrb[16].mxu0 %vm749_vm1, %v34419_v19  ;;  %21396 = vmatprep.mubr.msk.f32.mxu1 %vm749_vm1, %v34420_v26  ;;  %v34429_v26 = vld [vmem:[#allocation89_spill] sm:$0xff] }
 0x5a4   : > { %22708 = vmatprep.mubr.msk.f32.mxu0 %vm749_vm1, %v34421_v48  ;;  %23467 = vmatpush3.bf16.msra.mxu1 %v34390_v1  ;;  %v34428_v1 = vld [vmem:[#allocation88_spill] sm:$0xff] }
 0x5a5   : > { %23466 = vmatprep.subr.bf16.mxu1 %v34422_v52 }
 0x5a6   : > { %21397 = vmatmul.mubr.msk.f32.gmra.mrb[2].mxu1 %vm749_vm1, %v34423_v34  ;;  %v34430_v34 = vld [vmem:[#allocation90_spill] sm:$0xff] }
 0x5a7   : > { %22709 = vmatmul.mubr.msk.f32.gmra.mrb[18].mxu0 %vm749_vm1, %v34424_v4  ;;  %21399 = vmatprep.mubr.msk.f32.mxu1 %vm749_vm1, %v34425_v51  ;;  %v34432_v51 = vld [vmem:[#allocation92_spill] sm:$0xff] }
 0x5a8   : > { %22711 = vmatprep.mubr.msk.f32.mxu0 %vm749_vm1, %v34426_v6  ;;  %23468 = vmatpush3.bf16.msra.mxu1 %v34422_v52  ;;  %v34431_v52 = vld [vmem:[#allocation91_spill] sm:$0xff] }
 0x5aa   : > { %21400 = vmatmul.mubr.msk.f32.gmra.mrb[4].mxu1 %vm749_vm1, %v34427_v47  ;;  %v13467_v47 = vrot.slane %v30369_v41, 3 }
 0x5ab   : > { %22712 = vmatmul.mubr.msk.f32.gmra.mrb[20].mxu0 %vm749_vm1, %v34428_v1  ;;  %21402 = vmatprep.mubr.msk.f32.mxu1 %vm749_vm1, %v34321_v10  ;;  %v34433_v10 = vld [vmem:[#allocation12_spill] sm:$0xff] }
 0x5ac   : > { %22714 = vmatprep.mubr.msk.f32.mxu0 %vm749_vm1, %v34429_v26 }
 0x5ae   : > { %21403 = vmatmul.mubr.msk.f32.gmra.mrb[6].mxu1 %vm749_vm1, %v34323_v42  ;;  %v13466_v42 = vrot.slane %v30358_v17, 3 }
 0x5af   : > { %22715 = vmatmul.mubr.msk.f32.gmra.mrb[22].mxu0 %vm749_vm1, %v34430_v34  ;;  %21405 = vmatprep.mubr.msk.f32.mxu1 %vm749_vm1, %v34325_v60  ;;  %v34434_v60 = vld [vmem:[#allocation15_spill] sm:$0xff] }
 0x5b0   : > { %22717 = vmatprep.mubr.msk.f32.mxu0 %vm749_vm1, %v34431_v52  ;;  %v34436_v52 = vld [vmem:[#allocation210_spill] sm:$0xff] }
 0x5b2   : > { %21406 = vmatmul.mubr.msk.f32.gmra.mrb[8].mxu1 %vm749_vm1, %v34327_v38  ;;  %v34435_v38 = vld [vmem:[#allocation209_spill] sm:$0xff] }
 0x5b3   : > { %22718 = vmatmul.mubr.msk.f32.gmra.mrb[24].mxu0 %vm749_vm1, %v34432_v51  ;;  %21408 = vmatprep.mubr.msk.f32.mxu1 %vm749_vm1, %v34329_v5  ;;  %v13469_v5 = vrot.slane %v30518_v23, 3 }
 0x5b4   : > { %22720 = vmatprep.mubr.msk.f32.mxu0 %vm749_vm1, %v34433_v10  ;;  %v13468_v10 = vsel %vm1730_vm3, %v13466_v42, %v13467_v47  ;;  %v617_v42 = vld [vmem:[%s32669_s1 + $0x608] sm:$0xff] }
 0x5b6   : > { %21409 = vmatmul.mubr.msk.f32.gmra.mrb[10].mxu1 %vm749_vm1, %v34331_v11  ;;  %v614_v11 = vld [vmem:[%s32669_s1 + $0x5f0] sm:$0xff] }
 0x5b7   : > { %22721 = vmatmul.mubr.msk.f32.gmra.mrb[26].mxu0 %vm749_vm1, %v34434_v60  ;;  %21411 = vmatprep.mubr.msk.f32.mxu1 %vm749_vm1, %v34333_v43  ;;  %v13470_v43 = vsel %vm1730_vm3, %v13467_v47, %v13469_v5  ;;  %v34438_v47 = vld [vmem:[#allocation100_spill] sm:$0xff]  ;;  %v34442_v5 = vld [vmem:[#allocation62_spill] sm:$0xff] }
 0x5b8   : > { %22723 = vmatprep.mubr.msk.f32.mxu0 %vm749_vm1, %v34435_v38  ;;  %v34440_v60 = vld [vmem:[#allocation60_spill] sm:$0xff]  ;;  %v34441_v38 = vld [vmem:[#allocation102_spill] sm:$0xff] }
 0x5ba   : > { %21412 = vmatmul.mubr.msk.f32.gmra.mrb[12].mxu1 %vm749_vm1, %v34335_v53  ;;  %v615_v53 = vld [vmem:[%s32669_s1 + $0x5f8] sm:$0xff] }
 0x5bb   : > { %22724 = vmatmul.mubr.msk.f32.gmra.mrb[28].mxu0 %vm749_vm1, %v34436_v52  ;;  %21414 = vmatprep.mubr.msk.f32.mxu1 %vm749_vm1, %v34336_v62  ;;  %v34437_v62 = vld [vmem:[#allocation99_spill] sm:$0xff]  ;;  %v23413_v52 = vpack.c.bf16 %v615_v53, %v614_v11  ;;  %v34447_v11 = vld [vmem:[#allocation30_spill] sm:$0xff]  ;;  %v34448_v53 = vld [vmem:[#allocation68_spill] sm:$0xff] }
 0x5bc   : > { %22726 = vmatprep.mubr.msk.f32.mxu0 %vm749_vm1, %v13468_v10  ;;  %v34443_v10 = vld [vmem:[#allocation103_spill] sm:$0xff] }
 0x5be   : > { %21415 = vmatmul.mubr.msk.f32.gmra.mrb[14].mxu1 %vm749_vm1, %v34337_v35  ;;  %v616_v35 = vld [vmem:[%s32669_s1 + $0x600] sm:$0xff] }
 0x5bf   : > { %22727 = vmatmul.mubr.msk.f32.gmra.mrb[30].mxu0 %vm749_vm1, %v13470_v43  ;;  %21417 = vmatprep.mubr.msk.f32.mxu1 %vm749_vm1, %v34338_v8  ;;  %v34439_v8 = vld [vmem:[#allocation101_spill] sm:$0xff]  ;;  %v34446_v43 = vld [vmem:[#allocation66_spill] sm:$0xff] }
 0x5c0   : > { %22737 = vmatprep.mubr.msk.f32.mxu0 %vm749_vm1, %v34437_v62  ;;  %v34449_v62 = vld [vmem:[#allocation105_spill] sm:$0xff] }
 0x5c2   : > { %21418 = vmatmul.mubr.msk.f32.gmra.mrb[16].mxu1 %vm749_vm1, %v34339_v55  ;;  %v30871_v55 = vpack.c.bf16 %v617_v42, %v616_v35  ;;  %v34451_v35 = vld [vmem:[#allocation8_spill] sm:$0xff]  ;;  %v34452_v42 = vld [vmem:[#allocation107_spill] sm:$0xff] }
 0x5c3   : > { %22738 = vmatmul.mubr.msk.f32.vlgmr.msra.gmra.mrb[0].mxu0 %vm749_vm1, %v34438_v47  ;;  %21420 = vmatprep.mubr.msk.f32.mxu1 %vm749_vm1, %v34340_v46  ;;  %v34444_v46 = vld [vmem:[#allocation64_spill] sm:$0xff] }
 0x5c4   : > { %23412 = vmatpush3.bf16.msra.mxu0 %v30721_v63  ;;  %22740 = vmatprep.mubr.msk.f32.mxu0 %vm749_vm1, %v34439_v8  ;;  %v34445_v63 = vld [vmem:[#allocation104_spill] sm:$0xff]  ;;  %v34458_v8 = vld [vmem:[#allocation114_spill] sm:$0xff] }
 0x5c5   : > { %23414 = vmatprep.subr.bf16.mxu0 %v23413_v52  ;;  %v34453_v47 = vld [vmem:[#allocation108_spill] sm:$0xff] }
 0x5c6   : > { %21421 = vmatmul.mubr.msk.f32.gmra.mrb[18].mxu1 %vm749_vm1, %v34440_v60  ;;  %v34462_v60 = vld [vmem:[#allocation118_spill] sm:$0xff] }
 0x5c7   : > { %22741 = vmatmul.mubr.msk.f32.gmra.mrb[2].mxu0 %vm749_vm1, %v34441_v38  ;;  %21423 = vmatprep.mubr.msk.f32.mxu1 %vm749_vm1, %v34442_v5  ;;  %v13733_v38 = vrot.slane %v30369_v41, 4 }
 0x5c8   : > { %22743 = vmatprep.mubr.msk.f32.mxu0 %vm749_vm1, %v34443_v10  ;;  %23416 = vmatpush3.bf16.msra.mxu0 %v23413_v52  ;;  %v34450_v52 = vld [vmem:[#allocation106_spill] sm:$0xff] }
 0x5c9   : > { %23418 = vmatprep.subr.bf16.mxu0 %v30871_v55  ;;  %v34472_v10 = vld [vmem:[#allocation226_spill] sm:$0xff] }
 0x5ca   : > { %21424 = vmatmul.mubr.msk.f32.gmra.mrb[20].mxu1 %vm749_vm1, %v34444_v46  ;;  %v34473_v46 = vld [vmem:[#allocation20_spill] sm:$0xff] }
 0x5cb   : > { %22744 = vmatmul.mubr.msk.f32.gmra.mrb[4].mxu0 %vm749_vm1, %v34445_v63  ;;  %21426 = vmatprep.mubr.msk.f32.mxu1 %vm749_vm1, %v34446_v43  ;;  %v34475_v63 = vld [vmem:[#allocation230_spill] sm:$0xff]  ;;  %v618_v43 = vld [vmem:[%s32669_s1 + $0x610] sm:$0xff] }
 0x5cc   : > { %22746 = vmatprep.mubr.msk.f32.mxu0 %vm749_vm1, %v34447_v11  ;;  %v619_v11 = vld [vmem:[%s32669_s1 + $0x618] sm:$0xff] }
 0x5ce   : > { %21427 = vmatmul.mubr.msk.f32.gmra.mrb[22].mxu1 %vm749_vm1, %v34448_v53  ;;  %v34476_v53 = vld [vmem:[#allocation129_spill] sm:$0xff] }
 0x5cf   : > { %22747 = vmatmul.mubr.msk.f32.gmra.mrb[6].mxu0 %vm749_vm1, %v34449_v62  ;;  %21429 = vmatprep.mubr.msk.f32.mxu1 %vm749_vm1, %v34349_v56  ;;  %v34454_v56 = vld [vmem:[#allocation109_spill] sm:$0xff]  ;;  %v23421_v62 = vpack.c.bf16 %v619_v11, %v618_v43  ;;  %v34505_v43 = vld [vmem:[#allocation19_spill] sm:$0xff] }
 0x5d0   : > { %22749 = vmatprep.mubr.msk.f32.mxu0 %vm749_vm1, %v34450_v52  ;;  %v34477_v52 = vld [vmem:[#allocation131_spill] sm:$0xff] }
 0x5d2   : > { %21430 = vmatmul.mubr.msk.f32.gmra.mrb[24].mxu1 %vm749_vm1, %v34351_v25  ;;  %v34455_v25 = vld [vmem:[#allocation14_spill] sm:$0xff] }
 0x5d3   : > { %22750 = vmatmul.mubr.msk.f32.gmra.mrb[8].mxu0 %vm749_vm1, %v34451_v35  ;;  %21432 = vmatprep.mubr.msk.f32.mxu1 %vm749_vm1, %v34353_v59  ;;  %v34456_v59 = vld [vmem:[#allocation112_spill] sm:$0xff]  ;;  %v34478_v35 = vld [vmem:[#allocation133_spill] sm:$0xff] }
 0x5d4   : > { %22752 = vmatprep.mubr.msk.f32.mxu0 %vm749_vm1, %v34452_v42  ;;  %v34479_v42 = vld [vmem:[#allocation135_spill] sm:$0xff] }
 0x5d6   : > { %21433 = vmatmul.mubr.msk.f32.gmra.mrb[26].mxu1 %vm749_vm1, %v34355_v39  ;;  %v34457_v39 = vld [vmem:[#allocation217_spill] sm:$0xff] }
 0x5d7   : > { %22753 = vmatmul.mubr.msk.f32.gmra.mrb[10].mxu0 %vm749_vm1, %v34453_v47  ;;  %21435 = vmatprep.mubr.msk.f32.mxu1 %vm749_vm1, %v34356_v12  ;;  %v34459_v12 = vld [vmem:[#allocation115_spill] sm:$0xff]  ;;  %v34480_v47 = vld [vmem:[#allocation137_spill] sm:$0xff] }
 0x5d8   : > { %22755 = vmatprep.mubr.msk.f32.mxu0 %vm749_vm1, %v34454_v56  ;;  %v34481_v56 = vld [vmem:[#allocation139_spill] sm:$0xff] }
 0x5da   : > { %21436 = vmatmul.mubr.msk.f32.gmra.mrb[28].mxu1 %vm749_vm1, %v34357_v37  ;;  %v34460_v37 = vld [vmem:[#allocation116_spill] sm:$0xff] }
 0x5db   : > { %22756 = vmatmul.mubr.msk.f32.gmra.mrb[12].mxu0 %vm749_vm1, %v34455_v25  ;;  %21438 = vmatprep.mubr.msk.f32.mxu1 %vm749_vm1, %v34358_v31  ;;  %v34461_v31 = vld [vmem:[#allocation117_spill] sm:$0xff] }
 0x5dc   : > { %22758 = vmatprep.mubr.msk.f32.mxu0 %vm749_vm1, %v34456_v59  ;;  %v34482_v25 = vld [vmem:[#allocation141_spill] sm:$0xff]  ;;  %v34483_v59 = vld [vmem:[#allocation144_spill] sm:$0xff] }
 0x5de   : > { %21439 = vmatmul.mubr.msk.f32.gmra.mrb[30].mxu1 %vm749_vm1, %v34457_v39  ;;  %v34485_v39 = vld [vmem:[#allocation150_spill] sm:$0xff] }
 0x5df   : > { %22759 = vmatmul.mubr.msk.f32.gmra.mrb[14].mxu0 %vm749_vm1, %v34458_v8  ;;  %21473 = vmatprep.mubr.msk.f32.mxu1 %vm749_vm1, %v34377_v36  ;;  %v34463_v36 = vld [vmem:[#allocation83_spill] sm:$0xff]  ;;  %v34486_v8 = vld [vmem:[#allocation153_spill] sm:$0xff] }
 0x5e0   : > { %22761 = vmatprep.mubr.msk.f32.mxu0 %vm749_vm1, %v34459_v12  ;;  %v34487_v12 = vld [vmem:[#allocation154_spill] sm:$0xff] }
 0x5e2   : > { %21474 = vmatmul.mubr.msk.f32.vlgmr.msra.gmra.mrb[16].mxu1 %vm749_vm1, %v34378_v18  ;;  %v34464_v18 = vld [vmem:[#allocation84_spill] sm:$0xff] }
 0x5e3   : > { %22762 = vmatmul.mubr.msk.f32.gmra.mrb[16].mxu0 %vm749_vm1, %v34460_v37  ;;  %21476 = vmatprep.mubr.msk.f32.mxu1 %vm749_vm1, %v34379_v21  ;;  %v34465_v21 = vld [vmem:[#allocation85_spill] sm:$0xff] }
 0x5e4   : > { %22764 = vmatprep.mubr.msk.f32.mxu0 %vm749_vm1, %v34461_v31  ;;  %v34488_v37 = vld [vmem:[#allocation157_spill] sm:$0xff]  ;;  %v34489_v31 = vld [vmem:[#allocation159_spill] sm:$0xff] }
 0x5e6   : > { %21477 = vmatmul.mubr.msk.f32.gmra.mrb[18].mxu1 %vm749_vm1, %v34380_v54  ;;  %v34466_v54 = vld [vmem:[#allocation119_spill] sm:$0xff] }
 0x5e7   : > { %22765 = vmatmul.mubr.msk.f32.gmra.mrb[18].mxu0 %vm749_vm1, %v34462_v60  ;;  %21479 = vmatprep.mubr.msk.f32.mxu1 %vm749_vm1, %v34382_v29  ;;  %v34467_v29 = vld [vmem:[#allocation120_spill] sm:$0xff]  ;;  %v34490_v60 = vld [vmem:[#allocation161_spill] sm:$0xff] }
 0x5e8   : > { %22767 = vmatprep.mubr.msk.f32.mxu0 %vm749_vm1, %v34463_v36  ;;  %v34491_v36 = vld [vmem:[#allocation163_spill] sm:$0xff] }
 0x5ea   : > { %21480 = vmatmul.mubr.msk.f32.gmra.mrb[20].mxu1 %vm749_vm1, %v34384_v24  ;;  %v34468_v24 = vld [vmem:[#allocation121_spill] sm:$0xff] }
 0x5eb   : > { %22768 = vmatmul.mubr.msk.f32.gmra.mrb[20].mxu0 %vm749_vm1, %v34464_v18  ;;  %21482 = vmatprep.mubr.msk.f32.mxu1 %vm749_vm1, %v34385_v7  ;;  %v34469_v7 = vld [vmem:[#allocation10_spill] sm:$0xff]  ;;  %v34492_v18 = vld [vmem:[#allocation164_spill] sm:$0xff] }
 0x5ec   : > { %22770 = vmatprep.mubr.msk.f32.mxu0 %vm749_vm1, %v34465_v21  ;;  %v34493_v21 = vld [vmem:[#allocation165_spill] sm:$0xff] }
 0x5ee   : > { %21483 = vmatmul.mubr.msk.f32.gmra.mrb[22].mxu1 %vm749_vm1, %v34386_v33  ;;  %v13732_v33 = vrot.slane %v30358_v17, 4 }
 0x5ef   : > { %22771 = vmatmul.mubr.msk.f32.gmra.mrb[22].mxu0 %vm749_vm1, %v34466_v54  ;;  %21485 = vmatprep.mubr.msk.f32.mxu1 %vm749_vm1, %v34387_v20  ;;  %v34470_v20 = vld [vmem:[#allocation110_spill] sm:$0xff] }
 0x5f0   : > { %22773 = vmatprep.mubr.msk.f32.mxu0 %vm749_vm1, %v34467_v29  ;;  %v13734_v5 = vsel %vm2132_vm4, %v13732_v33, %v13733_v38  ;;  %v34494_v54 = vld [vmem:[#allocation166_spill] sm:$0xff]  ;;  %v34495_v29 = vld [vmem:[#allocation167_spill] sm:$0xff] }
 0x5f1   : > { %v34498_v33 = vld [vmem:[#allocation170_spill] sm:$0xff] }
 0x5f2   : > { %21486 = vmatmul.mubr.msk.f32.gmra.mrb[24].mxu1 %vm749_vm1, %v34388_v57  ;;  %v34471_v57 = vld [vmem:[#allocation18_spill] sm:$0xff] }
 0x5f3   : > { %22774 = vmatmul.mubr.msk.f32.gmra.mrb[24].mxu0 %vm749_vm1, %v34468_v24  ;;  %21488 = vmatprep.mubr.msk.f32.mxu1 %vm749_vm1, %v34389_v32  ;;  %v13735_v32 = vrot.slane %v30518_v23, 4  ;;  %v34496_v24 = vld [vmem:[#allocation168_spill] sm:$0xff] }
 0x5f4   : > { %22776 = vmatprep.mubr.msk.f32.mxu0 %vm749_vm1, %v34469_v7  ;;  %v34497_v7 = vld [vmem:[#allocation169_spill] sm:$0xff] }
 0x5f6   : > { %21489 = vmatmul.mubr.msk.f32.gmra.mrb[26].mxu1 %vm749_vm1, %v34391_v61  ;;  %v34474_v61 = vld [vmem:[#allocation227_spill] sm:$0xff] }
 0x5f7   : > { %22777 = vmatmul.mubr.msk.f32.gmra.mrb[26].mxu0 %vm749_vm1, %v34470_v20  ;;  %21491 = vmatprep.mubr.msk.f32.mxu1 %vm749_vm1, %v34392_v9  ;;  %v13736_v9 = vsel %vm2132_vm4, %v13733_v38, %v13735_v32  ;;  %v34499_v38 = vld [vmem:[#allocation171_spill] sm:$0xff]  ;;  %v34500_v20 = vld [vmem:[#allocation172_spill] sm:$0xff] }
 0x5f8   : > { %22779 = vmatprep.mubr.msk.f32.mxu0 %vm749_vm1, %v34471_v57  ;;  %v34501_v57 = vld [vmem:[#allocation173_spill] sm:$0xff]  ;;  %v34502_v32 = vld [vmem:[#allocation155_spill] sm:$0xff] }
 0x5fa   : > { %21492 = vmatmul.mubr.msk.f32.gmra.mrb[28].mxu1 %vm749_vm1, %v34472_v10  ;;  %v13999_v10 = vrot.slane %v30369_v41, 5 }
 0x5fb   : > { %22780 = vmatmul.mubr.msk.f32.gmra.mrb[28].mxu0 %vm749_vm1, %v34473_v46  ;;  %21494 = vmatprep.mubr.msk.f32.mxu1 %vm749_vm1, %v34474_v61  ;;  %v34503_v46 = vld [vmem:[#allocation158_spill] sm:$0xff]  ;;  %v34504_v61 = vld [vmem:[#allocation17_spill] sm:$0xff] }
 0x5fc   : > { %22782 = vmatprep.mubr.msk.f32.mxu0 %vm749_vm1, %v13734_v5  ;;  %v13998_v5 = vrot.slane %v30358_v17, 5 }
 0x5fe   : > { %21495 = vmatmul.mubr.msk.f32.gmra.mrb[30].mxu1 %vm749_vm1, %v34475_v63  ;;  %v14000_v63 = vsel %vm2534_vm5, %v13998_v5, %v13999_v10  ;;  %v14264_v5 = vrot.slane %v30358_v17, 6 }
 0x5ff   : > { %22783 = vmatmul.mubr.msk.f32.gmra.mrb[30].mxu0 %vm749_vm1, %v13736_v9  ;;  %v14001_v9 = vrot.slane %v30518_v23, 5 }
 0x600   : > { %22793 = vmatprep.mubr.msk.f32.mxu0 %vm749_vm1, %v34476_v53  ;;  %v34506_v53 = vld [vmem:[#allocation180_spill] sm:$0xff] }
 0x601   : > { %v14002_v11 = vsel %vm2534_vm5, %v13999_v10, %v14001_v9  ;;  %v14265_v10 = vrot.slane %v30369_v41, 6  ;;  %v34534_v9 = vld [vmem:[#allocation97_spill] sm:$0xff] }
 0x603   : > { %22794 = vmatmul.mubr.msk.f32.vlgmr.msra.gmra.mrb[0].mxu0 %vm749_vm1, %v34477_v52  ;;  %v34508_v52 = vld [vmem:[#allocation182_spill] sm:$0xff] }
 0x604   : > { %23420 = vmatpush3.bf16.msra.mxu0 %v30871_v55  ;;  %22796 = vmatprep.mubr.msk.f32.mxu0 %vm749_vm1, %v34478_v35  ;;  %v34484_v55 = vld [vmem:[#allocation148_spill] sm:$0xff]  ;;  %v34509_v35 = vld [vmem:[#allocation183_spill] sm:$0xff] }
 0x605   : > { %23422 = vmatprep.subr.bf16.mxu0 %v23421_v62 }
 0x607   : > { %22797 = vmatmul.mubr.msk.f32.gmra.mrb[2].mxu0 %vm749_vm1, %v34479_v42  ;;  %v34510_v42 = vld [vmem:[#allocation184_spill] sm:$0xff] }
 0x608   : > { %22799 = vmatprep.mubr.msk.f32.mxu0 %vm749_vm1, %v34480_v47  ;;  %23424 = vmatpush3.bf16.msra.mxu0 %v23421_v62  ;;  %v34507_v62 = vld [vmem:[#allocation181_spill] sm:$0xff] }
 0x609   : > { %v34511_v47 = vld [vmem:[#allocation185_spill] sm:$0xff] }
 0x60b   : > { %22800 = vmatmul.mubr.msk.f32.gmra.mrb[4].mxu0 %vm749_vm1, %v34481_v56  ;;  %v34512_v56 = vld [vmem:[#allocation186_spill] sm:$0xff] }
 0x60c   : > { %22802 = vmatprep.mubr.msk.f32.mxu0 %vm749_vm1, %v34482_v25  ;;  %v34513_v25 = vld [vmem:[#allocation142_spill] sm:$0xff] }
 0x60f   : > { %22803 = vmatmul.mubr.msk.f32.gmra.mrb[6].mxu0 %vm749_vm1, %v34483_v59  ;;  %v34514_v59 = vld [vmem:[#allocation146_spill] sm:$0xff] }
 0x610   : > { %22805 = vmatprep.mubr.msk.f32.mxu0 %vm749_vm1, %v34484_v55  ;;  %v34515_v55 = vld [vmem:[#allocation147_spill] sm:$0xff] }
 0x613   : > { %22806 = vmatmul.mubr.msk.f32.gmra.mrb[8].mxu0 %vm749_vm1, %v34485_v39  ;;  %v34516_v39 = vld [vmem:[#allocation151_spill] sm:$0xff] }
 0x614   : > { %22808 = vmatprep.mubr.msk.f32.mxu0 %vm749_vm1, %v34486_v8  ;;  %v34517_v8 = vld [vmem:[#allocation152_spill] sm:$0xff] }
 0x617   : > { %22809 = vmatmul.mubr.msk.f32.gmra.mrb[10].mxu0 %vm749_vm1, %v34487_v12  ;;  %v34518_v12 = vld [vmem:[#allocation156_spill] sm:$0xff] }
 0x618   : > { %22811 = vmatprep.mubr.msk.f32.mxu0 %vm749_vm1, %v34488_v37  ;;  %v34519_v37 = vld [vmem:[#allocation189_spill] sm:$0xff] }
 0x61b   : > { %22812 = vmatmul.mubr.msk.f32.gmra.mrb[12].mxu0 %vm749_vm1, %v34489_v31  ;;  %v34520_v31 = vld [vmem:[#allocation191_spill] sm:$0xff] }
 0x61c   : > { %22814 = vmatprep.mubr.msk.f32.mxu0 %vm749_vm1, %v34490_v60  ;;  %v34521_v60 = vld [vmem:[#allocation193_spill] sm:$0xff] }
 0x61f   : > { %22815 = vmatmul.mubr.msk.f32.gmra.mrb[14].mxu0 %vm749_vm1, %v34491_v36  ;;  %v34522_v36 = vld [vmem:[#allocation194_spill] sm:$0xff] }
 0x620   : > { %22817 = vmatprep.mubr.msk.f32.mxu0 %vm749_vm1, %v34492_v18  ;;  %v34523_v18 = vld [vmem:[#allocation195_spill] sm:$0xff] }
 0x623   : > { %22818 = vmatmul.mubr.msk.f32.gmra.mrb[16].mxu0 %vm749_vm1, %v34493_v21  ;;  %v34524_v21 = vld [vmem:[#allocation196_spill] sm:$0xff] }
 0x624   : > { %22820 = vmatprep.mubr.msk.f32.mxu0 %vm749_vm1, %v34494_v54  ;;  %v34525_v54 = vld [vmem:[#allocation197_spill] sm:$0xff] }
 0x627   : > { %22821 = vmatmul.mubr.msk.f32.gmra.mrb[18].mxu0 %vm749_vm1, %v34495_v29  ;;  %v34526_v29 = vld [vmem:[#allocation198_spill] sm:$0xff] }
 0x628   : > { %22823 = vmatprep.mubr.msk.f32.mxu0 %vm749_vm1, %v34496_v24  ;;  %v34527_v24 = vld [vmem:[#allocation199_spill] sm:$0xff] }
 0x62b   : > { %22824 = vmatmul.mubr.msk.f32.gmra.mrb[20].mxu0 %vm749_vm1, %v34497_v7  ;;  %v34528_v7 = vld [vmem:[#allocation201_spill] sm:$0xff] }
 0x62c   : > { %22826 = vmatprep.mubr.msk.f32.mxu0 %vm749_vm1, %v34498_v33  ;;  %v34529_v33 = vld [vmem:[#allocation202_spill] sm:$0xff] }
 0x62f   : > { %22827 = vmatmul.mubr.msk.f32.gmra.mrb[22].mxu0 %vm749_vm1, %v34499_v38  ;;  %v34530_v38 = vld [vmem:[#allocation203_spill] sm:$0xff] }
 0x630   : > { %22829 = vmatprep.mubr.msk.f32.mxu0 %vm749_vm1, %v34500_v20  ;;  %v34531_v20 = vld [vmem:[#allocation204_spill] sm:$0xff] }
 0x633   : > { %22830 = vmatmul.mubr.msk.f32.gmra.mrb[24].mxu0 %vm749_vm1, %v34501_v57  ;;  %v34532_v57 = vld [vmem:[#allocation187_spill] sm:$0xff] }
 0x634   : > { %22832 = vmatprep.mubr.msk.f32.mxu0 %vm749_vm1, %v34502_v32 }
 0x637   : > { %22833 = vmatmul.mubr.msk.f32.gmra.mrb[26].mxu0 %vm749_vm1, %v34503_v46 }
 0x638   : > { %22835 = vmatprep.mubr.msk.f32.mxu0 %vm749_vm1, %v34504_v61  ;;  %v34533_v61 = vld [vmem:[#allocation188_spill] sm:$0xff] }
 0x63b   : > { %22836 = vmatmul.mubr.msk.f32.gmra.mrb[28].mxu0 %vm749_vm1, %v34505_v43 }
 0x63c   : > { %22838 = vmatprep.mubr.msk.f32.mxu0 %vm749_vm1, %v14000_v63  ;;  %v14267_v63 = vrot.slane %v30518_v23, 6 }
 0x63e   : > { %v14268_v17 = vsel %vm2936_vm6, %v14265_v10, %v14267_v63  ;;  %v31181_v63 = vld [vmem:[%s32670_s2] ss:$0 sm:$0xff] }
 0x63f   : > { %22839 = vmatmul.mubr.msk.f32.gmra.mrb[30].mxu0 %vm749_vm1, %v14002_v11  ;;  %v14266_v11 = vsel %vm2936_vm6, %v14264_v5, %v14265_v10 }
 0x640   : > { %22849 = vmatprep.mubr.msk.f32.mxu0 %vm749_vm1, %v34506_v53 }
 0x643   : > { %22850 = vmatmul.mubr.msk.f32.vlgmr.msra.gmra.mrb[0].mxu0 %vm749_vm1, %v34507_v62  ;;  %v34535_v62 = vld [vmem:[#allocation98_spill] sm:$0xff] }
 0x644   : > { %22852 = vmatprep.mubr.msk.f32.mxu0 %vm749_vm1, %v34508_v52 }
 0x647   : > { %22853 = vmatmul.mubr.msk.f32.gmra.mrb[2].mxu0 %vm749_vm1, %v34509_v35 }
 0x648   : > { %22855 = vmatprep.mubr.msk.f32.mxu0 %vm749_vm1, %v34510_v42 }
 0x64b   : > { %22856 = vmatmul.mubr.msk.f32.gmra.mrb[4].mxu0 %vm749_vm1, %v34511_v47 }
 0x64c   : > { %22858 = vmatprep.mubr.msk.f32.mxu0 %vm749_vm1, %v34512_v56 }
 0x64f   : > { %22859 = vmatmul.mubr.msk.f32.gmra.mrb[6].mxu0 %vm749_vm1, %v34513_v25 }
 0x650   : > { %22861 = vmatprep.mubr.msk.f32.mxu0 %vm749_vm1, %v34514_v59 }
 0x653   : > { %22862 = vmatmul.mubr.msk.f32.gmra.mrb[8].mxu0 %vm749_vm1, %v34515_v55 }
 0x654   : > { %22864 = vmatprep.mubr.msk.f32.mxu0 %vm749_vm1, %v34516_v39 }
 0x657   : > { %22865 = vmatmul.mubr.msk.f32.gmra.mrb[10].mxu0 %vm749_vm1, %v34517_v8 }
 0x658   : > { %22867 = vmatprep.mubr.msk.f32.mxu0 %vm749_vm1, %v34518_v12 }
 0x65b   : > { %22868 = vmatmul.mubr.msk.f32.gmra.mrb[12].mxu0 %vm749_vm1, %v34519_v37 }
 0x65c   : > { %22870 = vmatprep.mubr.msk.f32.mxu0 %vm749_vm1, %v34520_v31 }
 0x65f   : > { %22871 = vmatmul.mubr.msk.f32.gmra.mrb[14].mxu0 %vm749_vm1, %v34521_v60 }
 0x660   : > { %22873 = vmatprep.mubr.msk.f32.mxu0 %vm749_vm1, %v34522_v36 }
 0x663   : > { %22874 = vmatmul.mubr.msk.f32.gmra.mrb[16].mxu0 %vm749_vm1, %v34523_v18 }
 0x664   : > { %22876 = vmatprep.mubr.msk.f32.mxu0 %vm749_vm1, %v34524_v21 }
 0x667   : > { %22877 = vmatmul.mubr.msk.f32.gmra.mrb[18].mxu0 %vm749_vm1, %v34525_v54 }
 0x668   : > { %22879 = vmatprep.mubr.msk.f32.mxu0 %vm749_vm1, %v34526_v29 }
 0x66b   : > { %22880 = vmatmul.mubr.msk.f32.gmra.mrb[20].mxu0 %vm749_vm1, %v34527_v24 }
 0x66c   : > { %22882 = vmatprep.mubr.msk.f32.mxu0 %vm749_vm1, %v34528_v7 }
 0x66f   : > { %22883 = vmatmul.mubr.msk.f32.gmra.mrb[22].mxu0 %vm749_vm1, %v34529_v33 }
 0x670   : > { %22885 = vmatprep.mubr.msk.f32.mxu0 %vm749_vm1, %v34530_v38 }
 0x673   : > { %22886 = vmatmul.mubr.msk.f32.gmra.mrb[24].mxu0 %vm749_vm1, %v34531_v20 }
 0x674   : > { %22888 = vmatprep.mubr.msk.f32.mxu0 %vm749_vm1, %v34532_v57 }
 0x675   : > { %v21395_v32 = vpop.f32.mrb[0].mxu1 }
 0x676   : > { %v7397_v46 = vpop.f32.mrb[1].mxu1 }
 0x677   : > { %22889 = vmatmul.mubr.msk.f32.gmra.mrb[26].mxu0 %vm749_vm1, %v34533_v61 }
 0x678   : > { %22891 = vmatprep.mubr.msk.f32.mxu0 %vm749_vm1, %v34534_v9 }
 0x679   : > { %v21398_v43 = vpop.f32.mrb[2].mxu1 }
 0x67a   : > { %v7407_v53 = vpop.f32.mrb[3].mxu1 }
 0x67b   : > { %22892 = vmatmul.mubr.msk.f32.gmra.mrb[28].mxu0 %vm749_vm1, %v34535_v62 }
 0x67c   : > { %22894 = vmatprep.mubr.msk.f32.mxu0 %vm749_vm1, %v14266_v11 }
 0x67d   : > { %v21401_v41 = vpop.f32.mrb[4].mxu1 }
 0x67e   : > { %v7417_v52 = vpop.f32.mrb[5].mxu1 }
 0x67f   : > { %22895 = vmatmul.mubr.msk.f32.gmra.mrb[30].mxu0 %vm749_vm1, %v14268_v17 }
 0x681   : > { %v21404_v35 = vpop.f32.mrb[6].mxu1 }
 0x682   : > { %v7427_v42 = vpop.f32.mrb[7].mxu1 }
 0x685   : > { %v21407_v47 = vpop.f32.mrb[8].mxu1 }
 0x686   : > { %v7437_v56 = vpop.f32.mrb[9].mxu1 }
 0x689   : > { %v31134_v23 = vpop.f32.mrb[10].mxu1 }
 0x68a   : > { %v31136_v25 = vpop.f32.mrb[11].mxu1 }
 0x68d   : > { %v31138_v59 = vpop.f32.mrb[12].mxu1 }
 0x68e   : > { %v31140_v55 = vpop.f32.mrb[13].mxu1 }
 0x691   : > { %v31142_v39 = vpop.f32.mrb[14].mxu1 }
 0x692   : > { %v31144_v8 = vpop.f32.mrb[15].mxu1 }
 0x6b5   : > { %v31146_v12 = vpop.f32.mrb[16].mxu1 }
 0x6b6   : > { %v31148_v37 = vpop.f32.mrb[17].mxu1 }
 0x6b9   : > { %v31150_v31 = vpop.f32.mrb[18].mxu1 }
 0x6ba   : > { %v31152_v60 = vpop.f32.mrb[19].mxu1 }
 0x6bd   : > { %v31154_v36 = vpop.f32.mrb[20].mxu1 }
 0x6be   : > { %v31156_v18 = vpop.f32.mrb[21].mxu1 }
 0x6c1   : > { %v31158_v21 = vpop.f32.mrb[22].mxu1 }
 0x6c2   : > { %v31160_v54 = vpop.f32.mrb[23].mxu1 }
 0x6c5   : > { %v31162_v29 = vpop.f32.mrb[24].mxu1 }
 0x6c6   : > { %v31164_v24 = vpop.f32.mrb[25].mxu1 }
 0x6c9   : > { %v31166_v7 = vpop.f32.mrb[26].mxu1 }
 0x6ca   : > { %v31168_v33 = vpop.f32.mrb[27].mxu1 }
 0x6cd   : > { %v31170_v38 = vpop.f32.mrb[28].mxu1 }
 0x6ce   : > { %v31172_v20 = vpop.f32.mrb[29].mxu1 }
 0x6d1   : > { %v31174_v57 = vpop.f32.mrb[30].mxu1 }
 0x6d2   : > { %v31176_v5 = vpop.f32.mrb[31].mxu1 }
 0x716   : > { %v22851_v10 = vpop.f32.mrb[0].mxu0 }
 0x717   : > { %v23469_v61 = vadd.f32 %v22851_v10, %v21395_v32  ;;  %v14339_v9 = vpop.f32.mrb[1].mxu0 }
 0x718   : > { %v23470_v11 = vadd.f32 %v14339_v9, %v7397_v46 }
 0x719   : > { %v31189_v1 = vadd.f32 %v23469_v61, %v31181_v63 }
 0x71a   : > { %v22854_v62 = vpop.f32.mrb[2].mxu0  ;;  %v31184_v17 = vadd.f32 %v23470_v11, %v31181_v63 }
 0x71b   : > { %v23471_v51 = vadd.f32 %v22854_v62, %v21398_v43  ;;  %v14349_v26 = vpop.f32.mrb[3].mxu0  ;;  %v14572_v11 = vsel %vm749_vm1, %v31189_v1, 0.0 }
 0x71c   : > { %v23472_v34 = vadd.f32 %v14349_v26, %v7407_v53  ;;  %v14569_v6 = vsel %vm749_vm1, %v31184_v17, 0.0 }
 0x71d   : > { %14570 = vadd.xlane.f32.xlu0 %v14569_v6  ;;  %v31199_v43 = vadd.f32 %v23471_v51, %v31181_v63 }
 0x71e   : > { %v22857_v32 = vpop.f32.mrb[4].mxu0  ;;  %v31192_v10 = vadd.f32 %v23472_v34, %v31181_v63 }
 0x71f   : > { %v23473_v48 = vadd.f32 %v22857_v32, %v21401_v41  ;;  %v14359_v46 = vpop.f32.mrb[5].mxu0 }
 0x720   : > { %v23474_v9 = vadd.f32 %v14359_v46, %v7417_v52  ;;  %v14575_v26 = vsel %vm749_vm1, %v31192_v10, 0.0  ;;  %v14578_v52 = vsel %vm749_vm1, %v31199_v43, 0.0 }
 0x721   : > { %14573 = vadd.xlane.f32.xlu0 %v14572_v11  ;;  %14576 = vadd.xlane.f32.xlu1 %v14575_v26  ;;  %v31209_v32 = vadd.f32 %v23473_v48, %v31181_v63 }
 0x722   : > { %v22860_v53 = vpop.f32.mrb[6].mxu0  ;;  %v31202_v6 = vadd.f32 %v23474_v9, %v31181_v63 }
 0x723   : > { %v23475_v34 = vadd.f32 %v22860_v53, %v21404_v35  ;;  %v14369_v61 = vpop.f32.mrb[7].mxu0 }
 0x724   : > { %v23476_v41 = vadd.f32 %v14369_v61, %v7427_v42  ;;  %v14581_v62 = vsel %vm749_vm1, %v31202_v6, 0.0  ;;  %v14584_v42 = vsel %vm749_vm1, %v31209_v32, 0.0 }
 0x725   : > { %14579 = vadd.xlane.f32.xlu1 %v14578_v52  ;;  %14582 = vadd.xlane.f32.xlu0 %v14581_v62  ;;  %v31219_v53 = vadd.f32 %v23475_v34, %v31181_v63 }
 0x726   : > { %v22863_v51 = vpop.f32.mrb[8].mxu0  ;;  %v31212_v46 = vadd.f32 %v23476_v41, %v31181_v63 }
 0x727   : > { %v23477_v9 = vadd.f32 %v22863_v51, %v21407_v47  ;;  %v14379_v11 = vpop.f32.mrb[9].mxu0  ;;  %v14590_v52 = vsel %vm749_vm1, %v31219_v53, 0.0 }
 0x728   : > { %v23478_v35 = vadd.f32 %v14379_v11, %v7437_v56  ;;  %v14587_v26 = vsel %vm749_vm1, %v31212_v46, 0.0 }
 0x729   : > { %14585 = vadd.xlane.f32.xlu1 %v14584_v42  ;;  %14588 = vadd.xlane.f32.xlu0 %v14587_v26  ;;  %v31231_v34 = vadd.f32 %v23477_v9, %v31181_v63 }
 0x72a   : > { %v22866_v48 = vpop.f32.mrb[10].mxu0  ;;  %v31222_v61 = vadd.f32 %v23478_v35, %v31181_v63 }
 0x72b   : > { %v23479_v41 = vadd.f32 %v22866_v48, %v31134_v23  ;;  %v14389_v47 = vpop.f32.mrb[11].mxu0  ;;  %v14596_v42 = vsel %vm749_vm1, %v31231_v34, 0.0 }
 0x72c   : > { %v23480_v56 = vadd.f32 %v14389_v47, %v31136_v25  ;;  %v14593_v62 = vsel %vm749_vm1, %v31222_v61, 0.0 }
 0x72d   : > { %14591 = vadd.xlane.f32.xlu1 %v14590_v52  ;;  %14594 = vadd.xlane.f32.xlu0 %v14593_v62  ;;  %v31243_v9 = vadd.f32 %v23479_v41, %v31181_v63 }
 0x72e   : > { %v22869_v51 = vpop.f32.mrb[12].mxu0  ;;  %v31234_v11 = vadd.f32 %v23480_v56, %v31181_v63 }
 0x72f   : > { %v23481_v23 = vadd.f32 %v22869_v51, %v31138_v59  ;;  %v14399_v35 = vpop.f32.mrb[13].mxu0  ;;  %v14602_v52 = vsel %vm749_vm1, %v31243_v9, 0.0 }
 0x730   : > { %v23482_v25 = vadd.f32 %v14399_v35, %v31140_v55  ;;  %v14599_v26 = vsel %vm749_vm1, %v31234_v11, 0.0 }
 0x731   : > { %14597 = vadd.xlane.f32.xlu1 %v14596_v42  ;;  %14600 = vadd.xlane.f32.xlu0 %v14599_v26  ;;  %v31255_v41 = vadd.f32 %v23481_v23, %v31181_v63 }
 0x732   : > { %v22872_v48 = vpop.f32.mrb[14].mxu0  ;;  %v31246_v47 = vadd.f32 %v23482_v25, %v31181_v63 }
 0x733   : > { %v23483_v59 = vadd.f32 %v22872_v48, %v31142_v39  ;;  %v14409_v56 = vpop.f32.mrb[15].mxu0  ;;  %v14608_v42 = vsel %vm749_vm1, %v31255_v41, 0.0 }
 0x734   : > { %v23484_v55 = vadd.f32 %v14409_v56, %v31144_v8  ;;  %v14605_v62 = vsel %vm749_vm1, %v31246_v47, 0.0 }
 0x735   : > { %14603 = vadd.xlane.f32.xlu1 %v14602_v52  ;;  %14606 = vadd.xlane.f32.xlu0 %v14605_v62  ;;  %v31267_v23 = vadd.f32 %v23483_v59, %v31181_v63 }
 0x736   : > { %v22875_v51 = vpop.f32.mrb[16].mxu0  ;;  %v31258_v35 = vadd.f32 %v23484_v55, %v31181_v63 }
 0x737   : > { %v23485_v39 = vadd.f32 %v22875_v51, %v31146_v12  ;;  %v14419_v25 = vpop.f32.mrb[17].mxu0  ;;  %v14614_v52 = vsel %vm749_vm1, %v31267_v23, 0.0 }
 0x738   : > { %v23486_v8 = vadd.f32 %v14419_v25, %v31148_v37  ;;  %v14611_v26 = vsel %vm749_vm1, %v31258_v35, 0.0 }
 0x739   : > { %14609 = vadd.xlane.f32.xlu1 %v14608_v42  ;;  %14612 = vadd.xlane.f32.xlu0 %v14611_v26  ;;  %v31279_v59 = vadd.f32 %v23485_v39, %v31181_v63 }
 0x73a   : > { %v22878_v48 = vpop.f32.mrb[18].mxu0  ;;  %v31270_v56 = vadd.f32 %v23486_v8, %v31181_v63 }
 0x73b   : > { %v23487_v12 = vadd.f32 %v22878_v48, %v31150_v31  ;;  %v14429_v55 = vpop.f32.mrb[19].mxu0  ;;  %v14620_v42 = vsel %vm749_vm1, %v31279_v59, 0.0 }
 0x73c   : > { %v23488_v37 = vadd.f32 %v14429_v55, %v31152_v60  ;;  %v14617_v62 = vsel %vm749_vm1, %v31270_v56, 0.0 }
 0x73d   : > { %14615 = vadd.xlane.f32.xlu1 %v14614_v52  ;;  %14618 = vadd.xlane.f32.xlu0 %v14617_v62  ;;  %v31291_v39 = vadd.f32 %v23487_v12, %v31181_v63 }
 0x73e   : > { %v22881_v51 = vpop.f32.mrb[20].mxu0  ;;  %v31282_v25 = vadd.f32 %v23488_v37, %v31181_v63 }
 0x73f   : > { %v23489_v31 = vadd.f32 %v22881_v51, %v31154_v36  ;;  %v14439_v8 = vpop.f32.mrb[21].mxu0  ;;  %v14626_v52 = vsel %vm749_vm1, %v31291_v39, 0.0 }
 0x740   : > { %v23490_v60 = vadd.f32 %v14439_v8, %v31156_v18  ;;  %v14623_v26 = vsel %vm749_vm1, %v31282_v25, 0.0 }
 0x741   : > { %14621 = vadd.xlane.f32.xlu1 %v14620_v42  ;;  %14624 = vadd.xlane.f32.xlu0 %v14623_v26  ;;  %v31303_v12 = vadd.f32 %v23489_v31, %v31181_v63 }
 0x742   : > { %v22884_v48 = vpop.f32.mrb[22].mxu0  ;;  %v31294_v55 = vadd.f32 %v23490_v60, %v31181_v63 }
 0x743   : > { %v23491_v36 = vadd.f32 %v22884_v48, %v31158_v21  ;;  %v14449_v37 = vpop.f32.mrb[23].mxu0  ;;  %v14632_v42 = vsel %vm749_vm1, %v31303_v12, 0.0 }
 0x744   : > { %v23492_v18 = vadd.f32 %v14449_v37, %v31160_v54  ;;  %v14629_v62 = vsel %vm749_vm1, %v31294_v55, 0.0 }
 0x745   : > { %14627 = vadd.xlane.f32.xlu1 %v14626_v52  ;;  %14630 = vadd.xlane.f32.xlu0 %v14629_v62  ;;  %v31315_v31 = vadd.f32 %v23491_v36, %v31181_v63 }
 0x746   : > { %v22887_v51 = vpop.f32.mrb[24].mxu0  ;;  %v31306_v8 = vadd.f32 %v23492_v18, %v31181_v63 }
 0x747   : > { %v23493_v21 = vadd.f32 %v22887_v51, %v31162_v29  ;;  %v14459_v60 = vpop.f32.mrb[25].mxu0  ;;  %v14638_v52 = vsel %vm749_vm1, %v31315_v31, 0.0 }
 0x748   : > { %v23494_v54 = vadd.f32 %v14459_v60, %v31164_v24  ;;  %v14635_v26 = vsel %vm749_vm1, %v31306_v8, 0.0 }
 0x749   : > { %14633 = vadd.xlane.f32.xlu1 %v14632_v42  ;;  %14636 = vadd.xlane.f32.xlu0 %v14635_v26  ;;  %v31327_v36 = vadd.f32 %v23493_v21, %v31181_v63 }
 0x74a   : > { %v22890_v48 = vpop.f32.mrb[26].mxu0  ;;  %v31318_v37 = vadd.f32 %v23494_v54, %v31181_v63 }
 0x74b   : > { %v23495_v29 = vadd.f32 %v22890_v48, %v31166_v7  ;;  %v14469_v18 = vpop.f32.mrb[27].mxu0  ;;  %v14644_v42 = vsel %vm749_vm1, %v31327_v36, 0.0 }
 0x74c   : > { %v23496_v24 = vadd.f32 %v14469_v18, %v31168_v33  ;;  %v14641_v62 = vsel %vm749_vm1, %v31318_v37, 0.0 }
 0x74d   : > { %14639 = vadd.xlane.f32.xlu1 %v14638_v52  ;;  %14642 = vadd.xlane.f32.xlu0 %v14641_v62  ;;  %v31339_v21 = vadd.f32 %v23495_v29, %v31181_v63 }
 0x74e   : > { %v22893_v51 = vpop.f32.mrb[28].mxu0  ;;  %v31330_v60 = vadd.f32 %v23496_v24, %v31181_v63 }
 0x74f   : > { %v23497_v7 = vadd.f32 %v22893_v51, %v31170_v38  ;;  %v14479_v54 = vpop.f32.mrb[29].mxu0  ;;  %v14650_v52 = vsel %vm749_vm1, %v31339_v21, 0.0 }
 0x750   : > { %v23498_v33 = vadd.f32 %v14479_v54, %v31172_v20  ;;  %v14647_v26 = vsel %vm749_vm1, %v31330_v60, 0.0 }
 0x751   : > { %14645 = vadd.xlane.f32.xlu1 %v14644_v42  ;;  %14648 = vadd.xlane.f32.xlu0 %v14647_v26  ;;  %v31351_v29 = vadd.f32 %v23497_v7, %v31181_v63 }
 0x752   : > { %v22896_v48 = vpop.f32.mrb[30].mxu0  ;;  %v31342_v18 = vadd.f32 %v23498_v33, %v31181_v63  ;;  %v15064_v33 = vld [vmem:[%s32673_s5] sm:$0xff] }
 0x753   : > { %v23499_v38 = vadd.f32 %v22896_v48, %v31174_v57  ;;  %v14489_v24 = vpop.f32.mrb[31].mxu0  ;;  %v14656_v57 = vsel %vm749_vm1, %v31351_v29, 0.0 }
 0x754   : > { %v23500_v20 = vadd.f32 %v14489_v24, %v31176_v5  ;;  %v14653_v62 = vsel %vm749_vm1, %v31342_v18, 0.0 }
 0x755   : > { %14651 = vadd.xlane.f32.xlu1 %v14650_v52  ;;  %14654 = vadd.xlane.f32.xlu0 %v14653_v62  ;;  %v31354_v51 = vadd.f32 %v23499_v38, %v31181_v63 }
 0x756   : > { %v31357_v54 = vadd.f32 %v23500_v20, %v31181_v63  ;;  %v15065_v63 = vld [vmem:[%s32673_s5 + $0x8] sm:$0xff] }
 0x757   : > { %v14662_v7 = vsel %vm749_vm1, %v31354_v51, 0.0  ;;  %v23425_v42 = vpack.c.bf16 %v15065_v63, %v15064_v33 }
 0x758   : > { %v14659_v5 = vsel %vm749_vm1, %v31357_v54, 0.0 }
 0x759   : > { %14657 = vadd.xlane.f32.xlu1 %v14656_v57  ;;  %14660 = vadd.xlane.f32.xlu0 %v14659_v5 }
 0x75a   : > { %23426 = vmatprep.subr.bf16.mxu1 %v23425_v42 }
 0x75b   : > { %23428 = vmatpush3.bf16.msra.mxu1 %v23425_v42 }
 0x75d   : > { %14663 = vadd.xlane.f32.xlu1 %v14662_v7 }
 0x7aa   : > { %v14571_v26 = vpop.xlane.xlu0 %14570 }
 0x7ab   : > { %v14666_v48 = vmul.f32 0.03125, %v14571_v26 }
 0x7ad   : > { %v31372_v38 = vsub.f32 %v31184_v17, %v14666_v48 }
 0x7ae   : > { %v14574_v24 = vpop.xlane.xlu0 %14573  ;;  %v14577_v20 = vpop.xlane.xlu1 %14576 }
 0x7af   : > { %v14667_v52 = vmul.f32 0.03125, %v14574_v24  ;;  %v14668_v62 = vmul.f32 0.03125, %v14577_v20  ;;  %v14730_v57 = vmul.f32 %v31372_v38, %v31372_v38 }
 0x7b1   : > { %v31377_v5 = vsub.f32 %v31189_v1, %v14667_v52  ;;  %v31380_v7 = vsub.f32 %v31192_v10, %v14668_v62  ;;  %v14762_v33 = vsel %vm749_vm1, %v14730_v57, 0.0 }
 0x7b2   : > { %v14580_v63 = vpop.xlane.xlu1 %14579  ;;  %v14583_v42 = vpop.xlane.xlu0 %14582  ;;  %14763 = vadd.xlane.f32.xlu0 %v14762_v33 }
 0x7b3   : > { %v14669_v17 = vmul.f32 0.03125, %v14580_v63  ;;  %v14670_v26 = vmul.f32 0.03125, %v14583_v42  ;;  %v14731_v48 = vmul.f32 %v31377_v5, %v31377_v5  ;;  %v14732_v24 = vmul.f32 %v31380_v7, %v31380_v7 }
 0x7b5   : > { %v31388_v20 = vsub.f32 %v31199_v43, %v14669_v17  ;;  %v31391_v1 = vsub.f32 %v31202_v6, %v14670_v26  ;;  %v14765_v10 = vsel %vm749_vm1, %v14731_v48, 0.0  ;;  %v14768_v52 = vsel %vm749_vm1, %v14732_v24, 0.0 }
 0x7b6   : > { %v14586_v62 = vpop.xlane.xlu1 %14585  ;;  %v14589_v57 = vpop.xlane.xlu0 %14588  ;;  %14766 = vadd.xlane.f32.xlu1 %v14765_v10  ;;  %14769 = vadd.xlane.f32.xlu0 %v14768_v52 }
 0x7b7   : > { %v14671_v33 = vmul.f32 0.03125, %v14586_v62  ;;  %v14672_v63 = vmul.f32 0.03125, %v14589_v57  ;;  %v14733_v42 = vmul.f32 %v31388_v20, %v31388_v20  ;;  %v14734_v43 = vmul.f32 %v31391_v1, %v31391_v1 }
 0x7b9   : > { %v31400_v17 = vsub.f32 %v31209_v32, %v14671_v33  ;;  %v31403_v6 = vsub.f32 %v31212_v46, %v14672_v63  ;;  %v14771_v26 = vsel %vm749_vm1, %v14733_v42, 0.0  ;;  %v14774_v48 = vsel %vm749_vm1, %v14734_v43, 0.0 }
 0x7ba   : > { %v14592_v24 = vpop.xlane.xlu1 %14591  ;;  %v14595_v10 = vpop.xlane.xlu0 %14594  ;;  %14772 = vadd.xlane.f32.xlu1 %v14771_v26  ;;  %14775 = vadd.xlane.f32.xlu0 %v14774_v48 }
 0x7bb   : > { %v14673_v52 = vmul.f32 0.03125, %v14592_v24  ;;  %v14674_v62 = vmul.f32 0.03125, %v14595_v10  ;;  %v14735_v57 = vmul.f32 %v31400_v17, %v31400_v17  ;;  %v14736_v32 = vmul.f32 %v31403_v6, %v31403_v6 }
 0x7bd   : > { %v31412_v33 = vsub.f32 %v31219_v53, %v14673_v52  ;;  %v31415_v46 = vsub.f32 %v31222_v61, %v14674_v62  ;;  %v14777_v63 = vsel %vm749_vm1, %v14735_v57, 0.0  ;;  %v14780_v42 = vsel %vm749_vm1, %v14736_v32, 0.0 }
 0x7be   : > { %v14598_v43 = vpop.xlane.xlu1 %14597  ;;  %v14601_v26 = vpop.xlane.xlu0 %14600  ;;  %14778 = vadd.xlane.f32.xlu1 %v14777_v63  ;;  %14781 = vadd.xlane.f32.xlu0 %v14780_v42 }
 0x7bf   : > { %v14675_v48 = vmul.f32 0.03125, %v14598_v43  ;;  %v14676_v24 = vmul.f32 0.03125, %v14601_v26  ;;  %v14737_v10 = vmul.f32 %v31412_v33, %v31412_v33  ;;  %v14738_v53 = vmul.f32 %v31415_v46, %v31415_v46 }
 0x7c1   : > { %v31424_v52 = vsub.f32 %v31231_v34, %v14675_v48  ;;  %v31427_v61 = vsub.f32 %v31234_v11, %v14676_v24  ;;  %v14783_v62 = vsel %vm749_vm1, %v14737_v10, 0.0  ;;  %v14786_v57 = vsel %vm749_vm1, %v14738_v53, 0.0 }
 0x7c2   : > { %v14604_v32 = vpop.xlane.xlu1 %14603  ;;  %v14607_v63 = vpop.xlane.xlu0 %14606  ;;  %14784 = vadd.xlane.f32.xlu1 %v14783_v62  ;;  %14787 = vadd.xlane.f32.xlu0 %v14786_v57 }
 0x7c3   : > { %v14677_v42 = vmul.f32 0.03125, %v14604_v32  ;;  %v14678_v43 = vmul.f32 0.03125, %v14607_v63  ;;  %v14739_v26 = vmul.f32 %v31424_v52, %v31424_v52  ;;  %v14740_v34 = vmul.f32 %v31427_v61, %v31427_v61 }
 0x7c5   : > { %v31436_v48 = vsub.f32 %v31243_v9, %v14677_v42  ;;  %v31439_v11 = vsub.f32 %v31246_v47, %v14678_v43  ;;  %v14789_v24 = vsel %vm749_vm1, %v14739_v26, 0.0  ;;  %v14792_v10 = vsel %vm749_vm1, %v14740_v34, 0.0 }
 0x7c6   : > { %v14610_v53 = vpop.xlane.xlu1 %14609  ;;  %v14613_v62 = vpop.xlane.xlu0 %14612  ;;  %14790 = vadd.xlane.f32.xlu1 %v14789_v24  ;;  %14793 = vadd.xlane.f32.xlu0 %v14792_v10 }
 0x7c7   : > { %v14679_v57 = vmul.f32 0.03125, %v14610_v53  ;;  %v14680_v32 = vmul.f32 0.03125, %v14613_v62  ;;  %v14741_v63 = vmul.f32 %v31436_v48, %v31436_v48  ;;  %v14742_v9 = vmul.f32 %v31439_v11, %v31439_v11 }
 0x7c9   : > { %v31448_v42 = vsub.f32 %v31255_v41, %v14679_v57  ;;  %v31451_v47 = vsub.f32 %v31258_v35, %v14680_v32  ;;  %v14795_v43 = vsel %vm749_vm1, %v14741_v63, 0.0  ;;  %v14798_v26 = vsel %vm749_vm1, %v14742_v9, 0.0 }
 0x7ca   : > { %v14616_v34 = vpop.xlane.xlu1 %14615  ;;  %v14619_v24 = vpop.xlane.xlu0 %14618  ;;  %14796 = vadd.xlane.f32.xlu1 %v14795_v43  ;;  %14799 = vadd.xlane.f32.xlu0 %v14798_v26 }
 0x7cb   : > { %v14681_v10 = vmul.f32 0.03125, %v14616_v34  ;;  %v14682_v53 = vmul.f32 0.03125, %v14619_v24  ;;  %v14743_v62 = vmul.f32 %v31448_v42, %v31448_v42  ;;  %v14744_v41 = vmul.f32 %v31451_v47, %v31451_v47 }
 0x7cd   : > { %v31460_v57 = vsub.f32 %v31267_v23, %v14681_v10  ;;  %v31463_v35 = vsub.f32 %v31270_v56, %v14682_v53  ;;  %v14801_v32 = vsel %vm749_vm1, %v14743_v62, 0.0  ;;  %v14804_v63 = vsel %vm749_vm1, %v14744_v41, 0.0 }
 0x7ce   : > { %v14622_v9 = vpop.xlane.xlu1 %14621  ;;  %v14625_v43 = vpop.xlane.xlu0 %14624  ;;  %14802 = vadd.xlane.f32.xlu1 %v14801_v32  ;;  %14805 = vadd.xlane.f32.xlu0 %v14804_v63 }
 0x7cf   : > { %v14683_v26 = vmul.f32 0.03125, %v14622_v9  ;;  %v14684_v34 = vmul.f32 0.03125, %v14625_v43  ;;  %v14745_v24 = vmul.f32 %v31460_v57, %v31460_v57  ;;  %v14746_v23 = vmul.f32 %v31463_v35, %v31463_v35 }
 0x7d1   : > { %v31472_v10 = vsub.f32 %v31279_v59, %v14683_v26  ;;  %v31475_v56 = vsub.f32 %v31282_v25, %v14684_v34  ;;  %v14807_v53 = vsel %vm749_vm1, %v14745_v24, 0.0  ;;  %v14810_v62 = vsel %vm749_vm1, %v14746_v23, 0.0  ;;  %v15066_v25 = vld [vmem:[%s32673_s5 + $0x10] sm:$0xff]  ;;  %v15067_v26 = vld [vmem:[%s32673_s5 + $0x18] sm:$0xff] }
 0x7d2   : > { %v14628_v41 = vpop.xlane.xlu1 %14627  ;;  %v14631_v32 = vpop.xlane.xlu0 %14630  ;;  %14808 = vadd.xlane.f32.xlu1 %v14807_v53  ;;  %14811 = vadd.xlane.f32.xlu0 %v14810_v62  ;;  %v23429_v34 = vpack.c.bf16 %v15067_v26, %v15066_v25 }
 0x7d3   : > { %v14685_v63 = vmul.f32 0.03125, %v14628_v41  ;;  %v14686_v9 = vmul.f32 0.03125, %v14631_v32  ;;  %v14747_v43 = vmul.f32 %v31472_v10, %v31472_v10  ;;  %v14748_v59 = vmul.f32 %v31475_v56, %v31475_v56 }
 0x7d4   : > { %23430 = vmatprep.subr.bf16.mxu1 %v23429_v34 }
 0x7d5   : > { %v31490_v24 = vsub.f32 %v31291_v39, %v14685_v63  ;;  %v31493_v23 = vsub.f32 %v31294_v55, %v14686_v9  ;;  %v14813_v53 = vsel %vm749_vm1, %v14747_v43, 0.0  ;;  %v14816_v62 = vsel %vm749_vm1, %v14748_v59, 0.0  ;;  %23432 = vmatpush3.bf16.msra.mxu1 %v23429_v34 }
 0x7d6   : > { %v14634_v41 = vpop.xlane.xlu1 %14633  ;;  %v14637_v32 = vpop.xlane.xlu0 %14636  ;;  %14814 = vadd.xlane.f32.xlu1 %v14813_v53  ;;  %14817 = vadd.xlane.f32.xlu0 %v14816_v62 }
 0x7d7   : > { %v14687_v4 = vmul.f32 0.03125, %v14634_v41  ;;  %v14688_v49 = vmul.f32 0.03125, %v14637_v32  ;;  %v14749_v19 = vmul.f32 %v31490_v24, %v31490_v24  ;;  %v14750_v39 = vmul.f32 %v31493_v23, %v31493_v23 }
 0x7d9   : > { %v31502_v55 = vsub.f32 %v31303_v12, %v14687_v4  ;;  %v31505_v63 = vsub.f32 %v31306_v8, %v14688_v49  ;;  %v14819_v9 = vsel %vm749_vm1, %v14749_v19, 0.0  ;;  %v14822_v43 = vsel %vm749_vm1, %v14750_v39, 0.0 }
 0x7da   : > { %v14640_v59 = vpop.xlane.xlu1 %14639  ;;  %v14643_v25 = vpop.xlane.xlu0 %14642  ;;  %14820 = vadd.xlane.f32.xlu1 %v14819_v9  ;;  %14823 = vadd.xlane.f32.xlu0 %v14822_v43 }
 0x7db   : > { %v14689_v26 = vmul.f32 0.03125, %v14640_v59  ;;  %v14690_v53 = vmul.f32 0.03125, %v14643_v25  ;;  %v14751_v62 = vmul.f32 %v31502_v55, %v31502_v55  ;;  %v14752_v4 = vmul.f32 %v31505_v63, %v31505_v63 }
 0x7dd   : > { %v31514_v12 = vsub.f32 %v31315_v31, %v14689_v26  ;;  %v31517_v49 = vsub.f32 %v31318_v37, %v14690_v53  ;;  %v14825_v19 = vsel %vm749_vm1, %v14751_v62, 0.0  ;;  %v14828_v8 = vsel %vm749_vm1, %v14752_v4, 0.0 }
 0x7de   : > { %v14646_v34 = vpop.xlane.xlu1 %14645  ;;  %v14649_v41 = vpop.xlane.xlu0 %14648  ;;  %14826 = vadd.xlane.f32.xlu1 %v14825_v19  ;;  %14829 = vadd.xlane.f32.xlu0 %v14828_v8 }
 0x7df   : > { %v14691_v32 = vmul.f32 0.03125, %v14646_v34  ;;  %v14692_v39 = vmul.f32 0.03125, %v14649_v41  ;;  %v14753_v9 = vmul.f32 %v31514_v12, %v31514_v12  ;;  %v14754_v31 = vmul.f32 %v31517_v49, %v31517_v49 }
 0x7e1   : > { %v31526_v43 = vsub.f32 %v31327_v36, %v14691_v32  ;;  %v31529_v37 = vsub.f32 %v31330_v60, %v14692_v39  ;;  %v14831_v59 = vsel %vm749_vm1, %v14753_v9, 0.0  ;;  %v14834_v25 = vsel %vm749_vm1, %v14754_v31, 0.0 }
 0x7e2   : > { %v14652_v26 = vpop.xlane.xlu1 %14651  ;;  %v14655_v53 = vpop.xlane.xlu0 %14654  ;;  %14832 = vadd.xlane.f32.xlu1 %v14831_v59  ;;  %14835 = vadd.xlane.f32.xlu0 %v14834_v25 }
 0x7e3   : > { %v14693_v62 = vmul.f32 0.03125, %v14652_v26  ;;  %v14694_v4 = vmul.f32 0.03125, %v14655_v53  ;;  %v14755_v19 = vmul.f32 %v31526_v43, %v31526_v43  ;;  %v14756_v36 = vmul.f32 %v31529_v37, %v31529_v37 }
 0x7e5   : > { %v31538_v8 = vsub.f32 %v31339_v21, %v14693_v62  ;;  %v31541_v60 = vsub.f32 %v31342_v18, %v14694_v4  ;;  %v14837_v34 = vsel %vm749_vm1, %v14755_v19, 0.0  ;;  %v14840_v41 = vsel %vm749_vm1, %v14756_v36, 0.0 }
 0x7e6   : > { %v14658_v32 = vpop.xlane.xlu1 %14657  ;;  %14838 = vadd.xlane.f32.xlu1 %v14837_v34  ;;  %14841 = vadd.xlane.f32.xlu0 %v14840_v41  ;;  %v14661_v39 = vpop.xlane.xlu0 %14660 }
 0x7e7   : > { %v14695_v9 = vmul.f32 0.03125, %v14658_v32  ;;  %v14696_v31 = vmul.f32 0.03125, %v14661_v39  ;;  %v14757_v59 = vmul.f32 %v31538_v8, %v31538_v8  ;;  %v14758_v21 = vmul.f32 %v31541_v60, %v31541_v60  ;;  %v16260_v39 = vld [vmem:[%s32675_s7] sm:$0xff] }
 0x7e9   : > { %v31550_v25 = vsub.f32 %v31351_v29, %v14695_v9  ;;  %v31553_v18 = vsub.f32 %v31357_v54, %v14696_v31  ;;  %v14843_v26 = vsel %vm749_vm1, %v14757_v59, 0.0  ;;  %v14846_v53 = vsel %vm749_vm1, %v14758_v21, 0.0 }
 0x7ea   : > { %14844 = vadd.xlane.f32.xlu1 %v14843_v26  ;;  %v14664_v62 = vpop.xlane.xlu1 %14663  ;;  %14847 = vadd.xlane.f32.xlu0 %v14846_v53 }
 0x7eb   : > { %v14697_v4 = vmul.f32 0.03125, %v14664_v62  ;;  %v14759_v19 = vmul.f32 %v31550_v25, %v31550_v25  ;;  %v14760_v36 = vmul.f32 %v31553_v18, %v31553_v18 }
 0x7ed   : > { %v31562_v29 = vsub.f32 %v31354_v51, %v14697_v4  ;;  %v14849_v54 = vsel %vm749_vm1, %v14759_v19, 0.0  ;;  %v14852_v34 = vsel %vm749_vm1, %v14760_v36, 0.0  ;;  %v16261_v51 = vld [vmem:[%s32675_s7 + $0x8] sm:$0xff] }
 0x7ee   : > { %14850 = vadd.xlane.f32.xlu1 %v14849_v54  ;;  %14853 = vadd.xlane.f32.xlu0 %v14852_v34  ;;  %v31575_v9 = vpack.c.bf16 %v16261_v51, %v16260_v39 }
 0x7ef   : > { %v14761_v41 = vmul.f32 %v31562_v29, %v31562_v29 }
 0x7f0   : > { %23434 = vmatprep.subr.bf16.mxu1 %v31575_v9 }
 0x7f1   : > { %v14855_v32 = vsel %vm749_vm1, %v14761_v41, 0.0 }
 0x7f2   : > { %14856 = vadd.xlane.f32.xlu1 %v14855_v32 }
 0x83f   : > { %v14764_v31 = vpop.xlane.xlu0 %14763 }
 0x840   : > { %v14858_v59 = vmul.f32 0.03125, %v14764_v31 }
 0x842   : > { %v14890_v21 = vadd.f32 1e-06, %v14858_v59 }
 0x843   : > { %v14767_v26 = vpop.xlane.xlu1 %14766  ;;  %v14770_v53 = vpop.xlane.xlu0 %14769 }
 0x844   : > { %25048 = vrsqrt.f32 %v14890_v21  ;;  %v14859_v62 = vmul.f32 0.03125, %v14767_v26  ;;  %v14860_v4 = vmul.f32 0.03125, %v14770_v53  ;;  %v31581_v21 = vld [vmem:[%s32671_s3] ss:$0 sm:$0xff] }
 0x846   : > { %v14891_v19 = vadd.f32 1e-06, %v14859_v62  ;;  %v14892_v36 = vadd.f32 1e-06, %v14860_v4 }
 0x847   : > { %v14773_v54 = vpop.xlane.xlu1 %14772  ;;  %v14776_v34 = vpop.xlane.xlu0 %14775 }
 0x848   : > { %25050 = vrsqrt.f32 %v14891_v19  ;;  %v14861_v41 = vmul.f32 0.03125, %v14773_v54  ;;  %v14862_v32 = vmul.f32 0.03125, %v14776_v34 }
 0x849   : > { %25052 = vrsqrt.f32 %v14892_v36  ;;  %v31587_v36 = vld [vmem:[%s32672_s4] ss:$0 sm:$0xff] }
 0x84a   : > { %v14893_v39 = vadd.f32 1e-06, %v14861_v41  ;;  %v14894_v51 = vadd.f32 1e-06, %v14862_v32 }
 0x84b   : > { %v14779_v2 = vpop.xlane.xlu1 %14778  ;;  %v14782_v40 = vpop.xlane.xlu0 %14781 }
 0x84c   : > { %25054 = vrsqrt.f32 %v14893_v39  ;;  %v14863_v31 = vmul.f32 0.03125, %v14779_v2  ;;  %v14864_v59 = vmul.f32 0.03125, %v14782_v40 }
 0x84d   : > { %25056 = vrsqrt.f32 %v14894_v51 }
 0x84e   : > { %v25049_v30 = vpop.eup %25048  ;;  %v14895_v26 = vadd.f32 1e-06, %v14863_v31  ;;  %v14896_v53 = vadd.f32 1e-06, %v14864_v59 }
 0x84f   : > { %v14785_v62 = vpop.xlane.xlu1 %14784  ;;  %v14788_v4 = vpop.xlane.xlu0 %14787  ;;  %v14954_v19 = vmul.f32 %v25049_v30, %v31372_v38 }
 0x850   : > { %25058 = vrsqrt.f32 %v14895_v26  ;;  %v14865_v2 = vmul.f32 0.03125, %v14785_v62  ;;  %v14866_v40 = vmul.f32 0.03125, %v14788_v4  ;;  %v16263_v62 = vld [vmem:[%s32675_s7 + $0x18] sm:$0xff] }
 0x851   : > { %25060 = vrsqrt.f32 %v14896_v53  ;;  %v14993_v54 = vmul.f32 %v31581_v21, %v14954_v19  ;;  %v16262_v53 = vld [vmem:[%s32675_s7 + $0x10] sm:$0xff] }
 0x852   : > { %v25051_v34 = vpop.eup %25050  ;;  %v14897_v41 = vadd.f32 1e-06, %v14865_v2  ;;  %v14898_v32 = vadd.f32 1e-06, %v14866_v40 }
 0x853   : > { %v25053_v39 = vpop.eup %25052  ;;  %v14955_v51 = vmul.f32 %v25051_v34, %v31377_v5  ;;  %v14791_v31 = vpop.xlane.xlu1 %14790  ;;  %v15032_v30 = vadd.f32 %v31587_v36, %v14993_v54 }
 0x854   : > { %v14794_v59 = vpop.xlane.xlu0 %14793  ;;  %25062 = vrsqrt.f32 %v14897_v41  ;;  %v14867_v38 = vmul.f32 0.03125, %v14791_v31  ;;  %v14956_v26 = vmul.f32 %v25053_v39, %v31380_v7  ;;  %v23437_v31 = vpack.c.bf16 %v16263_v62, %v16262_v53 }
 0x855   : > { %v14868_v22 = vmul.f32 0.03125, %v14794_v59  ;;  %v14994_v4 = vmul.f32 %v31581_v21, %v14955_v51  ;;  %25064 = vrsqrt.f32 %v14898_v32  ;;  %22905 = vmatprep.mubr.msk.f32.mxu1 %vm749_vm1, %v15032_v30 }
 0x856   : > { %v25055_v5 = vpop.eup %25054  ;;  %v14899_v19 = vadd.f32 1e-06, %v14867_v38  ;;  %v14995_v40 = vmul.f32 %v31581_v21, %v14956_v26 }
 0x857   : > { %v14900_v2 = vadd.f32 1e-06, %v14868_v22  ;;  %v25057_v54 = vpop.eup %25056  ;;  %v15033_v7 = vadd.f32 %v31587_v36, %v14994_v4  ;;  %v14797_v34 = vpop.xlane.xlu1 %14796  ;;  %v14957_v39 = vmul.f32 %v25055_v5, %v31388_v20 }
 0x858   : > { %v14800_v41 = vpop.xlane.xlu0 %14799  ;;  %25066 = vrsqrt.f32 %v14899_v19  ;;  %v14869_v59 = vmul.f32 0.03125, %v14797_v34  ;;  %v15034_v32 = vadd.f32 %v31587_v36, %v14995_v40  ;;  %v14958_v51 = vmul.f32 %v25057_v54, %v31391_v1 }
 0x859   : > { %v14870_v28 = vmul.f32 0.03125, %v14800_v41  ;;  %25068 = vrsqrt.f32 %v14900_v2  ;;  %22906 = vmatmul.mubr.msk.f32.vlgmr.msra.gmra.mrb[32].mxu1 %vm749_vm1, %v15033_v7  ;;  %v14996_v22 = vmul.f32 %v31581_v21, %v14957_v39 }
 0x85a   : > { %v25059_v30 = vpop.eup %25058  ;;  %v14901_v38 = vadd.f32 1e-06, %v14869_v59  ;;  %22908 = vmatprep.mubr.msk.f32.mxu1 %vm749_vm1, %v15034_v32  ;;  %23436 = vmatpush3.bf16.msra.mxu1 %v31575_v9  ;;  %v14997_v5 = vmul.f32 %v31581_v21, %v14958_v51 }
 0x85b   : > { %v14902_v26 = vadd.f32 1e-06, %v14870_v28  ;;  %v25061_v20 = vpop.eup %25060  ;;  %v14803_v53 = vpop.xlane.xlu1 %14802  ;;  %v15035_v4 = vadd.f32 %v31587_v36, %v14996_v22  ;;  %v14959_v19 = vmul.f32 %v25059_v30, %v31400_v17  ;;  %23438 = vmatprep.subr.bf16.mxu1 %v23437_v31 }
 0x85c   : > { %v14806_v62 = vpop.xlane.xlu0 %14805  ;;  %25070 = vrsqrt.f32 %v14901_v38  ;;  %v14871_v2 = vmul.f32 0.03125, %v14803_v53  ;;  %v14960_v40 = vmul.f32 %v25061_v20, %v31403_v6  ;;  %v15036_v28 = vadd.f32 %v31587_v36, %v14997_v5 }
 0x85d   : > { %v14872_v1 = vmul.f32 0.03125, %v14806_v62  ;;  %25072 = vrsqrt.f32 %v14902_v26  ;;  %22909 = vmatmul.mubr.msk.f32.gmra.mrb[34].mxu1 %vm749_vm1, %v15035_v4  ;;  %v14998_v9 = vmul.f32 %v31581_v21, %v14959_v19 }
 0x85e   : > { %v25063_v54 = vpop.eup %25062  ;;  %v14903_v7 = vadd.f32 1e-06, %v14871_v2  ;;  %v14999_v41 = vmul.f32 %v31581_v21, %v14960_v40  ;;  %23440 = vmatpush3.bf16.msra.mxu1 %v23437_v31  ;;  %22911 = vmatprep.mubr.msk.f32.mxu1 %vm749_vm1, %v15036_v28 }
 0x85f   : > { %v14904_v34 = vadd.f32 1e-06, %v14872_v1  ;;  %v25065_v17 = vpop.eup %25064  ;;  %v14809_v39 = vpop.xlane.xlu1 %14808  ;;  %v15037_v6 = vadd.f32 %v31587_v36, %v14998_v9  ;;  %v14961_v32 = vmul.f32 %v25063_v54, %v31412_v33 }
 0x860   : > { %v14812_v59 = vpop.xlane.xlu0 %14811  ;;  %25074 = vrsqrt.f32 %v14903_v7  ;;  %v14873_v22 = vmul.f32 0.03125, %v14809_v39  ;;  %v15038_v30 = vadd.f32 %v31587_v36, %v14999_v41  ;;  %v14962_v31 = vmul.f32 %v25065_v17, %v31415_v46 }
 0x861   : > { %v14874_v51 = vmul.f32 0.03125, %v14812_v59  ;;  %25076 = vrsqrt.f32 %v14904_v34  ;;  %22912 = vmatmul.mubr.msk.f32.gmra.mrb[36].mxu1 %vm749_vm1, %v15037_v6  ;;  %v15000_v38 = vmul.f32 %v31581_v21, %v14961_v32 }
 0x862   : > { %v25067_v26 = vpop.eup %25066  ;;  %v14905_v20 = vadd.f32 1e-06, %v14873_v22  ;;  %22914 = vmatprep.mubr.msk.f32.mxu1 %vm749_vm1, %v15038_v30  ;;  %v15001_v19 = vmul.f32 %v31581_v21, %v14962_v31 }
 0x863   : > { %v14906_v53 = vadd.f32 1e-06, %v14874_v51  ;;  %v25069_v62 = vpop.eup %25068  ;;  %v14815_v4 = vpop.xlane.xlu1 %14814  ;;  %v15039_v5 = vadd.f32 %v31587_v36, %v15000_v38  ;;  %v14963_v2 = vmul.f32 %v25067_v26, %v31424_v52 }
 0x864   : > { %v14818_v33 = vpop.xlane.xlu0 %14817  ;;  %25078 = vrsqrt.f32 %v14905_v20  ;;  %v14875_v1 = vmul.f32 0.03125, %v14815_v4  ;;  %v14964_v28 = vmul.f32 %v25069_v62, %v31427_v61  ;;  %v15040_v46 = vadd.f32 %v31587_v36, %v15001_v19 }
 0x865   : > { %v14876_v40 = vmul.f32 0.03125, %v14818_v33  ;;  %25080 = vrsqrt.f32 %v14906_v53  ;;  %22915 = vmatmul.mubr.msk.f32.gmra.mrb[38].mxu1 %vm749_vm1, %v15039_v5  ;;  %v15002_v9 = vmul.f32 %v31581_v21, %v14963_v2 }
 0x866   : > { %v25071_v54 = vpop.eup %25070  ;;  %v14907_v7 = vadd.f32 1e-06, %v14875_v1  ;;  %v15003_v41 = vmul.f32 %v31581_v21, %v14964_v28  ;;  %22917 = vmatprep.mubr.msk.f32.mxu1 %vm749_vm1, %v15040_v46 }
 0x867   : > { %v14908_v34 = vadd.f32 1e-06, %v14876_v40  ;;  %v25073_v17 = vpop.eup %25072  ;;  %v14821_v52 = vpop.xlane.xlu1 %14820  ;;  %v15041_v59 = vadd.f32 %v31587_v36, %v15002_v9  ;;  %v14965_v61 = vmul.f32 %v25071_v54, %v31436_v48 }
 0x868   : > { %v14824_v39 = vpop.xlane.xlu0 %14823  ;;  %25082 = vrsqrt.f32 %v14907_v7  ;;  %v14877_v6 = vmul.f32 0.03125, %v14821_v52  ;;  %v15042_v22 = vadd.f32 %v31587_v36, %v15003_v41  ;;  %v14966_v30 = vmul.f32 %v25073_v17, %v31439_v11 }
 0x869   : > { %v14878_v32 = vmul.f32 0.03125, %v14824_v39  ;;  %25084 = vrsqrt.f32 %v14908_v34  ;;  %22918 = vmatmul.mubr.msk.f32.gmra.mrb[40].mxu1 %vm749_vm1, %v15041_v59  ;;  %v15004_v51 = vmul.f32 %v31581_v21, %v14965_v61 }
 0x86a   : > { %v25075_v38 = vpop.eup %25074  ;;  %v14909_v31 = vadd.f32 1e-06, %v14877_v6  ;;  %22920 = vmatprep.mubr.msk.f32.mxu1 %vm749_vm1, %v15042_v22  ;;  %v15005_v4 = vmul.f32 %v31581_v21, %v14966_v30 }
 0x86b   : > { %v14910_v26 = vadd.f32 1e-06, %v14878_v32  ;;  %v25077_v20 = vpop.eup %25076  ;;  %v14827_v53 = vpop.xlane.xlu1 %14826  ;;  %v15043_v62 = vadd.f32 %v31587_v36, %v15004_v51  ;;  %v14967_v33 = vmul.f32 %v25075_v38, %v31448_v42 }
 0x86c   : > { %v14830_v48 = vpop.xlane.xlu0 %14829  ;;  %25086 = vrsqrt.f32 %v14909_v31  ;;  %v14879_v5 = vmul.f32 0.03125, %v14827_v53  ;;  %v14968_v2 = vmul.f32 %v25077_v20, %v31451_v47  ;;  %v15044_v11 = vadd.f32 %v31587_v36, %v15005_v4 }
 0x86d   : > { %v14880_v19 = vmul.f32 0.03125, %v14830_v48  ;;  %25088 = vrsqrt.f32 %v14910_v26  ;;  %22921 = vmatmul.mubr.msk.f32.gmra.mrb[42].mxu1 %vm749_vm1, %v15043_v62  ;;  %v15006_v1 = vmul.f32 %v31581_v21, %v14967_v33 }
 0x86e   : > { %v25079_v40 = vpop.eup %25078  ;;  %v14911_v28 = vadd.f32 1e-06, %v14879_v5  ;;  %v15007_v9 = vmul.f32 %v31581_v21, %v14968_v2  ;;  %22923 = vmatprep.mubr.msk.f32.mxu1 %vm749_vm1, %v15044_v11 }
 0x86f   : > { %v14912_v46 = vadd.f32 1e-06, %v14880_v19  ;;  %v25081_v54 = vpop.eup %25080  ;;  %v14833_v42 = vpop.xlane.xlu1 %14832  ;;  %v15045_v34 = vadd.f32 %v31587_v36, %v15006_v1  ;;  %v14969_v47 = vmul.f32 %v25079_v40, %v31460_v57 }
 0x870   : > { %v14836_v7 = vpop.xlane.xlu0 %14835  ;;  %25090 = vrsqrt.f32 %v14911_v28  ;;  %v14881_v41 = vmul.f32 0.03125, %v14833_v42  ;;  %v15046_v52 = vadd.f32 %v31587_v36, %v15007_v9  ;;  %v14970_v59 = vmul.f32 %v25081_v54, %v31463_v35 }
 0x871   : > { %v14882_v17 = vmul.f32 0.03125, %v14836_v7  ;;  %25092 = vrsqrt.f32 %v14912_v46  ;;  %22924 = vmatmul.mubr.msk.f32.gmra.mrb[44].mxu1 %vm749_vm1, %v15045_v34  ;;  %v15008_v39 = vmul.f32 %v31581_v21, %v14969_v47 }
 0x872   : > { %v25083_v61 = vpop.eup %25082  ;;  %v14913_v6 = vadd.f32 1e-06, %v14881_v41  ;;  %22926 = vmatprep.mubr.msk.f32.mxu1 %vm749_vm1, %v15046_v52  ;;  %v15009_v38 = vmul.f32 %v31581_v21, %v14970_v59 }
 0x873   : > { %v14914_v32 = vadd.f32 1e-06, %v14882_v17  ;;  %v25085_v22 = vpop.eup %25084  ;;  %v14839_v51 = vpop.xlane.xlu1 %14838  ;;  %v15047_v30 = vadd.f32 %v31587_v36, %v15008_v39  ;;  %v14971_v31 = vmul.f32 %v25083_v61, %v31472_v10 }
 0x874   : > { %v14842_v57 = vpop.xlane.xlu0 %14841  ;;  %25094 = vrsqrt.f32 %v14913_v6  ;;  %v14883_v26 = vmul.f32 0.03125, %v14839_v51  ;;  %v14972_v53 = vmul.f32 %v25085_v22, %v31475_v56  ;;  %v15048_v35 = vadd.f32 %v31587_v36, %v15009_v38 }
 0x875   : > { %v14884_v20 = vmul.f32 0.03125, %v14842_v57  ;;  %25096 = vrsqrt.f32 %v14914_v32  ;;  %22927 = vmatmul.mubr.msk.f32.gmra.mrb[46].mxu1 %vm749_vm1, %v15047_v30  ;;  %v15010_v48 = vmul.f32 %v31581_v21, %v14971_v31 }
 0x876   : > { %v25087_v62 = vpop.eup %25086  ;;  %v14915_v4 = vadd.f32 1e-06, %v14883_v26  ;;  %v15011_v5 = vmul.f32 %v31581_v21, %v14972_v53  ;;  %22929 = vmatprep.mubr.msk.f32.mxu1 %vm749_vm1, %v15048_v35 }
 0x877   : > { %v14916_v33 = vadd.f32 1e-06, %v14884_v20  ;;  %v25089_v19 = vpop.eup %25088  ;;  %v14845_v10 = vpop.xlane.xlu1 %14844  ;;  %v15049_v11 = vadd.f32 %v31587_v36, %v15010_v48  ;;  %v14973_v56 = vmul.f32 %v25087_v62, %v31490_v24 }
 0x878   : > { %v14848_v2 = vpop.xlane.xlu0 %14847  ;;  %25098 = vrsqrt.f32 %v14915_v4  ;;  %v14885_v1 = vmul.f32 0.03125, %v14845_v10  ;;  %v15050_v28 = vadd.f32 %v31587_v36, %v15011_v5  ;;  %v14974_v9 = vmul.f32 %v25089_v19, %v31493_v23 }
 0x879   : > { %v14886_v40 = vmul.f32 0.03125, %v14848_v2  ;;  %25100 = vrsqrt.f32 %v14916_v33  ;;  %22930 = vmatmul.mubr.msk.f32.gmra.mrb[48].mxu1 %vm749_vm1, %v15049_v11  ;;  %v15012_v46 = vmul.f32 %v31581_v21, %v14973_v56 }
 0x87a   : > { %v25091_v54 = vpop.eup %25090  ;;  %v14917_v42 = vadd.f32 1e-06, %v14885_v1  ;;  %22932 = vmatprep.mubr.msk.f32.mxu1 %vm749_vm1, %v15050_v28  ;;  %v15013_v17 = vmul.f32 %v31581_v21, %v14974_v9 }
 0x87b   : > { %v14918_v7 = vadd.f32 1e-06, %v14886_v40  ;;  %v25093_v34 = vpop.eup %25092  ;;  %v14851_v47 = vpop.xlane.xlu1 %14850  ;;  %v15051_v41 = vadd.f32 %v31587_v36, %v15012_v46  ;;  %v14975_v52 = vmul.f32 %v25091_v54, %v31502_v55 }
 0x87c   : > { %v14854_v24 = vpop.xlane.xlu0 %14853  ;;  %25102 = vrsqrt.f32 %v14917_v42  ;;  %v14887_v39 = vmul.f32 0.03125, %v14851_v47  ;;  %v14976_v61 = vmul.f32 %v25093_v34, %v31505_v63  ;;  %v15052_v23 = vadd.f32 %v31587_v36, %v15013_v17 }
 0x87d   : > { %v14888_v59 = vmul.f32 0.03125, %v14854_v24  ;;  %25104 = vrsqrt.f32 %v14918_v7  ;;  %22933 = vmatmul.mubr.msk.f32.gmra.mrb[50].mxu1 %vm749_vm1, %v15051_v41  ;;  %v15014_v6 = vmul.f32 %v31581_v21, %v14975_v52  ;;  %v16264_v52 = vld [vmem:[%s32675_s7 + $0x20] sm:$0xff] }
 0x87e   : > { %v25095_v32 = vpop.eup %25094  ;;  %v14919_v22 = vadd.f32 1e-06, %v14887_v39  ;;  %v15015_v57 = vmul.f32 %v31581_v21, %v14976_v61  ;;  %22935 = vmatprep.mubr.msk.f32.mxu1 %vm749_vm1, %v15052_v23  ;;  %v16268_v61 = vld [vmem:[%s32675_s7 + $0x40] sm:$0xff]  ;;  %v16269_v23 = vld [vmem:[%s32675_s7 + $0x48] sm:$0xff] }
 0x87f   : > { %v14920_v51 = vadd.f32 1e-06, %v14888_v59  ;;  %v25097_v30 = vpop.eup %25096  ;;  %v14857_v55 = vpop.xlane.xlu1 %14856  ;;  %v15053_v38 = vadd.f32 %v31587_v36, %v15014_v6  ;;  %v14977_v63 = vmul.f32 %v25095_v32, %v31514_v12  ;;  %v23449_v6 = vpack.c.bf16 %v16269_v23, %v16268_v61  ;;  %v16270_v32 = vld [vmem:[%s32675_s7 + $0x50] sm:$0xff] }
 0x880   : > { %25106 = vrsqrt.f32 %v14919_v22  ;;  %v14889_v31 = vmul.f32 0.03125, %v14857_v55  ;;  %v15054_v26 = vadd.f32 %v31587_v36, %v15015_v57  ;;  %v14978_v20 = vmul.f32 %v25097_v30, %v31517_v49  ;;  %v16271_v22 = vld [vmem:[%s32675_s7 + $0x58] sm:$0xff]  ;;  %v16272_v57 = vld [vmem:[%s32675_s7 + $0x60] sm:$0xff]  ;;  %v16273_v30 = vld [vmem:[%s32675_s7 + $0x68] sm:$0xff] }
 0x881   : > { %25108 = vrsqrt.f32 %v14920_v51  ;;  %22936 = vmatmul.mubr.msk.f32.gmra.mrb[52].mxu1 %vm749_vm1, %v15053_v38  ;;  %v15016_v53 = vmul.f32 %v31581_v21, %v14977_v63  ;;  %v23453_v51 = vpack.c.bf16 %v16271_v22, %v16270_v32  ;;  %v23457_v55 = vpack.c.bf16 %v16273_v30, %v16272_v57  ;;  %v16274_v38 = vld [vmem:[%s32675_s7 + $0x70] sm:$0xff]  ;;  %v16275_v63 = vld [vmem:[%s32675_s7 + $0x78] sm:$0xff] }
 0x882   : > { %v25099_v35 = vpop.eup %25098  ;;  %v14921_v48 = vadd.f32 1e-06, %v14889_v31  ;;  %22938 = vmatprep.mubr.msk.f32.mxu1 %vm749_vm1, %v15054_v26  ;;  %v15017_v62 = vmul.f32 %v31581_v21, %v14978_v20  ;;  %v23461_v31 = vpack.c.bf16 %v16275_v63, %v16274_v38  ;;  %v31762_v26 = vld [vmem:[%s32674_s6] ss:$0 sm:$0xff] }
 0x883   : > { %v25101_v4 = vpop.eup %25100  ;;  %v15055_v12 = vadd.f32 %v31587_v36, %v15016_v53  ;;  %v14979_v33 = vmul.f32 %v25099_v35, %v31526_v43 }
 0x884   : > { %25110 = vrsqrt.f32 %v14921_v48  ;;  %v15056_v5 = vadd.f32 %v31587_v36, %v15017_v62  ;;  %v14980_v49 = vmul.f32 %v25101_v4, %v31529_v37 }
 0x885   : > { %22939 = vmatmul.mubr.msk.f32.gmra.mrb[54].mxu1 %vm749_vm1, %v15055_v12  ;;  %v15018_v19 = vmul.f32 %v31581_v21, %v14979_v33 }
 0x886   : > { %v25103_v10 = vpop.eup %25102  ;;  %22941 = vmatprep.mubr.msk.f32.mxu1 %vm749_vm1, %v15056_v5  ;;  %v15019_v2 = vmul.f32 %v31581_v21, %v14980_v49 }
 0x887   : > { %v25105_v11 = vpop.eup %25104  ;;  %v15057_v56 = vadd.f32 %v31587_v36, %v15018_v19  ;;  %v14981_v1 = vmul.f32 %v25103_v10, %v31538_v8 }
 0x888   : > { %v15058_v43 = vadd.f32 %v31587_v36, %v15019_v2  ;;  %v14982_v40 = vmul.f32 %v25105_v11, %v31541_v60 }
 0x889   : > { %22942 = vmatmul.mubr.msk.f32.gmra.mrb[56].mxu1 %vm749_vm1, %v15057_v56  ;;  %v15020_v37 = vmul.f32 %v31581_v21, %v14981_v1 }
 0x88a   : > { %v25107_v28 = vpop.eup %25106  ;;  %22944 = vmatprep.mubr.msk.f32.mxu1 %vm749_vm1, %v15058_v43  ;;  %v15021_v46 = vmul.f32 %v31581_v21, %v14982_v40 }
 0x88b   : > { %v25109_v9 = vpop.eup %25108  ;;  %v15059_v54 = vadd.f32 %v31587_v36, %v15020_v37  ;;  %v14983_v42 = vmul.f32 %v25107_v28, %v31550_v25 }
 0x88c   : > { %v15060_v8 = vadd.f32 %v31587_v36, %v15021_v46  ;;  %v14984_v7 = vmul.f32 %v25109_v9, %v31553_v18 }
 0x88d   : > { %22945 = vmatmul.mubr.msk.f32.gmra.mrb[58].mxu1 %vm749_vm1, %v15059_v54  ;;  %v15022_v60 = vmul.f32 %v31581_v21, %v14983_v42 }
 0x88e   : > { %v25111_v34 = vpop.eup %25110  ;;  %22947 = vmatprep.mubr.msk.f32.mxu1 %vm749_vm1, %v15060_v8  ;;  %v15023_v47 = vmul.f32 %v31581_v21, %v14984_v7 }
 0x88f   : > { %v15061_v24 = vadd.f32 %v31587_v36, %v15022_v60  ;;  %v14985_v41 = vmul.f32 %v25111_v34, %v31562_v29  ;;  %v16265_v29 = vld [vmem:[%s32675_s7 + $0x28] sm:$0xff] }
 0x890   : > { %v15062_v17 = vadd.f32 %v31587_v36, %v15023_v47  ;;  %v23441_v39 = vpack.c.bf16 %v16265_v29, %v16264_v52  ;;  %v33397_v52 = vmov -1.0  }
 0x891   : > { %22948 = vmatmul.mubr.msk.f32.gmra.mrb[60].mxu1 %vm749_vm1, %v15061_v24  ;;  %v15024_v25 = vmul.f32 %v31581_v21, %v14985_v41  ;;  %v16266_v21 = vld [vmem:[%s32675_s7 + $0x30] sm:$0xff] }
 0x892   : > { %22950 = vmatprep.mubr.msk.f32.mxu1 %vm749_vm1, %v15062_v17  ;;  %23442 = vmatprep.subr.bf16.mxu1 %v23441_v39 }
 0x893   : > { %v15063_v18 = vadd.f32 %v31587_v36, %v15024_v25  ;;  %23444 = vmatpush3.bf16.msra.mxu1 %v23441_v39  ;;  %v16267_v36 = vld [vmem:[%s32675_s7 + $0x38] sm:$0xff] }
 0x894   : > { %v23445_v59 = vpack.c.bf16 %v16267_v36, %v16266_v21 }
 0x895   : > { %22951 = vmatmul.mubr.msk.f32.gmra.mrb[62].mxu1 %vm749_vm1, %v15063_v18 }
 0x896   : > { %23446 = vmatprep.subr.bf16.mxu1 %v23445_v59 }
 0x897   : > { %23448 = vmatpush3.bf16.msra.mxu1 %v23445_v59 }
 0x898   : > { %23450 = vmatprep.subr.bf16.mxu1 %v23449_v6 }
 0x89b   : > { %23452 = vmatpush3.bf16.msra.mxu1 %v23449_v6 }
 0x89c   : > { %23454 = vmatprep.subr.bf16.mxu1 %v23453_v51 }
 0x89f   : > { %23456 = vmatpush3.bf16.msra.mxu1 %v23453_v51 }
 0x8a0   : > { %23458 = vmatprep.subr.bf16.mxu1 %v23457_v55 }
 0x8a3   : > { %23460 = vmatpush3.bf16.msra.mxu1 %v23457_v55 }
 0x8a4   : > { %23462 = vmatprep.subr.bf16.mxu1 %v23461_v31 }
 0x8a7   : > { %23464 = vmatpush3.bf16.msra.mxu1 %v23461_v31 }
 0x92c   : > { %v22907_v20 = vpop.f32.mrb[32].mxu1 }
 0x92d   : > { %v15243_v53 = vadd.f32 %v22907_v20, %v31762_v26  ;;  %v15237_v35 = vpop.f32.mrb[33].mxu1 }
 0x92e   : > { %v15238_v48 = vadd.f32 %v31762_v26, %v15237_v35 }
 0x92f   : > { %v15429_v62 = vmul.f32 0.70710677, %v15243_v53  ;;  %v31768_v7 = vmul.f32 0.5, %v15243_v53 }
 0x930   : > { %v15428_v4 = vmul.f32 0.70710677, %v15238_v48  ;;  %v22910_v12 = vpop.f32.mrb[34].mxu1  ;;  %v31771_v41 = vmul.f32 0.5, %v15238_v48 }
 0x931   : > { %v15525_v33 = vand.u32 2147483647, %v15429_v62  ;;  %v15253_v5 = vadd.f32 %v22910_v12, %v31762_v26  ;;  %v15247_v49 = vpop.f32.mrb[35].mxu1  ;;  %vm15461_vm7 = vcmp.ge.f32.partialorder %v15429_v62, 0.0 }
 0x932   : > { %v15524_v19 = vand.u32 2147483647, %v15428_v4  ;;  %v15248_v10 = vadd.f32 %v31762_v26, %v15247_v49  ;;  %vm15460_vm8 = vcmp.ge.f32.partialorder %v15428_v4, 0.0  ;;  %v31775_v29 = vsel %vm15461_vm7, 1.0, %v33397_v52 }
 0x933   : > { %v15557_v2 = vmul.f32 0.3275911, %v15525_v33  ;;  %v15973_v11 = vsub.f32 0.0, %v15525_v33  ;;  %v15431_v1 = vmul.f32 0.70710677, %v15253_v5  ;;  %v31778_v21 = vsel %vm15460_vm8, 1.0, %v33397_v52 }
 0x934   : > { %v15972_v56 = vsub.f32 0.0, %v15524_v19  ;;  %v15430_v40 = vmul.f32 0.70710677, %v15248_v10  ;;  %v22913_v37 = vpop.f32.mrb[36].mxu1  ;;  %v15556_v28 = vmul.f32 0.3275911, %v15524_v19 }
 0x935   : > { %v15589_v43 = vadd.f32 1.0, %v15557_v2  ;;  %v15527_v46 = vand.u32 2147483647, %v15431_v1  ;;  %v15257_v9 = vpop.f32.mrb[37].mxu1  ;;  %v16005_v54 = vmul.f32 %v15973_v11, %v15525_v33  ;;  %v15263_v47 = vadd.f32 %v22913_v37, %v31762_v26 }
 0x936   : > { %v16004_v42 = vmul.f32 %v15972_v56, %v15524_v19  ;;  %v15526_v34 = vand.u32 2147483647, %v15430_v40  ;;  %v15588_v17 = vadd.f32 1.0, %v15556_v28  ;;  %v15258_v18 = vadd.f32 %v31762_v26, %v15257_v9 }
 0x937   : > { %25112 = vrcp.f32 %v15589_v43  ;;  %v15975_v60 = vsub.f32 0.0, %v15527_v46  ;;  %v15559_v25 = vmul.f32 0.3275911, %v15527_v46  ;;  %v16038_v39 = vmul.f32 1.442695, %v16005_v54 }
 0x938   : > { %v22916_v8 = vpop.f32.mrb[38].mxu1  ;;  %v15433_v36 = vmul.f32 0.70710677, %v15263_v47  ;;  %v16036_v59 = vmul.f32 1.442695, %v16004_v42  ;;  %vm15463_vm9 = vcmp.ge.f32.partialorder %v15431_v1, 0.0  ;;  %25114 = vrcp.f32 %v15588_v17 }
 0x939   : > { %v15267_v24 = vpop.f32.mrb[39].mxu1  ;;  %v15432_v61 = vmul.f32 0.70710677, %v15258_v18  ;;  %v16007_v6 = vmul.f32 %v15975_v60, %v15527_v46  ;;  %vm15462_vm10 = vcmp.ge.f32.partialorder %v15430_v40, 0.0  ;;  %v15974_v32 = vsub.f32 0.0, %v15526_v34 }
 0x93a   : > { %v15529_v22 = vand.u32 2147483647, %v15433_v36  ;;  %v31780_v57 = vmul.f32 0.5, %v15253_v5  ;;  %v15591_v30 = vadd.f32 1.0, %v15559_v25  ;;  %v31782_v55 = vmul.f32 0.5, %v15248_v10 }
 0x93b   : > { %25116 = vpow2.f32 %v16038_v39  ;;  %v31785_v38 = vsel %vm15463_vm9, 1.0, %v33397_v52  ;;  %v15558_v63 = vmul.f32 0.3275911, %v15526_v34  ;;  %v15528_v31 = vand.u32 2147483647, %v15432_v61 }
 0x93c   : > { %v22919_v23 = vpop.f32.mrb[40].mxu1  ;;  %25118 = vpow2.f32 %v16036_v59  ;;  %v31788_v20 = vsel %vm15462_vm10, 1.0, %v33397_v52  ;;  %v31790_v53 = vmul.f32 0.5, %v15263_v47  ;;  %v15273_v35 = vadd.f32 %v22916_v8, %v31762_v26 }
 0x93d   : > { %v15277_v51 = vpop.f32.mrb[41].mxu1  ;;  %v16042_v4 = vmul.f32 1.442695, %v16007_v6  ;;  %v16006_v12 = vmul.f32 %v15974_v32, %v15526_v34  ;;  %v15977_v33 = vsub.f32 0.0, %v15529_v22  ;;  %v15268_v5 = vadd.f32 %v31762_v26, %v15267_v24 }
 0x93e   : > { %34536 = vst [vmem:[#allocation111_spill] sm:$0xff] %v31790_v53  ;;  %25120 = vrcp.f32 %v15591_v30  ;;  %v15561_v10 = vmul.f32 0.3275911, %v15529_v22  ;;  %v31799_v2 = vmul.f32 0.5, %v15258_v18  ;;  %v15590_v11 = vadd.f32 1.0, %v15558_v63 }
 0x93f   : > { %vm15465_vm11 = vcmp.ge.f32.partialorder %v15433_v36, 0.0  ;;  %v15560_v56 = vmul.f32 0.3275911, %v15528_v31  ;;  %v15435_v1 = vmul.f32 0.70710677, %v15273_v35  ;;  %vm15464_vm12 = vcmp.ge.f32.partialorder %v15432_v61, 0.0 }
 0x940   : > { %v22922_v48 = vpop.f32.mrb[42].mxu1  ;;  %34537 = vst [vmem:[#allocation113_spill] sm:$0xff] %v31799_v2  ;;  %v15976_v40 = vsub.f32 0.0, %v15528_v31  ;;  %v15434_v37 = vmul.f32 0.70710677, %v15268_v5  ;;  %v16009_v46 = vmul.f32 %v15977_v33, %v15529_v22  ;;  %v15283_v54 = vadd.f32 %v22919_v23, %v31762_v26 }
 0x941   : > { %v31793_v62 = vpop.eup %25112  ;;  %v31796_v49 = vpop.f32.mrb[43].mxu1  ;;  %v16040_v28 = vmul.f32 1.442695, %v16006_v12  ;;  %v15531_v9 = vand.u32 2147483647, %v15435_v1  ;;  %25122 = vpow2.f32 %v16042_v4  ;;  %v31806_v60 = vsel %vm15465_vm11, 1.0, %v33397_v52 }
 0x942   : > { %v15685_v19 = vmul.f32 1.0614054, %v31793_v62  ;;  %34538 = vst [vmem:[#allocation9_spill] sm:$0xff] %v31806_v60  ;;  %v15593_v34 = vadd.f32 1.0, %v15561_v10  ;;  %25124 = vrcp.f32 %v15590_v11  ;;  %v31811_v24 = vsel %vm15464_vm12, 1.0, %v33397_v52  ;;  %v31813_v18 = vpop.eup %25114 }
 0x943   : > { %v15592_v17 = vadd.f32 1.0, %v15560_v56  ;;  %v15530_v25 = vand.u32 2147483647, %v15434_v37  ;;  %v16008_v36 = vmul.f32 %v15976_v40, %v15528_v31  ;;  %v15979_v59 = vsub.f32 0.0, %v15531_v9 }
 0x944   : > { %v15717_v43 = vadd.f32 -1.4531521, %v15685_v19  ;;  %v31802_v42 = vpop.f32.mrb[44].mxu1  ;;  %v15437_v61 = vmul.f32 0.70710677, %v15283_v54  ;;  %25126 = vpow2.f32 %v16040_v28  ;;  %v31817_v22 = vmul.f32 0.5, %v15273_v35 }
 0x945   : > { %v31808_v47 = vpop.f32.mrb[45].mxu1  ;;  %v25117_v6 = vpop.eup %25116  ;;  %v16046_v32 = vmul.f32 1.442695, %v16009_v46  ;;  %v15278_v30 = vadd.f32 %v31762_v26, %v15277_v51  ;;  %25128 = vrcp.f32 %v15593_v34  ;;  %vm15467_vm13 = vcmp.ge.f32.partialorder %v15435_v1, 0.0 }
 0x946   : > { %v15749_v8 = vmul.f32 %v31793_v62, %v15717_v43  ;;  %34539 = vst [vmem:[#allocation11_spill] sm:$0xff] %v31817_v22  ;;  %v31822_v4 = vpop.eup %25118  ;;  %v15533_v31 = vand.u32 2147483647, %v15437_v61  ;;  %v15563_v33 = vmul.f32 0.3275911, %v15531_v9  ;;  %v31825_v19 = vmul.f32 0.5, %v15268_v5 }
 0x947   : > { %vm15466_vm14 = vcmp.ge.f32.partialorder %v15434_v37, 0.0  ;;  %v15978_v10 = vsub.f32 0.0, %v15530_v25  ;;  %25130 = vrcp.f32 %v15592_v17  ;;  %v16044_v56 = vmul.f32 1.442695, %v16008_v36 }
 0x948   : > { %v15781_v39 = vadd.f32 1.4214138, %v15749_v8  ;;  %v31815_v23 = vpop.f32.mrb[46].mxu1  ;;  %34540 = vst [vmem:[#allocation13_spill] sm:$0xff] %v31825_v19  ;;  %v31827_v11 = vpop.eup %25120  ;;  %v16011_v51 = vmul.f32 %v15979_v59, %v15531_v9  ;;  %25132 = vpow2.f32 %v16046_v32  ;;  %v31830_v43 = vsel %vm15467_vm13, 1.0, %v33397_v52 }
 0x949   : > { %v31820_v63 = vpop.f32.mrb[47].mxu1  ;;  %34541 = vst [vmem:[#allocation16_spill] sm:$0xff] %v31830_v43  ;;  %v15436_v40 = vmul.f32 0.70710677, %v15278_v30  ;;  %v15293_v28 = vadd.f32 %v22922_v48, %v31762_v26  ;;  %v31837_v37 = vsel %vm15466_vm14, 1.0, %v33397_v52  ;;  %v15981_v8 = vsub.f32 0.0, %v15533_v31 }
 0x94a   : > { %v15813_v12 = vmul.f32 %v31793_v62, %v15781_v39  ;;  %34542 = vst [vmem:[#allocation126_spill] sm:$0xff] %v31837_v37  ;;  %v15562_v46 = vmul.f32 0.3275911, %v15530_v25  ;;  %v15595_v17 = vadd.f32 1.0, %v15563_v33  ;;  %v16010_v9 = vmul.f32 %v15978_v10, %v15530_v25 }
 0x94b   : > { %v31841_v39 = vmul.f32 0.5, %v15283_v54  ;;  %v15532_v36 = vand.u32 2147483647, %v15436_v40  ;;  %v31843_v59 = vpop.eup %25122  ;;  %25134 = vpow2.f32 %v16044_v56  ;;  %v16050_v48 = vmul.f32 1.442695, %v16011_v51 }
 0x94c   : > { %v15845_v35 = vadd.f32 -0.28449672, %v15813_v12  ;;  %v31833_v1 = vpop.f32.mrb[48].mxu1  ;;  %vm15469_vm15 = vcmp.ge.f32.partialorder %v15437_v61, 0.0  ;;  %v15565_v52 = vmul.f32 0.3275911, %v15533_v31  ;;  %v15288_v33 = vadd.f32 %v31762_v26, %v31796_v49 }
 0x94d   : > { %v31839_v34 = vpop.f32.mrb[49].mxu1  ;;  %34543 = vst [vmem:[#allocation127_spill] sm:$0xff] %v31841_v39  ;;  %v15980_v45 = vsub.f32 0.0, %v15532_v36  ;;  %v15439_v27 = vmul.f32 0.70710677, %v15293_v28  ;;  %v15594_v10 = vadd.f32 1.0, %v15562_v46  ;;  %v16013_v58 = vmul.f32 %v15981_v8, %v15533_v31 }
 0x94e   : > { %v15877_v5 = vmul.f32 %v31793_v62, %v15845_v35  ;;  %v31847_v35 = vpop.eup %25124  ;;  %25136 = vrcp.f32 %v15595_v17  ;;  %v16048_v61 = vmul.f32 1.442695, %v16010_v9  ;;  %v34545_v51 = vmov -1.0  }
 0x94f   : > { %v31856_v56 = vpop.eup %25126  ;;  %v31859_v3 = vsel %vm15469_vm15, 1.0, %v34545_v51  ;;  %v15535_v16 = vand.u32 2147483647, %v15439_v27  ;;  %v15564_v49 = vmul.f32 0.3275911, %v15532_v36  ;;  %25138 = vpow2.f32 %v16050_v48 }
 0x950   : > { %v15909_v32 = vadd.f32 0.2548296, %v15877_v5  ;;  %v31845_v12 = vpop.f32.mrb[50].mxu1  ;;  %v31854_v5 = vmul.f32 0.5, %v15278_v30  ;;  %34546 = vst [vmem:[#allocation162_spill] sm:$0xff] %v31859_v3  ;;  %v31861_v0 = vpop.eup %25128  ;;  %v15597_v30 = vadd.f32 1.0, %v15565_v52  ;;  %v16012_v31 = vmul.f32 %v15980_v45, %v15532_v36 }
 0x951   : > { %v31851_v25 = vpop.f32.mrb[51].mxu1  ;;  %v15438_v14 = vmul.f32 0.70710677, %v15288_v33  ;;  %v15298_v8 = vadd.f32 %v31762_v26, %v31808_v47  ;;  %v31871_v9 = vpop.eup %25130  ;;  %25140 = vrcp.f32 %v15594_v10  ;;  %vm15468_vm0 = vcmp.ge.f32.partialorder %v15436_v40, 0.0 }
 0x952   : > { %v15941_v54 = vmul.f32 %v31793_v62, %v15909_v32  ;;  %34544 = vst [vmem:[#allocation160_spill] sm:$0xff] %v31854_v5  ;;  %v15303_v62 = vadd.f32 %v31802_v42, %v31762_v26  ;;  %v16054_v32 = vmul.f32 1.442695, %v16013_v58  ;;  %v31875_v42 = vmul.f32 0.5, %v15293_v28 }
 0x953   : > { %vm15471_vm2 = vcmp.ge.f32.partialorder %v15439_v27, 0.0  ;;  %v15534_v48 = vand.u32 2147483647, %v15438_v14  ;;  %25142 = vpow2.f32 %v16048_v61  ;;  %v15596_v45 = vadd.f32 1.0, %v15564_v49 }
 0x954   : > { %v16101_v50 = vmul.f32 %v25117_v6, %v15941_v54  ;;  %v31865_v46 = vpop.f32.mrb[52].mxu1  ;;  %v15983_v6 = vsub.f32 0.0, %v15535_v16  ;;  %v31873_v54 = vpop.eup %25132  ;;  %34548 = vst [vmem:[#allocation179_spill] sm:$0xff] %v31875_v42  ;;  %v15567_v52 = vmul.f32 0.3275911, %v15535_v16  ;;  %25144 = vrcp.f32 %v15597_v30 }
 0x955   : > { %v31869_v17 = vpop.f32.mrb[53].mxu1  ;;  %34547 = vst [vmem:[#allocation178_spill] sm:$0xff] %v31873_v54  ;;  %v15441_v36 = vmul.f32 0.70710677, %v15303_v62  ;;  %v31880_v44 = vsel %vm15468_vm0, 1.0, %v34545_v51  ;;  %v31884_v15 = vpop.eup %25134  ;;  %25146 = vpow2.f32 %v16054_v32  ;;  %vm15470_vm3 = vcmp.ge.f32.partialorder %v15438_v14, 0.0 }
 0x956   : > { %v16133_v13 = vsub.f32 1.0, %v16101_v50  ;;  %34549 = vst [vmem:[#allocation190_spill] sm:$0xff] %v31880_v44  ;;  %v16052_v58 = vmul.f32 1.442695, %v16012_v31  ;;  %v15440_v40 = vmul.f32 0.70710677, %v15298_v8  ;;  %v16015_v27 = vmul.f32 %v15983_v6, %v15535_v16 }
 0x957   : > { %v31887_v50 = vsel %vm15471_vm2, 1.0, %v34545_v51  ;;  %v15566_v61 = vmul.f32 0.3275911, %v15534_v48  ;;  %v15982_v49 = vsub.f32 0.0, %v15534_v48  ;;  %v15537_v30 = vand.u32 2147483647, %v15441_v36 }
 0x958   : > { %v31877_v47 = vpop.f32.mrb[54].mxu1  ;;  %34550 = vst [vmem:[#allocation192_spill] sm:$0xff] %v31887_v50  ;;  %v16165_v28 = vmul.f32 %v16133_v13, %v31775_v29  ;;  %25148 = vrcp.f32 %v15596_v45  ;;  %v15599_v42 = vadd.f32 1.0, %v15567_v52  ;;  %v31890_v39 = vmul.f32 0.5, %v15288_v33  ;;  %v31896_v22 = vpop.eup %25136 }
 0x959   : > { %v31882_v10 = vpop.f32.mrb[55].mxu1  ;;  %v31892_v31 = vmul.f32 0.5, %v15303_v62  ;;  %25150 = vpow2.f32 %v16052_v58  ;;  %v15985_v32 = vsub.f32 0.0, %v15537_v30  ;;  %v15536_v50 = vand.u32 2147483647, %v15440_v40  ;;  %v31910_v45 = vpop.eup %25138 }
 0x95a   : > { %34551 = vst [vmem:[#allocation93_spill] sm:$0xff] %v31890_v39  ;;  %v15313_v16 = vadd.f32 %v31815_v23, %v31762_v26  ;;  %v16058_v29 = vmul.f32 1.442695, %v16015_v27  ;;  %v31904_v6 = vsel %vm15470_vm3, 1.0, %v34545_v51  ;;  %v31906_v33 = vmul.f32 0.5, %v15298_v8  ;;  %34555 = vst [vmem:[#allocation225_spill] sm:$0xff] %v31910_v45 }
 0x95b   : > { %34552 = vst [vmem:[#allocation94_spill] sm:$0xff] %v31892_v31  ;;  %34553 = vst [vmem:[#allocation95_spill] sm:$0xff] %v31904_v6  ;;  %v15308_v62 = vadd.f32 %v31762_v26, %v31820_v63  ;;  %v16197_v52 = vadd.f32 1.0, %v16165_v28  ;;  %v15598_v58 = vadd.f32 1.0, %v15566_v61  ;;  %v16014_v31 = vmul.f32 %v15982_v49, %v15534_v48  ;;  %v31912_v39 = vpop.eup %25140 }
 0x95c   : > { %v31894_v5 = vpop.f32.mrb[56].mxu1  ;;  %34554 = vst [vmem:[#allocation96_spill] sm:$0xff] %v31906_v33  ;;  %vm15473_vm4 = vcmp.ge.f32.partialorder %v15441_v36, 0.0  ;;  %25152 = vrcp.f32 %v15599_v42  ;;  %v15569_v23 = vmul.f32 0.3275911, %v15537_v30  ;;  %v16017_v14 = vmul.f32 %v15985_v32, %v15537_v30 }
 0x95d   : > { %v31900_v13 = vpop.f32.mrb[57].mxu1  ;;  %v15443_v27 = vmul.f32 0.70710677, %v15313_v16  ;;  %v15442_v3 = vmul.f32 0.70710677, %v15308_v62  ;;  %vm15472_vm5 = vcmp.ge.f32.partialorder %v15440_v40, 0.0  ;;  %v15323_v8 = vadd.f32 %v31833_v1, %v31762_v26  ;;  %v31918_v63 = vpop.eup %25142 }
 0x95e   : > { %v15984_v6 = vsub.f32 0.0, %v15536_v50  ;;  %34556 = vst [vmem:[#allocation228_spill] sm:$0xff] %v31918_v63  ;;  %25154 = vpow2.f32 %v16058_v29  ;;  %v15568_v28 = vmul.f32 0.3275911, %v15536_v50  ;;  %v31920_v49 = vpop.eup %25144  ;;  %v31923_v42 = vmul.f32 %v16197_v52, %v31768_v7 }
 0x95f   : > { %v15539_v48 = vand.u32 2147483647, %v15443_v27  ;;  %v15538_v61 = vand.u32 2147483647, %v15442_v3  ;;  %v16056_v19 = vmul.f32 1.442695, %v16014_v31  ;;  %v15318_v1 = vadd.f32 %v31762_v26, %v31839_v34  ;;  %v31933_v44 = vpop.eup %25146 }
 0x960   : > { %v31916_v33 = vpop.f32.mrb[58].mxu1  ;;  %v31927_v30 = vsel %vm15473_vm4, 1.0, %v34545_v51  ;;  %34558 = vst [vmem:[#allocation232_spill] sm:$0xff] %v31933_v44  ;;  %25156 = vrcp.f32 %v15598_v58  ;;  %v15601_v29 = vadd.f32 1.0, %v15569_v23  ;;  %v31937_v43 = vsel %vm15472_vm5, 1.0, %v34545_v51 }
 0x961   : > { %34557 = vst [vmem:[#allocation229_spill] sm:$0xff] %v31927_v30  ;;  %v31931_v32 = vpop.f32.mrb[59].mxu1  ;;  %34559 = vst [vmem:[#allocation233_spill] sm:$0xff] %v31937_v43  ;;  %v15987_v7 = vsub.f32 0.0, %v15539_v48  ;;  %v16062_v31 = vmul.f32 1.442695, %v16017_v14  ;;  %v16016_v36 = vmul.f32 %v15984_v6, %v15536_v50  ;;  %25158 = vpow2.f32 %v16056_v19 }
 0x962   : > { %v31941_v37 = vmul.f32 0.5, %v15313_v16  ;;  %v31943_v30 = vmul.f32 0.70710677, %v15323_v8  ;;  %v31947_v53 = vpop.eup %25148  ;;  %v15600_v44 = vadd.f32 1.0, %v15568_v28  ;;  %vm15475_vm6 = vcmp.ge.f32.partialorder %v15443_v27, 0.0 }
 0x963   : > { %v15571_v58 = vmul.f32 0.3275911, %v15539_v48  ;;  %v15986_v23 = vsub.f32 0.0, %v15538_v61  ;;  %v31949_v40 = vpop.eup %25150  ;;  %v15570_v43 = vmul.f32 0.3275911, %v15538_v61  ;;  %25160 = vrcp.f32 %v15601_v29 }
 0x964   : > { %v31939_v52 = vpop.f32.mrb[60].mxu1  ;;  %34560 = vst [vmem:[#allocation236_spill] sm:$0xff] %v31941_v37  ;;  %34561 = vst [vmem:[#allocation237_spill] sm:$0xff] %v31949_v40  ;;  %v15541_v45 = vand.u32 2147483647, %v31943_v30  ;;  %v16019_v50 = vmul.f32 %v15987_v7, %v15539_v48  ;;  %vm15474_vm7 = vcmp.ge.f32.partialorder %v15442_v3, 0.0  ;;  %v15333_v16 = vadd.f32 %v31845_v12, %v31762_v26 }
 0x965   : > { %v31945_v34 = vpop.f32.mrb[61].mxu1  ;;  %v15444_v14 = vmul.f32 0.70710677, %v15318_v1  ;;  %25162 = vpow2.f32 %v16062_v31  ;;  %v16060_v28 = vmul.f32 1.442695, %v16016_v36  ;;  %v31956_v37 = vmul.f32 0.5, %v15308_v62 }
 0x966   : > { %v15989_v63 = vsub.f32 0.0, %v15541_v45  ;;  %v31960_v19 = vpop.eup %25152  ;;  %v31964_v40 = vsel %vm15475_vm6, 1.0, %v34545_v51  ;;  %v15603_v48 = vadd.f32 1.0, %v15571_v58  ;;  %v16018_v3 = vmul.f32 %v15986_v23, %v15538_v61 }
 0x967   : > { %34562 = vst [vmem:[#allocation239_spill] sm:$0xff] %v31956_v37  ;;  %34563 = vst [vmem:[#allocation205_spill] sm:$0xff] %v31964_v40  ;;  %v15540_v29 = vand.u32 2147483647, %v15444_v14  ;;  %25164 = vrcp.f32 %v15600_v44  ;;  %v31967_v12 = vsel %vm15474_vm7, 1.0, %v34545_v51  ;;  %v15602_v7 = vadd.f32 1.0, %v15570_v43 }
 0x968   : > { %v31954_v6 = vpop.f32.mrb[62].mxu1  ;;  %34564 = vst [vmem:[#allocation206_spill] sm:$0xff] %v31967_v12  ;;  %v15573_v31 = vmul.f32 0.3275911, %v15541_v45  ;;  %v31969_v62 = vpop.eup %25154  ;;  %v16066_v36 = vmul.f32 1.442695, %v16019_v50  ;;  %v16021_v37 = vmul.f32 %v15989_v63, %v15541_v45  ;;  %v15328_v2 = vadd.f32 %v31762_v26, %v31851_v25 }
 0x969   : > { %v31958_v60 = vpop.f32.mrb[63].mxu1  ;;  %34565 = vst [vmem:[#allocation207_spill] sm:$0xff] %v31969_v62  ;;  %v15447_v54 = vmul.f32 0.70710677, %v15333_v16  ;;  %25166 = vpow2.f32 %v16060_v28  ;;  %v31973_v27 = vmul.f32 0.5, %v15323_v8  ;;  %v15988_v58 = vsub.f32 0.0, %v15540_v29 }
 0x96a   : > { %v15343_v44 = vadd.f32 %v31865_v46, %v31762_v26  ;;  %v31977_v61 = vpop.eup %25156  ;;  %25168 = vrcp.f32 %v15603_v48  ;;  %v16064_v43 = vmul.f32 1.442695, %v16018_v3  ;;  %v31979_v23 = vmul.f32 0.5, %v15318_v1 }
 0x96b   : > { %34566 = vst [vmem:[#allocation208_spill] sm:$0xff] %v31973_v27  ;;  %v15543_v40 = vand.u32 2147483647, %v15447_v54  ;;  %25170 = vrcp.f32 %v15602_v7  ;;  %v15605_v45 = vadd.f32 1.0, %v15573_v31  ;;  %v15572_v63 = vmul.f32 0.3275911, %v15540_v29  ;;  %v31982_v8 = vpop.eup %25158 }
 0x96c   : > { %34567 = vst [vmem:[#allocation122_spill] sm:$0xff] %v31979_v23  ;;  %v15446_v50 = vmul.f32 0.70710677, %v15328_v2  ;;  %25172 = vpow2.f32 %v16066_v36  ;;  %vm15477_vm8 = vcmp.ge.f32.partialorder %v31943_v30, 0.0  ;;  %v16070_v25 = vmul.f32 1.442695, %v16021_v37 }
 0x96d   : > { %vm15476_vm9 = vcmp.ge.f32.partialorder %v15444_v14, 0.0  ;;  %v16020_v28 = vmul.f32 %v15988_v58, %v15540_v29  ;;  %v15991_v46 = vsub.f32 0.0, %v15543_v40  ;;  %v15449_v12 = vmul.f32 0.70710677, %v15343_v44  ;;  %v31984_v48 = vpop.eup %25160 }
 0x96e   : > { %v15542_v27 = vand.u32 2147483647, %v15446_v50  ;;  %25174 = vpow2.f32 %v16064_v43  ;;  %vm15479_vm10 = vcmp.ge.f32.partialorder %v15447_v54, 0.0  ;;  %v15575_v1 = vmul.f32 0.3275911, %v15543_v40 }
 0x96f   : > { %v15338_v3 = vadd.f32 %v31762_v26, %v31869_v17  ;;  %v31988_v7 = vpop.eup %25162  ;;  %v31991_v30 = vsel %vm15477_vm8, 1.0, %v34545_v51  ;;  %25176 = vrcp.f32 %v15605_v45  ;;  %v15604_v37 = vadd.f32 1.0, %v15572_v63 }
 0x970   : > { %34568 = vst [vmem:[#allocation123_spill] sm:$0xff] %v31988_v7  ;;  %34569 = vst [vmem:[#allocation124_spill] sm:$0xff] %v31991_v30  ;;  %v15545_v31 = vand.u32 2147483647, %v15449_v12  ;;  %25178 = vpow2.f32 %v16070_v25  ;;  %v31995_v29 = vsel %vm15476_vm9, 1.0, %v34545_v51  ;;  %v31997_v36 = vmul.f32 0.5, %v15333_v16 }
 0x971   : > { %34570 = vst [vmem:[#allocation125_spill] sm:$0xff] %v31995_v29  ;;  %v15990_v54 = vsub.f32 0.0, %v15542_v27  ;;  %v31999_v58 = vpop.eup %25164  ;;  %v16068_v43 = vmul.f32 1.442695, %v16020_v28  ;;  %v32002_v17 = vsel %vm15479_vm10, 1.0, %v34545_v51  ;;  %v16023_v23 = vmul.f32 %v15991_v46, %v15543_v40 }
 0x972   : > { %34571 = vst [vmem:[#allocation34_spill] sm:$0xff] %v31997_v36  ;;  %34572 = vst [vmem:[#allocation36_spill] sm:$0xff] %v32002_v17  ;;  %vm15478_vm11 = vcmp.ge.f32.partialorder %v15446_v50, 0.0  ;;  %v15607_v30 = vadd.f32 1.0, %v15575_v1  ;;  %v15574_v45 = vmul.f32 0.3275911, %v15542_v27  ;;  %v15353_v25 = vadd.f32 %v31877_v47, %v31762_v26 }
 0x973   : > { %v15448_v63 = vmul.f32 0.70710677, %v15338_v3  ;;  %v32006_v14 = vpop.eup %25166  ;;  %25180 = vrcp.f32 %v15604_v37  ;;  %v32008_v16 = vmul.f32 0.5, %v15328_v2  ;;  %v15993_v36 = vsub.f32 0.0, %v15545_v31 }
 0x974   : > { %34573 = vst [vmem:[#allocation38_spill] sm:$0xff] %v32006_v14  ;;  %v15348_v28 = vadd.f32 %v31762_v26, %v31882_v10  ;;  %v32012_v29 = vpop.eup %25168  ;;  %v16022_v17 = vmul.f32 %v15990_v54, %v15542_v27  ;;  %v32014_v40 = vmul.f32 0.5, %v15343_v44  ;;  %v15451_v1 = vmul.f32 0.70710677, %v15353_v25 }
 0x975   : > { %34574 = vst [vmem:[#allocation40_spill] sm:$0xff] %v32008_v16  ;;  %34575 = vst [vmem:[#allocation42_spill] sm:$0xff] %v32012_v29  ;;  %v15544_v46 = vand.u32 2147483647, %v15448_v63  ;;  %v32016_v7 = vpop.eup %25170  ;;  %25182 = vpow2.f32 %v16068_v43  ;;  %v16074_v47 = vmul.f32 1.442695, %v16023_v23  ;;  %v16025_v27 = vmul.f32 %v15993_v36, %v15545_v31 }
 0x976   : > { %34576 = vst [vmem:[#allocation44_spill] sm:$0xff] %v32014_v40  ;;  %34577 = vst [vmem:[#allocation46_spill] sm:$0xff] %v32016_v7  ;;  %v32020_v37 = vsel %vm15478_vm11, 1.0, %v34545_v51  ;;  %vm15481_vm12 = vcmp.ge.f32.partialorder %v15449_v12, 0.0  ;;  %v32022_v2 = vpop.eup %25172  ;;  %25184 = vrcp.f32 %v15607_v30  ;;  %v15606_v10 = vadd.f32 1.0, %v15574_v45 }
 0x977   : > { %34578 = vst [vmem:[#allocation48_spill] sm:$0xff] %v32020_v37  ;;  %34579 = vst [vmem:[#allocation50_spill] sm:$0xff] %v32022_v2  ;;  %v15577_v16 = vmul.f32 0.3275911, %v15545_v31  ;;  %v15576_v29 = vmul.f32 0.3275911, %v15544_v46  ;;  %v15363_v50 = vadd.f32 %v31894_v5, %v31762_v26  ;;  %v15358_v12 = vadd.f32 %v31762_v26, %v31900_v13 }
 0x978   : > { %v15992_v44 = vsub.f32 0.0, %v15544_v46  ;;  %v15547_v54 = vand.u32 2147483647, %v15451_v1  ;;  %v15450_v40 = vmul.f32 0.70710677, %v15348_v28  ;;  %v32024_v14 = vpop.eup %25174  ;;  %v32027_v23 = vsel %vm15481_vm12, 1.0, %v34545_v51 }
 0x979   : > { %34580 = vst [vmem:[#allocation52_spill] sm:$0xff] %v32024_v14  ;;  %v16072_v7 = vmul.f32 1.442695, %v16022_v17  ;;  %34581 = vst [vmem:[#allocation54_spill] sm:$0xff] %v32027_v23  ;;  %v32033_v30 = vpop.eup %25176  ;;  %25186 = vpow2.f32 %v16074_v47  ;;  %v32035_v43 = vmul.f32 0.5, %v15338_v3  ;;  %v15609_v17 = vadd.f32 1.0, %v15577_v16 }
 0x97a   : > { %34582 = vst [vmem:[#allocation56_spill] sm:$0xff] %v32033_v30  ;;  %v15995_v31 = vsub.f32 0.0, %v15547_v54  ;;  %v15546_v36 = vand.u32 2147483647, %v15450_v40  ;;  %v32037_v45 = vpop.eup %25178  ;;  %25188 = vrcp.f32 %v15606_v10  ;;  %vm15480_vm13 = vcmp.ge.f32.partialorder %v15448_v63, 0.0 }
 0x97b   : > { %34583 = vst [vmem:[#allocation58_spill] sm:$0xff] %v32035_v43  ;;  %v32039_v37 = vmul.f32 0.5, %v15353_v25  ;;  %v16078_v23 = vmul.f32 1.442695, %v16025_v27  ;;  %v15608_v2 = vadd.f32 1.0, %v15576_v29  ;;  %v16024_v5 = vmul.f32 %v15992_v44, %v15544_v46 }
 0x97c   : > { %v15994_v14 = vsub.f32 0.0, %v15546_v36  ;;  %25190 = vpow2.f32 %v16072_v7  ;;  %v15579_v13 = vmul.f32 0.3275911, %v15547_v54  ;;  %v15453_v62 = vmul.f32 0.70710677, %v15363_v50 }
 0x97d   : > { %34584 = vst [vmem:[#allocation211_spill] sm:$0xff] %v32039_v37  ;;  %v32041_v30 = vmul.f32 0.70710677, %v15358_v12  ;;  %v32043_v3 = vpop.eup %25180  ;;  %v32046_v47 = vsel %vm15480_vm13, 1.0, %v34545_v51  ;;  %vm15483_vm14 = vcmp.ge.f32.partialorder %v15451_v1, 0.0  ;;  %v16027_v10 = vmul.f32 %v15995_v31, %v15547_v54 }
 0x97e   : > { %34585 = vst [vmem:[#allocation212_spill] sm:$0xff] %v32046_v47  ;;  %vm15482_vm15 = vcmp.ge.f32.partialorder %v15450_v40, 0.0  ;;  %25192 = vrcp.f32 %v15609_v17  ;;  %v32048_v63 = vmul.f32 0.5, %v15348_v28  ;;  %v15578_v25 = vmul.f32 0.3275911, %v15546_v36 }
 0x97f   : > { %v15549_v29 = vand.u32 2147483647, %v15453_v62  ;;  %v32050_v16 = vpop.eup %25182  ;;  %25194 = vpow2.f32 %v16078_v23  ;;  %v16076_v7 = vmul.f32 1.442695, %v16024_v5  ;;  %v16026_v46 = vmul.f32 %v15994_v14, %v15546_v36 }
 0x980   : > { %34586 = vst [vmem:[#allocation174_spill] sm:$0xff] %v32048_v63  ;;  %v15548_v27 = vand.u32 2147483647, %v32041_v30  ;;  %v32053_v44 = vpop.eup %25184  ;;  %25196 = vrcp.f32 %v15608_v2  ;;  %v32056_v37 = vsel %vm15483_vm14, 1.0, %v34545_v51  ;;  %v15611_v1 = vadd.f32 1.0, %v15579_v13 }
 0x981   : > { %34587 = vst [vmem:[#allocation70_spill] sm:$0xff] %v32056_v37  ;;  %v32059_v40 = vsel %vm15482_vm15, 1.0, %v34545_v51  ;;  %v16082_v28 = vmul.f32 1.442695, %v16027_v10  ;;  %v15997_v54 = vsub.f32 0.0, %v15549_v29  ;;  %v32064_v23 = vadd.f32 %v31916_v33, %v31762_v26 }
 0x982   : > { %34588 = vst [vmem:[#allocation175_spill] sm:$0xff] %v32059_v40  ;;  %v15684_v31 = vmul.f32 1.0614054, %v31813_v18  ;;  %v15610_v14 = vadd.f32 1.0, %v15578_v25  ;;  %v32066_v36 = vmul.f32 0.5, %v15363_v50  ;;  %v15368_v2 = vadd.f32 %v31762_v26, %v31931_v32 }
 0x983   : > { %34589 = vst [vmem:[#allocation72_spill] sm:$0xff] %v32064_v23  ;;  %v15581_v17 = vmul.f32 0.3275911, %v15549_v29  ;;  %v32070_v5 = vpop.eup %25186  ;;  %25198 = vpow2.f32 %v16076_v7  ;;  %v16080_v13 = vmul.f32 1.442695, %v16026_v46  ;;  %vm15485_vm0 = vcmp.ge.f32.partialorder %v15453_v62, 0.0 }
 0x984   : > { %34590 = vst [vmem:[#allocation176_spill] sm:$0xff] %v32066_v36  ;;  %34591 = vst [vmem:[#allocation213_spill] sm:$0xff] %v32070_v5  ;;  %v15580_v63 = vmul.f32 0.3275911, %v15548_v27  ;;  %v15716_v10 = vadd.f32 -1.4531521, %v15684_v31  ;;  %v32072_v37 = vpop.eup %25188  ;;  %25200 = vrcp.f32 %v15611_v1  ;;  %v16029_v50 = vmul.f32 %v15997_v54, %v15549_v29 }
 0x985   : > { %v15996_v40 = vsub.f32 0.0, %v15548_v27  ;;  %v15455_v33 = vmul.f32 0.70710677, %v32064_v23  ;;  %25202 = vpow2.f32 %v16082_v28  ;;  %v32076_v36 = vmul.f32 0.70710677, %v15368_v2 }
 0x986   : > { %v15748_v25 = vmul.f32 %v31813_v18, %v15716_v10  ;;  %v32078_v32 = vpop.eup %25190  ;;  %25204 = vrcp.f32 %v15610_v14  ;;  %v15613_v7 = vadd.f32 1.0, %v15581_v17  ;;  %v32080_v46 = vmul.f32 0.5, %v15358_v12 }
 0x987   : > { %vm15484_vm2 = vcmp.ge.f32.partialorder %v32041_v30, 0.0  ;;  %25206 = vpow2.f32 %v16080_v13  ;;  %v32084_v62 = vsel %vm15485_vm0, 1.0, %v34545_v51  ;;  %v15612_v1 = vadd.f32 1.0, %v15580_v63 }
 0x988   : > { %34592 = vst [vmem:[#allocation177_spill] sm:$0xff] %v32080_v46  ;;  %34593 = vst [vmem:[#allocation214_spill] sm:$0xff] %v32084_v62  ;;  %v15780_v31 = vadd.f32 1.4214138, %v15748_v25  ;;  %v32086_v28 = vpop.eup %25192  ;;  %v16028_v29 = vmul.f32 %v15996_v40, %v15548_v27  ;;  %v15551_v54 = vand.u32 2147483647, %v15455_v33  ;;  %v32091_v14 = vadd.f32 %v31939_v52, %v31762_v26 }
 0x989   : > { %v15686_v10 = vmul.f32 1.0614054, %v31847_v35  ;;  %v32093_v12 = vpop.eup %25194  ;;  %v16086_v17 = vmul.f32 1.442695, %v16029_v50  ;;  %v15550_v23 = vand.u32 2147483647, %v32076_v36  ;;  %25208 = vrcp.f32 %v15613_v7 }
 0x98a   : > { %34594 = vst [vmem:[#allocation200_spill] sm:$0xff] %v32091_v14  ;;  %34595 = vst [vmem:[#allocation215_spill] sm:$0xff] %v32093_v12  ;;  %v15812_v13 = vmul.f32 %v31813_v18, %v15780_v31  ;;  %v15687_v63 = vmul.f32 1.0614054, %v31827_v11  ;;  %v32098_v25 = vpop.eup %25196  ;;  %v32103_v27 = vsel %vm15484_vm2, 1.0, %v34545_v51  ;;  %v32105_v40 = vmul.f32 0.5, %v15368_v2 }
 0x98b   : > { %34596 = vst [vmem:[#allocation216_spill] sm:$0xff] %v32103_v27  ;;  %v15718_v52 = vadd.f32 -1.4531521, %v15686_v10  ;;  %25210 = vrcp.f32 %v15612_v1  ;;  %vm15487_vm3 = vcmp.ge.f32.partialorder %v15455_v33, 0.0  ;;  %v32108_v50 = vmul.f32 0.70710677, %v32091_v14 }
 0x98c   : > { %34597 = vst [vmem:[#allocation218_spill] sm:$0xff] %v32105_v40  ;;  %v15844_v46 = vadd.f32 -0.28449672, %v15812_v13  ;;  %v15583_v31 = vmul.f32 0.3275911, %v15551_v54  ;;  %v15999_v62 = vsub.f32 0.0, %v15551_v54  ;;  %25212 = vpow2.f32 %v16086_v17 }
 0x98d   : > { %34598 = vst [vmem:[#allocation219_spill] sm:$0xff] %v32108_v50  ;;  %v15750_v12 = vmul.f32 %v31847_v35, %v15718_v52  ;;  %v15719_v43 = vadd.f32 -1.4531521, %v15687_v63  ;;  %v32111_v7 = vpop.eup %25198  ;;  %v16084_v30 = vmul.f32 1.442695, %v16028_v29  ;;  %v32117_v1 = vsel %vm15487_vm3, 1.0, %v34545_v51 }
 0x98e   : > { %34599 = vst [vmem:[#allocation221_spill] sm:$0xff] %v32111_v7  ;;  %v15876_v27 = vmul.f32 %v31813_v18, %v15844_v46  ;;  %v15582_v2 = vmul.f32 0.3275911, %v15550_v23  ;;  %v32114_v40 = vpop.eup %25200  ;;  %34601 = vst [vmem:[#allocation22_spill] sm:$0xff] %v32117_v1  ;;  %vm15486_vm4 = vcmp.ge.f32.partialorder %v32076_v36, 0.0  ;;  %v15998_v33 = vsub.f32 0.0, %v15550_v23 }
 0x98f   : > { %34600 = vst [vmem:[#allocation224_spill] sm:$0xff] %v32114_v40  ;;  %v15782_v10 = vadd.f32 1.4214138, %v15750_v12  ;;  %v32120_v13 = vpop.eup %25202  ;;  %v15553_v63 = vand.u32 2147483647, %v32108_v50  ;;  %v15751_v17 = vmul.f32 %v31827_v11, %v15719_v43  ;;  %v32126_v46 = vadd.f32 %v31762_v26, %v31945_v34 }
 0x990   : > { %34602 = vst [vmem:[#allocation24_spill] sm:$0xff] %v32120_v13  ;;  %v15908_v52 = vadd.f32 0.2548296, %v15876_v27  ;;  %v32128_v29 = vpop.eup %25204  ;;  %v15615_v14 = vadd.f32 1.0, %v15583_v31  ;;  %v16031_v47 = vmul.f32 %v15999_v62, %v15551_v54  ;;  %v15688_v40 = vmul.f32 1.0614054, %v31871_v9 }
 0x991   : > { %34603 = vst [vmem:[#allocation26_spill] sm:$0xff] %v32126_v46  ;;  %34604 = vst [vmem:[#allocation28_spill] sm:$0xff] %v32128_v29  ;;  %v15814_v1 = vmul.f32 %v31847_v35, %v15782_v10  ;;  %v32132_v12 = vpop.eup %25206  ;;  %v15614_v13 = vadd.f32 1.0, %v15582_v2  ;;  %v15783_v50 = vadd.f32 1.4214138, %v15751_v17  ;;  %25214 = vpow2.f32 %v16084_v30 }
 0x992   : > { %v15940_v27 = vmul.f32 %v31813_v18, %v15908_v52  ;;  %v32136_v43 = vmul.f32 0.70710677, %v32126_v46  ;;  %v16030_v34 = vmul.f32 %v15998_v33, %v15550_v23  ;;  %v15720_v5 = vadd.f32 -1.4531521, %v15688_v40 }
 0x993   : > { %v15846_v7 = vadd.f32 -0.28449672, %v15814_v1  ;;  %v15585_v62 = vmul.f32 0.3275911, %v15553_v63  ;;  %v15815_v54 = vmul.f32 %v31827_v11, %v15783_v50  ;;  %v32141_v29 = vpop.eup %25208  ;;  %25216 = vrcp.f32 %v15615_v14 }
 0x994   : > { %v16100_v31 = vmul.f32 %v31822_v4, %v15940_v27  ;;  %v15552_v10 = vand.u32 2147483647, %v32136_v43  ;;  %v16090_v18 = vmul.f32 1.442695, %v16031_v47  ;;  %v32146_v2 = vsel %vm15486_vm4, 1.0, %v34545_v51 }
 0x995   : > { %34605 = vst [vmem:[#allocation31_spill] sm:$0xff] %v32146_v2  ;;  %v15878_v23 = vmul.f32 %v31847_v35, %v15846_v7  ;;  %v32149_v30 = vpop.eup %25210  ;;  %25218 = vrcp.f32 %v15614_v13  ;;  %v16001_v4 = vsub.f32 0.0, %v15553_v63  ;;  %v15847_v1 = vadd.f32 -0.28449672, %v15815_v54 }
 0x996   : > { %v16132_v40 = vsub.f32 1.0, %v16100_v31  ;;  %v16000_v33 = vsub.f32 0.0, %v15552_v10  ;;  %v15752_v52 = vmul.f32 %v31871_v9, %v15720_v5  ;;  %v32154_v47 = vadd.f32 %v31954_v6, %v31762_v26  ;;  %v32156_v14 = vpop.eup %25212 }
 0x997   : > { %v15910_v50 = vadd.f32 0.2548296, %v15878_v23  ;;  %v16088_v17 = vmul.f32 1.442695, %v16030_v34  ;;  %v15617_v7 = vadd.f32 1.0, %v15585_v62  ;;  %v15879_v27 = vmul.f32 %v31827_v11, %v15847_v1 }
 0x998   : > { %v16164_v36 = vmul.f32 %v16132_v40, %v31778_v21  ;;  %v15584_v31 = vmul.f32 0.3275911, %v15552_v10  ;;  %v15784_v54 = vadd.f32 1.4214138, %v15752_v52  ;;  %v32162_v23 = vmul.f32 0.70710677, %v32154_v47 }
 0x999   : > { %v15942_v13 = vmul.f32 %v31847_v35, %v15910_v50  ;;  %25220 = vpow2.f32 %v16090_v18  ;;  %v16033_v46 = vmul.f32 %v16001_v4, %v15553_v63  ;;  %v15911_v26 = vadd.f32 0.2548296, %v15879_v27 }
 0x99a   : > { %v16196_v5 = vadd.f32 1.0, %v16164_v36  ;;  %v16032_v2 = vmul.f32 %v16000_v33, %v15552_v10  ;;  %v15816_v21 = vmul.f32 %v31871_v9, %v15784_v54  ;;  %v15555_v34 = vand.u32 2147483647, %v32162_v23 }
 0x99b   : > { %v16102_v6 = vmul.f32 %v31856_v56, %v15942_v13  ;;  %25222 = vpow2.f32 %v16088_v17  ;;  %v15943_v35 = vmul.f32 %v31827_v11, %v15911_v26  ;;  %vm15488_vm5 = vcmp.ge.f32.partialorder %v32136_v43, 0.0  ;;  %v32170_v40 = vpop.eup %25214 }
 0x99c   : > { %v16228_v62 = vmul.f32 %v16196_v5, %v31771_v41  ;;  %25224 = vrcp.f32 %v15617_v7  ;;  %v15616_v63 = vadd.f32 1.0, %v15584_v31  ;;  %v15848_v18 = vadd.f32 -0.28449672, %v15816_v21  ;;  %v25389_v41 = vld [vmem:[%s32674_s6] ss:$0 sm:$0xff] }
 0x99d   : > { %v16134_v1 = vsub.f32 1.0, %v16102_v6  ;;  %v32172_v56 = vmul.f32 1.442695, %v16033_v46  ;;  %v16103_v10 = vmul.f32 %v31843_v59, %v15943_v35  ;;  %v15689_v4 = vmul.f32 1.0614054, %v31861_v0  ;;  %v32182_v50 = vpop.eup %25216 }
 0x99e   : > { %22985 = vmatprep.mubr.f32.mxu1 %v16228_v62  ;;  %v32180_v11 = vadd.f32 %v25389_v41, %v31958_v60  ;;  %v16092_v52 = vmul.f32 1.442695, %v16032_v2  ;;  %v15880_v46 = vmul.f32 %v31871_v9, %v15848_v18  ;;  %v15587_v36 = vmul.f32 0.3275911, %v15555_v34 }
 0x99f   : > { %22986 = vmatmul.mubr.f32.vlgmr.msra.gmra.mrb[64].mxu1 %v31923_v42  ;;  %v16166_v33 = vmul.f32 %v16134_v1, %v31788_v20  ;;  %v32187_v59 = vpop.eup %25218  ;;  %v16135_v17 = vsub.f32 1.0, %v16103_v10  ;;  %v32192_v7 = vsel %vm15488_vm5, 1.0, %v34545_v51  ;;  %v15721_v60 = vadd.f32 -1.4531521, %v15689_v4 }
 0x9a0   : > { %v32195_v27 = vmul.f32 0.70710677, %v32180_v11  ;;  %25226 = vrcp.f32 %v15616_v63  ;;  %v15912_v42 = vadd.f32 0.2548296, %v15880_v46  ;;  %v15690_v20 = vmul.f32 1.0614054, %v31912_v39 }
 0x9a1   : > { %v16198_v13 = vadd.f32 1.0, %v16166_v33  ;;  %v16167_v2 = vmul.f32 %v16135_v17, %v31785_v38  ;;  %v16003_v31 = vsub.f32 0.0, %v15555_v34  ;;  %v15753_v54 = vmul.f32 %v31861_v0, %v15721_v60 }
 0x9a2   : > { %v15554_v5 = vand.u32 2147483647, %v32195_v27  ;;  %25228 = vpow2.f32 %v16092_v52  ;;  %v15944_v26 = vmul.f32 %v31871_v9, %v15912_v42  ;;  %v15619_v6 = vadd.f32 1.0, %v15587_v36 }
 0x9a3   : > { %v16230_v43 = vmul.f32 %v16198_v13, %v31782_v55  ;;  %v32203_v21 = vpop.eup %25220  ;;  %v16199_v62 = vadd.f32 1.0, %v16167_v2  ;;  %v15785_v35 = vadd.f32 1.4214138, %v15753_v54  ;;  %v15722_v18 = vadd.f32 -1.4531521, %v15690_v20 }
 0x9a4   : > { %v15586_v1 = vmul.f32 0.3275911, %v15554_v5  ;;  %v16002_v63 = vsub.f32 0.0, %v15554_v5  ;;  %v16104_v38 = vmul.f32 %v31884_v15, %v15944_v26  ;;  %v15691_v10 = vmul.f32 1.0614054, %v31896_v22 }
 0x9a5   : > { %22988 = vmatprep.mubr.f32.mxu1 %v16230_v43  ;;  %v15692_v4 = vmul.f32 1.0614054, %v31947_v53  ;;  %v32208_v41 = vpop.eup %25222  ;;  %v16231_v55 = vmul.f32 %v16199_v62, %v31780_v57  ;;  %v32211_v9 = vmul.f32 %v16003_v31, %v15555_v34  ;;  %v15817_v33 = vmul.f32 %v31861_v0, %v15785_v35 }
 0x9a6   : > { %v15618_v52 = vadd.f32 1.0, %v15586_v1  ;;  %v32214_v46 = vpop.eup %25224  ;;  %v16136_v36 = vsub.f32 1.0, %v16104_v38  ;;  %v15754_v17 = vmul.f32 %v31912_v39, %v15722_v18  ;;  %v15723_v15 = vadd.f32 -1.4531521, %v15691_v10 }
 0x9a7   : > { %v15724_v60 = vadd.f32 -1.4531521, %v15692_v4  ;;  %22989 = vmatmul.mubr.f32.gmra.mrb[66].mxu1 %v16231_v55  ;;  %25230 = vrcp.f32 %v15619_v6  ;;  %v15849_v13 = vadd.f32 -0.28449672, %v15817_v33  ;;  %v32217_v42 = vmul.f32 %v16002_v63, %v15554_v5  ;;  %v34606_v4 = vld [vmem:[#allocation113_spill] sm:$0xff] }
 0x9a8   : > { %v15693_v20 = vmul.f32 1.0614054, %v31920_v49  ;;  %v16168_v57 = vmul.f32 %v16136_v36, %v31811_v24  ;;  %v15786_v34 = vadd.f32 1.4214138, %v15754_v17  ;;  %v15755_v2 = vmul.f32 %v31896_v22, %v15723_v15 }
 0x9a9   : > { %v15756_v31 = vmul.f32 %v31947_v53, %v15724_v60  ;;  %v15881_v54 = vmul.f32 %v31861_v0, %v15849_v13  ;;  %25232 = vrcp.f32 %v15618_v52  ;;  %v15694_v26 = vmul.f32 1.0614054, %v31977_v61 }
 0x9aa   : > { %v15725_v43 = vadd.f32 -1.4531521, %v15693_v20  ;;  %v32225_v62 = vpop.eup %25226  ;;  %v16200_v6 = vadd.f32 1.0, %v16168_v57  ;;  %v15818_v5 = vmul.f32 %v31912_v39, %v15786_v34  ;;  %v15787_v35 = vadd.f32 1.4214138, %v15755_v2 }
 0x9ab   : > { %v15788_v1 = vadd.f32 1.4214138, %v15756_v31  ;;  %v15913_v63 = vadd.f32 0.2548296, %v15881_v54  ;;  %v15726_v38 = vadd.f32 -1.4531521, %v15694_v26  ;;  %25234 = vpow2.f32 %v32172_v56 }
 0x9ac   : > { %v15757_v24 = vmul.f32 %v31920_v49, %v15725_v43  ;;  %v15695_v18 = vmul.f32 1.0614054, %v31960_v19  ;;  %v32230_v10 = vpop.eup %25228  ;;  %v16232_v55 = vmul.f32 %v16200_v6, %v34606_v4  ;;  %v15850_v33 = vadd.f32 -0.28449672, %v15818_v5  ;;  %v34607_v31 = vld [vmem:[#allocation178_spill] sm:$0xff] }
 0x9ad   : > { %v15819_v52 = vmul.f32 %v31896_v22, %v15787_v35  ;;  %v15820_v36 = vmul.f32 %v31947_v53, %v15788_v1  ;;  %v15945_v17 = vmul.f32 %v31861_v0, %v15913_v63  ;;  %v15758_v60 = vmul.f32 %v31977_v61, %v15726_v38 }
 0x9ae   : > { %v15789_v15 = vadd.f32 1.4214138, %v15757_v24  ;;  %v15727_v13 = vadd.f32 -1.4531521, %v15695_v18  ;;  %22991 = vmatprep.mubr.f32.mxu1 %v16232_v55  ;;  %v15882_v20 = vmul.f32 %v31912_v39, %v15850_v33  ;;  %v15696_v2 = vmul.f32 1.0614054, %v31999_v58 }
 0x9af   : > { %v15851_v57 = vadd.f32 -0.28449672, %v15819_v52  ;;  %v15852_v34 = vadd.f32 -0.28449672, %v15820_v36  ;;  %v16105_v54 = vmul.f32 %v34607_v31, %v15945_v17  ;;  %v15790_v26 = vadd.f32 1.4214138, %v15758_v60 }
 0x9b0   : > { %v15821_v43 = vmul.f32 %v31920_v49, %v15789_v15  ;;  %v15759_v6 = vmul.f32 %v31960_v19, %v15727_v13  ;;  %v15914_v5 = vadd.f32 0.2548296, %v15882_v20  ;;  %v15728_v1 = vadd.f32 -1.4531521, %v15696_v2  ;;  %v34608_v15 = vld [vmem:[#allocation9_spill] sm:$0xff] }
 0x9b1   : > { %v15883_v0 = vmul.f32 %v31896_v22, %v15851_v57  ;;  %v15884_v35 = vmul.f32 %v31947_v53, %v15852_v34  ;;  %v32244_v63 = vpop.eup %25230  ;;  %v16137_v24 = vsub.f32 1.0, %v16105_v54  ;;  %v15822_v18 = vmul.f32 %v31977_v61, %v15790_v26  ;;  %v34609_v34 = vld [vmem:[#allocation228_spill] sm:$0xff] }
 0x9b2   : > { %v15853_v38 = vadd.f32 -0.28449672, %v15821_v43  ;;  %v15791_v4 = vadd.f32 1.4214138, %v15759_v6  ;;  %v15946_v55 = vmul.f32 %v31912_v39, %v15914_v5  ;;  %v15760_v36 = vmul.f32 %v31999_v58, %v15728_v1 }
 0x9b3   : > { %v15915_v33 = vadd.f32 0.2548296, %v15883_v0  ;;  %v15916_v52 = vadd.f32 0.2548296, %v15884_v35  ;;  %v32249_v17 = vpop.eup %25232  ;;  %v16169_v60 = vmul.f32 %v16137_v24, %v34608_v15  ;;  %v15854_v20 = vadd.f32 -0.28449672, %v15822_v18 }
 0x9b4   : > { %v15885_v13 = vmul.f32 %v31920_v49, %v15853_v38  ;;  %v15823_v57 = vmul.f32 %v31960_v19, %v15791_v4  ;;  %v16106_v2 = vmul.f32 %v34609_v34, %v15946_v55  ;;  %v15792_v39 = vadd.f32 1.4214138, %v15760_v36  ;;  %v34610_v35 = vld [vmem:[#allocation225_spill] sm:$0xff]  ;;  %v34612_v4 = vld [vmem:[#allocation111_spill] sm:$0xff] }
 0x9b5   : > { %v15947_v31 = vmul.f32 %v31896_v22, %v15915_v33  ;;  %v15948_v54 = vmul.f32 %v31947_v53, %v15916_v52  ;;  %v16201_v43 = vadd.f32 1.0, %v16169_v60  ;;  %v15886_v6 = vmul.f32 %v31977_v61, %v15854_v20  ;;  %v34611_v24 = vld [vmem:[#allocation237_spill] sm:$0xff]  ;;  %v34613_v33 = vld [vmem:[#allocation126_spill] sm:$0xff]  ;;  %v34614_v20 = vld [vmem:[#allocation232_spill] sm:$0xff] }
 0x9b6   : > { %v15917_v26 = vadd.f32 0.2548296, %v15885_v13  ;;  %v15855_v5 = vadd.f32 -0.28449672, %v15823_v57  ;;  %v16138_v0 = vsub.f32 1.0, %v16106_v2  ;;  %v15824_v18 = vmul.f32 %v31999_v58, %v15792_v39  ;;  %v34615_v39 = vld [vmem:[#allocation16_spill] sm:$0xff] }
 0x9b7   : > { %v16107_v1 = vmul.f32 %v34610_v35, %v15947_v31  ;;  %v16108_v38 = vmul.f32 %v34611_v24, %v15948_v54  ;;  %v16233_v15 = vmul.f32 %v16201_v43, %v34612_v4  ;;  %v15918_v22 = vadd.f32 0.2548296, %v15886_v6  ;;  %v34617_v24 = vld [vmem:[#allocation13_spill] sm:$0xff] }
 0x9b8   : > { %v15949_v55 = vmul.f32 %v31920_v49, %v15917_v26  ;;  %v15887_v53 = vmul.f32 %v31960_v19, %v15855_v5  ;;  %v16170_v52 = vmul.f32 %v16138_v0, %v34613_v33  ;;  %v15856_v13 = vadd.f32 -0.28449672, %v15824_v18  ;;  %v34616_v49 = vld [vmem:[#allocation190_spill] sm:$0xff] }
 0x9b9   : > { %v16139_v36 = vsub.f32 1.0, %v16107_v1  ;;  %v16140_v60 = vsub.f32 1.0, %v16108_v38  ;;  %22992 = vmatmul.mubr.f32.gmra.mrb[68].mxu1 %v16233_v15  ;;  %v15950_v34 = vmul.f32 %v31977_v61, %v15918_v22  ;;  %v15697_v31 = vmul.f32 1.0614054, %v31984_v48  ;;  %v34618_v15 = vld [vmem:[#allocation162_spill] sm:$0xff] }
 0x9ba   : > { %v16109_v57 = vmul.f32 %v34614_v20, %v15949_v55  ;;  %v15919_v2 = vadd.f32 0.2548296, %v15887_v53  ;;  %v16202_v54 = vadd.f32 1.0, %v16170_v52  ;;  %v15888_v6 = vmul.f32 %v31999_v58, %v15856_v13  ;;  %v34619_v53 = vld [vmem:[#allocation207_spill] sm:$0xff]  ;;  %v34621_v13 = vld [vmem:[#allocation160_spill] sm:$0xff]  ;;  %v34622_v20 = vld [vmem:[#allocation46_spill] sm:$0xff] }
 0x9bb   : > { %v16171_v43 = vmul.f32 %v16139_v36, %v34615_v39  ;;  %v16172_v26 = vmul.f32 %v16140_v60, %v34616_v49  ;;  %v16110_v0 = vmul.f32 %v31982_v8, %v15950_v34  ;;  %v15729_v1 = vadd.f32 -1.4531521, %v15697_v31  ;;  %v34620_v36 = vld [vmem:[#allocation11_spill] sm:$0xff] }
 0x9bc   : > { %v16141_v5 = vsub.f32 1.0, %v16109_v57  ;;  %v15951_v35 = vmul.f32 %v31960_v19, %v15919_v2  ;;  %v16234_v38 = vmul.f32 %v16202_v54, %v34617_v24  ;;  %v15920_v4 = vadd.f32 0.2548296, %v15888_v6  ;;  %v34623_v2 = vld [vmem:[#allocation95_spill] sm:$0xff]  ;;  %v34625_v6 = vld [vmem:[#allocation42_spill] sm:$0xff] }
 0x9bd   : > { %v16203_v18 = vadd.f32 1.0, %v16171_v43  ;;  %v16204_v61 = vadd.f32 1.0, %v16172_v26  ;;  %v16142_v22 = vsub.f32 1.0, %v16110_v0  ;;  %v15761_v52 = vmul.f32 %v31984_v48, %v15729_v1  ;;  %v34624_v43 = vld [vmem:[#allocation38_spill] sm:$0xff] }
 0x9be   : > { %v16173_v55 = vmul.f32 %v16141_v5, %v34618_v15  ;;  %v16111_v33 = vmul.f32 %v34619_v53, %v15951_v35  ;;  %22994 = vmatprep.mubr.f32.mxu1 %v16234_v38  ;;  %v15952_v19 = vmul.f32 %v31999_v58, %v15920_v4  ;;  %v15698_v57 = vmul.f32 1.0614054, %v34622_v20  ;;  %v34626_v35 = vld [vmem:[#allocation127_spill] sm:$0xff]  ;;  %v34627_v58 = vld [vmem:[#allocation192_spill] sm:$0xff] }
 0x9bf   : > { %v16235_v60 = vmul.f32 %v16203_v18, %v34620_v36  ;;  %v16236_v8 = vmul.f32 %v16204_v61, %v34621_v13  ;;  %v16174_v31 = vmul.f32 %v16142_v22, %v34623_v2  ;;  %v15793_v39 = vadd.f32 1.4214138, %v15761_v52  ;;  %v34628_v22 = vld [vmem:[#allocation93_spill] sm:$0xff]  ;;  %v34629_v36 = vld [vmem:[#allocation56_spill] sm:$0xff]  ;;  %v34631_v2 = vld [vmem:[#allocation179_spill] sm:$0xff] }
 0x9c0   : > { %v16205_v34 = vadd.f32 1.0, %v16173_v55  ;;  %v16143_v54 = vsub.f32 1.0, %v16111_v33  ;;  %v16112_v49 = vmul.f32 %v34624_v43, %v15952_v19  ;;  %v15730_v26 = vadd.f32 -1.4531521, %v15698_v57  ;;  %v34630_v13 = vld [vmem:[#allocation233_spill] sm:$0xff] }
 0x9c1   : > { %22995 = vmatmul.mubr.f32.gmra.mrb[70].mxu1 %v16235_v60  ;;  %v15699_v5 = vmul.f32 1.0614054, %v34625_v6  ;;  %v15700_v0 = vmul.f32 1.0614054, %v32043_v3  ;;  %v16206_v24 = vadd.f32 1.0, %v16174_v31  ;;  %v15825_v18 = vmul.f32 %v31984_v48, %v15793_v39 }
 0x9c2   : > { %22997 = vmatprep.mubr.f32.mxu1 %v16236_v8  ;;  %v16237_v1 = vmul.f32 %v16205_v34, %v34626_v35  ;;  %v16175_v38 = vmul.f32 %v16143_v54, %v34627_v58  ;;  %v16144_v61 = vsub.f32 1.0, %v16112_v49  ;;  %v15762_v4 = vmul.f32 %v34622_v20, %v15730_v26 }
 0x9c3   : > { %v15731_v15 = vadd.f32 -1.4531521, %v15699_v5  ;;  %v15732_v55 = vadd.f32 -1.4531521, %v15700_v0  ;;  %v16238_v53 = vmul.f32 %v16206_v24, %v34628_v22  ;;  %v15857_v52 = vadd.f32 -0.28449672, %v15825_v18 }
 0x9c4   : > { %v16207_v33 = vadd.f32 1.0, %v16175_v38  ;;  %v15701_v60 = vmul.f32 1.0614054, %v34629_v36  ;;  %v16176_v8 = vmul.f32 %v16144_v61, %v34630_v13  ;;  %v15794_v19 = vadd.f32 1.4214138, %v15762_v4  ;;  %v34632_v38 = vld [vmem:[#allocation96_spill] sm:$0xff] }
 0x9c5   : > { %22998 = vmatmul.mubr.f32.gmra.mrb[72].mxu1 %v16237_v1  ;;  %v15763_v57 = vmul.f32 %v34625_v6, %v15731_v15  ;;  %v15764_v34 = vmul.f32 %v32043_v3, %v15732_v55  ;;  %v15889_v54 = vmul.f32 %v31984_v48, %v15857_v52  ;;  %v15702_v43 = vmul.f32 1.0614054, %v32072_v37 }
 0x9c6   : > { %23000 = vmatprep.mubr.f32.mxu1 %v16238_v53  ;;  %v16239_v31 = vmul.f32 %v16207_v33, %v34631_v2  ;;  %v15733_v39 = vadd.f32 -1.4531521, %v15701_v60  ;;  %v16208_v49 = vadd.f32 1.0, %v16176_v8  ;;  %v15826_v26 = vmul.f32 %v34622_v20, %v15794_v19  ;;  %v34633_v19 = vld [vmem:[#allocation123_spill] sm:$0xff] }
 0x9c7   : > { %v15795_v5 = vadd.f32 1.4214138, %v15763_v57  ;;  %v15796_v0 = vadd.f32 1.4214138, %v15764_v34  ;;  %v15921_v35 = vadd.f32 0.2548296, %v15889_v54 }
 0x9c8   : > { %v15765_v1 = vmul.f32 %v34629_v36, %v15733_v39  ;;  %v15734_v24 = vadd.f32 -1.4531521, %v15702_v43  ;;  %v15703_v58 = vmul.f32 1.0614054, %v32053_v44  ;;  %v16240_v18 = vmul.f32 %v16208_v49, %v34632_v38  ;;  %v34634_v38 = vld [vmem:[#allocation229_spill] sm:$0xff] }
 0x9c9   : > { %23001 = vmatmul.mubr.f32.gmra.mrb[74].mxu1 %v16239_v31  ;;  %v15858_v61 = vadd.f32 -0.28449672, %v15826_v26  ;;  %v15827_v4 = vmul.f32 %v34625_v6, %v15795_v5  ;;  %v15828_v15 = vmul.f32 %v32043_v3, %v15796_v0  ;;  %v15953_v55 = vmul.f32 %v31984_v48, %v15921_v35 }
 0x9ca   : > { %v15797_v22 = vadd.f32 1.4214138, %v15765_v1  ;;  %v15766_v53 = vmul.f32 %v32072_v37, %v15734_v24  ;;  %v15735_v33 = vadd.f32 -1.4531521, %v15703_v58  ;;  %23003 = vmatprep.mubr.f32.mxu1 %v16240_v18  ;;  %v15704_v8 = vmul.f32 1.0614054, %v32098_v25 }
 0x9cb   : > { %v15890_v52 = vmul.f32 %v34622_v20, %v15858_v61  ;;  %v15859_v60 = vadd.f32 -0.28449672, %v15827_v4  ;;  %v15860_v13 = vadd.f32 -0.28449672, %v15828_v15  ;;  %v16113_v57 = vmul.f32 %v34633_v19, %v15953_v55  ;;  %v34635_v55 = vld [vmem:[#allocation52_spill] sm:$0xff] }
 0x9cc   : > { %v15829_v34 = vmul.f32 %v34629_v36, %v15797_v22  ;;  %v15798_v2 = vadd.f32 1.4214138, %v15766_v53  ;;  %v15767_v31 = vmul.f32 %v32053_v44, %v15735_v33  ;;  %v15736_v43 = vadd.f32 -1.4531521, %v15704_v8 }
 0x9cd   : > { %v15922_v54 = vadd.f32 0.2548296, %v15890_v52  ;;  %v15891_v48 = vmul.f32 %v34625_v6, %v15859_v60  ;;  %v15892_v39 = vmul.f32 %v32043_v3, %v15860_v13  ;;  %v16145_v49 = vsub.f32 1.0, %v16113_v57  ;;  %v34636_v57 = vld [vmem:[#allocation50_spill] sm:$0xff] }
 0x9ce   : > { %v15861_v26 = vadd.f32 -0.28449672, %v15829_v34  ;;  %v15830_v5 = vmul.f32 %v32072_v37, %v15798_v2  ;;  %v15799_v0 = vadd.f32 1.4214138, %v15767_v31  ;;  %v15768_v58 = vmul.f32 %v32098_v25, %v15736_v43  ;;  %v34638_v43 = vld [vmem:[#allocation206_spill] sm:$0xff] }
 0x9cf   : > { %v15954_v35 = vmul.f32 %v34622_v20, %v15922_v54  ;;  %v15923_v1 = vadd.f32 0.2548296, %v15891_v48  ;;  %v15924_v24 = vadd.f32 0.2548296, %v15892_v39  ;;  %v16177_v18 = vmul.f32 %v16145_v49, %v34634_v38  ;;  %v34637_v54 = vld [vmem:[#allocation94_spill] sm:$0xff]  ;;  %v34639_v38 = vld [vmem:[#allocation205_spill] sm:$0xff] }
 0x9d0   : > { %v15893_v61 = vmul.f32 %v34629_v36, %v15861_v26  ;;  %v15862_v4 = vadd.f32 -0.28449672, %v15830_v5  ;;  %v15831_v15 = vmul.f32 %v32053_v44, %v15799_v0  ;;  %v15800_v52 = vadd.f32 1.4214138, %v15768_v58 }
 0x9d1   : > { %v16114_v22 = vmul.f32 %v34635_v55, %v15954_v35  ;;  %v15955_v53 = vmul.f32 %v34625_v6, %v15923_v1  ;;  %v15956_v33 = vmul.f32 %v32043_v3, %v15924_v24  ;;  %v16209_v60 = vadd.f32 1.0, %v16177_v18 }
 0x9d2   : > { %v15925_v20 = vadd.f32 0.2548296, %v15893_v61  ;;  %v15894_v13 = vmul.f32 %v32072_v37, %v15862_v4  ;;  %v15863_v8 = vadd.f32 -0.28449672, %v15831_v15  ;;  %v15832_v31 = vmul.f32 %v32098_v25, %v15800_v52 }
 0x9d3   : > { %v16146_v19 = vsub.f32 1.0, %v16114_v22  ;;  %v16115_v34 = vmul.f32 %v34636_v57, %v15955_v53  ;;  %v16116_v2 = vmul.f32 %v32050_v16, %v15956_v33  ;;  %v16241_v48 = vmul.f32 %v16209_v60, %v34637_v54  ;;  %v34641_v33 = vld [vmem:[#allocation239_spill] sm:$0xff]  ;;  %v34645_v54 = vld [vmem:[#allocation122_spill] sm:$0xff] }
 0x9d4   : > { %v15957_v39 = vmul.f32 %v34629_v36, %v15925_v20  ;;  %v15926_v6 = vadd.f32 0.2548296, %v15894_v13  ;;  %v15895_v3 = vmul.f32 %v32053_v44, %v15863_v8  ;;  %v15864_v0 = vadd.f32 -0.28449672, %v15832_v31  ;;  %v34640_v36 = vld [vmem:[#allocation125_spill] sm:$0xff]  ;;  %v34642_v20 = vld [vmem:[#allocation124_spill] sm:$0xff] }
 0x9d5   : > { %v16178_v49 = vmul.f32 %v16146_v19, %v34638_v43  ;;  %v16147_v26 = vsub.f32 1.0, %v16115_v34  ;;  %v16148_v5 = vsub.f32 1.0, %v16116_v2  ;;  %23004 = vmatmul.mubr.f32.gmra.mrb[76].mxu1 %v16241_v48  ;;  %v15705_v24 = vmul.f32 1.0614054, %v32086_v28  ;;  %v34643_v19 = vld [vmem:[#allocation213_spill] sm:$0xff]  ;;  %v34644_v2 = vld [vmem:[#allocation236_spill] sm:$0xff] }
 0x9d6   : > { %v16117_v35 = vmul.f32 %v32037_v45, %v15957_v39  ;;  %v15958_v1 = vmul.f32 %v32072_v37, %v15926_v6  ;;  %v15927_v16 = vadd.f32 0.2548296, %v15895_v3  ;;  %v15896_v4 = vmul.f32 %v32098_v25, %v15864_v0  ;;  %v34646_v48 = vld [vmem:[#allocation28_spill] sm:$0xff] }
 0x9d7   : > { %v16210_v58 = vadd.f32 1.0, %v16178_v49  ;;  %v16179_v18 = vmul.f32 %v16147_v26, %v34639_v38  ;;  %v16180_v61 = vmul.f32 %v16148_v5, %v34640_v36  ;;  %v15737_v53 = vadd.f32 -1.4531521, %v15705_v24  ;;  %v34647_v3 = vld [vmem:[#allocation48_spill] sm:$0xff]  ;;  %v34648_v5 = vld [vmem:[#allocation221_spill] sm:$0xff] }
 0x9d8   : > { %v16149_v15 = vsub.f32 1.0, %v16117_v35  ;;  %v16118_v55 = vmul.f32 %v32078_v32, %v15958_v1  ;;  %v15959_v22 = vmul.f32 %v32053_v44, %v15927_v16  ;;  %v15928_v60 = vadd.f32 0.2548296, %v15896_v4  ;;  %v34649_v1 = vld [vmem:[#allocation224_spill] sm:$0xff] }
 0x9d9   : > { %v16242_v45 = vmul.f32 %v16210_v58, %v34641_v33  ;;  %v16211_v52 = vadd.f32 1.0, %v16179_v18  ;;  %v16212_v37 = vadd.f32 1.0, %v16180_v61  ;;  %v15769_v34 = vmul.f32 %v32086_v28, %v15737_v53  ;;  %v34650_v58 = vld [vmem:[#allocation208_spill] sm:$0xff] }
 0x9da   : > { %v16181_v13 = vmul.f32 %v16149_v15, %v34642_v20  ;;  %v16150_v8 = vsub.f32 1.0, %v16118_v55  ;;  %v16119_v57 = vmul.f32 %v34643_v19, %v15959_v22  ;;  %v15960_v44 = vmul.f32 %v32098_v25, %v15928_v60  ;;  %v34651_v25 = vld [vmem:[#allocation36_spill] sm:$0xff] }
 0x9db   : > { %23006 = vmatprep.mubr.f32.mxu1 %v16242_v45  ;;  %v16243_v31 = vmul.f32 %v16211_v52, %v34644_v2  ;;  %v16244_v32 = vmul.f32 %v16212_v37, %v34645_v54  ;;  %v15706_v39 = vmul.f32 1.0614054, %v34646_v48  ;;  %v15801_v26 = vadd.f32 1.4214138, %v15769_v34  ;;  %v34652_v53 = vld [vmem:[#allocation40_spill] sm:$0xff] }
 0x9dc   : > { %v16213_v6 = vadd.f32 1.0, %v16181_v13  ;;  %v16182_v43 = vmul.f32 %v16150_v8, %v34647_v3  ;;  %v16151_v49 = vsub.f32 1.0, %v16119_v57  ;;  %v16120_v0 = vmul.f32 %v34648_v5, %v15960_v44  ;;  %v34653_v60 = vld [vmem:[#allocation212_spill] sm:$0xff]  ;;  %v34654_v57 = vld [vmem:[#allocation34_spill] sm:$0xff] }
 0x9dd   : > { %23007 = vmatmul.mubr.f32.gmra.mrb[78].mxu1 %v16243_v31  ;;  %v15738_v35 = vadd.f32 -1.4531521, %v15706_v39  ;;  %v15707_v16 = vmul.f32 1.0614054, %v34649_v1  ;;  %v15708_v24 = vmul.f32 1.0614054, %v32149_v30  ;;  %v15833_v61 = vmul.f32 %v32086_v28, %v15801_v26 }
 0x9de   : > { %23009 = vmatprep.mubr.f32.mxu1 %v16244_v32  ;;  %v16245_v38 = vmul.f32 %v16213_v6, %v34650_v58  ;;  %v16214_v18 = vadd.f32 1.0, %v16182_v43  ;;  %v16183_v36 = vmul.f32 %v16151_v49, %v34651_v25  ;;  %v16152_v4 = vsub.f32 1.0, %v16120_v0  ;;  %v34655_v5 = vld [vmem:[#allocation58_spill] sm:$0xff] }
 0x9df   : > { %v15770_v15 = vmul.f32 %v34646_v48, %v15738_v35  ;;  %v15739_v55 = vadd.f32 -1.4531521, %v15707_v16  ;;  %v15740_v22 = vadd.f32 -1.4531521, %v15708_v24  ;;  %v15865_v52 = vadd.f32 -0.28449672, %v15833_v61 }
 0x9e0   : > { %v16246_v33 = vmul.f32 %v16214_v18, %v34652_v53  ;;  %v16215_v45 = vadd.f32 1.0, %v16183_v36  ;;  %v15709_v37 = vmul.f32 1.0614054, %v32141_v29  ;;  %v16184_v20 = vmul.f32 %v16152_v4, %v34653_v60 }
 0x9e1   : > { %23010 = vmatmul.mubr.f32.gmra.mrb[80].mxu1 %v16245_v38  ;;  %v15802_v13 = vadd.f32 1.4214138, %v15770_v15  ;;  %v15771_v8 = vmul.f32 %v34649_v1, %v15739_v55  ;;  %v15772_v19 = vmul.f32 %v32149_v30, %v15740_v22  ;;  %v15897_v2 = vmul.f32 %v32086_v28, %v15865_v52  ;;  %v34656_v55 = vld [vmem:[#allocation215_spill] sm:$0xff] }
 0x9e2   : > { %23012 = vmatprep.mubr.f32.mxu1 %v16246_v33  ;;  %v16247_v34 = vmul.f32 %v16215_v45, %v34654_v57  ;;  %v15741_v31 = vadd.f32 -1.4531521, %v15709_v37  ;;  %v15710_v54 = vmul.f32 1.0614054, %v32187_v59  ;;  %v16216_v32 = vadd.f32 1.0, %v16184_v20 }
 0x9e3   : > { %v15834_v44 = vmul.f32 %v34646_v48, %v15802_v13  ;;  %v15803_v39 = vadd.f32 1.4214138, %v15771_v8  ;;  %v15804_v6 = vadd.f32 1.4214138, %v15772_v19  ;;  %v15929_v3 = vadd.f32 0.2548296, %v15897_v2 }
 0x9e4   : > { %v15773_v43 = vmul.f32 %v32141_v29, %v15741_v31  ;;  %v15742_v49 = vadd.f32 -1.4531521, %v15710_v54  ;;  %v15711_v26 = vmul.f32 1.0614054, %v32182_v50  ;;  %v16248_v0 = vmul.f32 %v16216_v32, %v34655_v5  ;;  %v34657_v54 = vld [vmem:[#allocation54_spill] sm:$0xff] }
 0x9e5   : > { %23013 = vmatmul.mubr.f32.gmra.mrb[82].mxu1 %v16247_v34  ;;  %v15866_v35 = vadd.f32 -0.28449672, %v15834_v44  ;;  %v15835_v16 = vmul.f32 %v34649_v1, %v15803_v39  ;;  %v15836_v24 = vmul.f32 %v32149_v30, %v15804_v6  ;;  %v15961_v58 = vmul.f32 %v32086_v28, %v15929_v3 }
 0x9e6   : > { %v15805_v38 = vadd.f32 1.4214138, %v15773_v43  ;;  %v15774_v18 = vmul.f32 %v32187_v59, %v15742_v49  ;;  %v15743_v25 = vadd.f32 -1.4531521, %v15711_v26  ;;  %23015 = vmatprep.mubr.f32.mxu1 %v16248_v0  ;;  %v15712_v15 = vmul.f32 1.0614054, %v32225_v62 }
 0x9e7   : > { %v15898_v36 = vmul.f32 %v34646_v48, %v15866_v35  ;;  %v15867_v61 = vadd.f32 -0.28449672, %v15835_v16  ;;  %v15868_v4 = vadd.f32 -0.28449672, %v15836_v24  ;;  %v16121_v22 = vmul.f32 %v34656_v55, %v15961_v58  ;;  %v34658_v24 = vld [vmem:[#allocation24_spill] sm:$0xff] }
 0x9e8   : > { %v15837_v53 = vmul.f32 %v32141_v29, %v15805_v38  ;;  %v15806_v33 = vadd.f32 1.4214138, %v15774_v18  ;;  %v15775_v45 = vmul.f32 %v32182_v50, %v15743_v25  ;;  %v15744_v60 = vadd.f32 -1.4531521, %v15712_v15  ;;  %v34659_v25 = vld [vmem:[#allocation44_spill] sm:$0xff] }
 0x9e9   : > { %v15930_v52 = vadd.f32 0.2548296, %v15898_v36  ;;  %v15899_v28 = vmul.f32 %v34649_v1, %v15867_v61  ;;  %v15900_v37 = vmul.f32 %v32149_v30, %v15868_v4  ;;  %v16153_v20 = vsub.f32 1.0, %v16121_v22  ;;  %v34660_v61 = vld [vmem:[#allocation175_spill] sm:$0xff] }
 0x9ea   : > { %v15869_v13 = vadd.f32 -0.28449672, %v15837_v53  ;;  %v15838_v8 = vmul.f32 %v32187_v59, %v15806_v33  ;;  %v15807_v19 = vadd.f32 1.4214138, %v15775_v45  ;;  %v15776_v31 = vmul.f32 %v32225_v62, %v15744_v60 }
 0x9eb   : > { %v15962_v57 = vmul.f32 %v34646_v48, %v15930_v52  ;;  %v15931_v34 = vadd.f32 0.2548296, %v15899_v28  ;;  %v15932_v2 = vadd.f32 0.2548296, %v15900_v37  ;;  %v16185_v32 = vmul.f32 %v16153_v20, %v34657_v54  ;;  %v34661_v28 = vld [vmem:[#allocation70_spill] sm:$0xff] }
 0x9ec   : > { %v15901_v44 = vmul.f32 %v32141_v29, %v15869_v13  ;;  %v15870_v39 = vadd.f32 -0.28449672, %v15838_v8  ;;  %v15839_v6 = vmul.f32 %v32182_v50, %v15807_v19  ;;  %v15808_v26 = vadd.f32 1.4214138, %v15776_v31  ;;  %v34664_v54 = vld [vmem:[#allocation214_spill] sm:$0xff] }
 0x9ed   : > { %v16122_v3 = vmul.f32 %v32132_v12, %v15962_v57  ;;  %v15963_v43 = vmul.f32 %v34649_v1, %v15931_v34  ;;  %v15964_v49 = vmul.f32 %v32149_v30, %v15932_v2  ;;  %v16217_v5 = vadd.f32 1.0, %v16185_v32  ;;  %v34663_v34 = vld [vmem:[#allocation174_spill] sm:$0xff] }
 0x9ee   : > { %v15933_v48 = vadd.f32 0.2548296, %v15901_v44  ;;  %v15902_v0 = vmul.f32 %v32187_v59, %v15870_v39  ;;  %v15871_v35 = vadd.f32 -0.28449672, %v15839_v6  ;;  %v15840_v18 = vmul.f32 %v32225_v62, %v15808_v26 }
 0x9ef   : > { %v16154_v16 = vsub.f32 1.0, %v16122_v3  ;;  %v16123_v58 = vmul.f32 %v34658_v24, %v15963_v43  ;;  %v16124_v38 = vmul.f32 %v32170_v40, %v15964_v49  ;;  %v16249_v36 = vmul.f32 %v16217_v5, %v34659_v25  ;;  %v34665_v3 = vld [vmem:[#allocation211_spill] sm:$0xff]  ;;  %v34666_v49 = vld [vmem:[#allocation177_spill] sm:$0xff] }
 0x9f0   : > { %v15965_v12 = vmul.f32 %v32141_v29, %v15933_v48  ;;  %v15934_v1 = vadd.f32 0.2548296, %v15902_v0  ;;  %v15903_v30 = vmul.f32 %v32182_v50, %v15871_v35  ;;  %v15872_v22 = vadd.f32 -0.28449672, %v15840_v18  ;;  %v34662_v29 = vld [vmem:[#allocation216_spill] sm:$0xff]  ;;  %v34667_v48 = vld [vmem:[#allocation31_spill] sm:$0xff] }
 0x9f1   : > { %v16186_v4 = vmul.f32 %v16154_v16, %v34660_v61  ;;  %v16155_v15 = vsub.f32 1.0, %v16123_v58  ;;  %v16156_v55 = vsub.f32 1.0, %v16124_v38  ;;  %23016 = vmatmul.mubr.f32.gmra.mrb[84].mxu1 %v16249_v36  ;;  %v15713_v45 = vmul.f32 1.0614054, %v32214_v46 }
 0x9f2   : > { %v16125_v53 = vmul.f32 %v32156_v14, %v15965_v12  ;;  %v15966_v33 = vmul.f32 %v32187_v59, %v15934_v1  ;;  %v15935_v40 = vadd.f32 0.2548296, %v15903_v30  ;;  %v15904_v20 = vmul.f32 %v32225_v62, %v15872_v22  ;;  %v34669_v12 = vld [vmem:[#allocation176_spill] sm:$0xff] }
 0x9f3   : > { %v16218_v52 = vadd.f32 1.0, %v16186_v4  ;;  %v16187_v37 = vmul.f32 %v16155_v15, %v34661_v28  ;;  %v16188_v60 = vmul.f32 %v16156_v55, %v34662_v29  ;;  %v15745_v57 = vadd.f32 -1.4531521, %v15713_v45 }
 0x9f4   : > { %v16157_v13 = vsub.f32 1.0, %v16125_v53  ;;  %v16126_v8 = vmul.f32 %v32208_v41, %v15966_v33  ;;  %v15967_v19 = vmul.f32 %v32182_v50, %v15935_v40  ;;  %v15936_v31 = vadd.f32 0.2548296, %v15904_v20  ;;  %v34671_v53 = vld [vmem:[#allocation72_spill] sm:$0xff] }
 0x9f5   : > { %v16250_v14 = vmul.f32 %v16218_v52, %v34663_v34  ;;  %v16219_v2 = vadd.f32 1.0, %v16187_v37  ;;  %v16220_v59 = vadd.f32 1.0, %v16188_v60  ;;  %v15777_v6 = vmul.f32 %v32214_v46, %v15745_v57  ;;  %v34672_v52 = vld [vmem:[#allocation26_spill] sm:$0xff]  ;;  %v25235_v34 = vpop.eup %25234 }
 0x9f6   : > { %v16189_v32 = vmul.f32 %v16157_v13, %v34664_v54  ;;  %v16158_v44 = vsub.f32 1.0, %v16126_v8  ;;  %v16127_v39 = vmul.f32 %v32203_v21, %v15967_v19  ;;  %v15968_v50 = vmul.f32 %v32225_v62, %v15936_v31  ;;  %v34668_v62 = vld [vmem:[#allocation22_spill] sm:$0xff] }
 0x9f7   : > { %23018 = vmatprep.mubr.f32.mxu1 %v16250_v14  ;;  %v16251_v43 = vmul.f32 %v16219_v2, %v34665_v3  ;;  %v16252_v41 = vmul.f32 %v16220_v59, %v34666_v49  ;;  %v15714_v26 = vmul.f32 1.0614054, %v32249_v17  ;;  %v15809_v16 = vadd.f32 1.4214138, %v15777_v6  ;;  %v34673_v59 = vld [vmem:[#allocation219_spill] sm:$0xff] }
 0x9f8   : > { %v16221_v5 = vadd.f32 1.0, %v16189_v32  ;;  %v16190_v0 = vmul.f32 %v16158_v44, %v34667_v48  ;;  %v16159_v35 = vsub.f32 1.0, %v16127_v39  ;;  %v16128_v21 = vmul.f32 %v32230_v10, %v15968_v50  ;;  %v34670_v10 = vld [vmem:[#allocation218_spill] sm:$0xff] }
 0x9f9   : > { %23019 = vmatmul.mubr.f32.gmra.mrb[86].mxu1 %v16251_v43  ;;  %v15746_v24 = vadd.f32 -1.4531521, %v15714_v26  ;;  %v15715_v58 = vmul.f32 1.0614054, %v32244_v63  ;;  %v16096_v38 = vmul.f32 1.442695, %v32217_v42  ;;  %v15841_v36 = vmul.f32 %v32214_v46, %v15809_v16 }
 0x9fa   : > { %23021 = vmatprep.mubr.f32.mxu1 %v16252_v41  ;;  %v16222_v18 = vadd.f32 1.0, %v16190_v0  ;;  %v16191_v25 = vmul.f32 %v16159_v35, %v34668_v62  ;;  %v16253_v1 = vmul.f32 %v16221_v5, %v34669_v12  ;;  %v16160_v30 = vsub.f32 1.0, %v16128_v21  ;;  %v34674_v26 = vld [vmem:[#allocation200_spill] sm:$0xff] }
 0x9fb   : > { %v15778_v61 = vmul.f32 %v32249_v17, %v15746_v24  ;;  %v15747_v56 = vadd.f32 -1.4531521, %v15715_v58  ;;  %v16098_v4 = vmul.f32 1.442695, %v32211_v9  ;;  %v15873_v22 = vadd.f32 -0.28449672, %v15841_v36 }
 0x9fc   : > { %v16254_v15 = vmul.f32 %v16222_v18, %v34670_v10  ;;  %v16223_v55 = vadd.f32 1.0, %v16191_v25  ;;  %v15423_v42 = vmul.f32 0.5, %v34671_v53  ;;  %v16192_v33 = vmul.f32 %v16160_v30, %v32192_v7  ;;  %v32445_v36 = vld [vmem:[%s32676_s8] ss:$0 sm:$0xff]  ;;  %v34676_v10 = vld [vmem:[#allocation43_spill] sm:$0xff] }
 0x9fd   : > { %23022 = vmatmul.mubr.f32.gmra.mrb[88].mxu1 %v16253_v1  ;;  %v15810_v40 = vadd.f32 1.4214138, %v15778_v61  ;;  %v15779_v45 = vmul.f32 %v32244_v63, %v15747_v56  ;;  %v15424_v28 = vmul.f32 0.5, %v34672_v52  ;;  %25236 = vpow2.f32 %v16096_v38  ;;  %v34675_v56 = vld [vmem:[#allocation45_spill] sm:$0xff] }
 0x9fe   : > { %23024 = vmatprep.mubr.f32.mxu1 %v16254_v15  ;;  %v15905_v37 = vmul.f32 %v32214_v46, %v15873_v22  ;;  %v16255_v29 = vmul.f32 %v16223_v55, %v15423_v42  ;;  %v16224_v9 = vadd.f32 1.0, %v16192_v33  ;;  %25238 = vpow2.f32 %v16098_v4 }
 0x9ff   : > { %v15842_v60 = vmul.f32 %v32249_v17, %v15810_v40  ;;  %v15811_v20 = vadd.f32 1.4214138, %v15779_v45  ;;  %vm15489_vm6 = vcmp.ge.f32.partialorder %v34673_v59, 0.0  ;;  %vm15490_vm7 = vcmp.ge.f32.partialorder %v32195_v27, 0.0  ;;  %v34677_v45 = vld [vmem:[#allocation49_spill] sm:$0xff] }
 0xa00   : > { %v15937_v13 = vadd.f32 0.2548296, %v15905_v37  ;;  %v16256_v8 = vmul.f32 %v16224_v9, %v15424_v28  ;;  %v15521_v39 = vsel %vm15489_vm6, 1.0, %v34545_v51  ;;  %v15425_v5 = vmul.f32 0.5, %v34674_v26  ;;  %v34678_v28 = vld [vmem:[#allocation47_spill] sm:$0xff] }
 0xa01   : > { %23025 = vmatmul.mubr.f32.gmra.mrb[90].mxu1 %v16255_v29  ;;  %v15874_v19 = vadd.f32 -0.28449672, %v15842_v60  ;;  %v15843_v7 = vmul.f32 %v32244_v63, %v15811_v20  ;;  %vm15491_vm8 = vcmp.ge.f32.partialorder %v32162_v23, 0.0  ;;  %v15522_v16 = vsel %vm15490_vm7, 1.0, %v34545_v51 }
 0xa02   : > { %v15969_v57 = vmul.f32 %v32214_v46, %v15937_v13  ;;  %23027 = vmatprep.mubr.f32.mxu1 %v16256_v8  ;;  %v15523_v27 = vsel %vm15491_vm8, 1.0, %v34545_v51  ;;  %v15427_v18 = vmul.f32 0.5, %v32154_v47  ;;  %v32450_v51 = vld [vmem:[%s32677_s9] ss:$0 sm:$0xff] }
 0xa03   : > { %v15906_v14 = vmul.f32 %v32249_v17, %v15874_v19  ;;  %v15875_v2 = vadd.f32 -0.28449672, %v15843_v7  ;;  %v34679_v19 = vld [vmem:[#allocation53_spill] sm:$0xff] }
 0xa04   : > { %v16129_v31 = vmul.f32 %v25235_v34, %v15969_v57  ;;  %v34680_v57 = vld [vmem:[#allocation51_spill] sm:$0xff] }
 0xa05   : > { %v15938_v54 = vadd.f32 0.2548296, %v15906_v14  ;;  %v15907_v32 = vmul.f32 %v32244_v63, %v15875_v2 }
 0xa06   : > { %v16161_v44 = vsub.f32 1.0, %v16129_v31 }
 0xa07   : > { %v15970_v6 = vmul.f32 %v32249_v17, %v15938_v54  ;;  %v15939_v3 = vadd.f32 0.2548296, %v15907_v32  ;;  %v25237_v43 = vpop.eup %25236 }
 0xa08   : > { %v16193_v49 = vmul.f32 %v16161_v44, %v15521_v39  ;;  %v25239_v50 = vpop.eup %25238  ;;  %v34681_v39 = vld [vmem:[#allocation57_spill] sm:$0xff] }
 0xa09   : > { %v16130_v46 = vmul.f32 %v25237_v43, %v15970_v6  ;;  %v15971_v41 = vmul.f32 %v32244_v63, %v15939_v3  ;;  %v15426_v63 = vmul.f32 0.5, %v32180_v11 }
 0xa0a   : > { %v16225_v48 = vadd.f32 1.0, %v16193_v49  ;;  %v34682_v49 = vld [vmem:[#allocation55_spill] sm:$0xff] }
 0xa0b   : > { %v16162_v0 = vsub.f32 1.0, %v16130_v46  ;;  %v16131_v35 = vmul.f32 %v25239_v50, %v15971_v41 }
 0xa0c   : > { %v16257_v17 = vmul.f32 %v16225_v48, %v15425_v5  ;;  %v34683_v48 = vld [vmem:[#allocation61_spill] sm:$0xff] }
 0xa0d   : > { %v16194_v21 = vmul.f32 %v16162_v0, %v15522_v16  ;;  %v16163_v24 = vsub.f32 1.0, %v16131_v35 }
 0xa0e   : > { %23028 = vmatmul.mubr.f32.gmra.mrb[92].mxu1 %v16257_v17  ;;  %v34684_v17 = vld [vmem:[#allocation59_spill] sm:$0xff] }
 0xa0f   : > { %v16226_v58 = vadd.f32 1.0, %v16194_v21  ;;  %v16195_v38 = vmul.f32 %v16163_v24, %v15523_v27 }
 0xa11   : > { %v16258_v62 = vmul.f32 %v16226_v58, %v15426_v63  ;;  %v16227_v23 = vadd.f32 1.0, %v16195_v38  ;;  %v34685_v58 = vld [vmem:[#allocation65_spill] sm:$0xff] }
 0xa13   : > { %23030 = vmatprep.mubr.f32.mxu1 %v16258_v62  ;;  %v16259_v25 = vmul.f32 %v16227_v23, %v15427_v18  ;;  %v34686_v18 = vld [vmem:[#allocation63_spill] sm:$0xff] }
 0xa15   : > { %23031 = vmatmul.mubr.f32.gmra.mrb[94].mxu1 %v16259_v25 }
 0xa72   : > { %v22987_v12 = vpop.f32.mrb[64].mxu1 }
 0xa73   : > { %v16355_v47 = vadd.f32 %v22987_v12, %v32445_v36  ;;  %v16349_v11 = vpop.f32.mrb[65].mxu1 }
 0xa74   : > { %v16350_v1 = vadd.f32 %v32445_v36, %v16349_v11 }
 0xa75   : > { %v16516_v30 = vmul.f32 %v32450_v51, %v16355_v47 }
 0xa76   : > { %v16515_v61 = vmul.f32 %v32450_v51, %v16350_v1 }
 0xa77   : > { %v16548_v4 = vadd.f32 %v16516_v30, %v34675_v56  ;;  %v34687_v30 = vld [vmem:[#allocation69_spill] sm:$0xff]  ;;  %v34688_v56 = vld [vmem:[#allocation67_spill] sm:$0xff] }
 0xa78   : > { %v16547_v15 = vadd.f32 %v16515_v61, %v34676_v10 }
 0xa79   : > { %16580 = vst.msk [vmem:[%s32460_s27 + $0x8] sm:$0xff] %vm749_vm1, %v16548_v4 }
 0xa7a   : > { %16579 = vst.msk [vmem:[%s32460_s27] sm:$0xff] %vm749_vm1, %v16547_v15  ;;  %v22990_v55 = vpop.f32.mrb[66].mxu1 }
 0xa7b   : > { %v16365_v22 = vadd.f32 %v22990_v55, %v32445_v36  ;;  %v16359_v53 = vpop.f32.mrb[67].mxu1 }
 0xa7c   : > { %v16360_v42 = vadd.f32 %v32445_v36, %v16359_v53 }
 0xa7d   : > { %v16518_v33 = vmul.f32 %v32450_v51, %v16365_v22 }
 0xa7e   : > { %v16517_v40 = vmul.f32 %v32450_v51, %v16360_v42 }
 0xa7f   : > { %v16550_v52 = vadd.f32 %v16518_v33, %v34677_v45 }
 0xa80   : > { %v16549_v37 = vadd.f32 %v16517_v40, %v34678_v28  ;;  %v34689_v40 = vld [vmem:[#allocation73_spill] sm:$0xff] }
 0xa81   : > { %16582 = vst.msk [vmem:[%s32460_s27 + $0x18] sm:$0xff] %vm749_vm1, %v16550_v52 }
 0xa82   : > { %16581 = vst.msk [vmem:[%s32460_s27 + $0x10] sm:$0xff] %vm749_vm1, %v16549_v37  ;;  %v34690_v37 = vld [vmem:[#allocation71_spill] sm:$0xff] }
 0xa8c   : > { %v22993_v29 = vpop.f32.mrb[68].mxu1 }
 0xa8d   : > { %v16375_v9 = vadd.f32 %v22993_v29, %v32445_v36  ;;  %v16369_v60 = vpop.f32.mrb[69].mxu1 }
 0xa8e   : > { %v16370_v20 = vadd.f32 %v32445_v36, %v16369_v60 }
 0xa8f   : > { %v16520_v13 = vmul.f32 %v32450_v51, %v16375_v9 }
 0xa90   : > { %v16519_v8 = vmul.f32 %v32450_v51, %v16370_v20 }
 0xa91   : > { %v16552_v7 = vadd.f32 %v16520_v13, %v34679_v19 }
 0xa92   : > { %v16551_v34 = vadd.f32 %v16519_v8, %v34680_v57  ;;  %v34691_v8 = vld [vmem:[#allocation75_spill] sm:$0xff] }
 0xa93   : > { %16584 = vst.msk [vmem:[%s32460_s27 + $0x28] sm:$0xff] %vm749_vm1, %v16552_v7 }
 0xa94   : > { %v22996_v14 = vpop.f32.mrb[70].mxu1  ;;  %16583 = vst.msk [vmem:[%s32460_s27 + $0x20] sm:$0xff] %vm749_vm1, %v16551_v34  ;;  %v34692_v34 = vld [vmem:[#allocation74_spill] sm:$0xff] }
 0xa95   : > { %v16385_v2 = vadd.f32 %v22996_v14, %v32445_v36  ;;  %v16379_v59 = vpop.f32.mrb[71].mxu1 }
 0xa96   : > { %v16380_v31 = vadd.f32 %v32445_v36, %v16379_v59 }
 0xa97   : > { %v16522_v54 = vmul.f32 %v32450_v51, %v16385_v2 }
 0xa98   : > { %v16521_v32 = vmul.f32 %v32450_v51, %v16380_v31  ;;  %v22999_v44 = vpop.f32.mrb[72].mxu1 }
 0xa99   : > { %v16554_v6 = vadd.f32 %v16522_v54, %v34681_v39  ;;  %v16395_v3 = vadd.f32 %v22999_v44, %v32445_v36  ;;  %v16389_v43 = vpop.f32.mrb[73].mxu1  ;;  %v34693_v54 = vld [vmem:[#allocation77_spill] sm:$0xff]  ;;  %v34694_v44 = vld [vmem:[#allocation76_spill] sm:$0xff] }
 0xa9a   : > { %v16553_v46 = vadd.f32 %v16521_v32, %v34682_v49  ;;  %v16390_v41 = vadd.f32 %v32445_v36, %v16389_v43 }
 0xa9b   : > { %16586 = vst.msk [vmem:[%s32460_s27 + $0x38] sm:$0xff] %vm749_vm1, %v16554_v6  ;;  %v16524_v50 = vmul.f32 %v32450_v51, %v16395_v3 }
 0xa9c   : > { %16585 = vst.msk [vmem:[%s32460_s27 + $0x30] sm:$0xff] %vm749_vm1, %v16553_v46  ;;  %v16523_v26 = vmul.f32 %v32450_v51, %v16390_v41  ;;  %v23002_v5 = vpop.f32.mrb[74].mxu1 }
 0xa9d   : > { %v16556_v0 = vadd.f32 %v16524_v50, %v34683_v48  ;;  %v16405_v35 = vadd.f32 %v23002_v5, %v32445_v36  ;;  %v16399_v16 = vpop.f32.mrb[75].mxu1  ;;  %v34695_v50 = vld [vmem:[#allocation79_spill] sm:$0xff]  ;;  %v34696_v5 = vld [vmem:[#allocation78_spill] sm:$0xff] }
 0xa9e   : > { %v16555_v21 = vadd.f32 %v16523_v26, %v34684_v17  ;;  %v16400_v24 = vadd.f32 %v32445_v36, %v16399_v16 }
 0xa9f   : > { %16588 = vst.msk [vmem:[%s32460_s27 + $0x48] sm:$0xff] %vm749_vm1, %v16556_v0  ;;  %v16526_v27 = vmul.f32 %v32450_v51, %v16405_v35 }
 0xaa0   : > { %16587 = vst.msk [vmem:[%s32460_s27 + $0x40] sm:$0xff] %vm749_vm1, %v16555_v21  ;;  %v16525_v63 = vmul.f32 %v32450_v51, %v16400_v24 }
 0xaa1   : > { %v16558_v38 = vadd.f32 %v16526_v27, %v34685_v58 }
 0xaa2   : > { %v16557_v62 = vadd.f32 %v16525_v63, %v34686_v18  ;;  %v34697_v63 = vld [vmem:[#allocation81_spill] sm:$0xff] }
 0xaa3   : > { %16590 = vst.msk [vmem:[%s32460_s27 + $0x58] sm:$0xff] %vm749_vm1, %v16558_v38 }
 0xaa4   : > { %16589 = vst.msk [vmem:[%s32460_s27 + $0x50] sm:$0xff] %vm749_vm1, %v16557_v62  ;;  %v34698_v62 = vld [vmem:[#allocation80_spill] sm:$0xff] }
 0xaa8   : > { %v23005_v23 = vpop.f32.mrb[76].mxu1 }
 0xaa9   : > { %v16415_v25 = vadd.f32 %v23005_v23, %v32445_v36  ;;  %v16409_v12 = vpop.f32.mrb[77].mxu1 }
 0xaaa   : > { %v16410_v47 = vadd.f32 %v32445_v36, %v16409_v12 }
 0xaab   : > { %v16528_v11 = vmul.f32 %v32450_v51, %v16415_v25 }
 0xaac   : > { %v16527_v1 = vmul.f32 %v32450_v51, %v16410_v47 }
 0xaad   : > { %v16560_v61 = vadd.f32 %v16528_v11, %v34687_v30 }
 0xaae   : > { %v16559_v4 = vadd.f32 %v16527_v1, %v34688_v56  ;;  %v34699_v1 = vld [vmem:[#allocation86_spill] sm:$0xff] }
 0xaaf   : > { %16592 = vst.msk [vmem:[%s32460_s27 + $0x68] sm:$0xff] %vm749_vm1, %v16560_v61 }
 0xab0   : > { %v23008_v10 = vpop.f32.mrb[78].mxu1  ;;  %16591 = vst.msk [vmem:[%s32460_s27 + $0x60] sm:$0xff] %vm749_vm1, %v16559_v4  ;;  %v34700_v4 = vld [vmem:[#allocation82_spill] sm:$0xff] }
 0xab1   : > { %v16425_v15 = vadd.f32 %v23008_v10, %v32445_v36  ;;  %v16419_v55 = vpop.f32.mrb[79].mxu1 }
 0xab2   : > { %v16420_v22 = vadd.f32 %v32445_v36, %v16419_v55 }
 0xab3   : > { %v16530_v53 = vmul.f32 %v32450_v51, %v16425_v15 }
 0xab4   : > { %v16529_v42 = vmul.f32 %v32450_v51, %v16420_v22  ;;  %v23011_v33 = vpop.f32.mrb[80].mxu1 }
 0xab5   : > { %v16562_v45 = vadd.f32 %v16530_v53, %v34689_v40  ;;  %v16435_v52 = vadd.f32 %v23011_v33, %v32445_v36  ;;  %v16429_v28 = vpop.f32.mrb[81].mxu1  ;;  %v34701_v53 = vld [vmem:[#allocation88_spill] sm:$0xff]  ;;  %v34702_v33 = vld [vmem:[#allocation87_spill] sm:$0xff] }
 0xab6   : > { %v16561_v29 = vadd.f32 %v16529_v42, %v34690_v37  ;;  %v16430_v9 = vadd.f32 %v32445_v36, %v16429_v28 }
 0xab7   : > { %16594 = vst.msk [vmem:[%s32460_s27 + $0x78] sm:$0xff] %vm749_vm1, %v16562_v45  ;;  %v16532_v60 = vmul.f32 %v32450_v51, %v16435_v52 }
 0xab8   : > { %16593 = vst.msk [vmem:[%s32460_s27 + $0x70] sm:$0xff] %vm749_vm1, %v16561_v29  ;;  %v16531_v20 = vmul.f32 %v32450_v51, %v16430_v9  ;;  %v23014_v13 = vpop.f32.mrb[82].mxu1 }
 0xab9   : > { %v16564_v19 = vadd.f32 %v16532_v60, %v34691_v8  ;;  %v16445_v7 = vadd.f32 %v23014_v13, %v32445_v36  ;;  %v16439_v57 = vpop.f32.mrb[83].mxu1  ;;  %v34703_v60 = vld [vmem:[#allocation90_spill] sm:$0xff]  ;;  %v34704_v13 = vld [vmem:[#allocation89_spill] sm:$0xff] }
 0xaba   : > { %v16563_v14 = vadd.f32 %v16531_v20, %v34692_v34  ;;  %v16440_v2 = vadd.f32 %v32445_v36, %v16439_v57 }
 0xabb   : > { %16596 = vst.msk [vmem:[%s32460_s27 + $0x88] sm:$0xff] %vm749_vm1, %v16564_v19  ;;  %v16534_v59 = vmul.f32 %v32450_v51, %v16445_v7 }
 0xabc   : > { %16595 = vst.msk [vmem:[%s32460_s27 + $0x80] sm:$0xff] %vm749_vm1, %v16563_v14  ;;  %v16533_v31 = vmul.f32 %v32450_v51, %v16440_v2 }
 0xabd   : > { %v16566_v32 = vadd.f32 %v16534_v59, %v34693_v54  ;;  %v34705_v59 = vld [vmem:[#allocation92_spill] sm:$0xff]  ;;  %v34706_v54 = vld [vmem:[#allocation91_spill] sm:$0xff] }
 0xabe   : > { %v16565_v39 = vadd.f32 %v16533_v31, %v34694_v44 }
 0xabf   : > { %16598 = vst.msk [vmem:[%s32460_s27 + $0x98] sm:$0xff] %vm749_vm1, %v16566_v32 }
 0xac0   : > { %16597 = vst.msk [vmem:[%s32460_s27 + $0x90] sm:$0xff] %vm749_vm1, %v16565_v39 }
 0xac4   : > { %v23017_v6 = vpop.f32.mrb[84].mxu1 }
 0xac5   : > { %v16455_v3 = vadd.f32 %v23017_v6, %v32445_v36  ;;  %v16449_v43 = vpop.f32.mrb[85].mxu1 }
 0xac6   : > { %v16450_v49 = vadd.f32 %v32445_v36, %v16449_v43 }
 0xac7   : > { %v16536_v46 = vmul.f32 %v32450_v51, %v16455_v3 }
 0xac8   : > { %v16535_v41 = vmul.f32 %v32450_v51, %v16450_v49 }
 0xac9   : > { %v16568_v26 = vadd.f32 %v16536_v46, %v34695_v50 }
 0xaca   : > { %v16567_v48 = vadd.f32 %v16535_v41, %v34696_v5 }
 0xacb   : > { %16600 = vst.msk [vmem:[%s32460_s27 + $0xa8] sm:$0xff] %vm749_vm1, %v16568_v26 }
 0xacc   : > { %v23020_v0 = vpop.f32.mrb[86].mxu1  ;;  %16599 = vst.msk [vmem:[%s32460_s27 + $0xa0] sm:$0xff] %vm749_vm1, %v16567_v48 }
 0xacd   : > { %v16465_v35 = vadd.f32 %v23020_v0, %v32445_v36  ;;  %v16459_v16 = vpop.f32.mrb[87].mxu1 }
 0xace   : > { %v16460_v17 = vadd.f32 %v32445_v36, %v16459_v16 }
 0xacf   : > { %v16538_v21 = vmul.f32 %v32450_v51, %v16465_v35 }
 0xad0   : > { %v16537_v24 = vmul.f32 %v32450_v51, %v16460_v17  ;;  %v23023_v27 = vpop.f32.mrb[88].mxu1 }
 0xad1   : > { %v16570_v58 = vadd.f32 %v16538_v21, %v34697_v63  ;;  %v16475_v38 = vadd.f32 %v23023_v27, %v32445_v36  ;;  %v16469_v18 = vpop.f32.mrb[89].mxu1 }
 0xad2   : > { %v16569_v23 = vadd.f32 %v16537_v24, %v34698_v62  ;;  %v16470_v25 = vadd.f32 %v32445_v36, %v16469_v18 }
 0xad3   : > { %16602 = vst.msk [vmem:[%s32460_s27 + $0xb8] sm:$0xff] %vm749_vm1, %v16570_v58  ;;  %v16540_v12 = vmul.f32 %v32450_v51, %v16475_v38 }
 0xad4   : > { %16601 = vst.msk [vmem:[%s32460_s27 + $0xb0] sm:$0xff] %vm749_vm1, %v16569_v23  ;;  %v16539_v47 = vmul.f32 %v32450_v51, %v16470_v25  ;;  %v23026_v11 = vpop.f32.mrb[90].mxu1 }
 0xad5   : > { %v16572_v30 = vadd.f32 %v16540_v12, %v34699_v1  ;;  %v16485_v61 = vadd.f32 %v23026_v11, %v32445_v36  ;;  %v16479_v56 = vpop.f32.mrb[91].mxu1 }
 0xad6   : > { %v16571_v10 = vadd.f32 %v16539_v47, %v34700_v4  ;;  %v16480_v15 = vadd.f32 %v32445_v36, %v16479_v56 }
 0xad7   : > { %16604 = vst.msk [vmem:[%s32460_s27 + $0xc8] sm:$0xff] %vm749_vm1, %v16572_v30  ;;  %v16542_v55 = vmul.f32 %v32450_v51, %v16485_v61 }
 0xad8   : > { %16603 = vst.msk [vmem:[%s32460_s27 + $0xc0] sm:$0xff] %vm749_vm1, %v16571_v10  ;;  %v16541_v22 = vmul.f32 %v32450_v51, %v16480_v15 }
 0xad9   : > { %v16574_v42 = vadd.f32 %v16542_v55, %v34701_v53 }
 0xada   : > { %v16573_v40 = vadd.f32 %v16541_v22, %v34702_v33 }
 0xadb   : > { %16606 = vst.msk [vmem:[%s32460_s27 + $0xd8] sm:$0xff] %vm749_vm1, %v16574_v42 }
 0xadc   : > { %16605 = vst.msk [vmem:[%s32460_s27 + $0xd0] sm:$0xff] %vm749_vm1, %v16573_v40 }
 0xae1   : > { %v23029_v45 = vpop.f32.mrb[92].mxu1 }
 0xae2   : > { %v16495_v52 = vadd.f32 %v23029_v45, %v32445_v36  ;;  %v16489_v28 = vpop.f32.mrb[93].mxu1 }
 0xae3   : > { %v16490_v37 = vadd.f32 %v32445_v36, %v16489_v28 }
 0xae4   : > { %v16544_v29 = vmul.f32 %v32450_v51, %v16495_v52 }
 0xae5   : > { %v16543_v9 = vmul.f32 %v32450_v51, %v16490_v37 }
 0xae6   : > { %v16576_v20 = vadd.f32 %v16544_v29, %v34703_v60 }
 0xae7   : > { %v16575_v8 = vadd.f32 %v16543_v9, %v34704_v13 }
 0xae8   : > { %16608 = vst.msk [vmem:[%s32460_s27 + $0xe8] sm:$0xff] %vm749_vm1, %v16576_v20  ;;  %v23032_v19 = vpop.f32.mrb[94].mxu1 }
 0xae9   : > { %16607 = vst.msk [vmem:[%s32460_s27 + $0xe0] sm:$0xff] %vm749_vm1, %v16575_v8  ;;  %v16505_v7 = vadd.f32 %v23032_v19, %v32445_v36  ;;  %v16499_v57 = vpop.f32.mrb[95].mxu1 }
 0xaea   : > { %v16500_v34 = vadd.f32 %v32445_v36, %v16499_v57 }
 0xaeb   : > { %v16546_v14 = vmul.f32 %v32450_v51, %v16505_v7 }
 0xaec   : > { %v16545_v2 = vmul.f32 %v32450_v51, %v16500_v34 }
 0xaed   : > { %v16578_v31 = vadd.f32 %v16546_v14, %v34705_v59 }
 0xaee   : > { %v16577_v36 = vadd.f32 %v16545_v2, %v34706_v54 }
 0xaef   : > { %16610 = vst.msk [vmem:[%s32460_s27 + $0xf8] sm:$0xff] %vm749_vm1, %v16578_v31 }
 0xaf0   : > { %16609 = vst.msk [vmem:[%s32460_s27 + $0xf0] sm:$0xff] %vm749_vm1, %v16577_v36 }
 0xaf1   : > { %25403 = shalt.err (!%p25400_p3)
}
 0xaf2   : > { %s25404_s25 = scalar_lea.hbm %s32616_s20, 4096  ;;  %s25408_s18 = scalar_lea.hbm %s32678_s10, 8192 }
 0xaf3   : > { %p25405_p4 = scmp.ne.s32.totalorder %s32616_s20, %s25404_s25  ;;  %p25409_p9 = scmp.lt.u32.totalorder %s32616_s20, %s32678_s10 }
 0xaf4   : > { %p25410_p10 = scmp.lt.u32.totalorder %s25408_s18, %s25404_s25  ;;  %p25412_p12 = scmp.lt.u32.totalorder %s25404_s25, %s32616_s20 }
 0xaf5   : > { %p25406_p7 = pnand %p25405_p4, %p25551_p5 }
 0xaf6   : > { %p25411_p11 = por %p25410_p10, %p25409_p9 }
 0xaf7   : > { %p25407_p8 = pneg %p25406_p7 }
 0xaf8   : > { %p25413_p13 = por %p25412_p12, %p25411_p11 }
 0xafa   : > { %p25414_p0 = pnand %p25413_p13, %p25407_p8 }
 0xafc   : > { %25417 = shalt.err (!%p25414_p0)
}
 0xafd   : > { %s25456_s26 = smov 128   ;;  %s25457_s28 = smov 8  }
 0xafe   : > { %25006 = dma.vmem_to_hbm [thread:$0]  (%p25551_p5), %s32618_s22, 4096, %s32616_s20, %s32627_s17, %s25456_s26, %s25456_s26, %s25457_s28  }
 0xaff PF: > { %p25012_p1 = scmp.ge.s32.totalorder %s25452_s16, 2  ;;  %s16640_s29 = sand.u32 1, %s25440_s13  }
 0xb00   : > { %s16641_s11 = scalar_lea.sflag [#allocation3], %s16640_s29 }
 0xb01   : > { %p25009_p2 = pnand %p25012_p1, %p25555_p6 }
 0xb03   : > { %25435 = dma.done.wait (!%p25009_p2), %s16641_s11, 4096  }
 0xb04   : > { %25437 = vsyncadd (!%p25009_p2), %s16641_s11, 4294963200  ;;  %s34707_s25 = sld [smem:[#allocation5_spill]]  ;;  %p20_p3 = scmp.ge.s32.totalorder %s25538_s19, 4  }
 0xb05   : > { %s34708_s13 = smov %s25444_s14  ;;  %s34709_s14 = smov %s25448_s15 }
 0xb06   : > { %s34711_s16 = smov %s25538_s19  ;;  %22 = sbr.rel (!%p20_p3) target bundleno = 3 (0x3), region = 95 }
 0xb0a   : > { %s34710_s15 = smov %s34707_s25 }
 0xb0d   :  { %16646 = vsyncpa [#allocation3], 1 }
 0xb0e   :  { %16648 = vsyncpa [#allocation3 + $0x1], 1 }

</bundles_post_ra>
